<compile_context>
chip_gen: v7x
topology: tpu7x:2x2x1
jax: 0.10.0
libtpu: 0.0.40
codegen_flags: <defaults>
</compile_context>

<pallas_src>
import math

import jax
import jax.numpy as jnp
from jax.experimental import pallas as pl
from jax.experimental.pallas import tpu as pltpu

C = 128                 # channel width of every conv in this network
BF16 = jnp.bfloat16


# ----------------------------------------------------------------------------
# In-kernel helpers (operate on Refs / traced values inside the kernel body)
# ----------------------------------------------------------------------------

def _write_padded(pad_ref, act_ref, val, H, W):
    """Store flat (H*W, C) f32 activation into the interior of the zero-bordered
    (H+2, W+2, C) f32 pad buffer."""
    if W % 8 == 0:
        # layout-preserving reshape: W (sublane dim) is a multiple of 8
        pad_ref[1:H + 1, 1:W + 1, :] = val.reshape(H, W, C)
    else:
        # stage in VMEM, then copy row by row (keeps all value reshapes layout-safe)
        act_ref[...] = val
        for h in range(H):
            pad_ref[h + 1, 1:W + 1, :] = act_ref[h * W:(h + 1) * W, :]


def _build_slab(pad_ref, slab_ref, H, W):
    """im2col: slab[h*W + w, (3*dy+dx)*C + c] = pad[h+dy, w+dx, c] (cast to bf16)."""
    for t in range(9):
        dy, dx = divmod(t, 3)
        if W % 8 == 0:
            blk = pad_ref[dy:dy + H, dx:dx + W, :]
            slab_ref[:, t * C:(t + 1) * C] = blk.reshape(H * W, C).astype(BF16)
        else:
            for h in range(H):
                slab_ref[h * W:(h + 1) * W, t * C:(t + 1) * C] = \
                    pad_ref[h + dy, dx:dx + W, :].astype(BF16)


def _conv3x3(val_f32, w_ref, b_ref, pad_ref, slab_ref, act_ref, H, W):
    """3x3 conv as a single fused MXU matmul: (H*W, 9C)bf16 @ (9C, C)bf16 -> f32."""
    _write_padded(pad_ref, act_ref, val_f32, H, W)
    _build_slab(pad_ref, slab_ref, H, W)
    return jnp.dot(slab_ref[...], w_ref[...],
                   preferred_element_type=jnp.float32) + b_ref[...]


# ----------------------------------------------------------------------------
# Kernels
# ----------------------------------------------------------------------------

def make_stem_kernel(H, W):
    """OptimizedResDisblock(3, 128), fully fused, one batch element per grid step."""
    def kernel(slab1_ref, xpool_ref, w1_ref, b1_ref, w2_ref, b2_ref,
               wsc_ref, bsc_ref, pool_ref, o_ref, pad_ref, slab_ref):
        pad_ref[...] = jnp.zeros(pad_ref.shape, pad_ref.dtype)
        # residual: conv3x3(3->128) on the pre-built K=27 im2col slab
        r = jnp.dot(slab1_ref[0], w1_ref[...],
                    preferred_element_type=jnp.float32) + b1_ref[...]
        r = jnp.maximum(r, 0.0)
        # -> ReLU -> conv3x3(128->128)
        r = _conv3x3(r, w2_ref, b2_ref, pad_ref, slab_ref, None, H, W)
        # -> avgpool2 (0.25-scaled selection matmul)
        r = jnp.dot(pool_ref[...], r.astype(BF16),
                    preferred_element_type=jnp.float32)
        # shortcut: avgpool2 (done in glue on the 3-channel input) -> conv1x1(3->128)
        sc = jnp.dot(xpool_ref[0], wsc_ref[...],
                     preferred_element_type=jnp.float32) + bsc_ref[...]
        o_ref[0] = (r + sc).astype(o_ref.dtype)
    return kernel


def make_block_kernel(H, W, down):
    """ResDisBlock(128, 128, down), fully fused, one batch element per grid step."""
    def kernel(*refs):
        if down:
            (x_ref, w1_ref, b1_ref, w2_ref, b2_ref, wsc_ref, bsc_ref, pool_ref,
             o_ref, pad_ref, slab_ref, act_ref) = refs
        else:
            (x_ref, w1_ref, b1_ref, w2_ref, b2_ref,
             o_ref, pad_ref, slab_ref, act_ref) = refs
        pad_ref[...] = jnp.zeros(pad_ref.shape, pad_ref.dtype)
        x = x_ref[0]                                       # (H*W, C) bf16
        # residual: ReLU -> conv3x3 -> ReLU -> conv3x3 [-> avgpool2]
        h = jnp.maximum(x.astype(jnp.float32), 0.0)        # pre-ReLU, applied once
        r = _conv3x3(h, w1_ref, b1_ref, pad_ref, slab_ref, act_ref, H, W)
        r = jnp.maximum(r, 0.0)
        r = _conv3x3(r, w2_ref, b2_ref, pad_ref, slab_ref, act_ref, H, W)
        if down:
            r = jnp.dot(pool_ref[...], r.astype(BF16),
                        preferred_element_type=jnp.float32)
            # shortcut: conv1x1 -> avgpool2
            sc = jnp.dot(x, wsc_ref[...],
                         preferred_element_type=jnp.float32) + bsc_ref[...]
            sc = jnp.dot(pool_ref[...], sc.astype(BF16),
                         preferred_element_type=jnp.float32)
        else:
            sc = x.astype(jnp.float32)                     # identity shortcut
        o_ref[0] = (r + sc).astype(o_ref.dtype)
    return kernel


def head_kernel(x_ref, w_ref, o_ref):
    """ReLU -> sum over flattened spatial -> Linear(128, 1, bias=False)."""
    x = x_ref[...].astype(jnp.float32)                     # (N, HW, C)
    s = jnp.sum(jnp.maximum(x, 0.0), axis=1)               # (N, C)
    o_ref[...] = jnp.dot(s, w_ref[...], preferred_element_type=jnp.float32)


# ----------------------------------------------------------------------------
# Wrappers (pallas_call glue)
# ----------------------------------------------------------------------------

def _pool_matrix(H, W):
    """(H*W/4, H*W) 2x2 average-pooling matrix with the 1/4 factor baked in."""
    q = jnp.arange(H * W)
    dst = (q // W // 2) * (W // 2) + (q % W) // 2
    P = (jnp.arange((H * W) // 4)[:, None] == dst[None, :]).astype(jnp.float32)
    return (P * 0.25).astype(BF16)


_CPARAMS = pltpu.CompilerParams(dimension_semantics=("parallel",),
                                vmem_limit_bytes=32 * 1024 * 1024)


def _full_spec(arr):
    return pl.BlockSpec(arr.shape, lambda n: (0,) * arr.ndim)


def stem_block(x_nhwc, p):
    N, H, W, _ = x_nhwc.shape
    HW, HWo = H * W, (H // 2) * (W // 2)
    # Glue: 3-channel im2col (K=27) + 2x2 avg pool of the tiny raw input (~3 KiB).
    xp = jnp.pad(x_nhwc, ((0, 0), (1, 1), (1, 1), (0, 0)))
    taps = [xp[:, dy:dy + H, dx:dx + W, :] for dy in range(3) for dx in range(3)]
    slab1 = jnp.concatenate(taps, axis=-1).reshape(N, HW, 27).astype(BF16)
    xpool = x_nhwc.reshape(N, H // 2, 2, W // 2, 2, 3).mean(axis=(2, 4))
    xpool = xpool.reshape(N, HWo, 3).astype(BF16)
    P = _pool_matrix(H, W)

    (w1, b1), (w2, b2), (wsc, bsc) = p["r1"], p["r2"], p["sc"]
    return pl.pallas_call(
        make_stem_kernel(H, W),
        out_shape=jax.ShapeDtypeStruct((N, HWo, C), BF16),
        grid=(N,),
        in_specs=[
            pl.BlockSpec((1, HW, 27), lambda n: (n, 0, 0)),
            pl.BlockSpec((1, HWo, 3), lambda n: (n, 0, 0)),
            _full_spec(w1), _full_spec(b1), _full_spec(w2), _full_spec(b2),
            _full_spec(wsc), _full_spec(bsc), _full_spec(P),
        ],
        out_specs=pl.BlockSpec((1, HWo, C), lambda n: (n, 0, 0)),
        scratch_shapes=[
            pltpu.VMEM((H + 2, W + 2, C), jnp.float32),    # zero-padded conv input
            pltpu.VMEM((HW, 9 * C), BF16),                 # im2col slab (MXU operand)
        ],
        compiler_params=_CPARAMS,
    )(slab1, xpool, w1, b1, w2, b2, wsc, bsc, P)


def res_block(x_flat, p, H, W, down):
    N = x_flat.shape[0]
    HW = H * W
    HWo = HW // 4 if down else HW
    (w1, b1), (w2, b2) = p["r1"], p["r2"]
    operands = [x_flat, w1, b1, w2, b2]
    in_specs = [pl.BlockSpec((1, HW, C), lambda n: (n, 0, 0)),
                _full_spec(w1), _full_spec(b1), _full_spec(w2), _full_spec(b2)]
    if down:
        wsc, bsc = p["sc"]
        P = _pool_matrix(H, W)
        operands += [wsc, bsc, P]
        in_specs += [_full_spec(wsc), _full_spec(bsc), _full_spec(P)]
    return pl.pallas_call(
        make_block_kernel(H, W, down),
        out_shape=jax.ShapeDtypeStruct((N, HWo, C), BF16),
        grid=(N,),
        in_specs=in_specs,
        out_specs=pl.BlockSpec((1, HWo, C), lambda n: (n, 0, 0)),
        scratch_shapes=[
            pltpu.VMEM((H + 2, W + 2, C), jnp.float32),    # zero-padded conv input
            pltpu.VMEM((HW, 9 * C), BF16),                 # im2col slab (MXU operand)
            pltpu.VMEM((HW, C), jnp.float32),              # row-staging (W % 8 != 0)
        ],
        compiler_params=_CPARAMS,
    )(*operands)


def head(x_flat, lin_w):
    N = x_flat.shape[0]
    return pl.pallas_call(
        head_kernel,
        out_shape=jax.ShapeDtypeStruct((N, 1), jnp.float32),
    )(x_flat, lin_w)


# ----------------------------------------------------------------------------
# Parameter init (glue): xavier_uniform + spectral norm (1 power iteration),
# matching PyTorch's init + spectral_norm first-forward semantics.
# ----------------------------------------------------------------------------

def xavier_uniform(key, shape, gain=1.0):
    if len(shape) == 4:                  # (Cout, Cin, KH, KW) — PyTorch layout
        rf = shape[2] * shape[3]
        fan_in, fan_out = shape[1] * rf, shape[0] * rf
    else:                                # (out, in)
        fan_in, fan_out = shape[1], shape[0]
    bound = gain * math.sqrt(6.0 / (fan_in + fan_out))
    return jax.random.uniform(key, shape, jnp.float32, -bound, bound)


def spectral_normalize(key, w):
    # TODO(synk): PyTorch's spectral_norm uses a persistent random `u` buffer
    # updated every forward; here we deterministically init `u` and do one
    # power iteration (the n_power_iterations=1 default).
    w_mat = w.reshape(w.shape[0], -1)
    u = jax.random.normal(key, (w_mat.shape[0],), jnp.float32)
    u = u / (jnp.linalg.norm(u) + 1e-12)
    v = w_mat.T @ u
    v = v / (jnp.linalg.norm(v) + 1e-12)
    u = w_mat @ v
    u = u / (jnp.linalg.norm(u) + 1e-12)
    sigma = u @ (w_mat @ v)
    return w / sigma


def init_params(key):
    keys = iter(jax.random.split(key, 26))
    g2 = math.sqrt(2.0)

    def conv_p(cin, cout, k, gain):
        w = xavier_uniform(next(keys), (cout, cin, k, k), gain)
        w = spectral_normalize(next(keys), w)
        b = jnp.zeros((cout,), jnp.float32)
        return jnp.transpose(w, (2, 3, 1, 0)), b   # -> HWIO

    params = {
        "opt": {"sc": conv_p(3, 128, 1, 1.0),
                "r1": conv_p(3, 128, 3, g2),
                "r2": conv_p(128, 128, 3, g2)},
        "b2": {"sc": conv_p(128, 128, 1, 1.0),
               "r1": conv_p(128, 128, 3, g2),
               "r2": conv_p(128, 128, 3, g2)},
        "b3": {"r1": conv_p(128, 128, 3, g2),
               "r2": conv_p(128, 128, 3, g2)},
        "b4": {"sc": conv_p(128, 128, 1, 1.0),
               "r1": conv_p(128, 128, 3, g2),
               "r2": conv_p(128, 128, 3, g2)},
    }
    lw = xavier_uniform(next(keys), (1, 128), 1.0)
    lw = spectral_normalize(next(keys), lw)
    params["lin_w"] = lw.T                        # (128, 1), no bias
    return params


# ----------------------------------------------------------------------------
# Forward passes
# ----------------------------------------------------------------------------

def _prep(block_params):
    """Flatten HWIO conv weights to (KH*KW*Cin, Cout) bf16, biases to (1, Cout) f32."""
    out = {}
    for name, (w, b) in block_params.items():
        cout = w.shape[-1]
        out[name] = (w.reshape(-1, cout).astype(BF16),
                     b.reshape(1, cout).astype(jnp.float32))
    return out


def pallas_forward(x_nchw, params):
    x = jnp.transpose(x_nchw, (0, 2, 3, 1)).astype(jnp.float32)   # NCHW -> NHWC
    N, H, W, _ = x.shape

    # OptimizedResDisblock(3, 128): H x W -> H/2 x W/2          (one fused kernel)
    y = stem_block(x, _prep(params["opt"]))
    h = w = H // 2
    # ResDisBlock(down) / ResDisBlock / ResDisBlock(down)       (one fused kernel each)
    for name, down in (("b2", True), ("b3", False), ("b4", True)):
        y = res_block(y, _prep(params[name]), h, w, down)
        if down:
            h, w = h // 2, w // 2
    # ReLU -> spatial sum -> Linear(128, 1, bias=False)
    return head(y, params["lin_w"].astype(jnp.float32))


def ref_forward(x_nchw, params, matmul_dtype=jnp.float32):
    """Plain-JAX reference.  With matmul_dtype=bf16 it mirrors the Pallas path's
    precision choices (bf16 MXU operands, f32 accumulation, bf16 inter-stage casts)."""
    md = matmul_dtype
    cast = lambda t: t.astype(md).astype(jnp.float32)
    x = jnp.transpose(x_nchw, (0, 2, 3, 1)).astype(jnp.float32)

    def conv(x, wb, pad, pre_relu=False):
        w, b = wb
        if pre_relu:
            x = jnp.maximum(x, 0.0)
        y = jax.lax.conv_general_dilated(
            x.astype(md), w.astype(md), (1, 1), [(pad, pad), (pad, pad)],
            dimension_numbers=("NHWC", "HWIO", "NHWC"),
            preferred_element_type=jnp.float32,
            precision=jax.lax.Precision.HIGHEST)
        return y + b

    def pool(x):
        N, H, W, Cc = x.shape
        return x.reshape(N, H // 2, 2, W // 2, 2, Cc).mean(axis=(2, 4))

    p = params["opt"]
    sc = conv(pool(x), p["sc"], 0)
    r = conv(x, p["r1"], 1)
    r = pool(cast(conv(r, p["r2"], 1, True)))
    x = cast(r + sc)
    for name, down in (("b2", True), ("b3", False), ("b4", True)):
        p = params[name]
        sc = pool(cast(conv(x, p["sc"], 0))) if down else x
        r = conv(x, p["r1"], 1, True)
        r = conv(r, p["r2"], 1, True)
        if down:
            r = pool(cast(r))
        x = cast(r + sc)
    s = jnp.maximum(x, 0.0).sum(axis=(1, 2))
    return jnp.dot(s, params["lin_w"], precision=jax.lax.Precision.HIGHEST)


# ----------------------------------------------------------------------------

if __name__ == "__main__":
    key = jax.random.PRNGKey(0)
    kp, kx = jax.random.split(key)
    params = init_params(kp)

    # Small example: batch=2, 3 channels, 16x16 spatial (spatial must be /8).
    x = jax.random.normal(kx, (2, 3, 16, 16), jnp.float32)

    out = jax.jit(pallas_forward)(x, params)
    out = jax.block_until_ready(out)
    assert out.shape == (2, 1)

    # Strict check vs a precision-matched reference (bf16 matmul operands,
    # f32 accumulation, same bf16 inter-stage roundings).
    ref_bf16 = ref_forward(x, params, jnp.bfloat16)
    rel_matched = float(jnp.max(jnp.abs(out - ref_bf16)) /
                        (jnp.max(jnp.abs(ref_bf16)) + 1e-6))
    assert rel_matched < 1e-2, f"mismatch vs precision-matched ref: {rel_matched}"

    # Loose sanity check vs the pure-f32 reference (bf16 MXU drift only).
    ref_f32 = ref_forward(x, params, jnp.float32)
    rel_f32 = float(jnp.max(jnp.abs(out - ref_f32)) /
                    (jnp.max(jnp.abs(ref_f32)) + 1e-6))
    assert rel_f32 < 1e-1, f"mismatch vs f32 ref: {rel_f32}"

    print("KERNEL_OK")
</pallas_src>

<mosaic_0001>
module attributes {stable_mosaic.version = 11 : i64} {
  func.func @kernel(%arg0: i32, %arg1: memref<1x64x128xbf16, #tpu.memory_space<vmem>>, %arg2: memref<1152x128xbf16, #tpu.memory_space<vmem>>, %arg3: memref<1x128xf32, #tpu.memory_space<vmem>>, %arg4: memref<1152x128xbf16, #tpu.memory_space<vmem>>, %arg5: memref<1x128xf32, #tpu.memory_space<vmem>>, %arg6: memref<128x128xbf16, #tpu.memory_space<vmem>>, %arg7: memref<1x128xf32, #tpu.memory_space<vmem>>, %arg8: memref<16x64xbf16, #tpu.memory_space<vmem>>, %arg9: memref<1x16x128xbf16, #tpu.memory_space<vmem>>, %arg10: memref<10x10x128xf32, #tpu.memory_space<vmem>>, %arg11: memref<64x1152xbf16, #tpu.memory_space<vmem>>, %arg12: memref<64x128xf32, #tpu.memory_space<vmem>>) attributes {dimension_semantics = [#tpu.dimension_semantics<parallel>], iteration_bounds = array<i64: 2>, scalar_prefetch = 0 : i64, scratch_operands = 3 : i64, tpu.core_type = #tpu.core_type<tc>, window_params = [{transform_indices = @transform_0, window_bounds = array<i64: 1, 64, 128>}, {pipeline_mode = #tpu.pipeline_mode<synchronous>, transform_indices = @transform_1, window_bounds = array<i64: 1152, 128>}, {pipeline_mode = #tpu.pipeline_mode<synchronous>, transform_indices = @transform_2, window_bounds = array<i64: 1, 128>}, {pipeline_mode = #tpu.pipeline_mode<synchronous>, transform_indices = @transform_3, window_bounds = array<i64: 1152, 128>}, {pipeline_mode = #tpu.pipeline_mode<synchronous>, transform_indices = @transform_4, window_bounds = array<i64: 1, 128>}, {pipeline_mode = #tpu.pipeline_mode<synchronous>, transform_indices = @transform_5, window_bounds = array<i64: 128, 128>}, {pipeline_mode = #tpu.pipeline_mode<synchronous>, transform_indices = @transform_6, window_bounds = array<i64: 1, 128>}, {pipeline_mode = #tpu.pipeline_mode<synchronous>, transform_indices = @transform_7, window_bounds = array<i64: 16, 64>}, {transform_indices = @transform_8, window_bounds = array<i64: 1, 16, 128>}]} {
    %cst = arith.constant 0.000000e+00 : f32
    %0 = vector.broadcast %cst : f32 to vector<10x10x128xf32>
    %c0 = arith.constant 0 : index
    %c0_0 = arith.constant 0 : index
    %c0_1 = arith.constant 0 : index
    %1 = vector.load %arg10[%c0, %c0_0, %c0_1] : memref<10x10x128xf32, #tpu.memory_space<vmem>>, vector<10x10x128xf32>
    tpu.vector_store %arg10[%c0, %c0_0, %c0_1], %0 {strides = array<i32>} : memref<10x10x128xf32, #tpu.memory_space<vmem>>, vector<10x10x128xf32>,
    %c0_2 = arith.constant 0 : index
    %c0_3 = arith.constant 0 : index
    %c0_4 = arith.constant 0 : index
    %2 = vector.load %arg1[%c0_2, %c0_3, %c0_4] : memref<1x64x128xbf16, #tpu.memory_space<vmem>>, vector<1x64x128xbf16>
    %3 = vector.shape_cast %2 : vector<1x64x128xbf16> to vector<64x128xbf16>
    %4 = arith.extf %3 : vector<64x128xbf16> to vector<64x128xf32>
    %cst_5 = arith.constant 0.000000e+00 : f32
    %5 = vector.broadcast %cst_5 : f32 to vector<64x128xf32>
    %6 = arith.maximumf %4, %5 : vector<64x128xf32>
    %7 = vector.shape_cast %6 : vector<64x128xf32> to vector<8x8x128xf32>
    %c1 = arith.constant 1 : index
    %c1_6 = arith.constant 1 : index
    %c0_7 = arith.constant 0 : index
    %8 = vector.load %arg10[%c1, %c1_6, %c0_7] : memref<10x10x128xf32, #tpu.memory_space<vmem>>, vector<8x8x128xf32>
    tpu.vector_store %arg10[%c1, %c1_6, %c0_7], %7 {strides = array<i32>} : memref<10x10x128xf32, #tpu.memory_space<vmem>>, vector<8x8x128xf32>,
    %c0_8 = arith.constant 0 : index
    %c0_9 = arith.constant 0 : index
    %c0_10 = arith.constant 0 : index
    %9 = vector.load %arg10[%c0_8, %c0_9, %c0_10] : memref<10x10x128xf32, #tpu.memory_space<vmem>>, vector<8x8x128xf32>
    %10 = vector.shape_cast %9 : vector<8x8x128xf32> to vector<64x128xf32>
    %11 = arith.truncf %10 : vector<64x128xf32> to vector<64x128xbf16>
    %c0_11 = arith.constant 0 : index
    %c0_12 = arith.constant 0 : index
    %12 = vector.load %arg11[%c0_11, %c0_12] : memref<64x1152xbf16, #tpu.memory_space<vmem>>, vector<64x128xbf16>
    tpu.vector_store %arg11[%c0_11, %c0_12], %11 {strides = array<i32>} : memref<64x1152xbf16, #tpu.memory_space<vmem>>, vector<64x128xbf16>,
    %c0_13 = arith.constant 0 : index
    %c1_14 = arith.constant 1 : index
    %c0_15 = arith.constant 0 : index
    %13 = vector.load %arg10[%c0_13, %c1_14, %c0_15] : memref<10x10x128xf32, #tpu.memory_space<vmem>>, vector<8x8x128xf32>
    %14 = vector.shape_cast %13 : vector<8x8x128xf32> to vector<64x128xf32>
    %15 = arith.truncf %14 : vector<64x128xf32> to vector<64x128xbf16>
    %c0_16 = arith.constant 0 : index
    %c128 = arith.constant 128 : index
    %16 = vector.load %arg11[%c0_16, %c128] : memref<64x1152xbf16, #tpu.memory_space<vmem>>, vector<64x128xbf16>
    tpu.vector_store %arg11[%c0_16, %c128], %15 {strides = array<i32>} : memref<64x1152xbf16, #tpu.memory_space<vmem>>, vector<64x128xbf16>,
    %c0_17 = arith.constant 0 : index
    %c2 = arith.constant 2 : index
    %c0_18 = arith.constant 0 : index
    %17 = vector.load %arg10[%c0_17, %c2, %c0_18] : memref<10x10x128xf32, #tpu.memory_space<vmem>>, vector<8x8x128xf32>
    %18 = vector.shape_cast %17 : vector<8x8x128xf32> to vector<64x128xf32>
    %19 = arith.truncf %18 : vector<64x128xf32> to vector<64x128xbf16>
    %c0_19 = arith.constant 0 : index
    %c256 = arith.constant 256 : index
    %20 = vector.load %arg11[%c0_19, %c256] : memref<64x1152xbf16, #tpu.memory_space<vmem>>, vector<64x128xbf16>
    tpu.vector_store %arg11[%c0_19, %c256], %19 {strides = array<i32>} : memref<64x1152xbf16, #tpu.memory_space<vmem>>, vector<64x128xbf16>,
    %c1_20 = arith.constant 1 : index
    %c0_21 = arith.constant 0 : index
    %c0_22 = arith.constant 0 : index
    %21 = vector.load %arg10[%c1_20, %c0_21, %c0_22] : memref<10x10x128xf32, #tpu.memory_space<vmem>>, vector<8x8x128xf32>
    %22 = vector.shape_cast %21 : vector<8x8x128xf32> to vector<64x128xf32>
    %23 = arith.truncf %22 : vector<64x128xf32> to vector<64x128xbf16>
    %c0_23 = arith.constant 0 : index
    %c384 = arith.constant 384 : index
    %24 = vector.load %arg11[%c0_23, %c384] : memref<64x1152xbf16, #tpu.memory_space<vmem>>, vector<64x128xbf16>
    tpu.vector_store %arg11[%c0_23, %c384], %23 {strides = array<i32>} : memref<64x1152xbf16, #tpu.memory_space<vmem>>, vector<64x128xbf16>,
    %c1_24 = arith.constant 1 : index
    %c1_25 = arith.constant 1 : index
    %c0_26 = arith.constant 0 : index
    %25 = vector.load %arg10[%c1_24, %c1_25, %c0_26] : memref<10x10x128xf32, #tpu.memory_space<vmem>>, vector<8x8x128xf32>
    %26 = vector.shape_cast %25 : vector<8x8x128xf32> to vector<64x128xf32>
    %27 = arith.truncf %26 : vector<64x128xf32> to vector<64x128xbf16>
    %c0_27 = arith.constant 0 : index
    %c512 = arith.constant 512 : index
    %28 = vector.load %arg11[%c0_27, %c512] : memref<64x1152xbf16, #tpu.memory_space<vmem>>, vector<64x128xbf16>
    tpu.vector_store %arg11[%c0_27, %c512], %27 {strides = array<i32>} : memref<64x1152xbf16, #tpu.memory_space<vmem>>, vector<64x128xbf16>,
    %c1_28 = arith.constant 1 : index
    %c2_29 = arith.constant 2 : index
    %c0_30 = arith.constant 0 : index
    %29 = vector.load %arg10[%c1_28, %c2_29, %c0_30] : memref<10x10x128xf32, #tpu.memory_space<vmem>>, vector<8x8x128xf32>
    %30 = vector.shape_cast %29 : vector<8x8x128xf32> to vector<64x128xf32>
    %31 = arith.truncf %30 : vector<64x128xf32> to vector<64x128xbf16>
    %c0_31 = arith.constant 0 : index
    %c640 = arith.constant 640 : index
    %32 = vector.load %arg11[%c0_31, %c640] : memref<64x1152xbf16, #tpu.memory_space<vmem>>, vector<64x128xbf16>
    tpu.vector_store %arg11[%c0_31, %c640], %31 {strides = array<i32>} : memref<64x1152xbf16, #tpu.memory_space<vmem>>, vector<64x128xbf16>,
    %c2_32 = arith.constant 2 : index
    %c0_33 = arith.constant 0 : index
    %c0_34 = arith.constant 0 : index
    %33 = vector.load %arg10[%c2_32, %c0_33, %c0_34] : memref<10x10x128xf32, #tpu.memory_space<vmem>>, vector<8x8x128xf32>
    %34 = vector.shape_cast %33 : vector<8x8x128xf32> to vector<64x128xf32>
    %35 = arith.truncf %34 : vector<64x128xf32> to vector<64x128xbf16>
    %c0_35 = arith.constant 0 : index
    %c768 = arith.constant 768 : index
    %36 = vector.load %arg11[%c0_35, %c768] : memref<64x1152xbf16, #tpu.memory_space<vmem>>, vector<64x128xbf16>
    tpu.vector_store %arg11[%c0_35, %c768], %35 {strides = array<i32>} : memref<64x1152xbf16, #tpu.memory_space<vmem>>, vector<64x128xbf16>,
    %c2_36 = arith.constant 2 : index
    %c1_37 = arith.constant 1 : index
    %c0_38 = arith.constant 0 : index
    %37 = vector.load %arg10[%c2_36, %c1_37, %c0_38] : memref<10x10x128xf32, #tpu.memory_space<vmem>>, vector<8x8x128xf32>
    %38 = vector.shape_cast %37 : vector<8x8x128xf32> to vector<64x128xf32>
    %39 = arith.truncf %38 : vector<64x128xf32> to vector<64x128xbf16>
    %c0_39 = arith.constant 0 : index
    %c896 = arith.constant 896 : index
    %40 = vector.load %arg11[%c0_39, %c896] : memref<64x1152xbf16, #tpu.memory_space<vmem>>, vector<64x128xbf16>
    tpu.vector_store %arg11[%c0_39, %c896], %39 {strides = array<i32>} : memref<64x1152xbf16, #tpu.memory_space<vmem>>, vector<64x128xbf16>,
    %c2_40 = arith.constant 2 : index
    %c2_41 = arith.constant 2 : index
    %c0_42 = arith.constant 0 : index
    %41 = vector.load %arg10[%c2_40, %c2_41, %c0_42] : memref<10x10x128xf32, #tpu.memory_space<vmem>>, vector<8x8x128xf32>
    %42 = vector.shape_cast %41 : vector<8x8x128xf32> to vector<64x128xf32>
    %43 = arith.truncf %42 : vector<64x128xf32> to vector<64x128xbf16>
    %c0_43 = arith.constant 0 : index
    %c1024 = arith.constant 1024 : index
    %44 = vector.load %arg11[%c0_43, %c1024] : memref<64x1152xbf16, #tpu.memory_space<vmem>>, vector<64x128xbf16>
    tpu.vector_store %arg11[%c0_43, %c1024], %43 {strides = array<i32>} : memref<64x1152xbf16, #tpu.memory_space<vmem>>, vector<64x128xbf16>,
    %c0_44 = arith.constant 0 : index
    %c0_45 = arith.constant 0 : index
    %45 = vector.load %arg11[%c0_44, %c0_45] : memref<64x1152xbf16, #tpu.memory_space<vmem>>, vector<64x1152xbf16>
    %c0_46 = arith.constant 0 : index
    %c0_47 = arith.constant 0 : index
    %46 = vector.load %arg2[%c0_46, %c0_47] : memref<1152x128xbf16, #tpu.memory_space<vmem>>, vector<1152x128xbf16>
    %cst_48 = arith.constant dense<0.000000e+00> : vector<64x128xf32>
    %47 = tpu.matmul %45, %46, %cst_48 {dimension_numbers = #tpu.dot_dimension_numbers<[1], [0], [0], [1], [0, 0, 1, 1], [], []>} : vector<64x1152xbf16>, vector<1152x128xbf16>, vector<64x128xf32> -> vector<64x128xf32>
    %c0_49 = arith.constant 0 : index
    %c0_50 = arith.constant 0 : index
    %48 = vector.load %arg3[%c0_49, %c0_50] : memref<1x128xf32, #tpu.memory_space<vmem>>, vector<1x128xf32>
    %49 = vector.broadcast %48 : vector<1x128xf32> to vector<64x128xf32>
    %50 = arith.addf %47, %49 : vector<64x128xf32>
    %cst_51 = arith.constant 0.000000e+00 : f32
    %51 = vector.broadcast %cst_51 : f32 to vector<64x128xf32>
    %52 = arith.maximumf %50, %51 : vector<64x128xf32>
    %53 = vector.shape_cast %52 : vector<64x128xf32> to vector<8x8x128xf32>
    %c1_52 = arith.constant 1 : index
    %c1_53 = arith.constant 1 : index
    %c0_54 = arith.constant 0 : index
    %54 = vector.load %arg10[%c1_52, %c1_53, %c0_54] : memref<10x10x128xf32, #tpu.memory_space<vmem>>, vector<8x8x128xf32>
    tpu.vector_store %arg10[%c1_52, %c1_53, %c0_54], %53 {strides = array<i32>} : memref<10x10x128xf32, #tpu.memory_space<vmem>>, vector<8x8x128xf32>,
    %c0_55 = arith.constant 0 : index
    %c0_56 = arith.constant 0 : index
    %c0_57 = arith.constant 0 : index
    %55 = vector.load %arg10[%c0_55, %c0_56, %c0_57] : memref<10x10x128xf32, #tpu.memory_space<vmem>>, vector<8x8x128xf32>
    %56 = vector.shape_cast %55 : vector<8x8x128xf32> to vector<64x128xf32>
    %57 = arith.truncf %56 : vector<64x128xf32> to vector<64x128xbf16>
    %c0_58 = arith.constant 0 : index
    %c0_59 = arith.constant 0 : index
    %58 = vector.load %arg11[%c0_58, %c0_59] : memref<64x1152xbf16, #tpu.memory_space<vmem>>, vector<64x128xbf16>
    tpu.vector_store %arg11[%c0_58, %c0_59], %57 {strides = array<i32>} : memref<64x1152xbf16, #tpu.memory_space<vmem>>, vector<64x128xbf16>,
    %c0_60 = arith.constant 0 : index
    %c1_61 = arith.constant 1 : index
    %c0_62 = arith.constant 0 : index
    %59 = vector.load %arg10[%c0_60, %c1_61, %c0_62] : memref<10x10x128xf32, #tpu.memory_space<vmem>>, vector<8x8x128xf32>
    %60 = vector.shape_cast %59 : vector<8x8x128xf32> to vector<64x128xf32>
    %61 = arith.truncf %60 : vector<64x128xf32> to vector<64x128xbf16>
    %c0_63 = arith.constant 0 : index
    %c128_64 = arith.constant 128 : index
    %62 = vector.load %arg11[%c0_63, %c128_64] : memref<64x1152xbf16, #tpu.memory_space<vmem>>, vector<64x128xbf16>
    tpu.vector_store %arg11[%c0_63, %c128_64], %61 {strides = array<i32>} : memref<64x1152xbf16, #tpu.memory_space<vmem>>, vector<64x128xbf16>,
    %c0_65 = arith.constant 0 : index
    %c2_66 = arith.constant 2 : index
    %c0_67 = arith.constant 0 : index
    %63 = vector.load %arg10[%c0_65, %c2_66, %c0_67] : memref<10x10x128xf32, #tpu.memory_space<vmem>>, vector<8x8x128xf32>
    %64 = vector.shape_cast %63 : vector<8x8x128xf32> to vector<64x128xf32>
    %65 = arith.truncf %64 : vector<64x128xf32> to vector<64x128xbf16>
    %c0_68 = arith.constant 0 : index
    %c256_69 = arith.constant 256 : index
    %66 = vector.load %arg11[%c0_68, %c256_69] : memref<64x1152xbf16, #tpu.memory_space<vmem>>, vector<64x128xbf16>
    tpu.vector_store %arg11[%c0_68, %c256_69], %65 {strides = array<i32>} : memref<64x1152xbf16, #tpu.memory_space<vmem>>, vector<64x128xbf16>,
    %c1_70 = arith.constant 1 : index
    %c0_71 = arith.constant 0 : index
    %c0_72 = arith.constant 0 : index
    %67 = vector.load %arg10[%c1_70, %c0_71, %c0_72] : memref<10x10x128xf32, #tpu.memory_space<vmem>>, vector<8x8x128xf32>
    %68 = vector.shape_cast %67 : vector<8x8x128xf32> to vector<64x128xf32>
    %69 = arith.truncf %68 : vector<64x128xf32> to vector<64x128xbf16>
    %c0_73 = arith.constant 0 : index
    %c384_74 = arith.constant 384 : index
    %70 = vector.load %arg11[%c0_73, %c384_74] : memref<64x1152xbf16, #tpu.memory_space<vmem>>, vector<64x128xbf16>
    tpu.vector_store %arg11[%c0_73, %c384_74], %69 {strides = array<i32>} : memref<64x1152xbf16, #tpu.memory_space<vmem>>, vector<64x128xbf16>,
    %c1_75 = arith.constant 1 : index
    %c1_76 = arith.constant 1 : index
    %c0_77 = arith.constant 0 : index
    %71 = vector.load %arg10[%c1_75, %c1_76, %c0_77] : memref<10x10x128xf32, #tpu.memory_space<vmem>>, vector<8x8x128xf32>
    %72 = vector.shape_cast %71 : vector<8x8x128xf32> to vector<64x128xf32>
    %73 = arith.truncf %72 : vector<64x128xf32> to vector<64x128xbf16>
    %c0_78 = arith.constant 0 : index
    %c512_79 = arith.constant 512 : index
    %74 = vector.load %arg11[%c0_78, %c512_79] : memref<64x1152xbf16, #tpu.memory_space<vmem>>, vector<64x128xbf16>
    tpu.vector_store %arg11[%c0_78, %c512_79], %73 {strides = array<i32>} : memref<64x1152xbf16, #tpu.memory_space<vmem>>, vector<64x128xbf16>,
    %c1_80 = arith.constant 1 : index
    %c2_81 = arith.constant 2 : index
    %c0_82 = arith.constant 0 : index
    %75 = vector.load %arg10[%c1_80, %c2_81, %c0_82] : memref<10x10x128xf32, #tpu.memory_space<vmem>>, vector<8x8x128xf32>
    %76 = vector.shape_cast %75 : vector<8x8x128xf32> to vector<64x128xf32>
    %77 = arith.truncf %76 : vector<64x128xf32> to vector<64x128xbf16>
    %c0_83 = arith.constant 0 : index
    %c640_84 = arith.constant 640 : index
    %78 = vector.load %arg11[%c0_83, %c640_84] : memref<64x1152xbf16, #tpu.memory_space<vmem>>, vector<64x128xbf16>
    tpu.vector_store %arg11[%c0_83, %c640_84], %77 {strides = array<i32>} : memref<64x1152xbf16, #tpu.memory_space<vmem>>, vector<64x128xbf16>,
    %c2_85 = arith.constant 2 : index
    %c0_86 = arith.constant 0 : index
    %c0_87 = arith.constant 0 : index
    %79 = vector.load %arg10[%c2_85, %c0_86, %c0_87] : memref<10x10x128xf32, #tpu.memory_space<vmem>>, vector<8x8x128xf32>
    %80 = vector.shape_cast %79 : vector<8x8x128xf32> to vector<64x128xf32>
    %81 = arith.truncf %80 : vector<64x128xf32> to vector<64x128xbf16>
    %c0_88 = arith.constant 0 : index
    %c768_89 = arith.constant 768 : index
    %82 = vector.load %arg11[%c0_88, %c768_89] : memref<64x1152xbf16, #tpu.memory_space<vmem>>, vector<64x128xbf16>
    tpu.vector_store %arg11[%c0_88, %c768_89], %81 {strides = array<i32>} : memref<64x1152xbf16, #tpu.memory_space<vmem>>, vector<64x128xbf16>,
    %c2_90 = arith.constant 2 : index
    %c1_91 = arith.constant 1 : index
    %c0_92 = arith.constant 0 : index
    %83 = vector.load %arg10[%c2_90, %c1_91, %c0_92] : memref<10x10x128xf32, #tpu.memory_space<vmem>>, vector<8x8x128xf32>
    %84 = vector.shape_cast %83 : vector<8x8x128xf32> to vector<64x128xf32>
    %85 = arith.truncf %84 : vector<64x128xf32> to vector<64x128xbf16>
    %c0_93 = arith.constant 0 : index
    %c896_94 = arith.constant 896 : index
    %86 = vector.load %arg11[%c0_93, %c896_94] : memref<64x1152xbf16, #tpu.memory_space<vmem>>, vector<64x128xbf16>
    tpu.vector_store %arg11[%c0_93, %c896_94], %85 {strides = array<i32>} : memref<64x1152xbf16, #tpu.memory_space<vmem>>, vector<64x128xbf16>,
    %c2_95 = arith.constant 2 : index
    %c2_96 = arith.constant 2 : index
    %c0_97 = arith.constant 0 : index
    %87 = vector.load %arg10[%c2_95, %c2_96, %c0_97] : memref<10x10x128xf32, #tpu.memory_space<vmem>>, vector<8x8x128xf32>
    %88 = vector.shape_cast %87 : vector<8x8x128xf32> to vector<64x128xf32>
    %89 = arith.truncf %88 : vector<64x128xf32> to vector<64x128xbf16>
    %c0_98 = arith.constant 0 : index
    %c1024_99 = arith.constant 1024 : index
    %90 = vector.load %arg11[%c0_98, %c1024_99] : memref<64x1152xbf16, #tpu.memory_space<vmem>>, vector<64x128xbf16>
    tpu.vector_store %arg11[%c0_98, %c1024_99], %89 {strides = array<i32>} : memref<64x1152xbf16, #tpu.memory_space<vmem>>, vector<64x128xbf16>,
    %c0_100 = arith.constant 0 : index
    %c0_101 = arith.constant 0 : index
    %91 = vector.load %arg11[%c0_100, %c0_101] : memref<64x1152xbf16, #tpu.memory_space<vmem>>, vector<64x1152xbf16>
    %c0_102 = arith.constant 0 : index
    %c0_103 = arith.constant 0 : index
    %92 = vector.load %arg4[%c0_102, %c0_103] : memref<1152x128xbf16, #tpu.memory_space<vmem>>, vector<1152x128xbf16>
    %cst_104 = arith.constant dense<0.000000e+00> : vector<64x128xf32>
    %93 = tpu.matmul %91, %92, %cst_104 {dimension_numbers = #tpu.dot_dimension_numbers<[1], [0], [0], [1], [0, 0, 1, 1], [], []>} : vector<64x1152xbf16>, vector<1152x128xbf16>, vector<64x128xf32> -> vector<64x128xf32>
    %c0_105 = arith.constant 0 : index
    %c0_106 = arith.constant 0 : index
    %94 = vector.load %arg5[%c0_105, %c0_106] : memref<1x128xf32, #tpu.memory_space<vmem>>, vector<1x128xf32>
    %95 = vector.broadcast %94 : vector<1x128xf32> to vector<64x128xf32>
    %96 = arith.addf %93, %95 : vector<64x128xf32>
    %c0_107 = arith.constant 0 : index
    %c0_108 = arith.constant 0 : index
    %97 = vector.load %arg8[%c0_107, %c0_108] : memref<16x64xbf16, #tpu.memory_space<vmem>>, vector<16x64xbf16>
    %98 = arith.truncf %96 : vector<64x128xf32> to vector<64x128xbf16>
    %cst_109 = arith.constant dense<0.000000e+00> : vector<16x128xf32>
    %99 = tpu.matmul %97, %98, %cst_109 {dimension_numbers = #tpu.dot_dimension_numbers<[1], [0], [0], [1], [0, 0, 1, 1], [], []>} : vector<16x64xbf16>, vector<64x128xbf16>, vector<16x128xf32> -> vector<16x128xf32>
    %c0_110 = arith.constant 0 : index
    %c0_111 = arith.constant 0 : index
    %100 = vector.load %arg6[%c0_110, %c0_111] : memref<128x128xbf16, #tpu.memory_space<vmem>>, vector<128x128xbf16>
    %cst_112 = arith.constant dense<0.000000e+00> : vector<64x128xf32>
    %101 = tpu.matmul %3, %100, %cst_112 {dimension_numbers = #tpu.dot_dimension_numbers<[1], [0], [0], [1], [0, 0, 1, 1], [], []>} : vector<64x128xbf16>, vector<128x128xbf16>, vector<64x128xf32> -> vector<64x128xf32>
    %c0_113 = arith.constant 0 : index
    %c0_114 = arith.constant 0 : index
    %102 = vector.load %arg7[%c0_113, %c0_114] : memref<1x128xf32, #tpu.memory_space<vmem>>, vector<1x128xf32>
    %103 = vector.broadcast %102 : vector<1x128xf32> to vector<64x128xf32>
    %104 = arith.addf %101, %103 : vector<64x128xf32>
    %c0_115 = arith.constant 0 : index
    %c0_116 = arith.constant 0 : index
    %105 = vector.load %arg8[%c0_115, %c0_116] : memref<16x64xbf16, #tpu.memory_space<vmem>>, vector<16x64xbf16>
    %106 = arith.truncf %104 : vector<64x128xf32> to vector<64x128xbf16>
    %cst_117 = arith.constant dense<0.000000e+00> : vector<16x128xf32>
    %107 = tpu.matmul %105, %106, %cst_117 {dimension_numbers = #tpu.dot_dimension_numbers<[1], [0], [0], [1], [0, 0, 1, 1], [], []>} : vector<16x64xbf16>, vector<64x128xbf16>, vector<16x128xf32> -> vector<16x128xf32>
    %108 = arith.addf %99, %107 : vector<16x128xf32>
    %109 = arith.truncf %108 : vector<16x128xf32> to vector<16x128xbf16>
    %c0_118 = arith.constant 0 : index
    %c0_119 = arith.constant 0 : index
    %c0_120 = arith.constant 0 : index
    %110 = vector.load %arg9[%c0_118, %c0_119, %c0_120] : memref<1x16x128xbf16, #tpu.memory_space<vmem>>, vector<1x16x128xbf16>
    %111 = vector.shape_cast %110 : vector<1x16x128xbf16> to vector<16x128xbf16>
    %112 = vector.shape_cast %109 : vector<16x128xbf16> to vector<1x16x128xbf16>
    tpu.vector_store %arg9[%c0_118, %c0_119, %c0_120], %112 {strides = array<i32>} : memref<1x16x128xbf16, #tpu.memory_space<vmem>>, vector<1x16x128xbf16>,
    return
  }
  func.func @transform_0(%arg0: i32) -> (i32, i32, i32) {
    %c0_i32 = arith.constant 0 : i32
    %c0_i32_0 = arith.constant 0 : i32
    %c0_i32_1 = arith.constant 0 : i32
    return %arg0, %c0_i32, %c0_i32_0 : i32, i32, i32
  }
  func.func @transform_1(%arg0: i32) -> (i32, i32) {
    %c0_i32 = arith.constant 0 : i32
    %c0_i32_0 = arith.constant 0 : i32
    %c0_i32_1 = arith.constant 0 : i32
    return %c0_i32, %c0_i32_0 : i32, i32
  }
  func.func @transform_2(%arg0: i32) -> (i32, i32) {
    %c0_i32 = arith.constant 0 : i32
    %c0_i32_0 = arith.constant 0 : i32
    %c0_i32_1 = arith.constant 0 : i32
    return %c0_i32, %c0_i32_0 : i32, i32
  }
  func.func @transform_3(%arg0: i32) -> (i32, i32) {
    %c0_i32 = arith.constant 0 : i32
    %c0_i32_0 = arith.constant 0 : i32
    %c0_i32_1 = arith.constant 0 : i32
    return %c0_i32, %c0_i32_0 : i32, i32
  }
  func.func @transform_4(%arg0: i32) -> (i32, i32) {
    %c0_i32 = arith.constant 0 : i32
    %c0_i32_0 = arith.constant 0 : i32
    %c0_i32_1 = arith.constant 0 : i32
    return %c0_i32, %c0_i32_0 : i32, i32
  }
  func.func @transform_5(%arg0: i32) -> (i32, i32) {
    %c0_i32 = arith.constant 0 : i32
    %c0_i32_0 = arith.constant 0 : i32
    %c0_i32_1 = arith.constant 0 : i32
    return %c0_i32, %c0_i32_0 : i32, i32
  }
  func.func @transform_6(%arg0: i32) -> (i32, i32) {
    %c0_i32 = arith.constant 0 : i32
    %c0_i32_0 = arith.constant 0 : i32
    %c0_i32_1 = arith.constant 0 : i32
    return %c0_i32, %c0_i32_0 : i32, i32
  }
  func.func @transform_7(%arg0: i32) -> (i32, i32) {
    %c0_i32 = arith.constant 0 : i32
    %c0_i32_0 = arith.constant 0 : i32
    %c0_i32_1 = arith.constant 0 : i32
    return %c0_i32, %c0_i32_0 : i32, i32
  }
  func.func @transform_8(%arg0: i32) -> (i32, i32, i32) {
    %c0_i32 = arith.constant 0 : i32
    %c0_i32_0 = arith.constant 0 : i32
    %c0_i32_1 = arith.constant 0 : i32
    return %arg0, %c0_i32, %c0_i32_0 : i32, i32, i32
  }
}

module attributes {stable_mosaic.version = 11 : i64} {
  func.func @kernel(%arg0: i32, %arg1: memref<1x256x27xbf16, #tpu.memory_space<vmem>>, %arg2: memref<1x64x3xbf16, #tpu.memory_space<vmem>>, %arg3: memref<27x128xbf16, #tpu.memory_space<vmem>>, %arg4: memref<1x128xf32, #tpu.memory_space<vmem>>, %arg5: memref<1152x128xbf16, #tpu.memory_space<vmem>>, %arg6: memref<1x128xf32, #tpu.memory_space<vmem>>, %arg7: memref<3x128xbf16, #tpu.memory_space<vmem>>, %arg8: memref<1x128xf32, #tpu.memory_space<vmem>>, %arg9: memref<64x256xbf16, #tpu.memory_space<vmem>>, %arg10: memref<1x64x128xbf16, #tpu.memory_space<vmem>>, %arg11: memref<18x18x128xf32, #tpu.memory_space<vmem>>, %arg12: memref<256x1152xbf16, #tpu.memory_space<vmem>>) attributes {dimension_semantics = [#tpu.dimension_semantics<parallel>], iteration_bounds = array<i64: 2>, scalar_prefetch = 0 : i64, scratch_operands = 2 : i64, tpu.core_type = #tpu.core_type<tc>, window_params = [{transform_indices = @transform_0, window_bounds = array<i64: 1, 256, 27>}, {transform_indices = @transform_1, window_bounds = array<i64: 1, 64, 3>}, {pipeline_mode = #tpu.pipeline_mode<synchronous>, transform_indices = @transform_2, window_bounds = array<i64: 27, 128>}, {pipeline_mode = #tpu.pipeline_mode<synchronous>, transform_indices = @transform_3, window_bounds = array<i64: 1, 128>}, {pipeline_mode = #tpu.pipeline_mode<synchronous>, transform_indices = @transform_4, window_bounds = array<i64: 1152, 128>}, {pipeline_mode = #tpu.pipeline_mode<synchronous>, transform_indices = @transform_5, window_bounds = array<i64: 1, 128>}, {pipeline_mode = #tpu.pipeline_mode<synchronous>, transform_indices = @transform_6, window_bounds = array<i64: 3, 128>}, {pipeline_mode = #tpu.pipeline_mode<synchronous>, transform_indices = @transform_7, window_bounds = array<i64: 1, 128>}, {pipeline_mode = #tpu.pipeline_mode<synchronous>, transform_indices = @transform_8, window_bounds = array<i64: 64, 256>}, {transform_indices = @transform_9, window_bounds = array<i64: 1, 64, 128>}]} {
    %cst = arith.constant 0.000000e+00 : f32
    %0 = vector.broadcast %cst : f32 to vector<18x18x128xf32>
    %c0 = arith.constant 0 : index
    %c0_0 = arith.constant 0 : index
    %c0_1 = arith.constant 0 : index
    %1 = vector.load %arg11[%c0, %c0_0, %c0_1] : memref<18x18x128xf32, #tpu.memory_space<vmem>>, vector<18x18x128xf32>
    tpu.vector_store %arg11[%c0, %c0_0, %c0_1], %0 {strides = array<i32>} : memref<18x18x128xf32, #tpu.memory_space<vmem>>, vector<18x18x128xf32>,
    %c0_2 = arith.constant 0 : index
    %c0_3 = arith.constant 0 : index
    %c0_4 = arith.constant 0 : index
    %2 = vector.load %arg1[%c0_2, %c0_3, %c0_4] : memref<1x256x27xbf16, #tpu.memory_space<vmem>>, vector<1x256x27xbf16>
    %3 = vector.shape_cast %2 : vector<1x256x27xbf16> to vector<256x27xbf16>
    %c0_5 = arith.constant 0 : index
    %c0_6 = arith.constant 0 : index
    %4 = vector.load %arg3[%c0_5, %c0_6] : memref<27x128xbf16, #tpu.memory_space<vmem>>, vector<27x128xbf16>
    %cst_7 = arith.constant dense<0.000000e+00> : vector<256x128xf32>
    %5 = tpu.matmul %3, %4, %cst_7 {dimension_numbers = #tpu.dot_dimension_numbers<[1], [0], [0], [1], [0, 0, 1, 1], [], []>} : vector<256x27xbf16>, vector<27x128xbf16>, vector<256x128xf32> -> vector<256x128xf32>
    %c0_8 = arith.constant 0 : index
    %c0_9 = arith.constant 0 : index
    %6 = vector.load %arg4[%c0_8, %c0_9] : memref<1x128xf32, #tpu.memory_space<vmem>>, vector<1x128xf32>
    %7 = vector.broadcast %6 : vector<1x128xf32> to vector<256x128xf32>
    %8 = arith.addf %5, %7 : vector<256x128xf32>
    %cst_10 = arith.constant 0.000000e+00 : f32
    %9 = vector.broadcast %cst_10 : f32 to vector<256x128xf32>
    %10 = arith.maximumf %8, %9 : vector<256x128xf32>
    %11 = vector.shape_cast %10 : vector<256x128xf32> to vector<16x16x128xf32>
    %c1 = arith.constant 1 : index
    %c1_11 = arith.constant 1 : index
    %c0_12 = arith.constant 0 : index
    %12 = vector.load %arg11[%c1, %c1_11, %c0_12] : memref<18x18x128xf32, #tpu.memory_space<vmem>>, vector<16x16x128xf32>
    tpu.vector_store %arg11[%c1, %c1_11, %c0_12], %11 {strides = array<i32>} : memref<18x18x128xf32, #tpu.memory_space<vmem>>, vector<16x16x128xf32>,
    %c0_13 = arith.constant 0 : index
    %c0_14 = arith.constant 0 : index
    %c0_15 = arith.constant 0 : index
    %13 = vector.load %arg11[%c0_13, %c0_14, %c0_15] : memref<18x18x128xf32, #tpu.memory_space<vmem>>, vector<16x16x128xf32>
    %14 = vector.shape_cast %13 : vector<16x16x128xf32> to vector<256x128xf32>
    %15 = arith.truncf %14 : vector<256x128xf32> to vector<256x128xbf16>
    %c0_16 = arith.constant 0 : index
    %c0_17 = arith.constant 0 : index
    %16 = vector.load %arg12[%c0_16, %c0_17] : memref<256x1152xbf16, #tpu.memory_space<vmem>>, vector<256x128xbf16>
    tpu.vector_store %arg12[%c0_16, %c0_17], %15 {strides = array<i32>} : memref<256x1152xbf16, #tpu.memory_space<vmem>>, vector<256x128xbf16>,
    %c0_18 = arith.constant 0 : index
    %c1_19 = arith.constant 1 : index
    %c0_20 = arith.constant 0 : index
    %17 = vector.load %arg11[%c0_18, %c1_19, %c0_20] : memref<18x18x128xf32, #tpu.memory_space<vmem>>, vector<16x16x128xf32>
    %18 = vector.shape_cast %17 : vector<16x16x128xf32> to vector<256x128xf32>
    %19 = arith.truncf %18 : vector<256x128xf32> to vector<256x128xbf16>
    %c0_21 = arith.constant 0 : index
    %c128 = arith.constant 128 : index
    %20 = vector.load %arg12[%c0_21, %c128] : memref<256x1152xbf16, #tpu.memory_space<vmem>>, vector<256x128xbf16>
    tpu.vector_store %arg12[%c0_21, %c128], %19 {strides = array<i32>} : memref<256x1152xbf16, #tpu.memory_space<vmem>>, vector<256x128xbf16>,
    %c0_22 = arith.constant 0 : index
    %c2 = arith.constant 2 : index
    %c0_23 = arith.constant 0 : index
    %21 = vector.load %arg11[%c0_22, %c2, %c0_23] : memref<18x18x128xf32, #tpu.memory_space<vmem>>, vector<16x16x128xf32>
    %22 = vector.shape_cast %21 : vector<16x16x128xf32> to vector<256x128xf32>
    %23 = arith.truncf %22 : vector<256x128xf32> to vector<256x128xbf16>
    %c0_24 = arith.constant 0 : index
    %c256 = arith.constant 256 : index
    %24 = vector.load %arg12[%c0_24, %c256] : memref<256x1152xbf16, #tpu.memory_space<vmem>>, vector<256x128xbf16>
    tpu.vector_store %arg12[%c0_24, %c256], %23 {strides = array<i32>} : memref<256x1152xbf16, #tpu.memory_space<vmem>>, vector<256x128xbf16>,
    %c1_25 = arith.constant 1 : index
    %c0_26 = arith.constant 0 : index
    %c0_27 = arith.constant 0 : index
    %25 = vector.load %arg11[%c1_25, %c0_26, %c0_27] : memref<18x18x128xf32, #tpu.memory_space<vmem>>, vector<16x16x128xf32>
    %26 = vector.shape_cast %25 : vector<16x16x128xf32> to vector<256x128xf32>
    %27 = arith.truncf %26 : vector<256x128xf32> to vector<256x128xbf16>
    %c0_28 = arith.constant 0 : index
    %c384 = arith.constant 384 : index
    %28 = vector.load %arg12[%c0_28, %c384] : memref<256x1152xbf16, #tpu.memory_space<vmem>>, vector<256x128xbf16>
    tpu.vector_store %arg12[%c0_28, %c384], %27 {strides = array<i32>} : memref<256x1152xbf16, #tpu.memory_space<vmem>>, vector<256x128xbf16>,
    %c1_29 = arith.constant 1 : index
    %c1_30 = arith.constant 1 : index
    %c0_31 = arith.constant 0 : index
    %29 = vector.load %arg11[%c1_29, %c1_30, %c0_31] : memref<18x18x128xf32, #tpu.memory_space<vmem>>, vector<16x16x128xf32>
    %30 = vector.shape_cast %29 : vector<16x16x128xf32> to vector<256x128xf32>
    %31 = arith.truncf %30 : vector<256x128xf32> to vector<256x128xbf16>
    %c0_32 = arith.constant 0 : index
    %c512 = arith.constant 512 : index
    %32 = vector.load %arg12[%c0_32, %c512] : memref<256x1152xbf16, #tpu.memory_space<vmem>>, vector<256x128xbf16>
    tpu.vector_store %arg12[%c0_32, %c512], %31 {strides = array<i32>} : memref<256x1152xbf16, #tpu.memory_space<vmem>>, vector<256x128xbf16>,
    %c1_33 = arith.constant 1 : index
    %c2_34 = arith.constant 2 : index
    %c0_35 = arith.constant 0 : index
    %33 = vector.load %arg11[%c1_33, %c2_34, %c0_35] : memref<18x18x128xf32, #tpu.memory_space<vmem>>, vector<16x16x128xf32>
    %34 = vector.shape_cast %33 : vector<16x16x128xf32> to vector<256x128xf32>
    %35 = arith.truncf %34 : vector<256x128xf32> to vector<256x128xbf16>
    %c0_36 = arith.constant 0 : index
    %c640 = arith.constant 640 : index
    %36 = vector.load %arg12[%c0_36, %c640] : memref<256x1152xbf16, #tpu.memory_space<vmem>>, vector<256x128xbf16>
    tpu.vector_store %arg12[%c0_36, %c640], %35 {strides = array<i32>} : memref<256x1152xbf16, #tpu.memory_space<vmem>>, vector<256x128xbf16>,
    %c2_37 = arith.constant 2 : index
    %c0_38 = arith.constant 0 : index
    %c0_39 = arith.constant 0 : index
    %37 = vector.load %arg11[%c2_37, %c0_38, %c0_39] : memref<18x18x128xf32, #tpu.memory_space<vmem>>, vector<16x16x128xf32>
    %38 = vector.shape_cast %37 : vector<16x16x128xf32> to vector<256x128xf32>
    %39 = arith.truncf %38 : vector<256x128xf32> to vector<256x128xbf16>
    %c0_40 = arith.constant 0 : index
    %c768 = arith.constant 768 : index
    %40 = vector.load %arg12[%c0_40, %c768] : memref<256x1152xbf16, #tpu.memory_space<vmem>>, vector<256x128xbf16>
    tpu.vector_store %arg12[%c0_40, %c768], %39 {strides = array<i32>} : memref<256x1152xbf16, #tpu.memory_space<vmem>>, vector<256x128xbf16>,
    %c2_41 = arith.constant 2 : index
    %c1_42 = arith.constant 1 : index
    %c0_43 = arith.constant 0 : index
    %41 = vector.load %arg11[%c2_41, %c1_42, %c0_43] : memref<18x18x128xf32, #tpu.memory_space<vmem>>, vector<16x16x128xf32>
    %42 = vector.shape_cast %41 : vector<16x16x128xf32> to vector<256x128xf32>
    %43 = arith.truncf %42 : vector<256x128xf32> to vector<256x128xbf16>
    %c0_44 = arith.constant 0 : index
    %c896 = arith.constant 896 : index
    %44 = vector.load %arg12[%c0_44, %c896] : memref<256x1152xbf16, #tpu.memory_space<vmem>>, vector<256x128xbf16>
    tpu.vector_store %arg12[%c0_44, %c896], %43 {strides = array<i32>} : memref<256x1152xbf16, #tpu.memory_space<vmem>>, vector<256x128xbf16>,
    %c2_45 = arith.constant 2 : index
    %c2_46 = arith.constant 2 : index
    %c0_47 = arith.constant 0 : index
    %45 = vector.load %arg11[%c2_45, %c2_46, %c0_47] : memref<18x18x128xf32, #tpu.memory_space<vmem>>, vector<16x16x128xf32>
    %46 = vector.shape_cast %45 : vector<16x16x128xf32> to vector<256x128xf32>
    %47 = arith.truncf %46 : vector<256x128xf32> to vector<256x128xbf16>
    %c0_48 = arith.constant 0 : index
    %c1024 = arith.constant 1024 : index
    %48 = vector.load %arg12[%c0_48, %c1024] : memref<256x1152xbf16, #tpu.memory_space<vmem>>, vector<256x128xbf16>
    tpu.vector_store %arg12[%c0_48, %c1024], %47 {strides = array<i32>} : memref<256x1152xbf16, #tpu.memory_space<vmem>>, vector<256x128xbf16>,
    %c0_49 = arith.constant 0 : index
    %c0_50 = arith.constant 0 : index
    %49 = vector.load %arg12[%c0_49, %c0_50] : memref<256x1152xbf16, #tpu.memory_space<vmem>>, vector<256x1152xbf16>
    %c0_51 = arith.constant 0 : index
    %c0_52 = arith.constant 0 : index
    %50 = vector.load %arg5[%c0_51, %c0_52] : memref<1152x128xbf16, #tpu.memory_space<vmem>>, vector<1152x128xbf16>
    %cst_53 = arith.constant dense<0.000000e+00> : vector<256x128xf32>
    %51 = tpu.matmul %49, %50, %cst_53 {dimension_numbers = #tpu.dot_dimension_numbers<[1], [0], [0], [1], [0, 0, 1, 1], [], []>} : vector<256x1152xbf16>, vector<1152x128xbf16>, vector<256x128xf32> -> vector<256x128xf32>
    %c0_54 = arith.constant 0 : index
    %c0_55 = arith.constant 0 : index
    %52 = vector.load %arg6[%c0_54, %c0_55] : memref<1x128xf32, #tpu.memory_space<vmem>>, vector<1x128xf32>
    %53 = vector.broadcast %52 : vector<1x128xf32> to vector<256x128xf32>
    %54 = arith.addf %51, %53 : vector<256x128xf32>
    %c0_56 = arith.constant 0 : index
    %c0_57 = arith.constant 0 : index
    %55 = vector.load %arg9[%c0_56, %c0_57] : memref<64x256xbf16, #tpu.memory_space<vmem>>, vector<64x256xbf16>
    %56 = arith.truncf %54 : vector<256x128xf32> to vector<256x128xbf16>
    %cst_58 = arith.constant dense<0.000000e+00> : vector<64x128xf32>
    %57 = tpu.matmul %55, %56, %cst_58 {dimension_numbers = #tpu.dot_dimension_numbers<[1], [0], [0], [1], [0, 0, 1, 1], [], []>} : vector<64x256xbf16>, vector<256x128xbf16>, vector<64x128xf32> -> vector<64x128xf32>
    %c0_59 = arith.constant 0 : index
    %c0_60 = arith.constant 0 : index
    %c0_61 = arith.constant 0 : index
    %58 = vector.load %arg2[%c0_59, %c0_60, %c0_61] : memref<1x64x3xbf16, #tpu.memory_space<vmem>>, vector<1x64x3xbf16>
    %59 = vector.shape_cast %58 : vector<1x64x3xbf16> to vector<64x3xbf16>
    %c0_62 = arith.constant 0 : index
    %c0_63 = arith.constant 0 : index
    %60 = vector.load %arg7[%c0_62, %c0_63] : memref<3x128xbf16, #tpu.memory_space<vmem>>, vector<3x128xbf16>
    %cst_64 = arith.constant dense<0.000000e+00> : vector<64x128xf32>
    %61 = tpu.matmul %59, %60, %cst_64 {dimension_numbers = #tpu.dot_dimension_numbers<[1], [0], [0], [1], [0, 0, 1, 1], [], []>} : vector<64x3xbf16>, vector<3x128xbf16>, vector<64x128xf32> -> vector<64x128xf32>
    %c0_65 = arith.constant 0 : index
    %c0_66 = arith.constant 0 : index
    %62 = vector.load %arg8[%c0_65, %c0_66] : memref<1x128xf32, #tpu.memory_space<vmem>>, vector<1x128xf32>
    %63 = vector.broadcast %62 : vector<1x128xf32> to vector<64x128xf32>
    %64 = arith.addf %61, %63 : vector<64x128xf32>
    %65 = arith.addf %57, %64 : vector<64x128xf32>
    %66 = arith.truncf %65 : vector<64x128xf32> to vector<64x128xbf16>
    %c0_67 = arith.constant 0 : index
    %c0_68 = arith.constant 0 : index
    %c0_69 = arith.constant 0 : index
    %67 = vector.load %arg10[%c0_67, %c0_68, %c0_69] : memref<1x64x128xbf16, #tpu.memory_space<vmem>>, vector<1x64x128xbf16>
    %68 = vector.shape_cast %67 : vector<1x64x128xbf16> to vector<64x128xbf16>
    %69 = vector.shape_cast %66 : vector<64x128xbf16> to vector<1x64x128xbf16>
    tpu.vector_store %arg10[%c0_67, %c0_68, %c0_69], %69 {strides = array<i32>} : memref<1x64x128xbf16, #tpu.memory_space<vmem>>, vector<1x64x128xbf16>,
    return
  }
  func.func @transform_0(%arg0: i32) -> (i32, i32, i32) {
    %c0_i32 = arith.constant 0 : i32
    %c0_i32_0 = arith.constant 0 : i32
    %c0_i32_1 = arith.constant 0 : i32
    return %arg0, %c0_i32, %c0_i32_0 : i32, i32, i32
  }
  func.func @transform_1(%arg0: i32) -> (i32, i32, i32) {
    %c0_i32 = arith.constant 0 : i32
    %c0_i32_0 = arith.constant 0 : i32
    %c0_i32_1 = arith.constant 0 : i32
    return %arg0, %c0_i32, %c0_i32_0 : i32, i32, i32
  }
  func.func @transform_2(%arg0: i32) -> (i32, i32) {
    %c0_i32 = arith.constant 0 : i32
    %c0_i32_0 = arith.constant 0 : i32
    %c0_i32_1 = arith.constant 0 : i32
    return %c0_i32, %c0_i32_0 : i32, i32
  }
  func.func @transform_3(%arg0: i32) -> (i32, i32) {
    %c0_i32 = arith.constant 0 : i32
    %c0_i32_0 = arith.constant 0 : i32
    %c0_i32_1 = arith.constant 0 : i32
    return %c0_i32, %c0_i32_0 : i32, i32
  }
  func.func @transform_4(%arg0: i32) -> (i32, i32) {
    %c0_i32 = arith.constant 0 : i32
    %c0_i32_0 = arith.constant 0 : i32
    %c0_i32_1 = arith.constant 0 : i32
    return %c0_i32, %c0_i32_0 : i32, i32
  }
  func.func @transform_5(%arg0: i32) -> (i32, i32) {
    %c0_i32 = arith.constant 0 : i32
    %c0_i32_0 = arith.constant 0 : i32
    %c0_i32_1 = arith.constant 0 : i32
    return %c0_i32, %c0_i32_0 : i32, i32
  }
  func.func @transform_6(%arg0: i32) -> (i32, i32) {
    %c0_i32 = arith.constant 0 : i32
    %c0_i32_0 = arith.constant 0 : i32
    %c0_i32_1 = arith.constant 0 : i32
    return %c0_i32, %c0_i32_0 : i32, i32
  }
  func.func @transform_7(%arg0: i32) -> (i32, i32) {
    %c0_i32 = arith.constant 0 : i32
    %c0_i32_0 = arith.constant 0 : i32
    %c0_i32_1 = arith.constant 0 : i32
    return %c0_i32, %c0_i32_0 : i32, i32
  }
  func.func @transform_8(%arg0: i32) -> (i32, i32) {
    %c0_i32 = arith.constant 0 : i32
    %c0_i32_0 = arith.constant 0 : i32
    %c0_i32_1 = arith.constant 0 : i32
    return %c0_i32, %c0_i32_0 : i32, i32
  }
  func.func @transform_9(%arg0: i32) -> (i32, i32, i32) {
    %c0_i32 = arith.constant 0 : i32
    %c0_i32_0 = arith.constant 0 : i32
    %c0_i32_1 = arith.constant 0 : i32
    return %arg0, %c0_i32, %c0_i32_0 : i32, i32, i32
  }
}

module attributes {stable_mosaic.version = 11 : i64} {
  func.func @kernel(%arg0: i32, %arg1: memref<1x16x128xbf16, #tpu.memory_space<vmem>>, %arg2: memref<1152x128xbf16, #tpu.memory_space<vmem>>, %arg3: memref<1x128xf32, #tpu.memory_space<vmem>>, %arg4: memref<1152x128xbf16, #tpu.memory_space<vmem>>, %arg5: memref<1x128xf32, #tpu.memory_space<vmem>>, %arg6: memref<1x16x128xbf16, #tpu.memory_space<vmem>>, %arg7: memref<6x6x128xf32, #tpu.memory_space<vmem>>, %arg8: memref<16x1152xbf16, #tpu.memory_space<vmem>>, %arg9: memref<16x128xf32, #tpu.memory_space<vmem>>) attributes {dimension_semantics = [#tpu.dimension_semantics<parallel>], iteration_bounds = array<i64: 2>, scalar_prefetch = 0 : i64, scratch_operands = 3 : i64, tpu.core_type = #tpu.core_type<tc>, window_params = [{transform_indices = @transform_0, window_bounds = array<i64: 1, 16, 128>}, {pipeline_mode = #tpu.pipeline_mode<synchronous>, transform_indices = @transform_1, window_bounds = array<i64: 1152, 128>}, {pipeline_mode = #tpu.pipeline_mode<synchronous>, transform_indices = @transform_2, window_bounds = array<i64: 1, 128>}, {pipeline_mode = #tpu.pipeline_mode<synchronous>, transform_indices = @transform_3, window_bounds = array<i64: 1152, 128>}, {pipeline_mode = #tpu.pipeline_mode<synchronous>, transform_indices = @transform_4, window_bounds = array<i64: 1, 128>}, {transform_indices = @transform_5, window_bounds = array<i64: 1, 16, 128>}]} {
    %cst = arith.constant 0.000000e+00 : f32
    %0 = vector.broadcast %cst : f32 to vector<6x6x128xf32>
    %c0 = arith.constant 0 : index
    %c0_0 = arith.constant 0 : index
    %c0_1 = arith.constant 0 : index
    %1 = vector.load %arg7[%c0, %c0_0, %c0_1] : memref<6x6x128xf32, #tpu.memory_space<vmem>>, vector<6x6x128xf32>
    tpu.vector_store %arg7[%c0, %c0_0, %c0_1], %0 {strides = array<i32>} : memref<6x6x128xf32, #tpu.memory_space<vmem>>, vector<6x6x128xf32>,
    %c0_2 = arith.constant 0 : index
    %c0_3 = arith.constant 0 : index
    %c0_4 = arith.constant 0 : index
    %2 = vector.load %arg1[%c0_2, %c0_3, %c0_4] : memref<1x16x128xbf16, #tpu.memory_space<vmem>>, vector<1x16x128xbf16>
    %3 = vector.shape_cast %2 : vector<1x16x128xbf16> to vector<16x128xbf16>
    %4 = arith.extf %3 : vector<16x128xbf16> to vector<16x128xf32>
    %cst_5 = arith.constant 0.000000e+00 : f32
    %5 = vector.broadcast %cst_5 : f32 to vector<16x128xf32>
    %6 = arith.maximumf %4, %5 : vector<16x128xf32>
    %c0_6 = arith.constant 0 : index
    %c0_7 = arith.constant 0 : index
    %7 = vector.load %arg9[%c0_6, %c0_7] : memref<16x128xf32, #tpu.memory_space<vmem>>, vector<16x128xf32>
    tpu.vector_store %arg9[%c0_6, %c0_7], %6 {strides = array<i32>} : memref<16x128xf32, #tpu.memory_space<vmem>>, vector<16x128xf32>,
    %c0_8 = arith.constant 0 : index
    %c0_9 = arith.constant 0 : index
    %8 = vector.load %arg9[%c0_8, %c0_9] : memref<16x128xf32, #tpu.memory_space<vmem>>, vector<4x128xf32>
    %c1 = arith.constant 1 : index
    %c1_10 = arith.constant 1 : index
    %c0_11 = arith.constant 0 : index
    %9 = vector.load %arg7[%c1, %c1_10, %c0_11] : memref<6x6x128xf32, #tpu.memory_space<vmem>>, vector<1x4x128xf32>
    %10 = vector.shape_cast %9 : vector<1x4x128xf32> to vector<4x128xf32>
    %11 = vector.shape_cast %8 : vector<4x128xf32> to vector<1x4x128xf32>
    tpu.vector_store %arg7[%c1, %c1_10, %c0_11], %11 {strides = array<i32>} : memref<6x6x128xf32, #tpu.memory_space<vmem>>, vector<1x4x128xf32>,
    %c4 = arith.constant 4 : index
    %c0_12 = arith.constant 0 : index
    %12 = vector.load %arg9[%c4, %c0_12] : memref<16x128xf32, #tpu.memory_space<vmem>>, vector<4x128xf32>
    %c2 = arith.constant 2 : index
    %c1_13 = arith.constant 1 : index
    %c0_14 = arith.constant 0 : index
    %13 = vector.load %arg7[%c2, %c1_13, %c0_14] : memref<6x6x128xf32, #tpu.memory_space<vmem>>, vector<1x4x128xf32>
    %14 = vector.shape_cast %13 : vector<1x4x128xf32> to vector<4x128xf32>
    %15 = vector.shape_cast %12 : vector<4x128xf32> to vector<1x4x128xf32>
    tpu.vector_store %arg7[%c2, %c1_13, %c0_14], %15 {strides = array<i32>} : memref<6x6x128xf32, #tpu.memory_space<vmem>>, vector<1x4x128xf32>,
    %c8 = arith.constant 8 : index
    %c0_15 = arith.constant 0 : index
    %16 = vector.load %arg9[%c8, %c0_15] : memref<16x128xf32, #tpu.memory_space<vmem>>, vector<4x128xf32>
    %c3 = arith.constant 3 : index
    %c1_16 = arith.constant 1 : index
    %c0_17 = arith.constant 0 : index
    %17 = vector.load %arg7[%c3, %c1_16, %c0_17] : memref<6x6x128xf32, #tpu.memory_space<vmem>>, vector<1x4x128xf32>
    %18 = vector.shape_cast %17 : vector<1x4x128xf32> to vector<4x128xf32>
    %19 = vector.shape_cast %16 : vector<4x128xf32> to vector<1x4x128xf32>
    tpu.vector_store %arg7[%c3, %c1_16, %c0_17], %19 {strides = array<i32>} : memref<6x6x128xf32, #tpu.memory_space<vmem>>, vector<1x4x128xf32>,
    %c12 = arith.constant 12 : index
    %c0_18 = arith.constant 0 : index
    %20 = vector.load %arg9[%c12, %c0_18] : memref<16x128xf32, #tpu.memory_space<vmem>>, vector<4x128xf32>
    %c4_19 = arith.constant 4 : index
    %c1_20 = arith.constant 1 : index
    %c0_21 = arith.constant 0 : index
    %21 = vector.load %arg7[%c4_19, %c1_20, %c0_21] : memref<6x6x128xf32, #tpu.memory_space<vmem>>, vector<1x4x128xf32>
    %22 = vector.shape_cast %21 : vector<1x4x128xf32> to vector<4x128xf32>
    %23 = vector.shape_cast %20 : vector<4x128xf32> to vector<1x4x128xf32>
    tpu.vector_store %arg7[%c4_19, %c1_20, %c0_21], %23 {strides = array<i32>} : memref<6x6x128xf32, #tpu.memory_space<vmem>>, vector<1x4x128xf32>,
    %c0_22 = arith.constant 0 : index
    %c0_23 = arith.constant 0 : index
    %c0_24 = arith.constant 0 : index
    %24 = vector.load %arg7[%c0_22, %c0_23, %c0_24] : memref<6x6x128xf32, #tpu.memory_space<vmem>>, vector<1x4x128xf32>
    %25 = vector.shape_cast %24 : vector<1x4x128xf32> to vector<4x128xf32>
    %26 = arith.truncf %25 : vector<4x128xf32> to vector<4x128xbf16>
    %c0_25 = arith.constant 0 : index
    %c0_26 = arith.constant 0 : index
    %27 = vector.load %arg8[%c0_25, %c0_26] : memref<16x1152xbf16, #tpu.memory_space<vmem>>, vector<4x128xbf16>
    tpu.vector_store %arg8[%c0_25, %c0_26], %26 {strides = array<i32>} : memref<16x1152xbf16, #tpu.memory_space<vmem>>, vector<4x128xbf16>,
    %c1_27 = arith.constant 1 : index
    %c0_28 = arith.constant 0 : index
    %c0_29 = arith.constant 0 : index
    %28 = vector.load %arg7[%c1_27, %c0_28, %c0_29] : memref<6x6x128xf32, #tpu.memory_space<vmem>>, vector<1x4x128xf32>
    %29 = vector.shape_cast %28 : vector<1x4x128xf32> to vector<4x128xf32>
    %30 = arith.truncf %29 : vector<4x128xf32> to vector<4x128xbf16>
    %c4_30 = arith.constant 4 : index
    %c0_31 = arith.constant 0 : index
    %31 = vector.load %arg8[%c4_30, %c0_31] : memref<16x1152xbf16, #tpu.memory_space<vmem>>, vector<4x128xbf16>
    tpu.vector_store %arg8[%c4_30, %c0_31], %30 {strides = array<i32>} : memref<16x1152xbf16, #tpu.memory_space<vmem>>, vector<4x128xbf16>,
    %c2_32 = arith.constant 2 : index
    %c0_33 = arith.constant 0 : index
    %c0_34 = arith.constant 0 : index
    %32 = vector.load %arg7[%c2_32, %c0_33, %c0_34] : memref<6x6x128xf32, #tpu.memory_space<vmem>>, vector<1x4x128xf32>
    %33 = vector.shape_cast %32 : vector<1x4x128xf32> to vector<4x128xf32>
    %34 = arith.truncf %33 : vector<4x128xf32> to vector<4x128xbf16>
    %c8_35 = arith.constant 8 : index
    %c0_36 = arith.constant 0 : index
    %35 = vector.load %arg8[%c8_35, %c0_36] : memref<16x1152xbf16, #tpu.memory_space<vmem>>, vector<4x128xbf16>
    tpu.vector_store %arg8[%c8_35, %c0_36], %34 {strides = array<i32>} : memref<16x1152xbf16, #tpu.memory_space<vmem>>, vector<4x128xbf16>,
    %c3_37 = arith.constant 3 : index
    %c0_38 = arith.constant 0 : index
    %c0_39 = arith.constant 0 : index
    %36 = vector.load %arg7[%c3_37, %c0_38, %c0_39] : memref<6x6x128xf32, #tpu.memory_space<vmem>>, vector<1x4x128xf32>
    %37 = vector.shape_cast %36 : vector<1x4x128xf32> to vector<4x128xf32>
    %38 = arith.truncf %37 : vector<4x128xf32> to vector<4x128xbf16>
    %c12_40 = arith.constant 12 : index
    %c0_41 = arith.constant 0 : index
    %39 = vector.load %arg8[%c12_40, %c0_41] : memref<16x1152xbf16, #tpu.memory_space<vmem>>, vector<4x128xbf16>
    tpu.vector_store %arg8[%c12_40, %c0_41], %38 {strides = array<i32>} : memref<16x1152xbf16, #tpu.memory_space<vmem>>, vector<4x128xbf16>,
    %c0_42 = arith.constant 0 : index
    %c1_43 = arith.constant 1 : index
    %c0_44 = arith.constant 0 : index
    %40 = vector.load %arg7[%c0_42, %c1_43, %c0_44] : memref<6x6x128xf32, #tpu.memory_space<vmem>>, vector<1x4x128xf32>
    %41 = vector.shape_cast %40 : vector<1x4x128xf32> to vector<4x128xf32>
    %42 = arith.truncf %41 : vector<4x128xf32> to vector<4x128xbf16>
    %c0_45 = arith.constant 0 : index
    %c128 = arith.constant 128 : index
    %43 = vector.load %arg8[%c0_45, %c128] : memref<16x1152xbf16, #tpu.memory_space<vmem>>, vector<4x128xbf16>
    tpu.vector_store %arg8[%c0_45, %c128], %42 {strides = array<i32>} : memref<16x1152xbf16, #tpu.memory_space<vmem>>, vector<4x128xbf16>,
    %c1_46 = arith.constant 1 : index
    %c1_47 = arith.constant 1 : index
    %c0_48 = arith.constant 0 : index
    %44 = vector.load %arg7[%c1_46, %c1_47, %c0_48] : memref<6x6x128xf32, #tpu.memory_space<vmem>>, vector<1x4x128xf32>
    %45 = vector.shape_cast %44 : vector<1x4x128xf32> to vector<4x128xf32>
    %46 = arith.truncf %45 : vector<4x128xf32> to vector<4x128xbf16>
    %c4_49 = arith.constant 4 : index
    %c128_50 = arith.constant 128 : index
    %47 = vector.load %arg8[%c4_49, %c128_50] : memref<16x1152xbf16, #tpu.memory_space<vmem>>, vector<4x128xbf16>
    tpu.vector_store %arg8[%c4_49, %c128_50], %46 {strides = array<i32>} : memref<16x1152xbf16, #tpu.memory_space<vmem>>, vector<4x128xbf16>,
    %c2_51 = arith.constant 2 : index
    %c1_52 = arith.constant 1 : index
    %c0_53 = arith.constant 0 : index
    %48 = vector.load %arg7[%c2_51, %c1_52, %c0_53] : memref<6x6x128xf32, #tpu.memory_space<vmem>>, vector<1x4x128xf32>
    %49 = vector.shape_cast %48 : vector<1x4x128xf32> to vector<4x128xf32>
    %50 = arith.truncf %49 : vector<4x128xf32> to vector<4x128xbf16>
    %c8_54 = arith.constant 8 : index
    %c128_55 = arith.constant 128 : index
    %51 = vector.load %arg8[%c8_54, %c128_55] : memref<16x1152xbf16, #tpu.memory_space<vmem>>, vector<4x128xbf16>
    tpu.vector_store %arg8[%c8_54, %c128_55], %50 {strides = array<i32>} : memref<16x1152xbf16, #tpu.memory_space<vmem>>, vector<4x128xbf16>,
    %c3_56 = arith.constant 3 : index
    %c1_57 = arith.constant 1 : index
    %c0_58 = arith.constant 0 : index
    %52 = vector.load %arg7[%c3_56, %c1_57, %c0_58] : memref<6x6x128xf32, #tpu.memory_space<vmem>>, vector<1x4x128xf32>
    %53 = vector.shape_cast %52 : vector<1x4x128xf32> to vector<4x128xf32>
    %54 = arith.truncf %53 : vector<4x128xf32> to vector<4x128xbf16>
    %c12_59 = arith.constant 12 : index
    %c128_60 = arith.constant 128 : index
    %55 = vector.load %arg8[%c12_59, %c128_60] : memref<16x1152xbf16, #tpu.memory_space<vmem>>, vector<4x128xbf16>
    tpu.vector_store %arg8[%c12_59, %c128_60], %54 {strides = array<i32>} : memref<16x1152xbf16, #tpu.memory_space<vmem>>, vector<4x128xbf16>,
    %c0_61 = arith.constant 0 : index
    %c2_62 = arith.constant 2 : index
    %c0_63 = arith.constant 0 : index
    %56 = vector.load %arg7[%c0_61, %c2_62, %c0_63] : memref<6x6x128xf32, #tpu.memory_space<vmem>>, vector<1x4x128xf32>
    %57 = vector.shape_cast %56 : vector<1x4x128xf32> to vector<4x128xf32>
    %58 = arith.truncf %57 : vector<4x128xf32> to vector<4x128xbf16>
    %c0_64 = arith.constant 0 : index
    %c256 = arith.constant 256 : index
    %59 = vector.load %arg8[%c0_64, %c256] : memref<16x1152xbf16, #tpu.memory_space<vmem>>, vector<4x128xbf16>
    tpu.vector_store %arg8[%c0_64, %c256], %58 {strides = array<i32>} : memref<16x1152xbf16, #tpu.memory_space<vmem>>, vector<4x128xbf16>,
    %c1_65 = arith.constant 1 : index
    %c2_66 = arith.constant 2 : index
    %c0_67 = arith.constant 0 : index
    %60 = vector.load %arg7[%c1_65, %c2_66, %c0_67] : memref<6x6x128xf32, #tpu.memory_space<vmem>>, vector<1x4x128xf32>
    %61 = vector.shape_cast %60 : vector<1x4x128xf32> to vector<4x128xf32>
    %62 = arith.truncf %61 : vector<4x128xf32> to vector<4x128xbf16>
    %c4_68 = arith.constant 4 : index
    %c256_69 = arith.constant 256 : index
    %63 = vector.load %arg8[%c4_68, %c256_69] : memref<16x1152xbf16, #tpu.memory_space<vmem>>, vector<4x128xbf16>
    tpu.vector_store %arg8[%c4_68, %c256_69], %62 {strides = array<i32>} : memref<16x1152xbf16, #tpu.memory_space<vmem>>, vector<4x128xbf16>,
    %c2_70 = arith.constant 2 : index
    %c2_71 = arith.constant 2 : index
    %c0_72 = arith.constant 0 : index
    %64 = vector.load %arg7[%c2_70, %c2_71, %c0_72] : memref<6x6x128xf32, #tpu.memory_space<vmem>>, vector<1x4x128xf32>
    %65 = vector.shape_cast %64 : vector<1x4x128xf32> to vector<4x128xf32>
    %66 = arith.truncf %65 : vector<4x128xf32> to vector<4x128xbf16>
    %c8_73 = arith.constant 8 : index
    %c256_74 = arith.constant 256 : index
    %67 = vector.load %arg8[%c8_73, %c256_74] : memref<16x1152xbf16, #tpu.memory_space<vmem>>, vector<4x128xbf16>
    tpu.vector_store %arg8[%c8_73, %c256_74], %66 {strides = array<i32>} : memref<16x1152xbf16, #tpu.memory_space<vmem>>, vector<4x128xbf16>,
    %c3_75 = arith.constant 3 : index
    %c2_76 = arith.constant 2 : index
    %c0_77 = arith.constant 0 : index
    %68 = vector.load %arg7[%c3_75, %c2_76, %c0_77] : memref<6x6x128xf32, #tpu.memory_space<vmem>>, vector<1x4x128xf32>
    %69 = vector.shape_cast %68 : vector<1x4x128xf32> to vector<4x128xf32>
    %70 = arith.truncf %69 : vector<4x128xf32> to vector<4x128xbf16>
    %c12_78 = arith.constant 12 : index
    %c256_79 = arith.constant 256 : index
    %71 = vector.load %arg8[%c12_78, %c256_79] : memref<16x1152xbf16, #tpu.memory_space<vmem>>, vector<4x128xbf16>
    tpu.vector_store %arg8[%c12_78, %c256_79], %70 {strides = array<i32>} : memref<16x1152xbf16, #tpu.memory_space<vmem>>, vector<4x128xbf16>,
    %c1_80 = arith.constant 1 : index
    %c0_81 = arith.constant 0 : index
    %c0_82 = arith.constant 0 : index
    %72 = vector.load %arg7[%c1_80, %c0_81, %c0_82] : memref<6x6x128xf32, #tpu.memory_space<vmem>>, vector<1x4x128xf32>
    %73 = vector.shape_cast %72 : vector<1x4x128xf32> to vector<4x128xf32>
    %74 = arith.truncf %73 : vector<4x128xf32> to vector<4x128xbf16>
    %c0_83 = arith.constant 0 : index
    %c384 = arith.constant 384 : index
    %75 = vector.load %arg8[%c0_83, %c384] : memref<16x1152xbf16, #tpu.memory_space<vmem>>, vector<4x128xbf16>
    tpu.vector_store %arg8[%c0_83, %c384], %74 {strides = array<i32>} : memref<16x1152xbf16, #tpu.memory_space<vmem>>, vector<4x128xbf16>,
    %c2_84 = arith.constant 2 : index
    %c0_85 = arith.constant 0 : index
    %c0_86 = arith.constant 0 : index
    %76 = vector.load %arg7[%c2_84, %c0_85, %c0_86] : memref<6x6x128xf32, #tpu.memory_space<vmem>>, vector<1x4x128xf32>
    %77 = vector.shape_cast %76 : vector<1x4x128xf32> to vector<4x128xf32>
    %78 = arith.truncf %77 : vector<4x128xf32> to vector<4x128xbf16>
    %c4_87 = arith.constant 4 : index
    %c384_88 = arith.constant 384 : index
    %79 = vector.load %arg8[%c4_87, %c384_88] : memref<16x1152xbf16, #tpu.memory_space<vmem>>, vector<4x128xbf16>
    tpu.vector_store %arg8[%c4_87, %c384_88], %78 {strides = array<i32>} : memref<16x1152xbf16, #tpu.memory_space<vmem>>, vector<4x128xbf16>,
    %c3_89 = arith.constant 3 : index
    %c0_90 = arith.constant 0 : index
    %c0_91 = arith.constant 0 : index
    %80 = vector.load %arg7[%c3_89, %c0_90, %c0_91] : memref<6x6x128xf32, #tpu.memory_space<vmem>>, vector<1x4x128xf32>
    %81 = vector.shape_cast %80 : vector<1x4x128xf32> to vector<4x128xf32>
    %82 = arith.truncf %81 : vector<4x128xf32> to vector<4x128xbf16>
    %c8_92 = arith.constant 8 : index
    %c384_93 = arith.constant 384 : index
    %83 = vector.load %arg8[%c8_92, %c384_93] : memref<16x1152xbf16, #tpu.memory_space<vmem>>, vector<4x128xbf16>
    tpu.vector_store %arg8[%c8_92, %c384_93], %82 {strides = array<i32>} : memref<16x1152xbf16, #tpu.memory_space<vmem>>, vector<4x128xbf16>,
    %c4_94 = arith.constant 4 : index
    %c0_95 = arith.constant 0 : index
    %c0_96 = arith.constant 0 : index
    %84 = vector.load %arg7[%c4_94, %c0_95, %c0_96] : memref<6x6x128xf32, #tpu.memory_space<vmem>>, vector<1x4x128xf32>
    %85 = vector.shape_cast %84 : vector<1x4x128xf32> to vector<4x128xf32>
    %86 = arith.truncf %85 : vector<4x128xf32> to vector<4x128xbf16>
    %c12_97 = arith.constant 12 : index
    %c384_98 = arith.constant 384 : index
    %87 = vector.load %arg8[%c12_97, %c384_98] : memref<16x1152xbf16, #tpu.memory_space<vmem>>, vector<4x128xbf16>
    tpu.vector_store %arg8[%c12_97, %c384_98], %86 {strides = array<i32>} : memref<16x1152xbf16, #tpu.memory_space<vmem>>, vector<4x128xbf16>,
    %c1_99 = arith.constant 1 : index
    %c1_100 = arith.constant 1 : index
    %c0_101 = arith.constant 0 : index
    %88 = vector.load %arg7[%c1_99, %c1_100, %c0_101] : memref<6x6x128xf32, #tpu.memory_space<vmem>>, vector<1x4x128xf32>
    %89 = vector.shape_cast %88 : vector<1x4x128xf32> to vector<4x128xf32>
    %90 = arith.truncf %89 : vector<4x128xf32> to vector<4x128xbf16>
    %c0_102 = arith.constant 0 : index
    %c512 = arith.constant 512 : index
    %91 = vector.load %arg8[%c0_102, %c512] : memref<16x1152xbf16, #tpu.memory_space<vmem>>, vector<4x128xbf16>
    tpu.vector_store %arg8[%c0_102, %c512], %90 {strides = array<i32>} : memref<16x1152xbf16, #tpu.memory_space<vmem>>, vector<4x128xbf16>,
    %c2_103 = arith.constant 2 : index
    %c1_104 = arith.constant 1 : index
    %c0_105 = arith.constant 0 : index
    %92 = vector.load %arg7[%c2_103, %c1_104, %c0_105] : memref<6x6x128xf32, #tpu.memory_space<vmem>>, vector<1x4x128xf32>
    %93 = vector.shape_cast %92 : vector<1x4x128xf32> to vector<4x128xf32>
    %94 = arith.truncf %93 : vector<4x128xf32> to vector<4x128xbf16>
    %c4_106 = arith.constant 4 : index
    %c512_107 = arith.constant 512 : index
    %95 = vector.load %arg8[%c4_106, %c512_107] : memref<16x1152xbf16, #tpu.memory_space<vmem>>, vector<4x128xbf16>
    tpu.vector_store %arg8[%c4_106, %c512_107], %94 {strides = array<i32>} : memref<16x1152xbf16, #tpu.memory_space<vmem>>, vector<4x128xbf16>,
    %c3_108 = arith.constant 3 : index
    %c1_109 = arith.constant 1 : index
    %c0_110 = arith.constant 0 : index
    %96 = vector.load %arg7[%c3_108, %c1_109, %c0_110] : memref<6x6x128xf32, #tpu.memory_space<vmem>>, vector<1x4x128xf32>
    %97 = vector.shape_cast %96 : vector<1x4x128xf32> to vector<4x128xf32>
    %98 = arith.truncf %97 : vector<4x128xf32> to vector<4x128xbf16>
    %c8_111 = arith.constant 8 : index
    %c512_112 = arith.constant 512 : index
    %99 = vector.load %arg8[%c8_111, %c512_112] : memref<16x1152xbf16, #tpu.memory_space<vmem>>, vector<4x128xbf16>
    tpu.vector_store %arg8[%c8_111, %c512_112], %98 {strides = array<i32>} : memref<16x1152xbf16, #tpu.memory_space<vmem>>, vector<4x128xbf16>,
    %c4_113 = arith.constant 4 : index
    %c1_114 = arith.constant 1 : index
    %c0_115 = arith.constant 0 : index
    %100 = vector.load %arg7[%c4_113, %c1_114, %c0_115] : memref<6x6x128xf32, #tpu.memory_space<vmem>>, vector<1x4x128xf32>
    %101 = vector.shape_cast %100 : vector<1x4x128xf32> to vector<4x128xf32>
    %102 = arith.truncf %101 : vector<4x128xf32> to vector<4x128xbf16>
    %c12_116 = arith.constant 12 : index
    %c512_117 = arith.constant 512 : index
    %103 = vector.load %arg8[%c12_116, %c512_117] : memref<16x1152xbf16, #tpu.memory_space<vmem>>, vector<4x128xbf16>
    tpu.vector_store %arg8[%c12_116, %c512_117], %102 {strides = array<i32>} : memref<16x1152xbf16, #tpu.memory_space<vmem>>, vector<4x128xbf16>,
    %c1_118 = arith.constant 1 : index
    %c2_119 = arith.constant 2 : index
    %c0_120 = arith.constant 0 : index
    %104 = vector.load %arg7[%c1_118, %c2_119, %c0_120] : memref<6x6x128xf32, #tpu.memory_space<vmem>>, vector<1x4x128xf32>
    %105 = vector.shape_cast %104 : vector<1x4x128xf32> to vector<4x128xf32>
    %106 = arith.truncf %105 : vector<4x128xf32> to vector<4x128xbf16>
    %c0_121 = arith.constant 0 : index
    %c640 = arith.constant 640 : index
    %107 = vector.load %arg8[%c0_121, %c640] : memref<16x1152xbf16, #tpu.memory_space<vmem>>, vector<4x128xbf16>
    tpu.vector_store %arg8[%c0_121, %c640], %106 {strides = array<i32>} : memref<16x1152xbf16, #tpu.memory_space<vmem>>, vector<4x128xbf16>,
    %c2_122 = arith.constant 2 : index
    %c2_123 = arith.constant 2 : index
    %c0_124 = arith.constant 0 : index
    %108 = vector.load %arg7[%c2_122, %c2_123, %c0_124] : memref<6x6x128xf32, #tpu.memory_space<vmem>>, vector<1x4x128xf32>
    %109 = vector.shape_cast %108 : vector<1x4x128xf32> to vector<4x128xf32>
    %110 = arith.truncf %109 : vector<4x128xf32> to vector<4x128xbf16>
    %c4_125 = arith.constant 4 : index
    %c640_126 = arith.constant 640 : index
    %111 = vector.load %arg8[%c4_125, %c640_126] : memref<16x1152xbf16, #tpu.memory_space<vmem>>, vector<4x128xbf16>
    tpu.vector_store %arg8[%c4_125, %c640_126], %110 {strides = array<i32>} : memref<16x1152xbf16, #tpu.memory_space<vmem>>, vector<4x128xbf16>,
    %c3_127 = arith.constant 3 : index
    %c2_128 = arith.constant 2 : index
    %c0_129 = arith.constant 0 : index
    %112 = vector.load %arg7[%c3_127, %c2_128, %c0_129] : memref<6x6x128xf32, #tpu.memory_space<vmem>>, vector<1x4x128xf32>
    %113 = vector.shape_cast %112 : vector<1x4x128xf32> to vector<4x128xf32>
    %114 = arith.truncf %113 : vector<4x128xf32> to vector<4x128xbf16>
    %c8_130 = arith.constant 8 : index
    %c640_131 = arith.constant 640 : index
    %115 = vector.load %arg8[%c8_130, %c640_131] : memref<16x1152xbf16, #tpu.memory_space<vmem>>, vector<4x128xbf16>
    tpu.vector_store %arg8[%c8_130, %c640_131], %114 {strides = array<i32>} : memref<16x1152xbf16, #tpu.memory_space<vmem>>, vector<4x128xbf16>,
    %c4_132 = arith.constant 4 : index
    %c2_133 = arith.constant 2 : index
    %c0_134 = arith.constant 0 : index
    %116 = vector.load %arg7[%c4_132, %c2_133, %c0_134] : memref<6x6x128xf32, #tpu.memory_space<vmem>>, vector<1x4x128xf32>
    %117 = vector.shape_cast %116 : vector<1x4x128xf32> to vector<4x128xf32>
    %118 = arith.truncf %117 : vector<4x128xf32> to vector<4x128xbf16>
    %c12_135 = arith.constant 12 : index
    %c640_136 = arith.constant 640 : index
    %119 = vector.load %arg8[%c12_135, %c640_136] : memref<16x1152xbf16, #tpu.memory_space<vmem>>, vector<4x128xbf16>
    tpu.vector_store %arg8[%c12_135, %c640_136], %118 {strides = array<i32>} : memref<16x1152xbf16, #tpu.memory_space<vmem>>, vector<4x128xbf16>,
    %c2_137 = arith.constant 2 : index
    %c0_138 = arith.constant 0 : index
    %c0_139 = arith.constant 0 : index
    %120 = vector.load %arg7[%c2_137, %c0_138, %c0_139] : memref<6x6x128xf32, #tpu.memory_space<vmem>>, vector<1x4x128xf32>
    %121 = vector.shape_cast %120 : vector<1x4x128xf32> to vector<4x128xf32>
    %122 = arith.truncf %121 : vector<4x128xf32> to vector<4x128xbf16>
    %c0_140 = arith.constant 0 : index
    %c768 = arith.constant 768 : index
    %123 = vector.load %arg8[%c0_140, %c768] : memref<16x1152xbf16, #tpu.memory_space<vmem>>, vector<4x128xbf16>
    tpu.vector_store %arg8[%c0_140, %c768], %122 {strides = array<i32>} : memref<16x1152xbf16, #tpu.memory_space<vmem>>, vector<4x128xbf16>,
    %c3_141 = arith.constant 3 : index
    %c0_142 = arith.constant 0 : index
    %c0_143 = arith.constant 0 : index
    %124 = vector.load %arg7[%c3_141, %c0_142, %c0_143] : memref<6x6x128xf32, #tpu.memory_space<vmem>>, vector<1x4x128xf32>
    %125 = vector.shape_cast %124 : vector<1x4x128xf32> to vector<4x128xf32>
    %126 = arith.truncf %125 : vector<4x128xf32> to vector<4x128xbf16>
    %c4_144 = arith.constant 4 : index
    %c768_145 = arith.constant 768 : index
    %127 = vector.load %arg8[%c4_144, %c768_145] : memref<16x1152xbf16, #tpu.memory_space<vmem>>, vector<4x128xbf16>
    tpu.vector_store %arg8[%c4_144, %c768_145], %126 {strides = array<i32>} : memref<16x1152xbf16, #tpu.memory_space<vmem>>, vector<4x128xbf16>,
    %c4_146 = arith.constant 4 : index
    %c0_147 = arith.constant 0 : index
    %c0_148 = arith.constant 0 : index
    %128 = vector.load %arg7[%c4_146, %c0_147, %c0_148] : memref<6x6x128xf32, #tpu.memory_space<vmem>>, vector<1x4x128xf32>
    %129 = vector.shape_cast %128 : vector<1x4x128xf32> to vector<4x128xf32>
    %130 = arith.truncf %129 : vector<4x128xf32> to vector<4x128xbf16>
    %c8_149 = arith.constant 8 : index
    %c768_150 = arith.constant 768 : index
    %131 = vector.load %arg8[%c8_149, %c768_150] : memref<16x1152xbf16, #tpu.memory_space<vmem>>, vector<4x128xbf16>
    tpu.vector_store %arg8[%c8_149, %c768_150], %130 {strides = array<i32>} : memref<16x1152xbf16, #tpu.memory_space<vmem>>, vector<4x128xbf16>,
    %c5 = arith.constant 5 : index
    %c0_151 = arith.constant 0 : index
    %c0_152 = arith.constant 0 : index
    %132 = vector.load %arg7[%c5, %c0_151, %c0_152] : memref<6x6x128xf32, #tpu.memory_space<vmem>>, vector<1x4x128xf32>
    %133 = vector.shape_cast %132 : vector<1x4x128xf32> to vector<4x128xf32>
    %134 = arith.truncf %133 : vector<4x128xf32> to vector<4x128xbf16>
    %c12_153 = arith.constant 12 : index
    %c768_154 = arith.constant 768 : index
    %135 = vector.load %arg8[%c12_153, %c768_154] : memref<16x1152xbf16, #tpu.memory_space<vmem>>, vector<4x128xbf16>
    tpu.vector_store %arg8[%c12_153, %c768_154], %134 {strides = array<i32>} : memref<16x1152xbf16, #tpu.memory_space<vmem>>, vector<4x128xbf16>,
    %c2_155 = arith.constant 2 : index
    %c1_156 = arith.constant 1 : index
    %c0_157 = arith.constant 0 : index
    %136 = vector.load %arg7[%c2_155, %c1_156, %c0_157] : memref<6x6x128xf32, #tpu.memory_space<vmem>>, vector<1x4x128xf32>
    %137 = vector.shape_cast %136 : vector<1x4x128xf32> to vector<4x128xf32>
    %138 = arith.truncf %137 : vector<4x128xf32> to vector<4x128xbf16>
    %c0_158 = arith.constant 0 : index
    %c896 = arith.constant 896 : index
    %139 = vector.load %arg8[%c0_158, %c896] : memref<16x1152xbf16, #tpu.memory_space<vmem>>, vector<4x128xbf16>
    tpu.vector_store %arg8[%c0_158, %c896], %138 {strides = array<i32>} : memref<16x1152xbf16, #tpu.memory_space<vmem>>, vector<4x128xbf16>,
    %c3_159 = arith.constant 3 : index
    %c1_160 = arith.constant 1 : index
    %c0_161 = arith.constant 0 : index
    %140 = vector.load %arg7[%c3_159, %c1_160, %c0_161] : memref<6x6x128xf32, #tpu.memory_space<vmem>>, vector<1x4x128xf32>
    %141 = vector.shape_cast %140 : vector<1x4x128xf32> to vector<4x128xf32>
    %142 = arith.truncf %141 : vector<4x128xf32> to vector<4x128xbf16>
    %c4_162 = arith.constant 4 : index
    %c896_163 = arith.constant 896 : index
    %143 = vector.load %arg8[%c4_162, %c896_163] : memref<16x1152xbf16, #tpu.memory_space<vmem>>, vector<4x128xbf16>
    tpu.vector_store %arg8[%c4_162, %c896_163], %142 {strides = array<i32>} : memref<16x1152xbf16, #tpu.memory_space<vmem>>, vector<4x128xbf16>,
    %c4_164 = arith.constant 4 : index
    %c1_165 = arith.constant 1 : index
    %c0_166 = arith.constant 0 : index
    %144 = vector.load %arg7[%c4_164, %c1_165, %c0_166] : memref<6x6x128xf32, #tpu.memory_space<vmem>>, vector<1x4x128xf32>
    %145 = vector.shape_cast %144 : vector<1x4x128xf32> to vector<4x128xf32>
    %146 = arith.truncf %145 : vector<4x128xf32> to vector<4x128xbf16>
    %c8_167 = arith.constant 8 : index
    %c896_168 = arith.constant 896 : index
    %147 = vector.load %arg8[%c8_167, %c896_168] : memref<16x1152xbf16, #tpu.memory_space<vmem>>, vector<4x128xbf16>
    tpu.vector_store %arg8[%c8_167, %c896_168], %146 {strides = array<i32>} : memref<16x1152xbf16, #tpu.memory_space<vmem>>, vector<4x128xbf16>,
    %c5_169 = arith.constant 5 : index
    %c1_170 = arith.constant 1 : index
    %c0_171 = arith.constant 0 : index
    %148 = vector.load %arg7[%c5_169, %c1_170, %c0_171] : memref<6x6x128xf32, #tpu.memory_space<vmem>>, vector<1x4x128xf32>
    %149 = vector.shape_cast %148 : vector<1x4x128xf32> to vector<4x128xf32>
    %150 = arith.truncf %149 : vector<4x128xf32> to vector<4x128xbf16>
    %c12_172 = arith.constant 12 : index
    %c896_173 = arith.constant 896 : index
    %151 = vector.load %arg8[%c12_172, %c896_173] : memref<16x1152xbf16, #tpu.memory_space<vmem>>, vector<4x128xbf16>
    tpu.vector_store %arg8[%c12_172, %c896_173], %150 {strides = array<i32>} : memref<16x1152xbf16, #tpu.memory_space<vmem>>, vector<4x128xbf16>,
    %c2_174 = arith.constant 2 : index
    %c2_175 = arith.constant 2 : index
    %c0_176 = arith.constant 0 : index
    %152 = vector.load %arg7[%c2_174, %c2_175, %c0_176] : memref<6x6x128xf32, #tpu.memory_space<vmem>>, vector<1x4x128xf32>
    %153 = vector.shape_cast %152 : vector<1x4x128xf32> to vector<4x128xf32>
    %154 = arith.truncf %153 : vector<4x128xf32> to vector<4x128xbf16>
    %c0_177 = arith.constant 0 : index
    %c1024 = arith.constant 1024 : index
    %155 = vector.load %arg8[%c0_177, %c1024] : memref<16x1152xbf16, #tpu.memory_space<vmem>>, vector<4x128xbf16>
    tpu.vector_store %arg8[%c0_177, %c1024], %154 {strides = array<i32>} : memref<16x1152xbf16, #tpu.memory_space<vmem>>, vector<4x128xbf16>,
    %c3_178 = arith.constant 3 : index
    %c2_179 = arith.constant 2 : index
    %c0_180 = arith.constant 0 : index
    %156 = vector.load %arg7[%c3_178, %c2_179, %c0_180] : memref<6x6x128xf32, #tpu.memory_space<vmem>>, vector<1x4x128xf32>
    %157 = vector.shape_cast %156 : vector<1x4x128xf32> to vector<4x128xf32>
    %158 = arith.truncf %157 : vector<4x128xf32> to vector<4x128xbf16>
    %c4_181 = arith.constant 4 : index
    %c1024_182 = arith.constant 1024 : index
    %159 = vector.load %arg8[%c4_181, %c1024_182] : memref<16x1152xbf16, #tpu.memory_space<vmem>>, vector<4x128xbf16>
    tpu.vector_store %arg8[%c4_181, %c1024_182], %158 {strides = array<i32>} : memref<16x1152xbf16, #tpu.memory_space<vmem>>, vector<4x128xbf16>,
    %c4_183 = arith.constant 4 : index
    %c2_184 = arith.constant 2 : index
    %c0_185 = arith.constant 0 : index
    %160 = vector.load %arg7[%c4_183, %c2_184, %c0_185] : memref<6x6x128xf32, #tpu.memory_space<vmem>>, vector<1x4x128xf32>
    %161 = vector.shape_cast %160 : vector<1x4x128xf32> to vector<4x128xf32>
    %162 = arith.truncf %161 : vector<4x128xf32> to vector<4x128xbf16>
    %c8_186 = arith.constant 8 : index
    %c1024_187 = arith.constant 1024 : index
    %163 = vector.load %arg8[%c8_186, %c1024_187] : memref<16x1152xbf16, #tpu.memory_space<vmem>>, vector<4x128xbf16>
    tpu.vector_store %arg8[%c8_186, %c1024_187], %162 {strides = array<i32>} : memref<16x1152xbf16, #tpu.memory_space<vmem>>, vector<4x128xbf16>,
    %c5_188 = arith.constant 5 : index
    %c2_189 = arith.constant 2 : index
    %c0_190 = arith.constant 0 : index
    %164 = vector.load %arg7[%c5_188, %c2_189, %c0_190] : memref<6x6x128xf32, #tpu.memory_space<vmem>>, vector<1x4x128xf32>
    %165 = vector.shape_cast %164 : vector<1x4x128xf32> to vector<4x128xf32>
    %166 = arith.truncf %165 : vector<4x128xf32> to vector<4x128xbf16>
    %c12_191 = arith.constant 12 : index
    %c1024_192 = arith.constant 1024 : index
    %167 = vector.load %arg8[%c12_191, %c1024_192] : memref<16x1152xbf16, #tpu.memory_space<vmem>>, vector<4x128xbf16>
    tpu.vector_store %arg8[%c12_191, %c1024_192], %166 {strides = array<i32>} : memref<16x1152xbf16, #tpu.memory_space<vmem>>, vector<4x128xbf16>,
    %c0_193 = arith.constant 0 : index
    %c0_194 = arith.constant 0 : index
    %168 = vector.load %arg8[%c0_193, %c0_194] : memref<16x1152xbf16, #tpu.memory_space<vmem>>, vector<16x1152xbf16>
    %c0_195 = arith.constant 0 : index
    %c0_196 = arith.constant 0 : index
    %169 = vector.load %arg2[%c0_195, %c0_196] : memref<1152x128xbf16, #tpu.memory_space<vmem>>, vector<1152x128xbf16>
    %cst_197 = arith.constant dense<0.000000e+00> : vector<16x128xf32>
    %170 = tpu.matmul %168, %169, %cst_197 {dimension_numbers = #tpu.dot_dimension_numbers<[1], [0], [0], [1], [0, 0, 1, 1], [], []>} : vector<16x1152xbf16>, vector<1152x128xbf16>, vector<16x128xf32> -> vector<16x128xf32>
    %c0_198 = arith.constant 0 : index
    %c0_199 = arith.constant 0 : index
    %171 = vector.load %arg3[%c0_198, %c0_199] : memref<1x128xf32, #tpu.memory_space<vmem>>, vector<1x128xf32>
    %172 = vector.broadcast %171 : vector<1x128xf32> to vector<16x128xf32>
    %173 = arith.addf %170, %172 : vector<16x128xf32>
    %cst_200 = arith.constant 0.000000e+00 : f32
    %174 = vector.broadcast %cst_200 : f32 to vector<16x128xf32>
    %175 = arith.maximumf %173, %174 : vector<16x128xf32>
    %c0_201 = arith.constant 0 : index
    %c0_202 = arith.constant 0 : index
    %176 = vector.load %arg9[%c0_201, %c0_202] : memref<16x128xf32, #tpu.memory_space<vmem>>, vector<16x128xf32>
    tpu.vector_store %arg9[%c0_201, %c0_202], %175 {strides = array<i32>} : memref<16x128xf32, #tpu.memory_space<vmem>>, vector<16x128xf32>,
    %c0_203 = arith.constant 0 : index
    %c0_204 = arith.constant 0 : index
    %177 = vector.load %arg9[%c0_203, %c0_204] : memref<16x128xf32, #tpu.memory_space<vmem>>, vector<4x128xf32>
    %c1_205 = arith.constant 1 : index
    %c1_206 = arith.constant 1 : index
    %c0_207 = arith.constant 0 : index
    %178 = vector.load %arg7[%c1_205, %c1_206, %c0_207] : memref<6x6x128xf32, #tpu.memory_space<vmem>>, vector<1x4x128xf32>
    %179 = vector.shape_cast %178 : vector<1x4x128xf32> to vector<4x128xf32>
    %180 = vector.shape_cast %177 : vector<4x128xf32> to vector<1x4x128xf32>
    tpu.vector_store %arg7[%c1_205, %c1_206, %c0_207], %180 {strides = array<i32>} : memref<6x6x128xf32, #tpu.memory_space<vmem>>, vector<1x4x128xf32>,
    %c4_208 = arith.constant 4 : index
    %c0_209 = arith.constant 0 : index
    %181 = vector.load %arg9[%c4_208, %c0_209] : memref<16x128xf32, #tpu.memory_space<vmem>>, vector<4x128xf32>
    %c2_210 = arith.constant 2 : index
    %c1_211 = arith.constant 1 : index
    %c0_212 = arith.constant 0 : index
    %182 = vector.load %arg7[%c2_210, %c1_211, %c0_212] : memref<6x6x128xf32, #tpu.memory_space<vmem>>, vector<1x4x128xf32>
    %183 = vector.shape_cast %182 : vector<1x4x128xf32> to vector<4x128xf32>
    %184 = vector.shape_cast %181 : vector<4x128xf32> to vector<1x4x128xf32>
    tpu.vector_store %arg7[%c2_210, %c1_211, %c0_212], %184 {strides = array<i32>} : memref<6x6x128xf32, #tpu.memory_space<vmem>>, vector<1x4x128xf32>,
    %c8_213 = arith.constant 8 : index
    %c0_214 = arith.constant 0 : index
    %185 = vector.load %arg9[%c8_213, %c0_214] : memref<16x128xf32, #tpu.memory_space<vmem>>, vector<4x128xf32>
    %c3_215 = arith.constant 3 : index
    %c1_216 = arith.constant 1 : index
    %c0_217 = arith.constant 0 : index
    %186 = vector.load %arg7[%c3_215, %c1_216, %c0_217] : memref<6x6x128xf32, #tpu.memory_space<vmem>>, vector<1x4x128xf32>
    %187 = vector.shape_cast %186 : vector<1x4x128xf32> to vector<4x128xf32>
    %188 = vector.shape_cast %185 : vector<4x128xf32> to vector<1x4x128xf32>
    tpu.vector_store %arg7[%c3_215, %c1_216, %c0_217], %188 {strides = array<i32>} : memref<6x6x128xf32, #tpu.memory_space<vmem>>, vector<1x4x128xf32>,
    %c12_218 = arith.constant 12 : index
    %c0_219 = arith.constant 0 : index
    %189 = vector.load %arg9[%c12_218, %c0_219] : memref<16x128xf32, #tpu.memory_space<vmem>>, vector<4x128xf32>
    %c4_220 = arith.constant 4 : index
    %c1_221 = arith.constant 1 : index
    %c0_222 = arith.constant 0 : index
    %190 = vector.load %arg7[%c4_220, %c1_221, %c0_222] : memref<6x6x128xf32, #tpu.memory_space<vmem>>, vector<1x4x128xf32>
    %191 = vector.shape_cast %190 : vector<1x4x128xf32> to vector<4x128xf32>
    %192 = vector.shape_cast %189 : vector<4x128xf32> to vector<1x4x128xf32>
    tpu.vector_store %arg7[%c4_220, %c1_221, %c0_222], %192 {strides = array<i32>} : memref<6x6x128xf32, #tpu.memory_space<vmem>>, vector<1x4x128xf32>,
    %c0_223 = arith.constant 0 : index
    %c0_224 = arith.constant 0 : index
    %c0_225 = arith.constant 0 : index
    %193 = vector.load %arg7[%c0_223, %c0_224, %c0_225] : memref<6x6x128xf32, #tpu.memory_space<vmem>>, vector<1x4x128xf32>
    %194 = vector.shape_cast %193 : vector<1x4x128xf32> to vector<4x128xf32>
    %195 = arith.truncf %194 : vector<4x128xf32> to vector<4x128xbf16>
    %c0_226 = arith.constant 0 : index
    %c0_227 = arith.constant 0 : index
    %196 = vector.load %arg8[%c0_226, %c0_227] : memref<16x1152xbf16, #tpu.memory_space<vmem>>, vector<4x128xbf16>
    tpu.vector_store %arg8[%c0_226, %c0_227], %195 {strides = array<i32>} : memref<16x1152xbf16, #tpu.memory_space<vmem>>, vector<4x128xbf16>,
    %c1_228 = arith.constant 1 : index
    %c0_229 = arith.constant 0 : index
    %c0_230 = arith.constant 0 : index
    %197 = vector.load %arg7[%c1_228, %c0_229, %c0_230] : memref<6x6x128xf32, #tpu.memory_space<vmem>>, vector<1x4x128xf32>
    %198 = vector.shape_cast %197 : vector<1x4x128xf32> to vector<4x128xf32>
    %199 = arith.truncf %198 : vector<4x128xf32> to vector<4x128xbf16>
    %c4_231 = arith.constant 4 : index
    %c0_232 = arith.constant 0 : index
    %200 = vector.load %arg8[%c4_231, %c0_232] : memref<16x1152xbf16, #tpu.memory_space<vmem>>, vector<4x128xbf16>
    tpu.vector_store %arg8[%c4_231, %c0_232], %199 {strides = array<i32>} : memref<16x1152xbf16, #tpu.memory_space<vmem>>, vector<4x128xbf16>,
    %c2_233 = arith.constant 2 : index
    %c0_234 = arith.constant 0 : index
    %c0_235 = arith.constant 0 : index
    %201 = vector.load %arg7[%c2_233, %c0_234, %c0_235] : memref<6x6x128xf32, #tpu.memory_space<vmem>>, vector<1x4x128xf32>
    %202 = vector.shape_cast %201 : vector<1x4x128xf32> to vector<4x128xf32>
    %203 = arith.truncf %202 : vector<4x128xf32> to vector<4x128xbf16>
    %c8_236 = arith.constant 8 : index
    %c0_237 = arith.constant 0 : index
    %204 = vector.load %arg8[%c8_236, %c0_237] : memref<16x1152xbf16, #tpu.memory_space<vmem>>, vector<4x128xbf16>
    tpu.vector_store %arg8[%c8_236, %c0_237], %203 {strides = array<i32>} : memref<16x1152xbf16, #tpu.memory_space<vmem>>, vector<4x128xbf16>,
    %c3_238 = arith.constant 3 : index
    %c0_239 = arith.constant 0 : index
    %c0_240 = arith.constant 0 : index
    %205 = vector.load %arg7[%c3_238, %c0_239, %c0_240] : memref<6x6x128xf32, #tpu.memory_space<vmem>>, vector<1x4x128xf32>
    %206 = vector.shape_cast %205 : vector<1x4x128xf32> to vector<4x128xf32>
    %207 = arith.truncf %206 : vector<4x128xf32> to vector<4x128xbf16>
    %c12_241 = arith.constant 12 : index
    %c0_242 = arith.constant 0 : index
    %208 = vector.load %arg8[%c12_241, %c0_242] : memref<16x1152xbf16, #tpu.memory_space<vmem>>, vector<4x128xbf16>
    tpu.vector_store %arg8[%c12_241, %c0_242], %207 {strides = array<i32>} : memref<16x1152xbf16, #tpu.memory_space<vmem>>, vector<4x128xbf16>,
    %c0_243 = arith.constant 0 : index
    %c1_244 = arith.constant 1 : index
    %c0_245 = arith.constant 0 : index
    %209 = vector.load %arg7[%c0_243, %c1_244, %c0_245] : memref<6x6x128xf32, #tpu.memory_space<vmem>>, vector<1x4x128xf32>
    %210 = vector.shape_cast %209 : vector<1x4x128xf32> to vector<4x128xf32>
    %211 = arith.truncf %210 : vector<4x128xf32> to vector<4x128xbf16>
    %c0_246 = arith.constant 0 : index
    %c128_247 = arith.constant 128 : index
    %212 = vector.load %arg8[%c0_246, %c128_247] : memref<16x1152xbf16, #tpu.memory_space<vmem>>, vector<4x128xbf16>
    tpu.vector_store %arg8[%c0_246, %c128_247], %211 {strides = array<i32>} : memref<16x1152xbf16, #tpu.memory_space<vmem>>, vector<4x128xbf16>,
    %c1_248 = arith.constant 1 : index
    %c1_249 = arith.constant 1 : index
    %c0_250 = arith.constant 0 : index
    %213 = vector.load %arg7[%c1_248, %c1_249, %c0_250] : memref<6x6x128xf32, #tpu.memory_space<vmem>>, vector<1x4x128xf32>
    %214 = vector.shape_cast %213 : vector<1x4x128xf32> to vector<4x128xf32>
    %215 = arith.truncf %214 : vector<4x128xf32> to vector<4x128xbf16>
    %c4_251 = arith.constant 4 : index
    %c128_252 = arith.constant 128 : index
    %216 = vector.load %arg8[%c4_251, %c128_252] : memref<16x1152xbf16, #tpu.memory_space<vmem>>, vector<4x128xbf16>
    tpu.vector_store %arg8[%c4_251, %c128_252], %215 {strides = array<i32>} : memref<16x1152xbf16, #tpu.memory_space<vmem>>, vector<4x128xbf16>,
    %c2_253 = arith.constant 2 : index
    %c1_254 = arith.constant 1 : index
    %c0_255 = arith.constant 0 : index
    %217 = vector.load %arg7[%c2_253, %c1_254, %c0_255] : memref<6x6x128xf32, #tpu.memory_space<vmem>>, vector<1x4x128xf32>
    %218 = vector.shape_cast %217 : vector<1x4x128xf32> to vector<4x128xf32>
    %219 = arith.truncf %218 : vector<4x128xf32> to vector<4x128xbf16>
    %c8_256 = arith.constant 8 : index
    %c128_257 = arith.constant 128 : index
    %220 = vector.load %arg8[%c8_256, %c128_257] : memref<16x1152xbf16, #tpu.memory_space<vmem>>, vector<4x128xbf16>
    tpu.vector_store %arg8[%c8_256, %c128_257], %219 {strides = array<i32>} : memref<16x1152xbf16, #tpu.memory_space<vmem>>, vector<4x128xbf16>,
    %c3_258 = arith.constant 3 : index
    %c1_259 = arith.constant 1 : index
    %c0_260 = arith.constant 0 : index
    %221 = vector.load %arg7[%c3_258, %c1_259, %c0_260] : memref<6x6x128xf32, #tpu.memory_space<vmem>>, vector<1x4x128xf32>
    %222 = vector.shape_cast %221 : vector<1x4x128xf32> to vector<4x128xf32>
    %223 = arith.truncf %222 : vector<4x128xf32> to vector<4x128xbf16>
    %c12_261 = arith.constant 12 : index
    %c128_262 = arith.constant 128 : index
    %224 = vector.load %arg8[%c12_261, %c128_262] : memref<16x1152xbf16, #tpu.memory_space<vmem>>, vector<4x128xbf16>
    tpu.vector_store %arg8[%c12_261, %c128_262], %223 {strides = array<i32>} : memref<16x1152xbf16, #tpu.memory_space<vmem>>, vector<4x128xbf16>,
    %c0_263 = arith.constant 0 : index
    %c2_264 = arith.constant 2 : index
    %c0_265 = arith.constant 0 : index
    %225 = vector.load %arg7[%c0_263, %c2_264, %c0_265] : memref<6x6x128xf32, #tpu.memory_space<vmem>>, vector<1x4x128xf32>
    %226 = vector.shape_cast %225 : vector<1x4x128xf32> to vector<4x128xf32>
    %227 = arith.truncf %226 : vector<4x128xf32> to vector<4x128xbf16>
    %c0_266 = arith.constant 0 : index
    %c256_267 = arith.constant 256 : index
    %228 = vector.load %arg8[%c0_266, %c256_267] : memref<16x1152xbf16, #tpu.memory_space<vmem>>, vector<4x128xbf16>
    tpu.vector_store %arg8[%c0_266, %c256_267], %227 {strides = array<i32>} : memref<16x1152xbf16, #tpu.memory_space<vmem>>, vector<4x128xbf16>,
    %c1_268 = arith.constant 1 : index
    %c2_269 = arith.constant 2 : index
    %c0_270 = arith.constant 0 : index
    %229 = vector.load %arg7[%c1_268, %c2_269, %c0_270] : memref<6x6x128xf32, #tpu.memory_space<vmem>>, vector<1x4x128xf32>
    %230 = vector.shape_cast %229 : vector<1x4x128xf32> to vector<4x128xf32>
    %231 = arith.truncf %230 : vector<4x128xf32> to vector<4x128xbf16>
    %c4_271 = arith.constant 4 : index
    %c256_272 = arith.constant 256 : index
    %232 = vector.load %arg8[%c4_271, %c256_272] : memref<16x1152xbf16, #tpu.memory_space<vmem>>, vector<4x128xbf16>
    tpu.vector_store %arg8[%c4_271, %c256_272], %231 {strides = array<i32>} : memref<16x1152xbf16, #tpu.memory_space<vmem>>, vector<4x128xbf16>,
    %c2_273 = arith.constant 2 : index
    %c2_274 = arith.constant 2 : index
    %c0_275 = arith.constant 0 : index
    %233 = vector.load %arg7[%c2_273, %c2_274, %c0_275] : memref<6x6x128xf32, #tpu.memory_space<vmem>>, vector<1x4x128xf32>
    %234 = vector.shape_cast %233 : vector<1x4x128xf32> to vector<4x128xf32>
    %235 = arith.truncf %234 : vector<4x128xf32> to vector<4x128xbf16>
    %c8_276 = arith.constant 8 : index
    %c256_277 = arith.constant 256 : index
    %236 = vector.load %arg8[%c8_276, %c256_277] : memref<16x1152xbf16, #tpu.memory_space<vmem>>, vector<4x128xbf16>
    tpu.vector_store %arg8[%c8_276, %c256_277], %235 {strides = array<i32>} : memref<16x1152xbf16, #tpu.memory_space<vmem>>, vector<4x128xbf16>,
    %c3_278 = arith.constant 3 : index
    %c2_279 = arith.constant 2 : index
    %c0_280 = arith.constant 0 : index
    %237 = vector.load %arg7[%c3_278, %c2_279, %c0_280] : memref<6x6x128xf32, #tpu.memory_space<vmem>>, vector<1x4x128xf32>
    %238 = vector.shape_cast %237 : vector<1x4x128xf32> to vector<4x128xf32>
    %239 = arith.truncf %238 : vector<4x128xf32> to vector<4x128xbf16>
    %c12_281 = arith.constant 12 : index
    %c256_282 = arith.constant 256 : index
    %240 = vector.load %arg8[%c12_281, %c256_282] : memref<16x1152xbf16, #tpu.memory_space<vmem>>, vector<4x128xbf16>
    tpu.vector_store %arg8[%c12_281, %c256_282], %239 {strides = array<i32>} : memref<16x1152xbf16, #tpu.memory_space<vmem>>, vector<4x128xbf16>,
    %c1_283 = arith.constant 1 : index
    %c0_284 = arith.constant 0 : index
    %c0_285 = arith.constant 0 : index
    %241 = vector.load %arg7[%c1_283, %c0_284, %c0_285] : memref<6x6x128xf32, #tpu.memory_space<vmem>>, vector<1x4x128xf32>
    %242 = vector.shape_cast %241 : vector<1x4x128xf32> to vector<4x128xf32>
    %243 = arith.truncf %242 : vector<4x128xf32> to vector<4x128xbf16>
    %c0_286 = arith.constant 0 : index
    %c384_287 = arith.constant 384 : index
    %244 = vector.load %arg8[%c0_286, %c384_287] : memref<16x1152xbf16, #tpu.memory_space<vmem>>, vector<4x128xbf16>
    tpu.vector_store %arg8[%c0_286, %c384_287], %243 {strides = array<i32>} : memref<16x1152xbf16, #tpu.memory_space<vmem>>, vector<4x128xbf16>,
    %c2_288 = arith.constant 2 : index
    %c0_289 = arith.constant 0 : index
    %c0_290 = arith.constant 0 : index
    %245 = vector.load %arg7[%c2_288, %c0_289, %c0_290] : memref<6x6x128xf32, #tpu.memory_space<vmem>>, vector<1x4x128xf32>
    %246 = vector.shape_cast %245 : vector<1x4x128xf32> to vector<4x128xf32>
    %247 = arith.truncf %246 : vector<4x128xf32> to vector<4x128xbf16>
    %c4_291 = arith.constant 4 : index
    %c384_292 = arith.constant 384 : index
    %248 = vector.load %arg8[%c4_291, %c384_292] : memref<16x1152xbf16, #tpu.memory_space<vmem>>, vector<4x128xbf16>
    tpu.vector_store %arg8[%c4_291, %c384_292], %247 {strides = array<i32>} : memref<16x1152xbf16, #tpu.memory_space<vmem>>, vector<4x128xbf16>,
    %c3_293 = arith.constant 3 : index
    %c0_294 = arith.constant 0 : index
    %c0_295 = arith.constant 0 : index
    %249 = vector.load %arg7[%c3_293, %c0_294, %c0_295] : memref<6x6x128xf32, #tpu.memory_space<vmem>>, vector<1x4x128xf32>
    %250 = vector.shape_cast %249 : vector<1x4x128xf32> to vector<4x128xf32>
    %251 = arith.truncf %250 : vector<4x128xf32> to vector<4x128xbf16>
    %c8_296 = arith.constant 8 : index
    %c384_297 = arith.constant 384 : index
    %252 = vector.load %arg8[%c8_296, %c384_297] : memref<16x1152xbf16, #tpu.memory_space<vmem>>, vector<4x128xbf16>
    tpu.vector_store %arg8[%c8_296, %c384_297], %251 {strides = array<i32>} : memref<16x1152xbf16, #tpu.memory_space<vmem>>, vector<4x128xbf16>,
    %c4_298 = arith.constant 4 : index
    %c0_299 = arith.constant 0 : index
    %c0_300 = arith.constant 0 : index
    %253 = vector.load %arg7[%c4_298, %c0_299, %c0_300] : memref<6x6x128xf32, #tpu.memory_space<vmem>>, vector<1x4x128xf32>
    %254 = vector.shape_cast %253 : vector<1x4x128xf32> to vector<4x128xf32>
    %255 = arith.truncf %254 : vector<4x128xf32> to vector<4x128xbf16>
    %c12_301 = arith.constant 12 : index
    %c384_302 = arith.constant 384 : index
    %256 = vector.load %arg8[%c12_301, %c384_302] : memref<16x1152xbf16, #tpu.memory_space<vmem>>, vector<4x128xbf16>
    tpu.vector_store %arg8[%c12_301, %c384_302], %255 {strides = array<i32>} : memref<16x1152xbf16, #tpu.memory_space<vmem>>, vector<4x128xbf16>,
    %c1_303 = arith.constant 1 : index
    %c1_304 = arith.constant 1 : index
    %c0_305 = arith.constant 0 : index
    %257 = vector.load %arg7[%c1_303, %c1_304, %c0_305] : memref<6x6x128xf32, #tpu.memory_space<vmem>>, vector<1x4x128xf32>
    %258 = vector.shape_cast %257 : vector<1x4x128xf32> to vector<4x128xf32>
    %259 = arith.truncf %258 : vector<4x128xf32> to vector<4x128xbf16>
    %c0_306 = arith.constant 0 : index
    %c512_307 = arith.constant 512 : index
    %260 = vector.load %arg8[%c0_306, %c512_307] : memref<16x1152xbf16, #tpu.memory_space<vmem>>, vector<4x128xbf16>
    tpu.vector_store %arg8[%c0_306, %c512_307], %259 {strides = array<i32>} : memref<16x1152xbf16, #tpu.memory_space<vmem>>, vector<4x128xbf16>,
    %c2_308 = arith.constant 2 : index
    %c1_309 = arith.constant 1 : index
    %c0_310 = arith.constant 0 : index
    %261 = vector.load %arg7[%c2_308, %c1_309, %c0_310] : memref<6x6x128xf32, #tpu.memory_space<vmem>>, vector<1x4x128xf32>
    %262 = vector.shape_cast %261 : vector<1x4x128xf32> to vector<4x128xf32>
    %263 = arith.truncf %262 : vector<4x128xf32> to vector<4x128xbf16>
    %c4_311 = arith.constant 4 : index
    %c512_312 = arith.constant 512 : index
    %264 = vector.load %arg8[%c4_311, %c512_312] : memref<16x1152xbf16, #tpu.memory_space<vmem>>, vector<4x128xbf16>
    tpu.vector_store %arg8[%c4_311, %c512_312], %263 {strides = array<i32>} : memref<16x1152xbf16, #tpu.memory_space<vmem>>, vector<4x128xbf16>,
    %c3_313 = arith.constant 3 : index
    %c1_314 = arith.constant 1 : index
    %c0_315 = arith.constant 0 : index
    %265 = vector.load %arg7[%c3_313, %c1_314, %c0_315] : memref<6x6x128xf32, #tpu.memory_space<vmem>>, vector<1x4x128xf32>
    %266 = vector.shape_cast %265 : vector<1x4x128xf32> to vector<4x128xf32>
    %267 = arith.truncf %266 : vector<4x128xf32> to vector<4x128xbf16>
    %c8_316 = arith.constant 8 : index
    %c512_317 = arith.constant 512 : index
    %268 = vector.load %arg8[%c8_316, %c512_317] : memref<16x1152xbf16, #tpu.memory_space<vmem>>, vector<4x128xbf16>
    tpu.vector_store %arg8[%c8_316, %c512_317], %267 {strides = array<i32>} : memref<16x1152xbf16, #tpu.memory_space<vmem>>, vector<4x128xbf16>,
    %c4_318 = arith.constant 4 : index
    %c1_319 = arith.constant 1 : index
    %c0_320 = arith.constant 0 : index
    %269 = vector.load %arg7[%c4_318, %c1_319, %c0_320] : memref<6x6x128xf32, #tpu.memory_space<vmem>>, vector<1x4x128xf32>
    %270 = vector.shape_cast %269 : vector<1x4x128xf32> to vector<4x128xf32>
    %271 = arith.truncf %270 : vector<4x128xf32> to vector<4x128xbf16>
    %c12_321 = arith.constant 12 : index
    %c512_322 = arith.constant 512 : index
    %272 = vector.load %arg8[%c12_321, %c512_322] : memref<16x1152xbf16, #tpu.memory_space<vmem>>, vector<4x128xbf16>
    tpu.vector_store %arg8[%c12_321, %c512_322], %271 {strides = array<i32>} : memref<16x1152xbf16, #tpu.memory_space<vmem>>, vector<4x128xbf16>,
    %c1_323 = arith.constant 1 : index
    %c2_324 = arith.constant 2 : index
    %c0_325 = arith.constant 0 : index
    %273 = vector.load %arg7[%c1_323, %c2_324, %c0_325] : memref<6x6x128xf32, #tpu.memory_space<vmem>>, vector<1x4x128xf32>
    %274 = vector.shape_cast %273 : vector<1x4x128xf32> to vector<4x128xf32>
    %275 = arith.truncf %274 : vector<4x128xf32> to vector<4x128xbf16>
    %c0_326 = arith.constant 0 : index
    %c640_327 = arith.constant 640 : index
    %276 = vector.load %arg8[%c0_326, %c640_327] : memref<16x1152xbf16, #tpu.memory_space<vmem>>, vector<4x128xbf16>
    tpu.vector_store %arg8[%c0_326, %c640_327], %275 {strides = array<i32>} : memref<16x1152xbf16, #tpu.memory_space<vmem>>, vector<4x128xbf16>,
    %c2_328 = arith.constant 2 : index
    %c2_329 = arith.constant 2 : index
    %c0_330 = arith.constant 0 : index
    %277 = vector.load %arg7[%c2_328, %c2_329, %c0_330] : memref<6x6x128xf32, #tpu.memory_space<vmem>>, vector<1x4x128xf32>
    %278 = vector.shape_cast %277 : vector<1x4x128xf32> to vector<4x128xf32>
    %279 = arith.truncf %278 : vector<4x128xf32> to vector<4x128xbf16>
    %c4_331 = arith.constant 4 : index
    %c640_332 = arith.constant 640 : index
    %280 = vector.load %arg8[%c4_331, %c640_332] : memref<16x1152xbf16, #tpu.memory_space<vmem>>, vector<4x128xbf16>
    tpu.vector_store %arg8[%c4_331, %c640_332], %279 {strides = array<i32>} : memref<16x1152xbf16, #tpu.memory_space<vmem>>, vector<4x128xbf16>,
    %c3_333 = arith.constant 3 : index
    %c2_334 = arith.constant 2 : index
    %c0_335 = arith.constant 0 : index
    %281 = vector.load %arg7[%c3_333, %c2_334, %c0_335] : memref<6x6x128xf32, #tpu.memory_space<vmem>>, vector<1x4x128xf32>
    %282 = vector.shape_cast %281 : vector<1x4x128xf32> to vector<4x128xf32>
    %283 = arith.truncf %282 : vector<4x128xf32> to vector<4x128xbf16>
    %c8_336 = arith.constant 8 : index
    %c640_337 = arith.constant 640 : index
    %284 = vector.load %arg8[%c8_336, %c640_337] : memref<16x1152xbf16, #tpu.memory_space<vmem>>, vector<4x128xbf16>
    tpu.vector_store %arg8[%c8_336, %c640_337], %283 {strides = array<i32>} : memref<16x1152xbf16, #tpu.memory_space<vmem>>, vector<4x128xbf16>,
    %c4_338 = arith.constant 4 : index
    %c2_339 = arith.constant 2 : index
    %c0_340 = arith.constant 0 : index
    %285 = vector.load %arg7[%c4_338, %c2_339, %c0_340] : memref<6x6x128xf32, #tpu.memory_space<vmem>>, vector<1x4x128xf32>
    %286 = vector.shape_cast %285 : vector<1x4x128xf32> to vector<4x128xf32>
    %287 = arith.truncf %286 : vector<4x128xf32> to vector<4x128xbf16>
    %c12_341 = arith.constant 12 : index
    %c640_342 = arith.constant 640 : index
    %288 = vector.load %arg8[%c12_341, %c640_342] : memref<16x1152xbf16, #tpu.memory_space<vmem>>, vector<4x128xbf16>
    tpu.vector_store %arg8[%c12_341, %c640_342], %287 {strides = array<i32>} : memref<16x1152xbf16, #tpu.memory_space<vmem>>, vector<4x128xbf16>,
    %c2_343 = arith.constant 2 : index
    %c0_344 = arith.constant 0 : index
    %c0_345 = arith.constant 0 : index
    %289 = vector.load %arg7[%c2_343, %c0_344, %c0_345] : memref<6x6x128xf32, #tpu.memory_space<vmem>>, vector<1x4x128xf32>
    %290 = vector.shape_cast %289 : vector<1x4x128xf32> to vector<4x128xf32>
    %291 = arith.truncf %290 : vector<4x128xf32> to vector<4x128xbf16>
    %c0_346 = arith.constant 0 : index
    %c768_347 = arith.constant 768 : index
    %292 = vector.load %arg8[%c0_346, %c768_347] : memref<16x1152xbf16, #tpu.memory_space<vmem>>, vector<4x128xbf16>
    tpu.vector_store %arg8[%c0_346, %c768_347], %291 {strides = array<i32>} : memref<16x1152xbf16, #tpu.memory_space<vmem>>, vector<4x128xbf16>,
    %c3_348 = arith.constant 3 : index
    %c0_349 = arith.constant 0 : index
    %c0_350 = arith.constant 0 : index
    %293 = vector.load %arg7[%c3_348, %c0_349, %c0_350] : memref<6x6x128xf32, #tpu.memory_space<vmem>>, vector<1x4x128xf32>
    %294 = vector.shape_cast %293 : vector<1x4x128xf32> to vector<4x128xf32>
    %295 = arith.truncf %294 : vector<4x128xf32> to vector<4x128xbf16>
    %c4_351 = arith.constant 4 : index
    %c768_352 = arith.constant 768 : index
    %296 = vector.load %arg8[%c4_351, %c768_352] : memref<16x1152xbf16, #tpu.memory_space<vmem>>, vector<4x128xbf16>
    tpu.vector_store %arg8[%c4_351, %c768_352], %295 {strides = array<i32>} : memref<16x1152xbf16, #tpu.memory_space<vmem>>, vector<4x128xbf16>,
    %c4_353 = arith.constant 4 : index
    %c0_354 = arith.constant 0 : index
    %c0_355 = arith.constant 0 : index
    %297 = vector.load %arg7[%c4_353, %c0_354, %c0_355] : memref<6x6x128xf32, #tpu.memory_space<vmem>>, vector<1x4x128xf32>
    %298 = vector.shape_cast %297 : vector<1x4x128xf32> to vector<4x128xf32>
    %299 = arith.truncf %298 : vector<4x128xf32> to vector<4x128xbf16>
    %c8_356 = arith.constant 8 : index
    %c768_357 = arith.constant 768 : index
    %300 = vector.load %arg8[%c8_356, %c768_357] : memref<16x1152xbf16, #tpu.memory_space<vmem>>, vector<4x128xbf16>
    tpu.vector_store %arg8[%c8_356, %c768_357], %299 {strides = array<i32>} : memref<16x1152xbf16, #tpu.memory_space<vmem>>, vector<4x128xbf16>,
    %c5_358 = arith.constant 5 : index
    %c0_359 = arith.constant 0 : index
    %c0_360 = arith.constant 0 : index
    %301 = vector.load %arg7[%c5_358, %c0_359, %c0_360] : memref<6x6x128xf32, #tpu.memory_space<vmem>>, vector<1x4x128xf32>
    %302 = vector.shape_cast %301 : vector<1x4x128xf32> to vector<4x128xf32>
    %303 = arith.truncf %302 : vector<4x128xf32> to vector<4x128xbf16>
    %c12_361 = arith.constant 12 : index
    %c768_362 = arith.constant 768 : index
    %304 = vector.load %arg8[%c12_361, %c768_362] : memref<16x1152xbf16, #tpu.memory_space<vmem>>, vector<4x128xbf16>
    tpu.vector_store %arg8[%c12_361, %c768_362], %303 {strides = array<i32>} : memref<16x1152xbf16, #tpu.memory_space<vmem>>, vector<4x128xbf16>,
    %c2_363 = arith.constant 2 : index
    %c1_364 = arith.constant 1 : index
    %c0_365 = arith.constant 0 : index
    %305 = vector.load %arg7[%c2_363, %c1_364, %c0_365] : memref<6x6x128xf32, #tpu.memory_space<vmem>>, vector<1x4x128xf32>
    %306 = vector.shape_cast %305 : vector<1x4x128xf32> to vector<4x128xf32>
    %307 = arith.truncf %306 : vector<4x128xf32> to vector<4x128xbf16>
    %c0_366 = arith.constant 0 : index
    %c896_367 = arith.constant 896 : index
    %308 = vector.load %arg8[%c0_366, %c896_367] : memref<16x1152xbf16, #tpu.memory_space<vmem>>, vector<4x128xbf16>
    tpu.vector_store %arg8[%c0_366, %c896_367], %307 {strides = array<i32>} : memref<16x1152xbf16, #tpu.memory_space<vmem>>, vector<4x128xbf16>,
    %c3_368 = arith.constant 3 : index
    %c1_369 = arith.constant 1 : index
    %c0_370 = arith.constant 0 : index
    %309 = vector.load %arg7[%c3_368, %c1_369, %c0_370] : memref<6x6x128xf32, #tpu.memory_space<vmem>>, vector<1x4x128xf32>
    %310 = vector.shape_cast %309 : vector<1x4x128xf32> to vector<4x128xf32>
    %311 = arith.truncf %310 : vector<4x128xf32> to vector<4x128xbf16>
    %c4_371 = arith.constant 4 : index
    %c896_372 = arith.constant 896 : index
    %312 = vector.load %arg8[%c4_371, %c896_372] : memref<16x1152xbf16, #tpu.memory_space<vmem>>, vector<4x128xbf16>
    tpu.vector_store %arg8[%c4_371, %c896_372], %311 {strides = array<i32>} : memref<16x1152xbf16, #tpu.memory_space<vmem>>, vector<4x128xbf16>,
    %c4_373 = arith.constant 4 : index
    %c1_374 = arith.constant 1 : index
    %c0_375 = arith.constant 0 : index
    %313 = vector.load %arg7[%c4_373, %c1_374, %c0_375] : memref<6x6x128xf32, #tpu.memory_space<vmem>>, vector<1x4x128xf32>
    %314 = vector.shape_cast %313 : vector<1x4x128xf32> to vector<4x128xf32>
    %315 = arith.truncf %314 : vector<4x128xf32> to vector<4x128xbf16>
    %c8_376 = arith.constant 8 : index
    %c896_377 = arith.constant 896 : index
    %316 = vector.load %arg8[%c8_376, %c896_377] : memref<16x1152xbf16, #tpu.memory_space<vmem>>, vector<4x128xbf16>
    tpu.vector_store %arg8[%c8_376, %c896_377], %315 {strides = array<i32>} : memref<16x1152xbf16, #tpu.memory_space<vmem>>, vector<4x128xbf16>,
    %c5_378 = arith.constant 5 : index
    %c1_379 = arith.constant 1 : index
    %c0_380 = arith.constant 0 : index
    %317 = vector.load %arg7[%c5_378, %c1_379, %c0_380] : memref<6x6x128xf32, #tpu.memory_space<vmem>>, vector<1x4x128xf32>
    %318 = vector.shape_cast %317 : vector<1x4x128xf32> to vector<4x128xf32>
    %319 = arith.truncf %318 : vector<4x128xf32> to vector<4x128xbf16>
    %c12_381 = arith.constant 12 : index
    %c896_382 = arith.constant 896 : index
    %320 = vector.load %arg8[%c12_381, %c896_382] : memref<16x1152xbf16, #tpu.memory_space<vmem>>, vector<4x128xbf16>
    tpu.vector_store %arg8[%c12_381, %c896_382], %319 {strides = array<i32>} : memref<16x1152xbf16, #tpu.memory_space<vmem>>, vector<4x128xbf16>,
    %c2_383 = arith.constant 2 : index
    %c2_384 = arith.constant 2 : index
    %c0_385 = arith.constant 0 : index
    %321 = vector.load %arg7[%c2_383, %c2_384, %c0_385] : memref<6x6x128xf32, #tpu.memory_space<vmem>>, vector<1x4x128xf32>
    %322 = vector.shape_cast %321 : vector<1x4x128xf32> to vector<4x128xf32>
    %323 = arith.truncf %322 : vector<4x128xf32> to vector<4x128xbf16>
    %c0_386 = arith.constant 0 : index
    %c1024_387 = arith.constant 1024 : index
    %324 = vector.load %arg8[%c0_386, %c1024_387] : memref<16x1152xbf16, #tpu.memory_space<vmem>>, vector<4x128xbf16>
    tpu.vector_store %arg8[%c0_386, %c1024_387], %323 {strides = array<i32>} : memref<16x1152xbf16, #tpu.memory_space<vmem>>, vector<4x128xbf16>,
    %c3_388 = arith.constant 3 : index
    %c2_389 = arith.constant 2 : index
    %c0_390 = arith.constant 0 : index
    %325 = vector.load %arg7[%c3_388, %c2_389, %c0_390] : memref<6x6x128xf32, #tpu.memory_space<vmem>>, vector<1x4x128xf32>
    %326 = vector.shape_cast %325 : vector<1x4x128xf32> to vector<4x128xf32>
    %327 = arith.truncf %326 : vector<4x128xf32> to vector<4x128xbf16>
    %c4_391 = arith.constant 4 : index
    %c1024_392 = arith.constant 1024 : index
    %328 = vector.load %arg8[%c4_391, %c1024_392] : memref<16x1152xbf16, #tpu.memory_space<vmem>>, vector<4x128xbf16>
    tpu.vector_store %arg8[%c4_391, %c1024_392], %327 {strides = array<i32>} : memref<16x1152xbf16, #tpu.memory_space<vmem>>, vector<4x128xbf16>,
    %c4_393 = arith.constant 4 : index
    %c2_394 = arith.constant 2 : index
    %c0_395 = arith.constant 0 : index
    %329 = vector.load %arg7[%c4_393, %c2_394, %c0_395] : memref<6x6x128xf32, #tpu.memory_space<vmem>>, vector<1x4x128xf32>
    %330 = vector.shape_cast %329 : vector<1x4x128xf32> to vector<4x128xf32>
    %331 = arith.truncf %330 : vector<4x128xf32> to vector<4x128xbf16>
    %c8_396 = arith.constant 8 : index
    %c1024_397 = arith.constant 1024 : index
    %332 = vector.load %arg8[%c8_396, %c1024_397] : memref<16x1152xbf16, #tpu.memory_space<vmem>>, vector<4x128xbf16>
    tpu.vector_store %arg8[%c8_396, %c1024_397], %331 {strides = array<i32>} : memref<16x1152xbf16, #tpu.memory_space<vmem>>, vector<4x128xbf16>,
    %c5_398 = arith.constant 5 : index
    %c2_399 = arith.constant 2 : index
    %c0_400 = arith.constant 0 : index
    %333 = vector.load %arg7[%c5_398, %c2_399, %c0_400] : memref<6x6x128xf32, #tpu.memory_space<vmem>>, vector<1x4x128xf32>
    %334 = vector.shape_cast %333 : vector<1x4x128xf32> to vector<4x128xf32>
    %335 = arith.truncf %334 : vector<4x128xf32> to vector<4x128xbf16>
    %c12_401 = arith.constant 12 : index
    %c1024_402 = arith.constant 1024 : index
    %336 = vector.load %arg8[%c12_401, %c1024_402] : memref<16x1152xbf16, #tpu.memory_space<vmem>>, vector<4x128xbf16>
    tpu.vector_store %arg8[%c12_401, %c1024_402], %335 {strides = array<i32>} : memref<16x1152xbf16, #tpu.memory_space<vmem>>, vector<4x128xbf16>,
    %c0_403 = arith.constant 0 : index
    %c0_404 = arith.constant 0 : index
    %337 = vector.load %arg8[%c0_403, %c0_404] : memref<16x1152xbf16, #tpu.memory_space<vmem>>, vector<16x1152xbf16>
    %c0_405 = arith.constant 0 : index
    %c0_406 = arith.constant 0 : index
    %338 = vector.load %arg4[%c0_405, %c0_406] : memref<1152x128xbf16, #tpu.memory_space<vmem>>, vector<1152x128xbf16>
    %cst_407 = arith.constant dense<0.000000e+00> : vector<16x128xf32>
    %339 = tpu.matmul %337, %338, %cst_407 {dimension_numbers = #tpu.dot_dimension_numbers<[1], [0], [0], [1], [0, 0, 1, 1], [], []>} : vector<16x1152xbf16>, vector<1152x128xbf16>, vector<16x128xf32> -> vector<16x128xf32>
    %c0_408 = arith.constant 0 : index
    %c0_409 = arith.constant 0 : index
    %340 = vector.load %arg5[%c0_408, %c0_409] : memref<1x128xf32, #tpu.memory_space<vmem>>, vector<1x128xf32>
    %341 = vector.broadcast %340 : vector<1x128xf32> to vector<16x128xf32>
    %342 = arith.addf %339, %341 : vector<16x128xf32>
    %343 = arith.extf %3 : vector<16x128xbf16> to vector<16x128xf32>
    %344 = arith.addf %342, %343 : vector<16x128xf32>
    %345 = arith.truncf %344 : vector<16x128xf32> to vector<16x128xbf16>
    %c0_410 = arith.constant 0 : index
    %c0_411 = arith.constant 0 : index
    %c0_412 = arith.constant 0 : index
    %346 = vector.load %arg6[%c0_410, %c0_411, %c0_412] : memref<1x16x128xbf16, #tpu.memory_space<vmem>>, vector<1x16x128xbf16>
    %347 = vector.shape_cast %346 : vector<1x16x128xbf16> to vector<16x128xbf16>
    %348 = vector.shape_cast %345 : vector<16x128xbf16> to vector<1x16x128xbf16>
    tpu.vector_store %arg6[%c0_410, %c0_411, %c0_412], %348 {strides = array<i32>} : memref<1x16x128xbf16, #tpu.memory_space<vmem>>, vector<1x16x128xbf16>,
    return
  }
  func.func @transform_0(%arg0: i32) -> (i32, i32, i32) {
    %c0_i32 = arith.constant 0 : i32
    %c0_i32_0 = arith.constant 0 : i32
    %c0_i32_1 = arith.constant 0 : i32
    return %arg0, %c0_i32, %c0_i32_0 : i32, i32, i32
  }
  func.func @transform_1(%arg0: i32) -> (i32, i32) {
    %c0_i32 = arith.constant 0 : i32
    %c0_i32_0 = arith.constant 0 : i32
    %c0_i32_1 = arith.constant 0 : i32
    return %c0_i32, %c0_i32_0 : i32, i32
  }
  func.func @transform_2(%arg0: i32) -> (i32, i32) {
    %c0_i32 = arith.constant 0 : i32
    %c0_i32_0 = arith.constant 0 : i32
    %c0_i32_1 = arith.constant 0 : i32
    return %c0_i32, %c0_i32_0 : i32, i32
  }
  func.func @transform_3(%arg0: i32) -> (i32, i32) {
    %c0_i32 = arith.constant 0 : i32
    %c0_i32_0 = arith.constant 0 : i32
    %c0_i32_1 = arith.constant 0 : i32
    return %c0_i32, %c0_i32_0 : i32, i32
  }
  func.func @transform_4(%arg0: i32) -> (i32, i32) {
    %c0_i32 = arith.constant 0 : i32
    %c0_i32_0 = arith.constant 0 : i32
    %c0_i32_1 = arith.constant 0 : i32
    return %c0_i32, %c0_i32_0 : i32, i32
  }
  func.func @transform_5(%arg0: i32) -> (i32, i32, i32) {
    %c0_i32 = arith.constant 0 : i32
    %c0_i32_0 = arith.constant 0 : i32
    %c0_i32_1 = arith.constant 0 : i32
    return %arg0, %c0_i32, %c0_i32_0 : i32, i32, i32
  }
}

module attributes {stable_mosaic.version = 11 : i64} {
  func.func @kernel(%arg0: i32, %arg1: memref<1x16x128xbf16, #tpu.memory_space<vmem>>, %arg2: memref<1152x128xbf16, #tpu.memory_space<vmem>>, %arg3: memref<1x128xf32, #tpu.memory_space<vmem>>, %arg4: memref<1152x128xbf16, #tpu.memory_space<vmem>>, %arg5: memref<1x128xf32, #tpu.memory_space<vmem>>, %arg6: memref<128x128xbf16, #tpu.memory_space<vmem>>, %arg7: memref<1x128xf32, #tpu.memory_space<vmem>>, %arg8: memref<4x16xbf16, #tpu.memory_space<vmem>>, %arg9: memref<1x4x128xbf16, #tpu.memory_space<vmem>>, %arg10: memref<6x6x128xf32, #tpu.memory_space<vmem>>, %arg11: memref<16x1152xbf16, #tpu.memory_space<vmem>>, %arg12: memref<16x128xf32, #tpu.memory_space<vmem>>) attributes {dimension_semantics = [#tpu.dimension_semantics<parallel>], iteration_bounds = array<i64: 2>, scalar_prefetch = 0 : i64, scratch_operands = 3 : i64, tpu.core_type = #tpu.core_type<tc>, window_params = [{transform_indices = @transform_0, window_bounds = array<i64: 1, 16, 128>}, {pipeline_mode = #tpu.pipeline_mode<synchronous>, transform_indices = @transform_1, window_bounds = array<i64: 1152, 128>}, {pipeline_mode = #tpu.pipeline_mode<synchronous>, transform_indices = @transform_2, window_bounds = array<i64: 1, 128>}, {pipeline_mode = #tpu.pipeline_mode<synchronous>, transform_indices = @transform_3, window_bounds = array<i64: 1152, 128>}, {pipeline_mode = #tpu.pipeline_mode<synchronous>, transform_indices = @transform_4, window_bounds = array<i64: 1, 128>}, {pipeline_mode = #tpu.pipeline_mode<synchronous>, transform_indices = @transform_5, window_bounds = array<i64: 128, 128>}, {pipeline_mode = #tpu.pipeline_mode<synchronous>, transform_indices = @transform_6, window_bounds = array<i64: 1, 128>}, {pipeline_mode = #tpu.pipeline_mode<synchronous>, transform_indices = @transform_7, window_bounds = array<i64: 4, 16>}, {transform_indices = @transform_8, window_bounds = array<i64: 1, 4, 128>}]} {
    %cst = arith.constant 0.000000e+00 : f32
    %0 = vector.broadcast %cst : f32 to vector<6x6x128xf32>
    %c0 = arith.constant 0 : index
    %c0_0 = arith.constant 0 : index
    %c0_1 = arith.constant 0 : index
    %1 = vector.load %arg10[%c0, %c0_0, %c0_1] : memref<6x6x128xf32, #tpu.memory_space<vmem>>, vector<6x6x128xf32>
    tpu.vector_store %arg10[%c0, %c0_0, %c0_1], %0 {strides = array<i32>} : memref<6x6x128xf32, #tpu.memory_space<vmem>>, vector<6x6x128xf32>,
    %c0_2 = arith.constant 0 : index
    %c0_3 = arith.constant 0 : index
    %c0_4 = arith.constant 0 : index
    %2 = vector.load %arg1[%c0_2, %c0_3, %c0_4] : memref<1x16x128xbf16, #tpu.memory_space<vmem>>, vector<1x16x128xbf16>
    %3 = vector.shape_cast %2 : vector<1x16x128xbf16> to vector<16x128xbf16>
    %4 = arith.extf %3 : vector<16x128xbf16> to vector<16x128xf32>
    %cst_5 = arith.constant 0.000000e+00 : f32
    %5 = vector.broadcast %cst_5 : f32 to vector<16x128xf32>
    %6 = arith.maximumf %4, %5 : vector<16x128xf32>
    %c0_6 = arith.constant 0 : index
    %c0_7 = arith.constant 0 : index
    %7 = vector.load %arg12[%c0_6, %c0_7] : memref<16x128xf32, #tpu.memory_space<vmem>>, vector<16x128xf32>
    tpu.vector_store %arg12[%c0_6, %c0_7], %6 {strides = array<i32>} : memref<16x128xf32, #tpu.memory_space<vmem>>, vector<16x128xf32>,
    %c0_8 = arith.constant 0 : index
    %c0_9 = arith.constant 0 : index
    %8 = vector.load %arg12[%c0_8, %c0_9] : memref<16x128xf32, #tpu.memory_space<vmem>>, vector<4x128xf32>
    %c1 = arith.constant 1 : index
    %c1_10 = arith.constant 1 : index
    %c0_11 = arith.constant 0 : index
    %9 = vector.load %arg10[%c1, %c1_10, %c0_11] : memref<6x6x128xf32, #tpu.memory_space<vmem>>, vector<1x4x128xf32>
    %10 = vector.shape_cast %9 : vector<1x4x128xf32> to vector<4x128xf32>
    %11 = vector.shape_cast %8 : vector<4x128xf32> to vector<1x4x128xf32>
    tpu.vector_store %arg10[%c1, %c1_10, %c0_11], %11 {strides = array<i32>} : memref<6x6x128xf32, #tpu.memory_space<vmem>>, vector<1x4x128xf32>,
    %c4 = arith.constant 4 : index
    %c0_12 = arith.constant 0 : index
    %12 = vector.load %arg12[%c4, %c0_12] : memref<16x128xf32, #tpu.memory_space<vmem>>, vector<4x128xf32>
    %c2 = arith.constant 2 : index
    %c1_13 = arith.constant 1 : index
    %c0_14 = arith.constant 0 : index
    %13 = vector.load %arg10[%c2, %c1_13, %c0_14] : memref<6x6x128xf32, #tpu.memory_space<vmem>>, vector<1x4x128xf32>
    %14 = vector.shape_cast %13 : vector<1x4x128xf32> to vector<4x128xf32>
    %15 = vector.shape_cast %12 : vector<4x128xf32> to vector<1x4x128xf32>
    tpu.vector_store %arg10[%c2, %c1_13, %c0_14], %15 {strides = array<i32>} : memref<6x6x128xf32, #tpu.memory_space<vmem>>, vector<1x4x128xf32>,
    %c8 = arith.constant 8 : index
    %c0_15 = arith.constant 0 : index
    %16 = vector.load %arg12[%c8, %c0_15] : memref<16x128xf32, #tpu.memory_space<vmem>>, vector<4x128xf32>
    %c3 = arith.constant 3 : index
    %c1_16 = arith.constant 1 : index
    %c0_17 = arith.constant 0 : index
    %17 = vector.load %arg10[%c3, %c1_16, %c0_17] : memref<6x6x128xf32, #tpu.memory_space<vmem>>, vector<1x4x128xf32>
    %18 = vector.shape_cast %17 : vector<1x4x128xf32> to vector<4x128xf32>
    %19 = vector.shape_cast %16 : vector<4x128xf32> to vector<1x4x128xf32>
    tpu.vector_store %arg10[%c3, %c1_16, %c0_17], %19 {strides = array<i32>} : memref<6x6x128xf32, #tpu.memory_space<vmem>>, vector<1x4x128xf32>,
    %c12 = arith.constant 12 : index
    %c0_18 = arith.constant 0 : index
    %20 = vector.load %arg12[%c12, %c0_18] : memref<16x128xf32, #tpu.memory_space<vmem>>, vector<4x128xf32>
    %c4_19 = arith.constant 4 : index
    %c1_20 = arith.constant 1 : index
    %c0_21 = arith.constant 0 : index
    %21 = vector.load %arg10[%c4_19, %c1_20, %c0_21] : memref<6x6x128xf32, #tpu.memory_space<vmem>>, vector<1x4x128xf32>
    %22 = vector.shape_cast %21 : vector<1x4x128xf32> to vector<4x128xf32>
    %23 = vector.shape_cast %20 : vector<4x128xf32> to vector<1x4x128xf32>
    tpu.vector_store %arg10[%c4_19, %c1_20, %c0_21], %23 {strides = array<i32>} : memref<6x6x128xf32, #tpu.memory_space<vmem>>, vector<1x4x128xf32>,
    %c0_22 = arith.constant 0 : index
    %c0_23 = arith.constant 0 : index
    %c0_24 = arith.constant 0 : index
    %24 = vector.load %arg10[%c0_22, %c0_23, %c0_24] : memref<6x6x128xf32, #tpu.memory_space<vmem>>, vector<1x4x128xf32>
    %25 = vector.shape_cast %24 : vector<1x4x128xf32> to vector<4x128xf32>
    %26 = arith.truncf %25 : vector<4x128xf32> to vector<4x128xbf16>
    %c0_25 = arith.constant 0 : index
    %c0_26 = arith.constant 0 : index
    %27 = vector.load %arg11[%c0_25, %c0_26] : memref<16x1152xbf16, #tpu.memory_space<vmem>>, vector<4x128xbf16>
    tpu.vector_store %arg11[%c0_25, %c0_26], %26 {strides = array<i32>} : memref<16x1152xbf16, #tpu.memory_space<vmem>>, vector<4x128xbf16>,
    %c1_27 = arith.constant 1 : index
    %c0_28 = arith.constant 0 : index
    %c0_29 = arith.constant 0 : index
    %28 = vector.load %arg10[%c1_27, %c0_28, %c0_29] : memref<6x6x128xf32, #tpu.memory_space<vmem>>, vector<1x4x128xf32>
    %29 = vector.shape_cast %28 : vector<1x4x128xf32> to vector<4x128xf32>
    %30 = arith.truncf %29 : vector<4x128xf32> to vector<4x128xbf16>
    %c4_30 = arith.constant 4 : index
    %c0_31 = arith.constant 0 : index
    %31 = vector.load %arg11[%c4_30, %c0_31] : memref<16x1152xbf16, #tpu.memory_space<vmem>>, vector<4x128xbf16>
    tpu.vector_store %arg11[%c4_30, %c0_31], %30 {strides = array<i32>} : memref<16x1152xbf16, #tpu.memory_space<vmem>>, vector<4x128xbf16>,
    %c2_32 = arith.constant 2 : index
    %c0_33 = arith.constant 0 : index
    %c0_34 = arith.constant 0 : index
    %32 = vector.load %arg10[%c2_32, %c0_33, %c0_34] : memref<6x6x128xf32, #tpu.memory_space<vmem>>, vector<1x4x128xf32>
    %33 = vector.shape_cast %32 : vector<1x4x128xf32> to vector<4x128xf32>
    %34 = arith.truncf %33 : vector<4x128xf32> to vector<4x128xbf16>
    %c8_35 = arith.constant 8 : index
    %c0_36 = arith.constant 0 : index
    %35 = vector.load %arg11[%c8_35, %c0_36] : memref<16x1152xbf16, #tpu.memory_space<vmem>>, vector<4x128xbf16>
    tpu.vector_store %arg11[%c8_35, %c0_36], %34 {strides = array<i32>} : memref<16x1152xbf16, #tpu.memory_space<vmem>>, vector<4x128xbf16>,
    %c3_37 = arith.constant 3 : index
    %c0_38 = arith.constant 0 : index
    %c0_39 = arith.constant 0 : index
    %36 = vector.load %arg10[%c3_37, %c0_38, %c0_39] : memref<6x6x128xf32, #tpu.memory_space<vmem>>, vector<1x4x128xf32>
    %37 = vector.shape_cast %36 : vector<1x4x128xf32> to vector<4x128xf32>
    %38 = arith.truncf %37 : vector<4x128xf32> to vector<4x128xbf16>
    %c12_40 = arith.constant 12 : index
    %c0_41 = arith.constant 0 : index
    %39 = vector.load %arg11[%c12_40, %c0_41] : memref<16x1152xbf16, #tpu.memory_space<vmem>>, vector<4x128xbf16>
    tpu.vector_store %arg11[%c12_40, %c0_41], %38 {strides = array<i32>} : memref<16x1152xbf16, #tpu.memory_space<vmem>>, vector<4x128xbf16>,
    %c0_42 = arith.constant 0 : index
    %c1_43 = arith.constant 1 : index
    %c0_44 = arith.constant 0 : index
    %40 = vector.load %arg10[%c0_42, %c1_43, %c0_44] : memref<6x6x128xf32, #tpu.memory_space<vmem>>, vector<1x4x128xf32>
    %41 = vector.shape_cast %40 : vector<1x4x128xf32> to vector<4x128xf32>
    %42 = arith.truncf %41 : vector<4x128xf32> to vector<4x128xbf16>
    %c0_45 = arith.constant 0 : index
    %c128 = arith.constant 128 : index
    %43 = vector.load %arg11[%c0_45, %c128] : memref<16x1152xbf16, #tpu.memory_space<vmem>>, vector<4x128xbf16>
    tpu.vector_store %arg11[%c0_45, %c128], %42 {strides = array<i32>} : memref<16x1152xbf16, #tpu.memory_space<vmem>>, vector<4x128xbf16>,
    %c1_46 = arith.constant 1 : index
    %c1_47 = arith.constant 1 : index
    %c0_48 = arith.constant 0 : index
    %44 = vector.load %arg10[%c1_46, %c1_47, %c0_48] : memref<6x6x128xf32, #tpu.memory_space<vmem>>, vector<1x4x128xf32>
    %45 = vector.shape_cast %44 : vector<1x4x128xf32> to vector<4x128xf32>
    %46 = arith.truncf %45 : vector<4x128xf32> to vector<4x128xbf16>
    %c4_49 = arith.constant 4 : index
    %c128_50 = arith.constant 128 : index
    %47 = vector.load %arg11[%c4_49, %c128_50] : memref<16x1152xbf16, #tpu.memory_space<vmem>>, vector<4x128xbf16>
    tpu.vector_store %arg11[%c4_49, %c128_50], %46 {strides = array<i32>} : memref<16x1152xbf16, #tpu.memory_space<vmem>>, vector<4x128xbf16>,
    %c2_51 = arith.constant 2 : index
    %c1_52 = arith.constant 1 : index
    %c0_53 = arith.constant 0 : index
    %48 = vector.load %arg10[%c2_51, %c1_52, %c0_53] : memref<6x6x128xf32, #tpu.memory_space<vmem>>, vector<1x4x128xf32>
    %49 = vector.shape_cast %48 : vector<1x4x128xf32> to vector<4x128xf32>
    %50 = arith.truncf %49 : vector<4x128xf32> to vector<4x128xbf16>
    %c8_54 = arith.constant 8 : index
    %c128_55 = arith.constant 128 : index
    %51 = vector.load %arg11[%c8_54, %c128_55] : memref<16x1152xbf16, #tpu.memory_space<vmem>>, vector<4x128xbf16>
    tpu.vector_store %arg11[%c8_54, %c128_55], %50 {strides = array<i32>} : memref<16x1152xbf16, #tpu.memory_space<vmem>>, vector<4x128xbf16>,
    %c3_56 = arith.constant 3 : index
    %c1_57 = arith.constant 1 : index
    %c0_58 = arith.constant 0 : index
    %52 = vector.load %arg10[%c3_56, %c1_57, %c0_58] : memref<6x6x128xf32, #tpu.memory_space<vmem>>, vector<1x4x128xf32>
    %53 = vector.shape_cast %52 : vector<1x4x128xf32> to vector<4x128xf32>
    %54 = arith.truncf %53 : vector<4x128xf32> to vector<4x128xbf16>
    %c12_59 = arith.constant 12 : index
    %c128_60 = arith.constant 128 : index
    %55 = vector.load %arg11[%c12_59, %c128_60] : memref<16x1152xbf16, #tpu.memory_space<vmem>>, vector<4x128xbf16>
    tpu.vector_store %arg11[%c12_59, %c128_60], %54 {strides = array<i32>} : memref<16x1152xbf16, #tpu.memory_space<vmem>>, vector<4x128xbf16>,
    %c0_61 = arith.constant 0 : index
    %c2_62 = arith.constant 2 : index
    %c0_63 = arith.constant 0 : index
    %56 = vector.load %arg10[%c0_61, %c2_62, %c0_63] : memref<6x6x128xf32, #tpu.memory_space<vmem>>, vector<1x4x128xf32>
    %57 = vector.shape_cast %56 : vector<1x4x128xf32> to vector<4x128xf32>
    %58 = arith.truncf %57 : vector<4x128xf32> to vector<4x128xbf16>
    %c0_64 = arith.constant 0 : index
    %c256 = arith.constant 256 : index
    %59 = vector.load %arg11[%c0_64, %c256] : memref<16x1152xbf16, #tpu.memory_space<vmem>>, vector<4x128xbf16>
    tpu.vector_store %arg11[%c0_64, %c256], %58 {strides = array<i32>} : memref<16x1152xbf16, #tpu.memory_space<vmem>>, vector<4x128xbf16>,
    %c1_65 = arith.constant 1 : index
    %c2_66 = arith.constant 2 : index
    %c0_67 = arith.constant 0 : index
    %60 = vector.load %arg10[%c1_65, %c2_66, %c0_67] : memref<6x6x128xf32, #tpu.memory_space<vmem>>, vector<1x4x128xf32>
    %61 = vector.shape_cast %60 : vector<1x4x128xf32> to vector<4x128xf32>
    %62 = arith.truncf %61 : vector<4x128xf32> to vector<4x128xbf16>
    %c4_68 = arith.constant 4 : index
    %c256_69 = arith.constant 256 : index
    %63 = vector.load %arg11[%c4_68, %c256_69] : memref<16x1152xbf16, #tpu.memory_space<vmem>>, vector<4x128xbf16>
    tpu.vector_store %arg11[%c4_68, %c256_69], %62 {strides = array<i32>} : memref<16x1152xbf16, #tpu.memory_space<vmem>>, vector<4x128xbf16>,
    %c2_70 = arith.constant 2 : index
    %c2_71 = arith.constant 2 : index
    %c0_72 = arith.constant 0 : index
    %64 = vector.load %arg10[%c2_70, %c2_71, %c0_72] : memref<6x6x128xf32, #tpu.memory_space<vmem>>, vector<1x4x128xf32>
    %65 = vector.shape_cast %64 : vector<1x4x128xf32> to vector<4x128xf32>
    %66 = arith.truncf %65 : vector<4x128xf32> to vector<4x128xbf16>
    %c8_73 = arith.constant 8 : index
    %c256_74 = arith.constant 256 : index
    %67 = vector.load %arg11[%c8_73, %c256_74] : memref<16x1152xbf16, #tpu.memory_space<vmem>>, vector<4x128xbf16>
    tpu.vector_store %arg11[%c8_73, %c256_74], %66 {strides = array<i32>} : memref<16x1152xbf16, #tpu.memory_space<vmem>>, vector<4x128xbf16>,
    %c3_75 = arith.constant 3 : index
    %c2_76 = arith.constant 2 : index
    %c0_77 = arith.constant 0 : index
    %68 = vector.load %arg10[%c3_75, %c2_76, %c0_77] : memref<6x6x128xf32, #tpu.memory_space<vmem>>, vector<1x4x128xf32>
    %69 = vector.shape_cast %68 : vector<1x4x128xf32> to vector<4x128xf32>
    %70 = arith.truncf %69 : vector<4x128xf32> to vector<4x128xbf16>
    %c12_78 = arith.constant 12 : index
    %c256_79 = arith.constant 256 : index
    %71 = vector.load %arg11[%c12_78, %c256_79] : memref<16x1152xbf16, #tpu.memory_space<vmem>>, vector<4x128xbf16>
    tpu.vector_store %arg11[%c12_78, %c256_79], %70 {strides = array<i32>} : memref<16x1152xbf16, #tpu.memory_space<vmem>>, vector<4x128xbf16>,
    %c1_80 = arith.constant 1 : index
    %c0_81 = arith.constant 0 : index
    %c0_82 = arith.constant 0 : index
    %72 = vector.load %arg10[%c1_80, %c0_81, %c0_82] : memref<6x6x128xf32, #tpu.memory_space<vmem>>, vector<1x4x128xf32>
    %73 = vector.shape_cast %72 : vector<1x4x128xf32> to vector<4x128xf32>
    %74 = arith.truncf %73 : vector<4x128xf32> to vector<4x128xbf16>
    %c0_83 = arith.constant 0 : index
    %c384 = arith.constant 384 : index
    %75 = vector.load %arg11[%c0_83, %c384] : memref<16x1152xbf16, #tpu.memory_space<vmem>>, vector<4x128xbf16>
    tpu.vector_store %arg11[%c0_83, %c384], %74 {strides = array<i32>} : memref<16x1152xbf16, #tpu.memory_space<vmem>>, vector<4x128xbf16>,
    %c2_84 = arith.constant 2 : index
    %c0_85 = arith.constant 0 : index
    %c0_86 = arith.constant 0 : index
    %76 = vector.load %arg10[%c2_84, %c0_85, %c0_86] : memref<6x6x128xf32, #tpu.memory_space<vmem>>, vector<1x4x128xf32>
    %77 = vector.shape_cast %76 : vector<1x4x128xf32> to vector<4x128xf32>
    %78 = arith.truncf %77 : vector<4x128xf32> to vector<4x128xbf16>
    %c4_87 = arith.constant 4 : index
    %c384_88 = arith.constant 384 : index
    %79 = vector.load %arg11[%c4_87, %c384_88] : memref<16x1152xbf16, #tpu.memory_space<vmem>>, vector<4x128xbf16>
    tpu.vector_store %arg11[%c4_87, %c384_88], %78 {strides = array<i32>} : memref<16x1152xbf16, #tpu.memory_space<vmem>>, vector<4x128xbf16>,
    %c3_89 = arith.constant 3 : index
    %c0_90 = arith.constant 0 : index
    %c0_91 = arith.constant 0 : index
    %80 = vector.load %arg10[%c3_89, %c0_90, %c0_91] : memref<6x6x128xf32, #tpu.memory_space<vmem>>, vector<1x4x128xf32>
    %81 = vector.shape_cast %80 : vector<1x4x128xf32> to vector<4x128xf32>
    %82 = arith.truncf %81 : vector<4x128xf32> to vector<4x128xbf16>
    %c8_92 = arith.constant 8 : index
    %c384_93 = arith.constant 384 : index
    %83 = vector.load %arg11[%c8_92, %c384_93] : memref<16x1152xbf16, #tpu.memory_space<vmem>>, vector<4x128xbf16>
    tpu.vector_store %arg11[%c8_92, %c384_93], %82 {strides = array<i32>} : memref<16x1152xbf16, #tpu.memory_space<vmem>>, vector<4x128xbf16>,
    %c4_94 = arith.constant 4 : index
    %c0_95 = arith.constant 0 : index
    %c0_96 = arith.constant 0 : index
    %84 = vector.load %arg10[%c4_94, %c0_95, %c0_96] : memref<6x6x128xf32, #tpu.memory_space<vmem>>, vector<1x4x128xf32>
    %85 = vector.shape_cast %84 : vector<1x4x128xf32> to vector<4x128xf32>
    %86 = arith.truncf %85 : vector<4x128xf32> to vector<4x128xbf16>
    %c12_97 = arith.constant 12 : index
    %c384_98 = arith.constant 384 : index
    %87 = vector.load %arg11[%c12_97, %c384_98] : memref<16x1152xbf16, #tpu.memory_space<vmem>>, vector<4x128xbf16>
    tpu.vector_store %arg11[%c12_97, %c384_98], %86 {strides = array<i32>} : memref<16x1152xbf16, #tpu.memory_space<vmem>>, vector<4x128xbf16>,
    %c1_99 = arith.constant 1 : index
    %c1_100 = arith.constant 1 : index
    %c0_101 = arith.constant 0 : index
    %88 = vector.load %arg10[%c1_99, %c1_100, %c0_101] : memref<6x6x128xf32, #tpu.memory_space<vmem>>, vector<1x4x128xf32>
    %89 = vector.shape_cast %88 : vector<1x4x128xf32> to vector<4x128xf32>
    %90 = arith.truncf %89 : vector<4x128xf32> to vector<4x128xbf16>
    %c0_102 = arith.constant 0 : index
    %c512 = arith.constant 512 : index
    %91 = vector.load %arg11[%c0_102, %c512] : memref<16x1152xbf16, #tpu.memory_space<vmem>>, vector<4x128xbf16>
    tpu.vector_store %arg11[%c0_102, %c512], %90 {strides = array<i32>} : memref<16x1152xbf16, #tpu.memory_space<vmem>>, vector<4x128xbf16>,
    %c2_103 = arith.constant 2 : index
    %c1_104 = arith.constant 1 : index
    %c0_105 = arith.constant 0 : index
    %92 = vector.load %arg10[%c2_103, %c1_104, %c0_105] : memref<6x6x128xf32, #tpu.memory_space<vmem>>, vector<1x4x128xf32>
    %93 = vector.shape_cast %92 : vector<1x4x128xf32> to vector<4x128xf32>
    %94 = arith.truncf %93 : vector<4x128xf32> to vector<4x128xbf16>
    %c4_106 = arith.constant 4 : index
    %c512_107 = arith.constant 512 : index
    %95 = vector.load %arg11[%c4_106, %c512_107] : memref<16x1152xbf16, #tpu.memory_space<vmem>>, vector<4x128xbf16>
    tpu.vector_store %arg11[%c4_106, %c512_107], %94 {strides = array<i32>} : memref<16x1152xbf16, #tpu.memory_space<vmem>>, vector<4x128xbf16>,
    %c3_108 = arith.constant 3 : index
    %c1_109 = arith.constant 1 : index
    %c0_110 = arith.constant 0 : index
    %96 = vector.load %arg10[%c3_108, %c1_109, %c0_110] : memref<6x6x128xf32, #tpu.memory_space<vmem>>, vector<1x4x128xf32>
    %97 = vector.shape_cast %96 : vector<1x4x128xf32> to vector<4x128xf32>
    %98 = arith.truncf %97 : vector<4x128xf32> to vector<4x128xbf16>
    %c8_111 = arith.constant 8 : index
    %c512_112 = arith.constant 512 : index
    %99 = vector.load %arg11[%c8_111, %c512_112] : memref<16x1152xbf16, #tpu.memory_space<vmem>>, vector<4x128xbf16>
    tpu.vector_store %arg11[%c8_111, %c512_112], %98 {strides = array<i32>} : memref<16x1152xbf16, #tpu.memory_space<vmem>>, vector<4x128xbf16>,
    %c4_113 = arith.constant 4 : index
    %c1_114 = arith.constant 1 : index
    %c0_115 = arith.constant 0 : index
    %100 = vector.load %arg10[%c4_113, %c1_114, %c0_115] : memref<6x6x128xf32, #tpu.memory_space<vmem>>, vector<1x4x128xf32>
    %101 = vector.shape_cast %100 : vector<1x4x128xf32> to vector<4x128xf32>
    %102 = arith.truncf %101 : vector<4x128xf32> to vector<4x128xbf16>
    %c12_116 = arith.constant 12 : index
    %c512_117 = arith.constant 512 : index
    %103 = vector.load %arg11[%c12_116, %c512_117] : memref<16x1152xbf16, #tpu.memory_space<vmem>>, vector<4x128xbf16>
    tpu.vector_store %arg11[%c12_116, %c512_117], %102 {strides = array<i32>} : memref<16x1152xbf16, #tpu.memory_space<vmem>>, vector<4x128xbf16>,
    %c1_118 = arith.constant 1 : index
    %c2_119 = arith.constant 2 : index
    %c0_120 = arith.constant 0 : index
    %104 = vector.load %arg10[%c1_118, %c2_119, %c0_120] : memref<6x6x128xf32, #tpu.memory_space<vmem>>, vector<1x4x128xf32>
    %105 = vector.shape_cast %104 : vector<1x4x128xf32> to vector<4x128xf32>
    %106 = arith.truncf %105 : vector<4x128xf32> to vector<4x128xbf16>
    %c0_121 = arith.constant 0 : index
    %c640 = arith.constant 640 : index
    %107 = vector.load %arg11[%c0_121, %c640] : memref<16x1152xbf16, #tpu.memory_space<vmem>>, vector<4x128xbf16>
    tpu.vector_store %arg11[%c0_121, %c640], %106 {strides = array<i32>} : memref<16x1152xbf16, #tpu.memory_space<vmem>>, vector<4x128xbf16>,
    %c2_122 = arith.constant 2 : index
    %c2_123 = arith.constant 2 : index
    %c0_124 = arith.constant 0 : index
    %108 = vector.load %arg10[%c2_122, %c2_123, %c0_124] : memref<6x6x128xf32, #tpu.memory_space<vmem>>, vector<1x4x128xf32>
    %109 = vector.shape_cast %108 : vector<1x4x128xf32> to vector<4x128xf32>
    %110 = arith.truncf %109 : vector<4x128xf32> to vector<4x128xbf16>
    %c4_125 = arith.constant 4 : index
    %c640_126 = arith.constant 640 : index
    %111 = vector.load %arg11[%c4_125, %c640_126] : memref<16x1152xbf16, #tpu.memory_space<vmem>>, vector<4x128xbf16>
    tpu.vector_store %arg11[%c4_125, %c640_126], %110 {strides = array<i32>} : memref<16x1152xbf16, #tpu.memory_space<vmem>>, vector<4x128xbf16>,
    %c3_127 = arith.constant 3 : index
    %c2_128 = arith.constant 2 : index
    %c0_129 = arith.constant 0 : index
    %112 = vector.load %arg10[%c3_127, %c2_128, %c0_129] : memref<6x6x128xf32, #tpu.memory_space<vmem>>, vector<1x4x128xf32>
    %113 = vector.shape_cast %112 : vector<1x4x128xf32> to vector<4x128xf32>
    %114 = arith.truncf %113 : vector<4x128xf32> to vector<4x128xbf16>
    %c8_130 = arith.constant 8 : index
    %c640_131 = arith.constant 640 : index
    %115 = vector.load %arg11[%c8_130, %c640_131] : memref<16x1152xbf16, #tpu.memory_space<vmem>>, vector<4x128xbf16>
    tpu.vector_store %arg11[%c8_130, %c640_131], %114 {strides = array<i32>} : memref<16x1152xbf16, #tpu.memory_space<vmem>>, vector<4x128xbf16>,
    %c4_132 = arith.constant 4 : index
    %c2_133 = arith.constant 2 : index
    %c0_134 = arith.constant 0 : index
    %116 = vector.load %arg10[%c4_132, %c2_133, %c0_134] : memref<6x6x128xf32, #tpu.memory_space<vmem>>, vector<1x4x128xf32>
    %117 = vector.shape_cast %116 : vector<1x4x128xf32> to vector<4x128xf32>
    %118 = arith.truncf %117 : vector<4x128xf32> to vector<4x128xbf16>
    %c12_135 = arith.constant 12 : index
    %c640_136 = arith.constant 640 : index
    %119 = vector.load %arg11[%c12_135, %c640_136] : memref<16x1152xbf16, #tpu.memory_space<vmem>>, vector<4x128xbf16>
    tpu.vector_store %arg11[%c12_135, %c640_136], %118 {strides = array<i32>} : memref<16x1152xbf16, #tpu.memory_space<vmem>>, vector<4x128xbf16>,
    %c2_137 = arith.constant 2 : index
    %c0_138 = arith.constant 0 : index
    %c0_139 = arith.constant 0 : index
    %120 = vector.load %arg10[%c2_137, %c0_138, %c0_139] : memref<6x6x128xf32, #tpu.memory_space<vmem>>, vector<1x4x128xf32>
    %121 = vector.shape_cast %120 : vector<1x4x128xf32> to vector<4x128xf32>
    %122 = arith.truncf %121 : vector<4x128xf32> to vector<4x128xbf16>
    %c0_140 = arith.constant 0 : index
    %c768 = arith.constant 768 : index
    %123 = vector.load %arg11[%c0_140, %c768] : memref<16x1152xbf16, #tpu.memory_space<vmem>>, vector<4x128xbf16>
    tpu.vector_store %arg11[%c0_140, %c768], %122 {strides = array<i32>} : memref<16x1152xbf16, #tpu.memory_space<vmem>>, vector<4x128xbf16>,
    %c3_141 = arith.constant 3 : index
    %c0_142 = arith.constant 0 : index
    %c0_143 = arith.constant 0 : index
    %124 = vector.load %arg10[%c3_141, %c0_142, %c0_143] : memref<6x6x128xf32, #tpu.memory_space<vmem>>, vector<1x4x128xf32>
    %125 = vector.shape_cast %124 : vector<1x4x128xf32> to vector<4x128xf32>
    %126 = arith.truncf %125 : vector<4x128xf32> to vector<4x128xbf16>
    %c4_144 = arith.constant 4 : index
    %c768_145 = arith.constant 768 : index
    %127 = vector.load %arg11[%c4_144, %c768_145] : memref<16x1152xbf16, #tpu.memory_space<vmem>>, vector<4x128xbf16>
    tpu.vector_store %arg11[%c4_144, %c768_145], %126 {strides = array<i32>} : memref<16x1152xbf16, #tpu.memory_space<vmem>>, vector<4x128xbf16>,
    %c4_146 = arith.constant 4 : index
    %c0_147 = arith.constant 0 : index
    %c0_148 = arith.constant 0 : index
    %128 = vector.load %arg10[%c4_146, %c0_147, %c0_148] : memref<6x6x128xf32, #tpu.memory_space<vmem>>, vector<1x4x128xf32>
    %129 = vector.shape_cast %128 : vector<1x4x128xf32> to vector<4x128xf32>
    %130 = arith.truncf %129 : vector<4x128xf32> to vector<4x128xbf16>
    %c8_149 = arith.constant 8 : index
    %c768_150 = arith.constant 768 : index
    %131 = vector.load %arg11[%c8_149, %c768_150] : memref<16x1152xbf16, #tpu.memory_space<vmem>>, vector<4x128xbf16>
    tpu.vector_store %arg11[%c8_149, %c768_150], %130 {strides = array<i32>} : memref<16x1152xbf16, #tpu.memory_space<vmem>>, vector<4x128xbf16>,
    %c5 = arith.constant 5 : index
    %c0_151 = arith.constant 0 : index
    %c0_152 = arith.constant 0 : index
    %132 = vector.load %arg10[%c5, %c0_151, %c0_152] : memref<6x6x128xf32, #tpu.memory_space<vmem>>, vector<1x4x128xf32>
    %133 = vector.shape_cast %132 : vector<1x4x128xf32> to vector<4x128xf32>
    %134 = arith.truncf %133 : vector<4x128xf32> to vector<4x128xbf16>
    %c12_153 = arith.constant 12 : index
    %c768_154 = arith.constant 768 : index
    %135 = vector.load %arg11[%c12_153, %c768_154] : memref<16x1152xbf16, #tpu.memory_space<vmem>>, vector<4x128xbf16>
    tpu.vector_store %arg11[%c12_153, %c768_154], %134 {strides = array<i32>} : memref<16x1152xbf16, #tpu.memory_space<vmem>>, vector<4x128xbf16>,
    %c2_155 = arith.constant 2 : index
    %c1_156 = arith.constant 1 : index
    %c0_157 = arith.constant 0 : index
    %136 = vector.load %arg10[%c2_155, %c1_156, %c0_157] : memref<6x6x128xf32, #tpu.memory_space<vmem>>, vector<1x4x128xf32>
    %137 = vector.shape_cast %136 : vector<1x4x128xf32> to vector<4x128xf32>
    %138 = arith.truncf %137 : vector<4x128xf32> to vector<4x128xbf16>
    %c0_158 = arith.constant 0 : index
    %c896 = arith.constant 896 : index
    %139 = vector.load %arg11[%c0_158, %c896] : memref<16x1152xbf16, #tpu.memory_space<vmem>>, vector<4x128xbf16>
    tpu.vector_store %arg11[%c0_158, %c896], %138 {strides = array<i32>} : memref<16x1152xbf16, #tpu.memory_space<vmem>>, vector<4x128xbf16>,
    %c3_159 = arith.constant 3 : index
    %c1_160 = arith.constant 1 : index
    %c0_161 = arith.constant 0 : index
    %140 = vector.load %arg10[%c3_159, %c1_160, %c0_161] : memref<6x6x128xf32, #tpu.memory_space<vmem>>, vector<1x4x128xf32>
    %141 = vector.shape_cast %140 : vector<1x4x128xf32> to vector<4x128xf32>
    %142 = arith.truncf %141 : vector<4x128xf32> to vector<4x128xbf16>
    %c4_162 = arith.constant 4 : index
    %c896_163 = arith.constant 896 : index
    %143 = vector.load %arg11[%c4_162, %c896_163] : memref<16x1152xbf16, #tpu.memory_space<vmem>>, vector<4x128xbf16>
    tpu.vector_store %arg11[%c4_162, %c896_163], %142 {strides = array<i32>} : memref<16x1152xbf16, #tpu.memory_space<vmem>>, vector<4x128xbf16>,
    %c4_164 = arith.constant 4 : index
    %c1_165 = arith.constant 1 : index
    %c0_166 = arith.constant 0 : index
    %144 = vector.load %arg10[%c4_164, %c1_165, %c0_166] : memref<6x6x128xf32, #tpu.memory_space<vmem>>, vector<1x4x128xf32>
    %145 = vector.shape_cast %144 : vector<1x4x128xf32> to vector<4x128xf32>
    %146 = arith.truncf %145 : vector<4x128xf32> to vector<4x128xbf16>
    %c8_167 = arith.constant 8 : index
    %c896_168 = arith.constant 896 : index
    %147 = vector.load %arg11[%c8_167, %c896_168] : memref<16x1152xbf16, #tpu.memory_space<vmem>>, vector<4x128xbf16>
    tpu.vector_store %arg11[%c8_167, %c896_168], %146 {strides = array<i32>} : memref<16x1152xbf16, #tpu.memory_space<vmem>>, vector<4x128xbf16>,
    %c5_169 = arith.constant 5 : index
    %c1_170 = arith.constant 1 : index
    %c0_171 = arith.constant 0 : index
    %148 = vector.load %arg10[%c5_169, %c1_170, %c0_171] : memref<6x6x128xf32, #tpu.memory_space<vmem>>, vector<1x4x128xf32>
    %149 = vector.shape_cast %148 : vector<1x4x128xf32> to vector<4x128xf32>
    %150 = arith.truncf %149 : vector<4x128xf32> to vector<4x128xbf16>
    %c12_172 = arith.constant 12 : index
    %c896_173 = arith.constant 896 : index
    %151 = vector.load %arg11[%c12_172, %c896_173] : memref<16x1152xbf16, #tpu.memory_space<vmem>>, vector<4x128xbf16>
    tpu.vector_store %arg11[%c12_172, %c896_173], %150 {strides = array<i32>} : memref<16x1152xbf16, #tpu.memory_space<vmem>>, vector<4x128xbf16>,
    %c2_174 = arith.constant 2 : index
    %c2_175 = arith.constant 2 : index
    %c0_176 = arith.constant 0 : index
    %152 = vector.load %arg10[%c2_174, %c2_175, %c0_176] : memref<6x6x128xf32, #tpu.memory_space<vmem>>, vector<1x4x128xf32>
    %153 = vector.shape_cast %152 : vector<1x4x128xf32> to vector<4x128xf32>
    %154 = arith.truncf %153 : vector<4x128xf32> to vector<4x128xbf16>
    %c0_177 = arith.constant 0 : index
    %c1024 = arith.constant 1024 : index
    %155 = vector.load %arg11[%c0_177, %c1024] : memref<16x1152xbf16, #tpu.memory_space<vmem>>, vector<4x128xbf16>
    tpu.vector_store %arg11[%c0_177, %c1024], %154 {strides = array<i32>} : memref<16x1152xbf16, #tpu.memory_space<vmem>>, vector<4x128xbf16>,
    %c3_178 = arith.constant 3 : index
    %c2_179 = arith.constant 2 : index
    %c0_180 = arith.constant 0 : index
    %156 = vector.load %arg10[%c3_178, %c2_179, %c0_180] : memref<6x6x128xf32, #tpu.memory_space<vmem>>, vector<1x4x128xf32>
    %157 = vector.shape_cast %156 : vector<1x4x128xf32> to vector<4x128xf32>
    %158 = arith.truncf %157 : vector<4x128xf32> to vector<4x128xbf16>
    %c4_181 = arith.constant 4 : index
    %c1024_182 = arith.constant 1024 : index
    %159 = vector.load %arg11[%c4_181, %c1024_182] : memref<16x1152xbf16, #tpu.memory_space<vmem>>, vector<4x128xbf16>
    tpu.vector_store %arg11[%c4_181, %c1024_182], %158 {strides = array<i32>} : memref<16x1152xbf16, #tpu.memory_space<vmem>>, vector<4x128xbf16>,
    %c4_183 = arith.constant 4 : index
    %c2_184 = arith.constant 2 : index
    %c0_185 = arith.constant 0 : index
    %160 = vector.load %arg10[%c4_183, %c2_184, %c0_185] : memref<6x6x128xf32, #tpu.memory_space<vmem>>, vector<1x4x128xf32>
    %161 = vector.shape_cast %160 : vector<1x4x128xf32> to vector<4x128xf32>
    %162 = arith.truncf %161 : vector<4x128xf32> to vector<4x128xbf16>
    %c8_186 = arith.constant 8 : index
    %c1024_187 = arith.constant 1024 : index
    %163 = vector.load %arg11[%c8_186, %c1024_187] : memref<16x1152xbf16, #tpu.memory_space<vmem>>, vector<4x128xbf16>
    tpu.vector_store %arg11[%c8_186, %c1024_187], %162 {strides = array<i32>} : memref<16x1152xbf16, #tpu.memory_space<vmem>>, vector<4x128xbf16>,
    %c5_188 = arith.constant 5 : index
    %c2_189 = arith.constant 2 : index
    %c0_190 = arith.constant 0 : index
    %164 = vector.load %arg10[%c5_188, %c2_189, %c0_190] : memref<6x6x128xf32, #tpu.memory_space<vmem>>, vector<1x4x128xf32>
    %165 = vector.shape_cast %164 : vector<1x4x128xf32> to vector<4x128xf32>
    %166 = arith.truncf %165 : vector<4x128xf32> to vector<4x128xbf16>
    %c12_191 = arith.constant 12 : index
    %c1024_192 = arith.constant 1024 : index
    %167 = vector.load %arg11[%c12_191, %c1024_192] : memref<16x1152xbf16, #tpu.memory_space<vmem>>, vector<4x128xbf16>
    tpu.vector_store %arg11[%c12_191, %c1024_192], %166 {strides = array<i32>} : memref<16x1152xbf16, #tpu.memory_space<vmem>>, vector<4x128xbf16>,
    %c0_193 = arith.constant 0 : index
    %c0_194 = arith.constant 0 : index
    %168 = vector.load %arg11[%c0_193, %c0_194] : memref<16x1152xbf16, #tpu.memory_space<vmem>>, vector<16x1152xbf16>
    %c0_195 = arith.constant 0 : index
    %c0_196 = arith.constant 0 : index
    %169 = vector.load %arg2[%c0_195, %c0_196] : memref<1152x128xbf16, #tpu.memory_space<vmem>>, vector<1152x128xbf16>
    %cst_197 = arith.constant dense<0.000000e+00> : vector<16x128xf32>
    %170 = tpu.matmul %168, %169, %cst_197 {dimension_numbers = #tpu.dot_dimension_numbers<[1], [0], [0], [1], [0, 0, 1, 1], [], []>} : vector<16x1152xbf16>, vector<1152x128xbf16>, vector<16x128xf32> -> vector<16x128xf32>
    %c0_198 = arith.constant 0 : index
    %c0_199 = arith.constant 0 : index
    %171 = vector.load %arg3[%c0_198, %c0_199] : memref<1x128xf32, #tpu.memory_space<vmem>>, vector<1x128xf32>
    %172 = vector.broadcast %171 : vector<1x128xf32> to vector<16x128xf32>
    %173 = arith.addf %170, %172 : vector<16x128xf32>
    %cst_200 = arith.constant 0.000000e+00 : f32
    %174 = vector.broadcast %cst_200 : f32 to vector<16x128xf32>
    %175 = arith.maximumf %173, %174 : vector<16x128xf32>
    %c0_201 = arith.constant 0 : index
    %c0_202 = arith.constant 0 : index
    %176 = vector.load %arg12[%c0_201, %c0_202] : memref<16x128xf32, #tpu.memory_space<vmem>>, vector<16x128xf32>
    tpu.vector_store %arg12[%c0_201, %c0_202], %175 {strides = array<i32>} : memref<16x128xf32, #tpu.memory_space<vmem>>, vector<16x128xf32>,
    %c0_203 = arith.constant 0 : index
    %c0_204 = arith.constant 0 : index
    %177 = vector.load %arg12[%c0_203, %c0_204] : memref<16x128xf32, #tpu.memory_space<vmem>>, vector<4x128xf32>
    %c1_205 = arith.constant 1 : index
    %c1_206 = arith.constant 1 : index
    %c0_207 = arith.constant 0 : index
    %178 = vector.load %arg10[%c1_205, %c1_206, %c0_207] : memref<6x6x128xf32, #tpu.memory_space<vmem>>, vector<1x4x128xf32>
    %179 = vector.shape_cast %178 : vector<1x4x128xf32> to vector<4x128xf32>
    %180 = vector.shape_cast %177 : vector<4x128xf32> to vector<1x4x128xf32>
    tpu.vector_store %arg10[%c1_205, %c1_206, %c0_207], %180 {strides = array<i32>} : memref<6x6x128xf32, #tpu.memory_space<vmem>>, vector<1x4x128xf32>,
    %c4_208 = arith.constant 4 : index
    %c0_209 = arith.constant 0 : index
    %181 = vector.load %arg12[%c4_208, %c0_209] : memref<16x128xf32, #tpu.memory_space<vmem>>, vector<4x128xf32>
    %c2_210 = arith.constant 2 : index
    %c1_211 = arith.constant 1 : index
    %c0_212 = arith.constant 0 : index
    %182 = vector.load %arg10[%c2_210, %c1_211, %c0_212] : memref<6x6x128xf32, #tpu.memory_space<vmem>>, vector<1x4x128xf32>
    %183 = vector.shape_cast %182 : vector<1x4x128xf32> to vector<4x128xf32>
    %184 = vector.shape_cast %181 : vector<4x128xf32> to vector<1x4x128xf32>
    tpu.vector_store %arg10[%c2_210, %c1_211, %c0_212], %184 {strides = array<i32>} : memref<6x6x128xf32, #tpu.memory_space<vmem>>, vector<1x4x128xf32>,
    %c8_213 = arith.constant 8 : index
    %c0_214 = arith.constant 0 : index
    %185 = vector.load %arg12[%c8_213, %c0_214] : memref<16x128xf32, #tpu.memory_space<vmem>>, vector<4x128xf32>
    %c3_215 = arith.constant 3 : index
    %c1_216 = arith.constant 1 : index
    %c0_217 = arith.constant 0 : index
    %186 = vector.load %arg10[%c3_215, %c1_216, %c0_217] : memref<6x6x128xf32, #tpu.memory_space<vmem>>, vector<1x4x128xf32>
    %187 = vector.shape_cast %186 : vector<1x4x128xf32> to vector<4x128xf32>
    %188 = vector.shape_cast %185 : vector<4x128xf32> to vector<1x4x128xf32>
    tpu.vector_store %arg10[%c3_215, %c1_216, %c0_217], %188 {strides = array<i32>} : memref<6x6x128xf32, #tpu.memory_space<vmem>>, vector<1x4x128xf32>,
    %c12_218 = arith.constant 12 : index
    %c0_219 = arith.constant 0 : index
    %189 = vector.load %arg12[%c12_218, %c0_219] : memref<16x128xf32, #tpu.memory_space<vmem>>, vector<4x128xf32>
    %c4_220 = arith.constant 4 : index
    %c1_221 = arith.constant 1 : index
    %c0_222 = arith.constant 0 : index
    %190 = vector.load %arg10[%c4_220, %c1_221, %c0_222] : memref<6x6x128xf32, #tpu.memory_space<vmem>>, vector<1x4x128xf32>
    %191 = vector.shape_cast %190 : vector<1x4x128xf32> to vector<4x128xf32>
    %192 = vector.shape_cast %189 : vector<4x128xf32> to vector<1x4x128xf32>
    tpu.vector_store %arg10[%c4_220, %c1_221, %c0_222], %192 {strides = array<i32>} : memref<6x6x128xf32, #tpu.memory_space<vmem>>, vector<1x4x128xf32>,
    %c0_223 = arith.constant 0 : index
    %c0_224 = arith.constant 0 : index
    %c0_225 = arith.constant 0 : index
    %193 = vector.load %arg10[%c0_223, %c0_224, %c0_225] : memref<6x6x128xf32, #tpu.memory_space<vmem>>, vector<1x4x128xf32>
    %194 = vector.shape_cast %193 : vector<1x4x128xf32> to vector<4x128xf32>
    %195 = arith.truncf %194 : vector<4x128xf32> to vector<4x128xbf16>
    %c0_226 = arith.constant 0 : index
    %c0_227 = arith.constant 0 : index
    %196 = vector.load %arg11[%c0_226, %c0_227] : memref<16x1152xbf16, #tpu.memory_space<vmem>>, vector<4x128xbf16>
    tpu.vector_store %arg11[%c0_226, %c0_227], %195 {strides = array<i32>} : memref<16x1152xbf16, #tpu.memory_space<vmem>>, vector<4x128xbf16>,
    %c1_228 = arith.constant 1 : index
    %c0_229 = arith.constant 0 : index
    %c0_230 = arith.constant 0 : index
    %197 = vector.load %arg10[%c1_228, %c0_229, %c0_230] : memref<6x6x128xf32, #tpu.memory_space<vmem>>, vector<1x4x128xf32>
    %198 = vector.shape_cast %197 : vector<1x4x128xf32> to vector<4x128xf32>
    %199 = arith.truncf %198 : vector<4x128xf32> to vector<4x128xbf16>
    %c4_231 = arith.constant 4 : index
    %c0_232 = arith.constant 0 : index
    %200 = vector.load %arg11[%c4_231, %c0_232] : memref<16x1152xbf16, #tpu.memory_space<vmem>>, vector<4x128xbf16>
    tpu.vector_store %arg11[%c4_231, %c0_232], %199 {strides = array<i32>} : memref<16x1152xbf16, #tpu.memory_space<vmem>>, vector<4x128xbf16>,
    %c2_233 = arith.constant 2 : index
    %c0_234 = arith.constant 0 : index
    %c0_235 = arith.constant 0 : index
    %201 = vector.load %arg10[%c2_233, %c0_234, %c0_235] : memref<6x6x128xf32, #tpu.memory_space<vmem>>, vector<1x4x128xf32>
    %202 = vector.shape_cast %201 : vector<1x4x128xf32> to vector<4x128xf32>
    %203 = arith.truncf %202 : vector<4x128xf32> to vector<4x128xbf16>
    %c8_236 = arith.constant 8 : index
    %c0_237 = arith.constant 0 : index
    %204 = vector.load %arg11[%c8_236, %c0_237] : memref<16x1152xbf16, #tpu.memory_space<vmem>>, vector<4x128xbf16>
    tpu.vector_store %arg11[%c8_236, %c0_237], %203 {strides = array<i32>} : memref<16x1152xbf16, #tpu.memory_space<vmem>>, vector<4x128xbf16>,
    %c3_238 = arith.constant 3 : index
    %c0_239 = arith.constant 0 : index
    %c0_240 = arith.constant 0 : index
    %205 = vector.load %arg10[%c3_238, %c0_239, %c0_240] : memref<6x6x128xf32, #tpu.memory_space<vmem>>, vector<1x4x128xf32>
    %206 = vector.shape_cast %205 : vector<1x4x128xf32> to vector<4x128xf32>
    %207 = arith.truncf %206 : vector<4x128xf32> to vector<4x128xbf16>
    %c12_241 = arith.constant 12 : index
    %c0_242 = arith.constant 0 : index
    %208 = vector.load %arg11[%c12_241, %c0_242] : memref<16x1152xbf16, #tpu.memory_space<vmem>>, vector<4x128xbf16>
    tpu.vector_store %arg11[%c12_241, %c0_242], %207 {strides = array<i32>} : memref<16x1152xbf16, #tpu.memory_space<vmem>>, vector<4x128xbf16>,
    %c0_243 = arith.constant 0 : index
    %c1_244 = arith.constant 1 : index
    %c0_245 = arith.constant 0 : index
    %209 = vector.load %arg10[%c0_243, %c1_244, %c0_245] : memref<6x6x128xf32, #tpu.memory_space<vmem>>, vector<1x4x128xf32>
    %210 = vector.shape_cast %209 : vector<1x4x128xf32> to vector<4x128xf32>
    %211 = arith.truncf %210 : vector<4x128xf32> to vector<4x128xbf16>
    %c0_246 = arith.constant 0 : index
    %c128_247 = arith.constant 128 : index
    %212 = vector.load %arg11[%c0_246, %c128_247] : memref<16x1152xbf16, #tpu.memory_space<vmem>>, vector<4x128xbf16>
    tpu.vector_store %arg11[%c0_246, %c128_247], %211 {strides = array<i32>} : memref<16x1152xbf16, #tpu.memory_space<vmem>>, vector<4x128xbf16>,
    %c1_248 = arith.constant 1 : index
    %c1_249 = arith.constant 1 : index
    %c0_250 = arith.constant 0 : index
    %213 = vector.load %arg10[%c1_248, %c1_249, %c0_250] : memref<6x6x128xf32, #tpu.memory_space<vmem>>, vector<1x4x128xf32>
    %214 = vector.shape_cast %213 : vector<1x4x128xf32> to vector<4x128xf32>
    %215 = arith.truncf %214 : vector<4x128xf32> to vector<4x128xbf16>
    %c4_251 = arith.constant 4 : index
    %c128_252 = arith.constant 128 : index
    %216 = vector.load %arg11[%c4_251, %c128_252] : memref<16x1152xbf16, #tpu.memory_space<vmem>>, vector<4x128xbf16>
    tpu.vector_store %arg11[%c4_251, %c128_252], %215 {strides = array<i32>} : memref<16x1152xbf16, #tpu.memory_space<vmem>>, vector<4x128xbf16>,
    %c2_253 = arith.constant 2 : index
    %c1_254 = arith.constant 1 : index
    %c0_255 = arith.constant 0 : index
    %217 = vector.load %arg10[%c2_253, %c1_254, %c0_255] : memref<6x6x128xf32, #tpu.memory_space<vmem>>, vector<1x4x128xf32>
    %218 = vector.shape_cast %217 : vector<1x4x128xf32> to vector<4x128xf32>
    %219 = arith.truncf %218 : vector<4x128xf32> to vector<4x128xbf16>
    %c8_256 = arith.constant 8 : index
    %c128_257 = arith.constant 128 : index
    %220 = vector.load %arg11[%c8_256, %c128_257] : memref<16x1152xbf16, #tpu.memory_space<vmem>>, vector<4x128xbf16>
    tpu.vector_store %arg11[%c8_256, %c128_257], %219 {strides = array<i32>} : memref<16x1152xbf16, #tpu.memory_space<vmem>>, vector<4x128xbf16>,
    %c3_258 = arith.constant 3 : index
    %c1_259 = arith.constant 1 : index
    %c0_260 = arith.constant 0 : index
    %221 = vector.load %arg10[%c3_258, %c1_259, %c0_260] : memref<6x6x128xf32, #tpu.memory_space<vmem>>, vector<1x4x128xf32>
    %222 = vector.shape_cast %221 : vector<1x4x128xf32> to vector<4x128xf32>
    %223 = arith.truncf %222 : vector<4x128xf32> to vector<4x128xbf16>
    %c12_261 = arith.constant 12 : index
    %c128_262 = arith.constant 128 : index
    %224 = vector.load %arg11[%c12_261, %c128_262] : memref<16x1152xbf16, #tpu.memory_space<vmem>>, vector<4x128xbf16>
    tpu.vector_store %arg11[%c12_261, %c128_262], %223 {strides = array<i32>} : memref<16x1152xbf16, #tpu.memory_space<vmem>>, vector<4x128xbf16>,
    %c0_263 = arith.constant 0 : index
    %c2_264 = arith.constant 2 : index
    %c0_265 = arith.constant 0 : index
    %225 = vector.load %arg10[%c0_263, %c2_264, %c0_265] : memref<6x6x128xf32, #tpu.memory_space<vmem>>, vector<1x4x128xf32>
    %226 = vector.shape_cast %225 : vector<1x4x128xf32> to vector<4x128xf32>
    %227 = arith.truncf %226 : vector<4x128xf32> to vector<4x128xbf16>
    %c0_266 = arith.constant 0 : index
    %c256_267 = arith.constant 256 : index
    %228 = vector.load %arg11[%c0_266, %c256_267] : memref<16x1152xbf16, #tpu.memory_space<vmem>>, vector<4x128xbf16>
    tpu.vector_store %arg11[%c0_266, %c256_267], %227 {strides = array<i32>} : memref<16x1152xbf16, #tpu.memory_space<vmem>>, vector<4x128xbf16>,
    %c1_268 = arith.constant 1 : index
    %c2_269 = arith.constant 2 : index
    %c0_270 = arith.constant 0 : index
    %229 = vector.load %arg10[%c1_268, %c2_269, %c0_270] : memref<6x6x128xf32, #tpu.memory_space<vmem>>, vector<1x4x128xf32>
    %230 = vector.shape_cast %229 : vector<1x4x128xf32> to vector<4x128xf32>
    %231 = arith.truncf %230 : vector<4x128xf32> to vector<4x128xbf16>
    %c4_271 = arith.constant 4 : index
    %c256_272 = arith.constant 256 : index
    %232 = vector.load %arg11[%c4_271, %c256_272] : memref<16x1152xbf16, #tpu.memory_space<vmem>>, vector<4x128xbf16>
    tpu.vector_store %arg11[%c4_271, %c256_272], %231 {strides = array<i32>} : memref<16x1152xbf16, #tpu.memory_space<vmem>>, vector<4x128xbf16>,
    %c2_273 = arith.constant 2 : index
    %c2_274 = arith.constant 2 : index
    %c0_275 = arith.constant 0 : index
    %233 = vector.load %arg10[%c2_273, %c2_274, %c0_275] : memref<6x6x128xf32, #tpu.memory_space<vmem>>, vector<1x4x128xf32>
    %234 = vector.shape_cast %233 : vector<1x4x128xf32> to vector<4x128xf32>
    %235 = arith.truncf %234 : vector<4x128xf32> to vector<4x128xbf16>
    %c8_276 = arith.constant 8 : index
    %c256_277 = arith.constant 256 : index
    %236 = vector.load %arg11[%c8_276, %c256_277] : memref<16x1152xbf16, #tpu.memory_space<vmem>>, vector<4x128xbf16>
    tpu.vector_store %arg11[%c8_276, %c256_277], %235 {strides = array<i32>} : memref<16x1152xbf16, #tpu.memory_space<vmem>>, vector<4x128xbf16>,
    %c3_278 = arith.constant 3 : index
    %c2_279 = arith.constant 2 : index
    %c0_280 = arith.constant 0 : index
    %237 = vector.load %arg10[%c3_278, %c2_279, %c0_280] : memref<6x6x128xf32, #tpu.memory_space<vmem>>, vector<1x4x128xf32>
    %238 = vector.shape_cast %237 : vector<1x4x128xf32> to vector<4x128xf32>
    %239 = arith.truncf %238 : vector<4x128xf32> to vector<4x128xbf16>
    %c12_281 = arith.constant 12 : index
    %c256_282 = arith.constant 256 : index
    %240 = vector.load %arg11[%c12_281, %c256_282] : memref<16x1152xbf16, #tpu.memory_space<vmem>>, vector<4x128xbf16>
    tpu.vector_store %arg11[%c12_281, %c256_282], %239 {strides = array<i32>} : memref<16x1152xbf16, #tpu.memory_space<vmem>>, vector<4x128xbf16>,
    %c1_283 = arith.constant 1 : index
    %c0_284 = arith.constant 0 : index
    %c0_285 = arith.constant 0 : index
    %241 = vector.load %arg10[%c1_283, %c0_284, %c0_285] : memref<6x6x128xf32, #tpu.memory_space<vmem>>, vector<1x4x128xf32>
    %242 = vector.shape_cast %241 : vector<1x4x128xf32> to vector<4x128xf32>
    %243 = arith.truncf %242 : vector<4x128xf32> to vector<4x128xbf16>
    %c0_286 = arith.constant 0 : index
    %c384_287 = arith.constant 384 : index
    %244 = vector.load %arg11[%c0_286, %c384_287] : memref<16x1152xbf16, #tpu.memory_space<vmem>>, vector<4x128xbf16>
    tpu.vector_store %arg11[%c0_286, %c384_287], %243 {strides = array<i32>} : memref<16x1152xbf16, #tpu.memory_space<vmem>>, vector<4x128xbf16>,
    %c2_288 = arith.constant 2 : index
    %c0_289 = arith.constant 0 : index
    %c0_290 = arith.constant 0 : index
    %245 = vector.load %arg10[%c2_288, %c0_289, %c0_290] : memref<6x6x128xf32, #tpu.memory_space<vmem>>, vector<1x4x128xf32>
    %246 = vector.shape_cast %245 : vector<1x4x128xf32> to vector<4x128xf32>
    %247 = arith.truncf %246 : vector<4x128xf32> to vector<4x128xbf16>
    %c4_291 = arith.constant 4 : index
    %c384_292 = arith.constant 384 : index
    %248 = vector.load %arg11[%c4_291, %c384_292] : memref<16x1152xbf16, #tpu.memory_space<vmem>>, vector<4x128xbf16>
    tpu.vector_store %arg11[%c4_291, %c384_292], %247 {strides = array<i32>} : memref<16x1152xbf16, #tpu.memory_space<vmem>>, vector<4x128xbf16>,
    %c3_293 = arith.constant 3 : index
    %c0_294 = arith.constant 0 : index
    %c0_295 = arith.constant 0 : index
    %249 = vector.load %arg10[%c3_293, %c0_294, %c0_295] : memref<6x6x128xf32, #tpu.memory_space<vmem>>, vector<1x4x128xf32>
    %250 = vector.shape_cast %249 : vector<1x4x128xf32> to vector<4x128xf32>
    %251 = arith.truncf %250 : vector<4x128xf32> to vector<4x128xbf16>
    %c8_296 = arith.constant 8 : index
    %c384_297 = arith.constant 384 : index
    %252 = vector.load %arg11[%c8_296, %c384_297] : memref<16x1152xbf16, #tpu.memory_space<vmem>>, vector<4x128xbf16>
    tpu.vector_store %arg11[%c8_296, %c384_297], %251 {strides = array<i32>} : memref<16x1152xbf16, #tpu.memory_space<vmem>>, vector<4x128xbf16>,
    %c4_298 = arith.constant 4 : index
    %c0_299 = arith.constant 0 : index
    %c0_300 = arith.constant 0 : index
    %253 = vector.load %arg10[%c4_298, %c0_299, %c0_300] : memref<6x6x128xf32, #tpu.memory_space<vmem>>, vector<1x4x128xf32>
    %254 = vector.shape_cast %253 : vector<1x4x128xf32> to vector<4x128xf32>
    %255 = arith.truncf %254 : vector<4x128xf32> to vector<4x128xbf16>
    %c12_301 = arith.constant 12 : index
    %c384_302 = arith.constant 384 : index
    %256 = vector.load %arg11[%c12_301, %c384_302] : memref<16x1152xbf16, #tpu.memory_space<vmem>>, vector<4x128xbf16>
    tpu.vector_store %arg11[%c12_301, %c384_302], %255 {strides = array<i32>} : memref<16x1152xbf16, #tpu.memory_space<vmem>>, vector<4x128xbf16>,
    %c1_303 = arith.constant 1 : index
    %c1_304 = arith.constant 1 : index
    %c0_305 = arith.constant 0 : index
    %257 = vector.load %arg10[%c1_303, %c1_304, %c0_305] : memref<6x6x128xf32, #tpu.memory_space<vmem>>, vector<1x4x128xf32>
    %258 = vector.shape_cast %257 : vector<1x4x128xf32> to vector<4x128xf32>
    %259 = arith.truncf %258 : vector<4x128xf32> to vector<4x128xbf16>
    %c0_306 = arith.constant 0 : index
    %c512_307 = arith.constant 512 : index
    %260 = vector.load %arg11[%c0_306, %c512_307] : memref<16x1152xbf16, #tpu.memory_space<vmem>>, vector<4x128xbf16>
    tpu.vector_store %arg11[%c0_306, %c512_307], %259 {strides = array<i32>} : memref<16x1152xbf16, #tpu.memory_space<vmem>>, vector<4x128xbf16>,
    %c2_308 = arith.constant 2 : index
    %c1_309 = arith.constant 1 : index
    %c0_310 = arith.constant 0 : index
    %261 = vector.load %arg10[%c2_308, %c1_309, %c0_310] : memref<6x6x128xf32, #tpu.memory_space<vmem>>, vector<1x4x128xf32>
    %262 = vector.shape_cast %261 : vector<1x4x128xf32> to vector<4x128xf32>
    %263 = arith.truncf %262 : vector<4x128xf32> to vector<4x128xbf16>
    %c4_311 = arith.constant 4 : index
    %c512_312 = arith.constant 512 : index
    %264 = vector.load %arg11[%c4_311, %c512_312] : memref<16x1152xbf16, #tpu.memory_space<vmem>>, vector<4x128xbf16>
    tpu.vector_store %arg11[%c4_311, %c512_312], %263 {strides = array<i32>} : memref<16x1152xbf16, #tpu.memory_space<vmem>>, vector<4x128xbf16>,
    %c3_313 = arith.constant 3 : index
    %c1_314 = arith.constant 1 : index
    %c0_315 = arith.constant 0 : index
    %265 = vector.load %arg10[%c3_313, %c1_314, %c0_315] : memref<6x6x128xf32, #tpu.memory_space<vmem>>, vector<1x4x128xf32>
    %266 = vector.shape_cast %265 : vector<1x4x128xf32> to vector<4x128xf32>
    %267 = arith.truncf %266 : vector<4x128xf32> to vector<4x128xbf16>
    %c8_316 = arith.constant 8 : index
    %c512_317 = arith.constant 512 : index
    %268 = vector.load %arg11[%c8_316, %c512_317] : memref<16x1152xbf16, #tpu.memory_space<vmem>>, vector<4x128xbf16>
    tpu.vector_store %arg11[%c8_316, %c512_317], %267 {strides = array<i32>} : memref<16x1152xbf16, #tpu.memory_space<vmem>>, vector<4x128xbf16>,
    %c4_318 = arith.constant 4 : index
    %c1_319 = arith.constant 1 : index
    %c0_320 = arith.constant 0 : index
    %269 = vector.load %arg10[%c4_318, %c1_319, %c0_320] : memref<6x6x128xf32, #tpu.memory_space<vmem>>, vector<1x4x128xf32>
    %270 = vector.shape_cast %269 : vector<1x4x128xf32> to vector<4x128xf32>
    %271 = arith.truncf %270 : vector<4x128xf32> to vector<4x128xbf16>
    %c12_321 = arith.constant 12 : index
    %c512_322 = arith.constant 512 : index
    %272 = vector.load %arg11[%c12_321, %c512_322] : memref<16x1152xbf16, #tpu.memory_space<vmem>>, vector<4x128xbf16>
    tpu.vector_store %arg11[%c12_321, %c512_322], %271 {strides = array<i32>} : memref<16x1152xbf16, #tpu.memory_space<vmem>>, vector<4x128xbf16>,
    %c1_323 = arith.constant 1 : index
    %c2_324 = arith.constant 2 : index
    %c0_325 = arith.constant 0 : index
    %273 = vector.load %arg10[%c1_323, %c2_324, %c0_325] : memref<6x6x128xf32, #tpu.memory_space<vmem>>, vector<1x4x128xf32>
    %274 = vector.shape_cast %273 : vector<1x4x128xf32> to vector<4x128xf32>
    %275 = arith.truncf %274 : vector<4x128xf32> to vector<4x128xbf16>
    %c0_326 = arith.constant 0 : index
    %c640_327 = arith.constant 640 : index
    %276 = vector.load %arg11[%c0_326, %c640_327] : memref<16x1152xbf16, #tpu.memory_space<vmem>>, vector<4x128xbf16>
    tpu.vector_store %arg11[%c0_326, %c640_327], %275 {strides = array<i32>} : memref<16x1152xbf16, #tpu.memory_space<vmem>>, vector<4x128xbf16>,
    %c2_328 = arith.constant 2 : index
    %c2_329 = arith.constant 2 : index
    %c0_330 = arith.constant 0 : index
    %277 = vector.load %arg10[%c2_328, %c2_329, %c0_330] : memref<6x6x128xf32, #tpu.memory_space<vmem>>, vector<1x4x128xf32>
    %278 = vector.shape_cast %277 : vector<1x4x128xf32> to vector<4x128xf32>
    %279 = arith.truncf %278 : vector<4x128xf32> to vector<4x128xbf16>
    %c4_331 = arith.constant 4 : index
    %c640_332 = arith.constant 640 : index
    %280 = vector.load %arg11[%c4_331, %c640_332] : memref<16x1152xbf16, #tpu.memory_space<vmem>>, vector<4x128xbf16>
    tpu.vector_store %arg11[%c4_331, %c640_332], %279 {strides = array<i32>} : memref<16x1152xbf16, #tpu.memory_space<vmem>>, vector<4x128xbf16>,
    %c3_333 = arith.constant 3 : index
    %c2_334 = arith.constant 2 : index
    %c0_335 = arith.constant 0 : index
    %281 = vector.load %arg10[%c3_333, %c2_334, %c0_335] : memref<6x6x128xf32, #tpu.memory_space<vmem>>, vector<1x4x128xf32>
    %282 = vector.shape_cast %281 : vector<1x4x128xf32> to vector<4x128xf32>
    %283 = arith.truncf %282 : vector<4x128xf32> to vector<4x128xbf16>
    %c8_336 = arith.constant 8 : index
    %c640_337 = arith.constant 640 : index
    %284 = vector.load %arg11[%c8_336, %c640_337] : memref<16x1152xbf16, #tpu.memory_space<vmem>>, vector<4x128xbf16>
    tpu.vector_store %arg11[%c8_336, %c640_337], %283 {strides = array<i32>} : memref<16x1152xbf16, #tpu.memory_space<vmem>>, vector<4x128xbf16>,
    %c4_338 = arith.constant 4 : index
    %c2_339 = arith.constant 2 : index
    %c0_340 = arith.constant 0 : index
    %285 = vector.load %arg10[%c4_338, %c2_339, %c0_340] : memref<6x6x128xf32, #tpu.memory_space<vmem>>, vector<1x4x128xf32>
    %286 = vector.shape_cast %285 : vector<1x4x128xf32> to vector<4x128xf32>
    %287 = arith.truncf %286 : vector<4x128xf32> to vector<4x128xbf16>
    %c12_341 = arith.constant 12 : index
    %c640_342 = arith.constant 640 : index
    %288 = vector.load %arg11[%c12_341, %c640_342] : memref<16x1152xbf16, #tpu.memory_space<vmem>>, vector<4x128xbf16>
    tpu.vector_store %arg11[%c12_341, %c640_342], %287 {strides = array<i32>} : memref<16x1152xbf16, #tpu.memory_space<vmem>>, vector<4x128xbf16>,
    %c2_343 = arith.constant 2 : index
    %c0_344 = arith.constant 0 : index
    %c0_345 = arith.constant 0 : index
    %289 = vector.load %arg10[%c2_343, %c0_344, %c0_345] : memref<6x6x128xf32, #tpu.memory_space<vmem>>, vector<1x4x128xf32>
    %290 = vector.shape_cast %289 : vector<1x4x128xf32> to vector<4x128xf32>
    %291 = arith.truncf %290 : vector<4x128xf32> to vector<4x128xbf16>
    %c0_346 = arith.constant 0 : index
    %c768_347 = arith.constant 768 : index
    %292 = vector.load %arg11[%c0_346, %c768_347] : memref<16x1152xbf16, #tpu.memory_space<vmem>>, vector<4x128xbf16>
    tpu.vector_store %arg11[%c0_346, %c768_347], %291 {strides = array<i32>} : memref<16x1152xbf16, #tpu.memory_space<vmem>>, vector<4x128xbf16>,
    %c3_348 = arith.constant 3 : index
    %c0_349 = arith.constant 0 : index
    %c0_350 = arith.constant 0 : index
    %293 = vector.load %arg10[%c3_348, %c0_349, %c0_350] : memref<6x6x128xf32, #tpu.memory_space<vmem>>, vector<1x4x128xf32>
    %294 = vector.shape_cast %293 : vector<1x4x128xf32> to vector<4x128xf32>
    %295 = arith.truncf %294 : vector<4x128xf32> to vector<4x128xbf16>
    %c4_351 = arith.constant 4 : index
    %c768_352 = arith.constant 768 : index
    %296 = vector.load %arg11[%c4_351, %c768_352] : memref<16x1152xbf16, #tpu.memory_space<vmem>>, vector<4x128xbf16>
    tpu.vector_store %arg11[%c4_351, %c768_352], %295 {strides = array<i32>} : memref<16x1152xbf16, #tpu.memory_space<vmem>>, vector<4x128xbf16>,
    %c4_353 = arith.constant 4 : index
    %c0_354 = arith.constant 0 : index
    %c0_355 = arith.constant 0 : index
    %297 = vector.load %arg10[%c4_353, %c0_354, %c0_355] : memref<6x6x128xf32, #tpu.memory_space<vmem>>, vector<1x4x128xf32>
    %298 = vector.shape_cast %297 : vector<1x4x128xf32> to vector<4x128xf32>
    %299 = arith.truncf %298 : vector<4x128xf32> to vector<4x128xbf16>
    %c8_356 = arith.constant 8 : index
    %c768_357 = arith.constant 768 : index
    %300 = vector.load %arg11[%c8_356, %c768_357] : memref<16x1152xbf16, #tpu.memory_space<vmem>>, vector<4x128xbf16>
    tpu.vector_store %arg11[%c8_356, %c768_357], %299 {strides = array<i32>} : memref<16x1152xbf16, #tpu.memory_space<vmem>>, vector<4x128xbf16>,
    %c5_358 = arith.constant 5 : index
    %c0_359 = arith.constant 0 : index
    %c0_360 = arith.constant 0 : index
    %301 = vector.load %arg10[%c5_358, %c0_359, %c0_360] : memref<6x6x128xf32, #tpu.memory_space<vmem>>, vector<1x4x128xf32>
    %302 = vector.shape_cast %301 : vector<1x4x128xf32> to vector<4x128xf32>
    %303 = arith.truncf %302 : vector<4x128xf32> to vector<4x128xbf16>
    %c12_361 = arith.constant 12 : index
    %c768_362 = arith.constant 768 : index
    %304 = vector.load %arg11[%c12_361, %c768_362] : memref<16x1152xbf16, #tpu.memory_space<vmem>>, vector<4x128xbf16>
    tpu.vector_store %arg11[%c12_361, %c768_362], %303 {strides = array<i32>} : memref<16x1152xbf16, #tpu.memory_space<vmem>>, vector<4x128xbf16>,
    %c2_363 = arith.constant 2 : index
    %c1_364 = arith.constant 1 : index
    %c0_365 = arith.constant 0 : index
    %305 = vector.load %arg10[%c2_363, %c1_364, %c0_365] : memref<6x6x128xf32, #tpu.memory_space<vmem>>, vector<1x4x128xf32>
    %306 = vector.shape_cast %305 : vector<1x4x128xf32> to vector<4x128xf32>
    %307 = arith.truncf %306 : vector<4x128xf32> to vector<4x128xbf16>
    %c0_366 = arith.constant 0 : index
    %c896_367 = arith.constant 896 : index
    %308 = vector.load %arg11[%c0_366, %c896_367] : memref<16x1152xbf16, #tpu.memory_space<vmem>>, vector<4x128xbf16>
    tpu.vector_store %arg11[%c0_366, %c896_367], %307 {strides = array<i32>} : memref<16x1152xbf16, #tpu.memory_space<vmem>>, vector<4x128xbf16>,
    %c3_368 = arith.constant 3 : index
    %c1_369 = arith.constant 1 : index
    %c0_370 = arith.constant 0 : index
    %309 = vector.load %arg10[%c3_368, %c1_369, %c0_370] : memref<6x6x128xf32, #tpu.memory_space<vmem>>, vector<1x4x128xf32>
    %310 = vector.shape_cast %309 : vector<1x4x128xf32> to vector<4x128xf32>
    %311 = arith.truncf %310 : vector<4x128xf32> to vector<4x128xbf16>
    %c4_371 = arith.constant 4 : index
    %c896_372 = arith.constant 896 : index
    %312 = vector.load %arg11[%c4_371, %c896_372] : memref<16x1152xbf16, #tpu.memory_space<vmem>>, vector<4x128xbf16>
    tpu.vector_store %arg11[%c4_371, %c896_372], %311 {strides = array<i32>} : memref<16x1152xbf16, #tpu.memory_space<vmem>>, vector<4x128xbf16>,
    %c4_373 = arith.constant 4 : index
    %c1_374 = arith.constant 1 : index
    %c0_375 = arith.constant 0 : index
    %313 = vector.load %arg10[%c4_373, %c1_374, %c0_375] : memref<6x6x128xf32, #tpu.memory_space<vmem>>, vector<1x4x128xf32>
    %314 = vector.shape_cast %313 : vector<1x4x128xf32> to vector<4x128xf32>
    %315 = arith.truncf %314 : vector<4x128xf32> to vector<4x128xbf16>
    %c8_376 = arith.constant 8 : index
    %c896_377 = arith.constant 896 : index
    %316 = vector.load %arg11[%c8_376, %c896_377] : memref<16x1152xbf16, #tpu.memory_space<vmem>>, vector<4x128xbf16>
    tpu.vector_store %arg11[%c8_376, %c896_377], %315 {strides = array<i32>} : memref<16x1152xbf16, #tpu.memory_space<vmem>>, vector<4x128xbf16>,
    %c5_378 = arith.constant 5 : index
    %c1_379 = arith.constant 1 : index
    %c0_380 = arith.constant 0 : index
    %317 = vector.load %arg10[%c5_378, %c1_379, %c0_380] : memref<6x6x128xf32, #tpu.memory_space<vmem>>, vector<1x4x128xf32>
    %318 = vector.shape_cast %317 : vector<1x4x128xf32> to vector<4x128xf32>
    %319 = arith.truncf %318 : vector<4x128xf32> to vector<4x128xbf16>
    %c12_381 = arith.constant 12 : index
    %c896_382 = arith.constant 896 : index
    %320 = vector.load %arg11[%c12_381, %c896_382] : memref<16x1152xbf16, #tpu.memory_space<vmem>>, vector<4x128xbf16>
    tpu.vector_store %arg11[%c12_381, %c896_382], %319 {strides = array<i32>} : memref<16x1152xbf16, #tpu.memory_space<vmem>>, vector<4x128xbf16>,
    %c2_383 = arith.constant 2 : index
    %c2_384 = arith.constant 2 : index
    %c0_385 = arith.constant 0 : index
    %321 = vector.load %arg10[%c2_383, %c2_384, %c0_385] : memref<6x6x128xf32, #tpu.memory_space<vmem>>, vector<1x4x128xf32>
    %322 = vector.shape_cast %321 : vector<1x4x128xf32> to vector<4x128xf32>
    %323 = arith.truncf %322 : vector<4x128xf32> to vector<4x128xbf16>
    %c0_386 = arith.constant 0 : index
    %c1024_387 = arith.constant 1024 : index
    %324 = vector.load %arg11[%c0_386, %c1024_387] : memref<16x1152xbf16, #tpu.memory_space<vmem>>, vector<4x128xbf16>
    tpu.vector_store %arg11[%c0_386, %c1024_387], %323 {strides = array<i32>} : memref<16x1152xbf16, #tpu.memory_space<vmem>>, vector<4x128xbf16>,
    %c3_388 = arith.constant 3 : index
    %c2_389 = arith.constant 2 : index
    %c0_390 = arith.constant 0 : index
    %325 = vector.load %arg10[%c3_388, %c2_389, %c0_390] : memref<6x6x128xf32, #tpu.memory_space<vmem>>, vector<1x4x128xf32>
    %326 = vector.shape_cast %325 : vector<1x4x128xf32> to vector<4x128xf32>
    %327 = arith.truncf %326 : vector<4x128xf32> to vector<4x128xbf16>
    %c4_391 = arith.constant 4 : index
    %c1024_392 = arith.constant 1024 : index
    %328 = vector.load %arg11[%c4_391, %c1024_392] : memref<16x1152xbf16, #tpu.memory_space<vmem>>, vector<4x128xbf16>
    tpu.vector_store %arg11[%c4_391, %c1024_392], %327 {strides = array<i32>} : memref<16x1152xbf16, #tpu.memory_space<vmem>>, vector<4x128xbf16>,
    %c4_393 = arith.constant 4 : index
    %c2_394 = arith.constant 2 : index
    %c0_395 = arith.constant 0 : index
    %329 = vector.load %arg10[%c4_393, %c2_394, %c0_395] : memref<6x6x128xf32, #tpu.memory_space<vmem>>, vector<1x4x128xf32>
    %330 = vector.shape_cast %329 : vector<1x4x128xf32> to vector<4x128xf32>
    %331 = arith.truncf %330 : vector<4x128xf32> to vector<4x128xbf16>
    %c8_396 = arith.constant 8 : index
    %c1024_397 = arith.constant 1024 : index
    %332 = vector.load %arg11[%c8_396, %c1024_397] : memref<16x1152xbf16, #tpu.memory_space<vmem>>, vector<4x128xbf16>
    tpu.vector_store %arg11[%c8_396, %c1024_397], %331 {strides = array<i32>} : memref<16x1152xbf16, #tpu.memory_space<vmem>>, vector<4x128xbf16>,
    %c5_398 = arith.constant 5 : index
    %c2_399 = arith.constant 2 : index
    %c0_400 = arith.constant 0 : index
    %333 = vector.load %arg10[%c5_398, %c2_399, %c0_400] : memref<6x6x128xf32, #tpu.memory_space<vmem>>, vector<1x4x128xf32>
    %334 = vector.shape_cast %333 : vector<1x4x128xf32> to vector<4x128xf32>
    %335 = arith.truncf %334 : vector<4x128xf32> to vector<4x128xbf16>
    %c12_401 = arith.constant 12 : index
    %c1024_402 = arith.constant 1024 : index
    %336 = vector.load %arg11[%c12_401, %c1024_402] : memref<16x1152xbf16, #tpu.memory_space<vmem>>, vector<4x128xbf16>
    tpu.vector_store %arg11[%c12_401, %c1024_402], %335 {strides = array<i32>} : memref<16x1152xbf16, #tpu.memory_space<vmem>>, vector<4x128xbf16>,
    %c0_403 = arith.constant 0 : index
    %c0_404 = arith.constant 0 : index
    %337 = vector.load %arg11[%c0_403, %c0_404] : memref<16x1152xbf16, #tpu.memory_space<vmem>>, vector<16x1152xbf16>
    %c0_405 = arith.constant 0 : index
    %c0_406 = arith.constant 0 : index
    %338 = vector.load %arg4[%c0_405, %c0_406] : memref<1152x128xbf16, #tpu.memory_space<vmem>>, vector<1152x128xbf16>
    %cst_407 = arith.constant dense<0.000000e+00> : vector<16x128xf32>
    %339 = tpu.matmul %337, %338, %cst_407 {dimension_numbers = #tpu.dot_dimension_numbers<[1], [0], [0], [1], [0, 0, 1, 1], [], []>} : vector<16x1152xbf16>, vector<1152x128xbf16>, vector<16x128xf32> -> vector<16x128xf32>
    %c0_408 = arith.constant 0 : index
    %c0_409 = arith.constant 0 : index
    %340 = vector.load %arg5[%c0_408, %c0_409] : memref<1x128xf32, #tpu.memory_space<vmem>>, vector<1x128xf32>
    %341 = vector.broadcast %340 : vector<1x128xf32> to vector<16x128xf32>
    %342 = arith.addf %339, %341 : vector<16x128xf32>
    %c0_410 = arith.constant 0 : index
    %c0_411 = arith.constant 0 : index
    %343 = vector.load %arg8[%c0_410, %c0_411] : memref<4x16xbf16, #tpu.memory_space<vmem>>, vector<4x16xbf16>
    %344 = arith.truncf %342 : vector<16x128xf32> to vector<16x128xbf16>
    %cst_412 = arith.constant dense<0.000000e+00> : vector<4x128xf32>
    %345 = tpu.matmul %343, %344, %cst_412 {dimension_numbers = #tpu.dot_dimension_numbers<[1], [0], [0], [1], [0, 0, 1, 1], [], []>} : vector<4x16xbf16>, vector<16x128xbf16>, vector<4x128xf32> -> vector<4x128xf32>
    %c0_413 = arith.constant 0 : index
    %c0_414 = arith.constant 0 : index
    %346 = vector.load %arg6[%c0_413, %c0_414] : memref<128x128xbf16, #tpu.memory_space<vmem>>, vector<128x128xbf16>
    %cst_415 = arith.constant dense<0.000000e+00> : vector<16x128xf32>
    %347 = tpu.matmul %3, %346, %cst_415 {dimension_numbers = #tpu.dot_dimension_numbers<[1], [0], [0], [1], [0, 0, 1, 1], [], []>} : vector<16x128xbf16>, vector<128x128xbf16>, vector<16x128xf32> -> vector<16x128xf32>
    %c0_416 = arith.constant 0 : index
    %c0_417 = arith.constant 0 : index
    %348 = vector.load %arg7[%c0_416, %c0_417] : memref<1x128xf32, #tpu.memory_space<vmem>>, vector<1x128xf32>
    %349 = vector.broadcast %348 : vector<1x128xf32> to vector<16x128xf32>
    %350 = arith.addf %347, %349 : vector<16x128xf32>
    %c0_418 = arith.constant 0 : index
    %c0_419 = arith.constant 0 : index
    %351 = vector.load %arg8[%c0_418, %c0_419] : memref<4x16xbf16, #tpu.memory_space<vmem>>, vector<4x16xbf16>
    %352 = arith.truncf %350 : vector<16x128xf32> to vector<16x128xbf16>
    %cst_420 = arith.constant dense<0.000000e+00> : vector<4x128xf32>
    %353 = tpu.matmul %351, %352, %cst_420 {dimension_numbers = #tpu.dot_dimension_numbers<[1], [0], [0], [1], [0, 0, 1, 1], [], []>} : vector<4x16xbf16>, vector<16x128xbf16>, vector<4x128xf32> -> vector<4x128xf32>
    %354 = arith.addf %345, %353 : vector<4x128xf32>
    %355 = arith.truncf %354 : vector<4x128xf32> to vector<4x128xbf16>
    %c0_421 = arith.constant 0 : index
    %c0_422 = arith.constant 0 : index
    %c0_423 = arith.constant 0 : index
    %356 = vector.load %arg9[%c0_421, %c0_422, %c0_423] : memref<1x4x128xbf16, #tpu.memory_space<vmem>>, vector<1x4x128xbf16>
    %357 = vector.shape_cast %356 : vector<1x4x128xbf16> to vector<4x128xbf16>
    %358 = vector.shape_cast %355 : vector<4x128xbf16> to vector<1x4x128xbf16>
    tpu.vector_store %arg9[%c0_421, %c0_422, %c0_423], %358 {strides = array<i32>} : memref<1x4x128xbf16, #tpu.memory_space<vmem>>, vector<1x4x128xbf16>,
    return
  }
  func.func @transform_0(%arg0: i32) -> (i32, i32, i32) {
    %c0_i32 = arith.constant 0 : i32
    %c0_i32_0 = arith.constant 0 : i32
    %c0_i32_1 = arith.constant 0 : i32
    return %arg0, %c0_i32, %c0_i32_0 : i32, i32, i32
  }
  func.func @transform_1(%arg0: i32) -> (i32, i32) {
    %c0_i32 = arith.constant 0 : i32
    %c0_i32_0 = arith.constant 0 : i32
    %c0_i32_1 = arith.constant 0 : i32
    return %c0_i32, %c0_i32_0 : i32, i32
  }
  func.func @transform_2(%arg0: i32) -> (i32, i32) {
    %c0_i32 = arith.constant 0 : i32
    %c0_i32_0 = arith.constant 0 : i32
    %c0_i32_1 = arith.constant 0 : i32
    return %c0_i32, %c0_i32_0 : i32, i32
  }
  func.func @transform_3(%arg0: i32) -> (i32, i32) {
    %c0_i32 = arith.constant 0 : i32
    %c0_i32_0 = arith.constant 0 : i32
    %c0_i32_1 = arith.constant 0 : i32
    return %c0_i32, %c0_i32_0 : i32, i32
  }
  func.func @transform_4(%arg0: i32) -> (i32, i32) {
    %c0_i32 = arith.constant 0 : i32
    %c0_i32_0 = arith.constant 0 : i32
    %c0_i32_1 = arith.constant 0 : i32
    return %c0_i32, %c0_i32_0 : i32, i32
  }
  func.func @transform_5(%arg0: i32) -> (i32, i32) {
    %c0_i32 = arith.constant 0 : i32
    %c0_i32_0 = arith.constant 0 : i32
    %c0_i32_1 = arith.constant 0 : i32
    return %c0_i32, %c0_i32_0 : i32, i32
  }
  func.func @transform_6(%arg0: i32) -> (i32, i32) {
    %c0_i32 = arith.constant 0 : i32
    %c0_i32_0 = arith.constant 0 : i32
    %c0_i32_1 = arith.constant 0 : i32
    return %c0_i32, %c0_i32_0 : i32, i32
  }
  func.func @transform_7(%arg0: i32) -> (i32, i32) {
    %c0_i32 = arith.constant 0 : i32
    %c0_i32_0 = arith.constant 0 : i32
    %c0_i32_1 = arith.constant 0 : i32
    return %c0_i32, %c0_i32_0 : i32, i32
  }
  func.func @transform_8(%arg0: i32) -> (i32, i32, i32) {
    %c0_i32 = arith.constant 0 : i32
    %c0_i32_0 = arith.constant 0 : i32
    %c0_i32_1 = arith.constant 0 : i32
    return %arg0, %c0_i32, %c0_i32_0 : i32, i32, i32
  }
}

module attributes {stable_mosaic.version = 11 : i64} {
  func.func @head_kernel(%arg0: memref<2x4x128xbf16, #tpu.memory_space<vmem>>, %arg1: memref<128x1xf32, #tpu.memory_space<vmem>>, %arg2: memref<2x1xf32, #tpu.memory_space<vmem>>) attributes {dimension_semantics = [], scalar_prefetch = 0 : i64, scratch_operands = 0 : i64, tpu.core_type = #tpu.core_type<tc>} {
    %c0 = arith.constant 0 : index
    %c0_0 = arith.constant 0 : index
    %c0_1 = arith.constant 0 : index
    %0 = vector.load %arg0[%c0, %c0_0, %c0_1] : memref<2x4x128xbf16, #tpu.memory_space<vmem>>, vector<2x4x128xbf16>
    %1 = arith.extf %0 : vector<2x4x128xbf16> to vector<2x4x128xf32>
    %cst = arith.constant 0.000000e+00 : f32
    %2 = vector.broadcast %cst : f32 to vector<2x4x128xf32>
    %3 = arith.maximumf %1, %2 : vector<2x4x128xf32>
    %cst_2 = arith.constant dense<0.000000e+00> : vector<2x128xf32>
    %4 = vector.multi_reduction <add>, %3, %cst_2 [1] : vector<2x4x128xf32> to vector<2x128xf32>
    %c0_3 = arith.constant 0 : index
    %c0_4 = arith.constant 0 : index
    %5 = vector.load %arg1[%c0_3, %c0_4] : memref<128x1xf32, #tpu.memory_space<vmem>>, vector<128x1xf32>
    %cst_5 = arith.constant dense<0.000000e+00> : vector<2x1xf32>
    %6 = tpu.matmul %4, %5, %cst_5 {dimension_numbers = #tpu.dot_dimension_numbers<[1], [0], [0], [1], [0, 0, 1, 1], [], []>} : vector<2x128xf32>, vector<128x1xf32>, vector<2x1xf32> -> vector<2x1xf32>
    %c0_6 = arith.constant 0 : index
    %c0_7 = arith.constant 0 : index
    %7 = vector.load %arg2[%c0_6, %c0_7] : memref<2x1xf32, #tpu.memory_space<vmem>>, vector<2x1xf32>
    tpu.vector_store %arg2[%c0_6, %c0_7], %6 {strides = array<i32>} : memref<2x1xf32, #tpu.memory_space<vmem>>, vector<2x1xf32>,
    return
  }
}

</mosaic_0001>

<bundles_post_ra>
// kernel: pallas_forward.6
= control target key start
LH: loop header
LB: loop body
LE: loop exit
PB: predicated region body
PF: predicated region fallthrough
CT: control target
= control target key end

     0   :  { %s3760_s27 = smov 0   ;;  %s4501_s0 = inlined_call_operand.vmem [shape: bf16[2,64,128], index: 0, kind: input, shape index: {}]   ;;  %s4502_s1 = inlined_call_operand.vmem [shape: bf16[1152,128], index: 1, kind: input, shape index: {}]   ;;  %s4503_s2 = inlined_call_operand.vmem [shape: f32[1,128], index: 2, kind: input, shape index: {}]   ;;  %s4504_s3 = inlined_call_operand.vmem [shape: bf16[1152,128], index: 3, kind: input, shape index: {}]   ;;  %s4505_s4 = inlined_call_operand.vmem [shape: f32[1,128], index: 4, kind: input, shape index: {}]   ;;  %s4506_s5 = inlined_call_operand.vmem [shape: bf16[128,128], index: 5, kind: input, shape index: {}]   ;;  %s4507_s6 = inlined_call_operand.vmem [shape: f32[1,128], index: 6, kind: input, shape index: {}]   ;;  %s4508_s7 = inlined_call_operand.vmem [shape: bf16[16,64], index: 7, kind: input, shape index: {}]   ;;  %s4509_s8 = inlined_call_operand.vmem [shape: bf16[2,16,128], index: 8, kind: output, shape index: {}]  }
   0x1 LB: > { %s2879_s28 = sadd.s32 4294967295, %s3711_s27   ;;  %p2883_p0 = scmp.ge.s32.totalorder %s3711_s27, 1  ;;  %s3711_s27 = sphi %s3760_s27, %s18_s27  }
   0x2   : > { %p262_p1 = scmp.lt.s32.totalorder %s3711_s27, 3 }
   0x4   : > { %p263_p2 = pnand %p2883_p0, %p262_p1 }
   0x5   : > { %v3539_v0 = vld [vmem:[%s4502_s1 + $0x40] sm:$0xff] (!%p263_p2)   ;;  %v3713_v3 = vmov (!%p263_p2), 0.0   ;;  %v3543_v5 = vld [vmem:[%s4502_s1 + $0x48] sm:$0xff] (!%p263_p2)   ;;  %v3547_v9 = vld [vmem:[%s4502_s1 + $0x50] sm:$0xff] (!%p263_p2)   ;;  %p296_p3 = scmp.lt.s32.totalorder (!%p263_p2), %s2879_s28, 1  ;;  %vm3714_vm0 = vmmov (!%p263_p2), 0  }
   0x6   : > { %266 = sbr.rel (%p263_p2) target bundleno = 863 (0x35f), region = 52  ;;  %v3540_v1 = vld [vmem:[%s4502_s1] sm:$0xff] (!%p263_p2)   ;;  %3063 = vmatprep.subr.bf16.mxu0 (!%p263_p2), %v3539_v0  ;;  %307 = vst [vmem:[#allocation2] sm:$0xff] (!%p263_p2), %v3713_v3  ;;  %308 = vst [vmem:[#allocation2 + $0x8] sm:$0x3] (!%p263_p2), %v3713_v3  ;;  %v3544_v6 = vld [vmem:[%s4502_s1 + $0x8] sm:$0xff] (!%p263_p2)  }
   0x7   : > { %v3541_v2 = vld [vmem:[%s4502_s1 + $0xc0] sm:$0xff] (!%p263_p2)   ;;  %309 = vst [vmem:[#allocation2 + $0x10] sm:$0xff] (!%p263_p2), %v3713_v3  ;;  %310 = vst [vmem:[#allocation2 + $0x18] sm:$0x3] (!%p263_p2), %v3713_v3  ;;  %3064 = vmatpush3.bf16.msra.mxu0 (!%p263_p2), %v3540_v1  ;;  %v3545_v7 = vld [vmem:[%s4502_s1 + $0xc8] sm:$0xff] (!%p263_p2)   ;;  %vm2728_vm1 = vcmask (!%p263_p2), 523264  }
   0x8   : > { %311 = vst [vmem:[#allocation2 + $0x20] sm:$0xff] (!%p263_p2), %v3713_v3  ;;  %312 = vst [vmem:[#allocation2 + $0x28] sm:$0x3] (!%p263_p2), %v3713_v3  ;;  %v3542_v4 = vld [vmem:[%s4502_s1 + $0x80] sm:$0xff] (!%p263_p2)   ;;  %3103 = vmatprep.subr.bf16.mxu1 (!%p263_p2), %v3541_v2  ;;  %3065 = vmatprep.subr.bf16.mxu0 (!%p263_p2), %v3543_v5  ;;  %v3546_v8 = vld [vmem:[%s4502_s1 + $0x88] sm:$0xff] (!%p263_p2)  }
   0x9   : > { %313 = vst [vmem:[#allocation2 + $0x30] sm:$0xff] (!%p263_p2), %v3713_v3  ;;  %314 = vst [vmem:[#allocation2 + $0x38] sm:$0x3] (!%p263_p2), %v3713_v3  ;;  %3104 = vmatpush3.bf16.msra.mxu1 (!%p263_p2), %v3542_v4  ;;  %v3548_v10 = vld [vmem:[%s4502_s1 + $0x10] sm:$0xff] (!%p263_p2)   ;;  %v3551_v13 = vld [vmem:[%s4502_s1 + $0x58] sm:$0xff] (!%p263_p2)  }
   0xa   : > { %315 = vst [vmem:[#allocation2 + $0x40] sm:$0xff] (!%p263_p2), %v3713_v3  ;;  %316 = vst [vmem:[#allocation2 + $0x48] sm:$0x3] (!%p263_p2), %v3713_v3  ;;  %3105 = vmatprep.subr.bf16.mxu1 (!%p263_p2), %v3545_v7  ;;  %v3549_v11 = vld [vmem:[%s4502_s1 + $0xd0] sm:$0xff] (!%p263_p2)   ;;  %v3552_v14 = vld [vmem:[%s4502_s1 + $0x18] sm:$0xff] (!%p263_p2)  }
   0xb   : > { %317 = vst [vmem:[#allocation2 + $0x50] sm:$0xff] (!%p263_p2), %v3713_v3  ;;  %318 = vst [vmem:[#allocation2 + $0x58] sm:$0x3] (!%p263_p2), %v3713_v3  ;;  %3066 = vmatpush3.bf16.msra.mxu0 (!%p263_p2), %v3544_v6  ;;  %v3550_v12 = vld [vmem:[%s4502_s1 + $0x90] sm:$0xff] (!%p263_p2)   ;;  %v3553_v15 = vld [vmem:[%s4502_s1 + $0xd8] sm:$0xff] (!%p263_p2)  }
   0xc   : > { %319 = vst [vmem:[#allocation2 + $0x60] sm:$0xff] (!%p263_p2), %v3713_v3  ;;  %320 = vst [vmem:[#allocation2 + $0x68] sm:$0x3] (!%p263_p2), %v3713_v3  ;;  %3067 = vmatprep.subr.bf16.mxu0 (!%p263_p2), %v3547_v9  ;;  %v3554_v16 = vld [vmem:[%s4502_s1 + $0x98] sm:$0xff] (!%p263_p2)   ;;  %v3555_v17 = vld [vmem:[%s4502_s1 + $0x60] sm:$0xff] (!%p263_p2)  }
   0xd   : > { %321 = vst [vmem:[#allocation2 + $0x70] sm:$0xff] %v3713_v3  ;;  %322 = vst [vmem:[#allocation2 + $0x78] sm:$0x3] %v3713_v3  ;;  %3106 = vmatpush3.bf16.msra.mxu1 %v3546_v8  ;;  %v3556_v18 = vld [vmem:[%s4502_s1 + $0x20] sm:$0xff]   ;;  %v3559_v21 = vld [vmem:[%s4502_s1 + $0x68] sm:$0xff]   ;;  %s4511_s28 = smov (!%p296_p3, %s2879_s28), 1 }
   0xe   : > { %323 = vst [vmem:[#allocation2 + $0x80] sm:$0xff] %v3713_v3  ;;  %324 = vst [vmem:[#allocation2 + $0x88] sm:$0x3] %v3713_v3  ;;  %3107 = vmatprep.subr.bf16.mxu1 %v3549_v11  ;;  %v3557_v19 = vld [vmem:[%s4502_s1 + $0xe0] sm:$0xff]   ;;  %v3560_v22 = vld [vmem:[%s4502_s1 + $0x28] sm:$0xff]   ;;  %s3054_s19 = sshll.u32 %s4511_s28, 5 }
   0xf   : > { %325 = vst [vmem:[#allocation2 + $0x90] sm:$0xff] %v3713_v3  ;;  %326 = vst [vmem:[#allocation2 + $0x98] sm:$0x3] %v3713_v3  ;;  %3068 = vmatpush3.bf16.msra.mxu0 %v3548_v10  ;;  %v3558_v20 = vld [vmem:[%s4502_s1 + $0xa0] sm:$0xff]   ;;  %v3561_v23 = vld [vmem:[%s4502_s1 + $0xe8] sm:$0xff]   ;;  %s3885_s30 = scalar_lea.vmem %s4501_s0, %s3054_s19  ;;  %s3055_s15 = sshll.u32 %s4511_s28, 3 }
  0x10   : > { %3069 = vmatprep.subr.bf16.mxu0 %v3551_v13  ;;  %v3562_v24 = vld [vmem:[%s4502_s1 + $0xa8] sm:$0xff]   ;;  %v3563_v25 = vld [vmem:[%s4502_s1 + $0x70] sm:$0xff]   ;;  %v3567_v29 = vld [vmem:[%s4502_s1 + $0x78] sm:$0xff]   ;;  %s305_s18 = scalar_lea.vmem %s4509_s8, %s3055_s15 }
  0x11   : > { %3108 = vmatpush3.bf16.msra.mxu1 %v3550_v12  ;;  %v3564_v26 = vld [vmem:[%s4502_s1 + $0x30] sm:$0xff]   ;;  %v3568_v30 = vld [vmem:[%s4502_s1 + $0x38] sm:$0xff]   ;;  %v327_v32 = vld [vmem:[%s3885_s30] sm:$0xff]  }
  0x12   : > { %3109 = vmatprep.subr.bf16.mxu1 %v3553_v15  ;;  %v3565_v27 = vld [vmem:[%s4502_s1 + $0xf0] sm:$0xff]   ;;  %v3569_v31 = vld [vmem:[%s4502_s1 + $0xf8] sm:$0xff]   ;;  %v376_v33 = vld [vmem:[#allocation2 + $0x1] sm:$0xff]  ;;  %v335_v34 = vunpack.c.l.bf16 %v327_v32  ;;  %v336_v36 = vunpack.c.h.bf16 %v327_v32 }
  0x13   : > { %3070 = vmatpush3.bf16.msra.mxu0 %v3552_v14  ;;  %v3566_v28 = vld [vmem:[%s4502_s1 + $0xb0] sm:$0xff]   ;;  %v3570_v35 = vld [vmem:[%s4502_s1 + $0xb8] sm:$0xff]   ;;  %v3571_v37 = vld [vmem:[%s4502_s1 + $0x140] sm:$0xff]  }
  0x14   : > { %3071 = vmatprep.subr.bf16.mxu0 %v3555_v17  ;;  %v3900_v38 = vmax.f32 %v335_v34, 0.0  ;;  %v3902_v39 = vmax.f32 %v336_v36, 0.0  ;;  %v3573_v40 = vld [vmem:[%s4502_s1 + $0x1c0] sm:$0xff]   ;;  %v329_v42 = vld [vmem:[%s3885_s30 + $0x8] sm:$0xff]   ;;  %v3579_v61 = vld [vmem:[%s4502_s1 + $0x150] sm:$0xff]  }
  0x15   : > { %3110 = vmatpush3.bf16.msra.mxu1 %v3554_v16  ;;  %v392_v43 = vld [vmem:[#allocation2 + $0x2] sm:$0xff]  ;;  %v337_v44 = vunpack.c.l.bf16 %v329_v42  ;;  %v338_v45 = vunpack.c.h.bf16 %v329_v42  ;;  %v3581_v62 = vld [vmem:[%s4502_s1 + $0x1d0] sm:$0xff]   ;;  %v3583_v14 = vld [vmem:[%s4502_s1 + $0x158] sm:$0xff]  }
  0x16   : > { %3111 = vmatprep.subr.bf16.mxu1 %v3557_v19  ;;  %352 = vst [vmem:[#allocation2 + $0x11] sm:$0xff] %v3900_v38  ;;  %v384_v41 = vpack.c.bf16 %v3900_v38, %v376_v33  ;;  %353 = vst [vmem:[#allocation2 + $0x21] sm:$0xff] %v3902_v39  ;;  %v3572_v46 = vld [vmem:[%s4502_s1 + $0x100] sm:$0xff]   ;;  %v3575_v56 = vld [vmem:[%s4502_s1 + $0x148] sm:$0xff]  }
  0x17   : > { %3072 = vmatpush3.bf16.msra.mxu0 %v3556_v18  ;;  %v3916_v50 = vmax.f32 %v337_v44, 0.0  ;;  %v3918_v51 = vmax.f32 %v338_v45, 0.0  ;;  %v3574_v55 = vld [vmem:[%s4502_s1 + $0x180] sm:$0xff]   ;;  %v3577_v57 = vld [vmem:[%s4502_s1 + $0x1c8] sm:$0xff]   ;;  %v331_v63 = vld [vmem:[%s3885_s30 + $0x10] sm:$0xff]  }
  0x18   : > { %3073 = vmatprep.subr.bf16.mxu0 %v3559_v21  ;;  %1156 = vmatprep.mubr.bf16.mxu0 %v384_v41  ;;  %v3576_v59 = vld [vmem:[%s4502_s1 + $0x108] sm:$0xff]   ;;  %v3580_v0 = vld [vmem:[%s4502_s1 + $0x110] sm:$0xff]   ;;  %v339_v2 = vunpack.c.l.bf16 %v331_v63  ;;  %v340_v4 = vunpack.c.h.bf16 %v331_v63  ;;  %v3585_v15 = vld [vmem:[%s4502_s1 + $0x1d8] sm:$0xff]  }
  0x19   : > { %3112 = vmatpush3.bf16.msra.mxu1 %v3558_v20  ;;  %354 = vst [vmem:[#allocation2 + $0x31] sm:$0xff] %v3916_v50  ;;  %v3934_v58 = vpack.c.bf16 %v3916_v50, %v3902_v39  ;;  %355 = vst [vmem:[#allocation2 + $0x41] sm:$0xff] %v3918_v51  ;;  %v3578_v60 = vld [vmem:[%s4502_s1 + $0x188] sm:$0xff]   ;;  %v3582_v5 = vld [vmem:[%s4502_s1 + $0x190] sm:$0xff]  }
  0x1a   : > { %3113 = vmatprep.subr.bf16.mxu1 %v3561_v23  ;;  %v3961_v9 = vmax.f32 %v339_v2, 0.0  ;;  %v3963_v10 = vmax.f32 %v340_v4, 0.0  ;;  %v3584_v17 = vld [vmem:[%s4502_s1 + $0x118] sm:$0xff]   ;;  %v3587_v19 = vld [vmem:[%s4502_s1 + $0x160] sm:$0xff]   ;;  %v3591_v33 = vld [vmem:[%s4502_s1 + $0x168] sm:$0xff]  }
  0x1b   : > { %3074 = vmatpush3.bf16.msra.mxu0 %v3560_v22  ;;  %v3586_v18 = vld [vmem:[%s4502_s1 + $0x198] sm:$0xff]   ;;  %v3589_v20 = vld [vmem:[%s4502_s1 + $0x1e0] sm:$0xff]   ;;  %v3594_v41 = vld [vmem:[%s4502_s1 + $0x1a8] sm:$0xff]  }
  0x1c   : > { %3075 = vmatprep.subr.bf16.mxu0 %v3563_v25  ;;  %356 = vst [vmem:[#allocation2 + $0x51] sm:$0xff] %v3961_v9  ;;  %v3980_v16 = vpack.c.bf16 %v3961_v9, %v3918_v51  ;;  %357 = vst [vmem:[#allocation2 + $0x61] sm:$0xff] %v3963_v10  ;;  %v3588_v21 = vld [vmem:[%s4502_s1 + $0x120] sm:$0xff]   ;;  %v333_v23 = vld [vmem:[%s3885_s30 + $0x18] sm:$0xff]  }
  0x1d   : > { %3114 = vmatpush3.bf16.msra.mxu1 %v3562_v24  ;;  %v361_v47 = vld [vmem:[#allocation2 + $0x10] sm:$0xff]  ;;  %v409_v48 = vld [vmem:[#allocation2 + $0x20] sm:$0xff]  ;;  %v341_v25 = vunpack.c.l.bf16 %v333_v23  ;;  %v3604_v63 = vld [vmem:[%s4502_s1 + $0x208] sm:$0xff]  }
  0x1e   : > { %3115 = vmatprep.subr.bf16.mxu1 %v3565_v27  ;;  %v3914_v49 = vld [vmem:[#allocation2 + $0x12] sm:$0xff]  ;;  %v368_v52 = vpack.c.bf16 %v361_v47, %v3713_v3  ;;  %v416_v53 = vpack.c.bf16 %v409_v48, %v361_v47  ;;  %v3954_v1 = vld [vmem:[#allocation2 + $0x22] sm:$0xff] }
  0x1f   : > { %3076 = vmatpush3.bf16.msra.mxu0 %v3564_v26  ;;  %v400_v54 = vpack.c.bf16 %v3914_v49, %v392_v43  ;;  %v3590_v24 = vld [vmem:[%s4502_s1 + $0x1a0] sm:$0xff]   ;;  %v342_v26 = vunpack.c.h.bf16 %v333_v23  ;;  %v4018_v34 = vmax.f32 %v341_v25, 0.0  ;;  %v3595_v42 = vld [vmem:[%s4502_s1 + $0x170] sm:$0xff]   ;;  %v3599_v47 = vld [vmem:[%s4502_s1 + $0x178] sm:$0xff]  }
  0x20   : > { %3077 = vmatprep.subr.bf16.mxu0 %v3567_v29  ;;  %1221 = vmatprep.mubr.bf16.mxu1 %v416_v53  ;;  %v363_v6 = vld [vmem:[#allocation2 + $0x30] sm:$0xff]  ;;  %v411_v7 = vld [vmem:[#allocation2 + $0x40] sm:$0xff]  ;;  %v3600_v53 = vld [vmem:[%s4502_s1 + $0x138] sm:$0xff]  }
  0x21   : > { %3116 = vmatpush3.bf16.msra.mxu1 %v3566_v28  ;;  %v3959_v8 = vld [vmem:[#allocation2 + $0x32] sm:$0xff]  ;;  %v3965_v11 = vpack.c.bf16 %v363_v6, %v409_v48  ;;  %v417_v12 = vpack.c.bf16 %v411_v7, %v363_v6  ;;  %v4001_v22 = vld [vmem:[#allocation2 + $0x42] sm:$0xff]  ;;  %v4023_v36 = vmax.f32 %v342_v26, 0.0  ;;  %358 = vst [vmem:[#allocation2 + $0x71] sm:$0xff] %v4018_v34 }
  0x22   : > { %3117 = vmatprep.subr.bf16.mxu1 %v3569_v31  ;;  %v3969_v13 = vpack.c.bf16 %v3959_v8, %v3954_v1  ;;  %v3596_v43 = vld [vmem:[%s4502_s1 + $0x130] sm:$0xff]   ;;  %v3607_v2 = vld [vmem:[%s4502_s1 + $0x220] sm:$0xff]   ;;  %v3623_v25 = vld [vmem:[%s4504_s3 + $0x58] sm:$0xff]  }
  0x23   : > { %3078 = vmatpush3.bf16.msra.mxu0 %v3568_v30  ;;  %v365_v27 = vld [vmem:[#allocation2 + $0x50] sm:$0xff]  ;;  %v413_v28 = vld [vmem:[#allocation2 + $0x60] sm:$0xff]  ;;  %359 = vst [vmem:[#allocation2 + $0x81] sm:$0xff] %v4023_v36  ;;  %v3624_v26 = vld [vmem:[%s4504_s3 + $0x18] sm:$0xff]  }
  0x24   : > { %3143 = vmatprep.subr.bf16.mxu0 %v3571_v37  ;;  %v4007_v29 = vld [vmem:[#allocation2 + $0x52] sm:$0xff]  ;;  %v4009_v30 = vpack.c.bf16 %v365_v27, %v411_v7  ;;  %v418_v31 = vpack.c.bf16 %v413_v28, %v365_v27  ;;  %v3592_v37 = vld [vmem:[%s4502_s1 + $0x128] sm:$0xff]  }
  0x25   : > { %3118 = vmatpush3.bf16.msra.mxu1 %v3570_v35  ;;  %v4013_v32 = vpack.c.bf16 %v4007_v29, %v4001_v22  ;;  %v3593_v35 = vld [vmem:[%s4502_s1 + $0x1e8] sm:$0xff]   ;;  %v3597_v44 = vld [vmem:[%s4502_s1 + $0x1f0] sm:$0xff]   ;;  %v3625_v27 = vld [vmem:[%s4504_s3 + $0xd8] sm:$0xff]  }
  0x26   : > { %3183 = vmatprep.subr.bf16.mxu1 %v3573_v40  ;;  %1157 = vmatmul.mubr.bf16.vlgmr.msra.gmra.mrb[0].mxu0 %v368_v52  ;;  %v4032_v40 = vpack.c.bf16 %v4018_v34, %v3963_v10  ;;  %v398_v45 = vld [vmem:[#allocation2 + $0x62] sm:$0xff]  ;;  %v3621_v23 = vld [vmem:[%s4504_s3 + $0xd0] sm:$0xff]  }
  0x27   : > { %3144 = vmatpush3.bf16.msra.mxu0 %v3572_v46  ;;  %1164 = vmatprep.mubr.bf16.mxu0 %v3934_v58  ;;  %v3598_v46 = vld [vmem:[%s4502_s1 + $0x1b0] sm:$0xff]  }
  0x28   : > { %1222 = vmatmul.mubr.bf16.vlgmr.msra.gmra.mrb[0].mxu1 %v400_v54  ;;  %3145 = vmatprep.subr.bf16.mxu0 %v3575_v56  ;;  %v367_v48 = vld [vmem:[#allocation2 + $0x70] sm:$0xff] }
  0x29   : > { %3184 = vmatpush3.bf16.msra.mxu1 %v3574_v55  ;;  %1229 = vmatprep.mubr.bf16.mxu1 %v417_v12  ;;  %v399_v52 = vld [vmem:[#allocation2 + $0x72] sm:$0xff]  ;;  %v371_v54 = vpack.c.bf16 %v367_v48, %v413_v28 }
  0x2a   : > { %3185 = vmatprep.subr.bf16.mxu1 %v3577_v57  ;;  %v415_v55 = vld [vmem:[#allocation2 + $0x80] sm:$0xff]  ;;  %v4058_v56 = vpack.c.bf16 %v399_v52, %v398_v45  ;;  %v3601_v57 = vld [vmem:[%s4502_s1 + $0x1f8] sm:$0xff]  }
  0x2b   : > { %3146 = vmatpush3.bf16.msra.mxu0 %v3576_v59  ;;  %v419_v59 = vpack.c.bf16 %v415_v55, %v367_v48  ;;  %v447_v4 = vld [vmem:[#allocation2 + $0x82] sm:$0xff]  ;;  %v496_v12 = vld [vmem:[#allocation2 + $0x92] sm:$0xff] }
  0x2c   : > { %3147 = vmatprep.subr.bf16.mxu0 %v3579_v61  ;;  %v3602_v61 = vld [vmem:[%s4502_s1 + $0x1b8] sm:$0xff]   ;;  %v451_v6 = vpack.c.bf16 %v447_v4, %v399_v52  ;;  %v3645_v48 = vld [vmem:[%s4504_s3 + $0x1c0] sm:$0xff]  }
  0x2d   : > { %3186 = vmatpush3.bf16.msra.mxu1 %v3578_v60  ;;  %v448_v60 = vpack.c.bf16 %v3954_v1, %v3914_v49  ;;  %v432_v49 = vpack.c.bf16 %v3902_v39, %v3900_v38  ;;  %v3605_v1 = vld [vmem:[%s4502_s1 + $0x210] sm:$0xff]   ;;  %v433_v38 = vpack.c.bf16 %v3918_v51, %v3916_v50  ;;  %v3606_v39 = vld [vmem:[%s4502_s1 + $0x218] sm:$0xff]   ;;  %v434_v51 = vpack.c.bf16 %v3963_v10, %v3961_v9 }
  0x2e   : > { %3187 = vmatprep.subr.bf16.mxu1 %v3581_v62  ;;  %1165 = vmatmul.mubr.bf16.gmra.mrb[4].mxu0 %v3965_v11  ;;  %v3603_v62 = vld [vmem:[%s4502_s1 + $0x200] sm:$0xff]   ;;  %v480_v50 = vld [vmem:[#allocation2 + $0x91] sm:$0xff]  ;;  %v435_v9 = vpack.c.bf16 %v4023_v36, %v4018_v34  ;;  %v3632_v34 = vld [vmem:[%s4504_s3 + $0x28] sm:$0xff]  }
  0x2f   : > { %3148 = vmatpush3.bf16.msra.mxu0 %v3580_v0  ;;  %1172 = vmatprep.mubr.bf16.mxu0 %v3980_v16  ;;  %v449_v0 = vpack.c.bf16 %v4001_v22, %v3959_v8  ;;  %v484_v7 = vpack.c.bf16 %v480_v50, %v4023_v36  ;;  %v3609_v8 = vld [vmem:[%s4502_s1 + $0x230] sm:$0xff]   ;;  %v3610_v10 = vld [vmem:[%s4502_s1 + $0x238] sm:$0xff]   ;;  %v3634_v36 = vld [vmem:[%s4504_s3 + $0xa8] sm:$0xff]  }
  0x30   : > { %1230 = vmatmul.mubr.bf16.gmra.mrb[4].mxu1 %v3969_v13  ;;  %3149 = vmatprep.subr.bf16.mxu0 %v3583_v14  ;;  %v500_v14 = vpack.c.bf16 %v496_v12, %v447_v4  ;;  %v3620_v22 = vld [vmem:[%s4504_s3 + $0x10] sm:$0xff]   ;;  %v3626_v28 = vld [vmem:[%s4504_s3 + $0x98] sm:$0xff]  }
  0x31   : > { %3188 = vmatpush3.bf16.msra.mxu1 %v3582_v5  ;;  %1237 = vmatprep.mubr.bf16.mxu1 %v418_v31  ;;  %v3608_v5 = vld [vmem:[%s4502_s1 + $0x228] sm:$0xff]   ;;  %v3629_v31 = vld [vmem:[%s4504_s3 + $0xe0] sm:$0xff]  }
  0x32   : > { %3189 = vmatprep.subr.bf16.mxu1 %v3585_v15  ;;  %v3611_v15 = vld [vmem:[%s4504_s3 + $0x40] sm:$0xff]  }
  0x33   : > { %3150 = vmatpush3.bf16.msra.mxu0 %v3584_v17  ;;  %v3615_v17 = vld [vmem:[%s4504_s3 + $0x48] sm:$0xff]  }
  0x34   : > { %3151 = vmatprep.subr.bf16.mxu0 %v3587_v19  ;;  %v3617_v19 = vld [vmem:[%s4504_s3 + $0xc8] sm:$0xff]  }
  0x35   : > { %3190 = vmatpush3.bf16.msra.mxu1 %v3586_v18  ;;  %v3616_v18 = vld [vmem:[%s4504_s3 + $0x8] sm:$0xff]  }
  0x36   : > { %3191 = vmatprep.subr.bf16.mxu1 %v3589_v20  ;;  %1173 = vmatmul.mubr.bf16.gmra.mrb[8].mxu0 %v4009_v30  ;;  %v3618_v20 = vld [vmem:[%s4504_s3 + $0x88] sm:$0xff]  }
  0x37   : > { %3152 = vmatpush3.bf16.msra.mxu0 %v3588_v21  ;;  %1180 = vmatprep.mubr.bf16.mxu0 %v4032_v40  ;;  %v3619_v21 = vld [vmem:[%s4504_s3 + $0x50] sm:$0xff]  }
  0x38   : > { %1238 = vmatmul.mubr.bf16.gmra.mrb[8].mxu1 %v4013_v32  ;;  %3153 = vmatprep.subr.bf16.mxu0 %v3591_v33  ;;  %v3631_v33 = vld [vmem:[%s4504_s3 + $0x68] sm:$0xff]  }
  0x39   : > { %3192 = vmatpush3.bf16.msra.mxu1 %v3590_v24  ;;  %1245 = vmatprep.mubr.bf16.mxu1 %v419_v59  ;;  %v3622_v24 = vld [vmem:[%s4504_s3 + $0x90] sm:$0xff]  }
  0x3a   : > { %3193 = vmatprep.subr.bf16.mxu1 %v3593_v35  ;;  %v3633_v35 = vld [vmem:[%s4504_s3 + $0xe8] sm:$0xff]  }
  0x3b   : > { %3154 = vmatpush3.bf16.msra.mxu0 %v3592_v37  ;;  %v3635_v37 = vld [vmem:[%s4504_s3 + $0x70] sm:$0xff]  }
  0x3c   : > { %3155 = vmatprep.subr.bf16.mxu0 %v3595_v42  ;;  %v3638_v42 = vld [vmem:[%s4504_s3 + $0xb0] sm:$0xff]  }
  0x3d   : > { %3194 = vmatpush3.bf16.msra.mxu1 %v3594_v41  ;;  %v3637_v41 = vld [vmem:[%s4504_s3 + $0xf0] sm:$0xff]  }
  0x3e   : > { %3195 = vmatprep.subr.bf16.mxu1 %v3597_v44  ;;  %1181 = vmatmul.mubr.bf16.gmra.mrb[12].mxu0 %v371_v54  ;;  %v3640_v44 = vld [vmem:[%s4504_s3 + $0x38] sm:$0xff]  }
  0x3f   : > { %3156 = vmatpush3.bf16.msra.mxu0 %v3596_v43  ;;  %1286 = vmatprep.mubr.bf16.mxu0 %v448_v60  ;;  %v3639_v43 = vld [vmem:[%s4504_s3 + $0x78] sm:$0xff]  }
  0x40   : > { %3157 = vmatprep.subr.bf16.mxu0 %v3599_v47  ;;  %1246 = vmatmul.mubr.bf16.gmra.mrb[12].mxu1 %v4058_v56  ;;  %v3643_v47 = vld [vmem:[%s4504_s3 + $0x140] sm:$0xff]  }
  0x41   : > { %3196 = vmatpush3.bf16.msra.mxu1 %v3598_v46  ;;  %1351 = vmatprep.mubr.bf16.mxu1 %v3934_v58  ;;  %v450_v58 = vpack.c.bf16 %v398_v45, %v4007_v29  ;;  %v3627_v29 = vld [vmem:[%s4504_s3 + $0x60] sm:$0xff]   ;;  %v3641_v45 = vld [vmem:[%s4504_s3 + $0xf8] sm:$0xff]  }
  0x42   : > { %3197 = vmatprep.subr.bf16.mxu1 %v3601_v57  ;;  %v3642_v46 = vld [vmem:[%s4504_s3 + $0xb8] sm:$0xff]  }
  0x43   : > { %3158 = vmatpush3.bf16.msra.mxu0 %v3600_v53  ;;  %v2888_v53 = vld [vmem:[%s4503_s2] ss:$0 sm:$0xff] }
  0x44   : > { %3429 = vmatprep.subr.bf16.mxu0 %v3603_v62 }
  0x45   : > { %3198 = vmatpush3.bf16.msra.mxu1 %v3602_v61 }
  0x46   : > { %1287 = vmatmul.mubr.bf16.vlgmr.msra.gmra.mrb[16].mxu0 %v432_v49  ;;  %3235 = vmatprep.subr.bf16.mxu1 %v3611_v15 }
  0x47   : > { %3430 = vmatpush3.bf16.msra.mxu0 %v3603_v62  ;;  %1294 = vmatprep.mubr.bf16.mxu0 %v449_v0 }
  0x48   : > { %1352 = vmatmul.mubr.bf16.vlgmr.msra.gmra.mrb[16].mxu1 %v3965_v11  ;;  %3431 = vmatprep.subr.bf16.mxu0 %v3604_v63  ;;  %v468_v11 = vpack.c.bf16 %v3713_v3, %v415_v55  ;;  %v3612_v3 = vld [vmem:[%s4504_s3] sm:$0xff]  }
  0x49   : > { %1359 = vmatprep.mubr.bf16.mxu1 %v3980_v16  ;;  %3236 = vmatpush3.bf16.msra.mxu1 %v3612_v3  ;;  %v3614_v16 = vld [vmem:[%s4504_s3 + $0x80] sm:$0xff]  }
  0x4a   : > { %3237 = vmatprep.subr.bf16.mxu1 %v3615_v17 }
  0x4b   : > { %3432 = vmatpush3.bf16.msra.mxu0 %v3604_v63 }
  0x4c   : > { %3433 = vmatprep.subr.bf16.mxu0 %v3605_v1 }
  0x4d   : > { %3238 = vmatpush3.bf16.msra.mxu1 %v3616_v18 }
  0x4e   : > { %1295 = vmatmul.mubr.bf16.gmra.mrb[20].mxu0 %v433_v38  ;;  %3239 = vmatprep.subr.bf16.mxu1 %v3619_v21 }
  0x4f   : > { %3434 = vmatpush3.bf16.msra.mxu0 %v3605_v1  ;;  %1302 = vmatprep.mubr.bf16.mxu0 %v450_v58 }
  0x50   : > { %1360 = vmatmul.mubr.bf16.gmra.mrb[20].mxu1 %v4009_v30  ;;  %3435 = vmatprep.subr.bf16.mxu0 %v3606_v39  ;;  %v3628_v30 = vld [vmem:[%s4504_s3 + $0x20] sm:$0xff]  }
  0x51   : > { %1367 = vmatprep.mubr.bf16.mxu1 %v4032_v40  ;;  %3240 = vmatpush3.bf16.msra.mxu1 %v3620_v22  ;;  %v3636_v40 = vld [vmem:[%s4504_s3 + $0x30] sm:$0xff]  }
  0x52   : > { %3241 = vmatprep.subr.bf16.mxu1 %v3623_v25 }
  0x53   : > { %3436 = vmatpush3.bf16.msra.mxu0 %v3606_v39 }
  0x54   : > { %3437 = vmatprep.subr.bf16.mxu0 %v3607_v2 }
  0x55   : > { %3242 = vmatpush3.bf16.msra.mxu1 %v3624_v26 }
  0x56   : > { %1303 = vmatmul.mubr.bf16.gmra.mrb[24].mxu0 %v434_v51  ;;  %3243 = vmatprep.subr.bf16.mxu1 %v3627_v29 }
  0x57   : > { %3438 = vmatpush3.bf16.msra.mxu0 %v3607_v2  ;;  %1310 = vmatprep.mubr.bf16.mxu0 %v451_v6 }
  0x58   : > { %1368 = vmatmul.mubr.bf16.gmra.mrb[24].mxu1 %v371_v54  ;;  %3439 = vmatprep.subr.bf16.mxu0 %v3608_v5 }
  0x59   : > { %1375 = vmatprep.mubr.bf16.mxu1 %v484_v7  ;;  %3244 = vmatpush3.bf16.msra.mxu1 %v3628_v30 }
  0x5a   : > { %3245 = vmatprep.subr.bf16.mxu1 %v3631_v33 }
  0x5b   : > { %3440 = vmatpush3.bf16.msra.mxu0 %v3608_v5 }
  0x5c   : > { %3441 = vmatprep.subr.bf16.mxu0 %v3609_v8 }
  0x5d   : > { %3246 = vmatpush3.bf16.msra.mxu1 %v3632_v34 }
  0x5e   : > { %1311 = vmatmul.mubr.bf16.gmra.mrb[28].mxu0 %v435_v9  ;;  %3247 = vmatprep.subr.bf16.mxu1 %v3635_v37 }
  0x5f   : > { %3442 = vmatpush3.bf16.msra.mxu0 %v3609_v8  ;;  %3445 = vmatprep.mubr.bf16.mxu0 %v3969_v13  ;;  %v3613_v13 = vld [vmem:[%s4504_s3 + $0xc0] sm:$0xff]  }
  0x60   : > { %1376 = vmatmul.mubr.bf16.gmra.mrb[28].mxu1 %v468_v11  ;;  %3443 = vmatprep.subr.bf16.mxu0 %v3610_v10 }
  0x61   : > { %3248 = vmatpush3.bf16.msra.mxu1 %v3636_v40 }
  0x62   : > { %3249 = vmatprep.subr.bf16.mxu1 %v3639_v43 }
  0x63   : > { %3444 = vmatpush3.bf16.msra.mxu0 %v3610_v10 }
  0x64   : > { %3275 = vmatprep.subr.bf16.mxu0 %v3613_v13 }
  0x65   : > { %3250 = vmatpush3.bf16.msra.mxu1 %v3640_v44 }
  0x66   : > { %3446 = vmatmul.mubr.bf16.vlgmr.msra.gmra.mrb[32].mxu0 %v4013_v32  ;;  %v3630_v32 = vld [vmem:[%s4504_s3 + $0xa0] sm:$0xff]   ;;  %3315 = vmatprep.subr.bf16.mxu1 %v3643_v47 }
  0x67   : > { %3449 = vmatprep.mubr.bf16.mxu0 %v4058_v56  ;;  %3276 = vmatpush3.bf16.msra.mxu0 %v3614_v16 }
  0x68   : > { %3277 = vmatprep.subr.bf16.mxu0 %v3617_v19 }
  0x6b   : > { %3278 = vmatpush3.bf16.msra.mxu0 %v3618_v20 }
  0x6c   : > { %3279 = vmatprep.subr.bf16.mxu0 %v3621_v23 }
  0x6e   : > { %3450 = vmatmul.mubr.bf16.gmra.mrb[36].mxu0 %v500_v14 }
  0x6f   : > { %3280 = vmatpush3.bf16.msra.mxu0 %v3622_v24 }
  0x70   : > { %3281 = vmatprep.subr.bf16.mxu0 %v3625_v27 }
  0x73   : > { %3282 = vmatpush3.bf16.msra.mxu0 %v3626_v28 }
  0x74   : > { %3283 = vmatprep.subr.bf16.mxu0 %v3629_v31 }
  0x77   : > { %3284 = vmatpush3.bf16.msra.mxu0 %v3630_v32 }
  0x78   : > { %3285 = vmatprep.subr.bf16.mxu0 %v3633_v35 }
  0x7b   : > { %3286 = vmatpush3.bf16.msra.mxu0 %v3634_v36 }
  0x7c   : > { %3287 = vmatprep.subr.bf16.mxu0 %v3637_v41 }
  0x7f   : > { %3288 = vmatpush3.bf16.msra.mxu0 %v3638_v42 }
  0x80   : > { %3289 = vmatprep.subr.bf16.mxu0 %v3641_v45 }
  0x83   : > { %3290 = vmatpush3.bf16.msra.mxu0 %v3642_v46 }
  0x84   : > { %3355 = vmatprep.subr.bf16.mxu0 %v3645_v48 }
  0xf9   : > { %v3079_v52 = vpop.f32.mrb[0].mxu0 }
  0xfa   : > { %v3080_v54 = vpop.f32.mrb[1].mxu0 }
  0xfb   : > { %v3119_v55 = vpop.f32.mrb[0].mxu1  ;;  %v3081_v56 = vadd.f32 %v3080_v54, %v3079_v52  ;;  %v3082_v57 = vpop.f32.mrb[2].mxu0 }
  0xfc   : > { %v3120_v59 = vpop.f32.mrb[1].mxu1  ;;  %v3083_v60 = vpop.f32.mrb[3].mxu0 }
  0xfd   : > { %v3121_v61 = vadd.f32 %v3120_v59, %v3119_v55  ;;  %v3122_v62 = vpop.f32.mrb[2].mxu1  ;;  %v1159_v49 = vadd.f32 %v3081_v56, %v2888_v53  ;;  %v3084_v63 = vadd.f32 %v3083_v60, %v3082_v57 }
  0xfe   : > { %v3123_v0 = vpop.f32.mrb[3].mxu1 }
  0xff   : > { %v3124_v1 = vadd.f32 %v3123_v0, %v3122_v62  ;;  %v1162_v38 = vadd.f32 %v3084_v63, %v2888_v53  ;;  %v1224_v39 = vadd.f32 %v3121_v61, %v1159_v49 }
 0x101   : > { %v1227_v58 = vadd.f32 %v3124_v1, %v1162_v38  ;;  %v3085_v2 = vpop.f32.mrb[4].mxu0 }
 0x102   : > { %v3086_v4 = vpop.f32.mrb[5].mxu0 }
 0x103   : > { %v3125_v50 = vpop.f32.mrb[4].mxu1  ;;  %v3087_v51 = vadd.f32 %v3086_v4, %v3085_v2  ;;  %v3088_v5 = vpop.f32.mrb[6].mxu0 }
 0x104   : > { %v3126_v6 = vpop.f32.mrb[5].mxu1  ;;  %v3089_v7 = vpop.f32.mrb[7].mxu0 }
 0x105   : > { %v3127_v8 = vadd.f32 %v3126_v6, %v3125_v50  ;;  %v3128_v9 = vpop.f32.mrb[6].mxu1  ;;  %v1167_v10 = vadd.f32 %v3087_v51, %v2888_v53  ;;  %v3090_v11 = vadd.f32 %v3089_v7, %v3088_v5 }
 0x106   : > { %v3129_v12 = vpop.f32.mrb[7].mxu1 }
 0x107   : > { %v3130_v14 = vadd.f32 %v3129_v12, %v3128_v9  ;;  %v1170_v15 = vadd.f32 %v3090_v11, %v2888_v53  ;;  %v1232_v3 = vadd.f32 %v3127_v8, %v1167_v10 }
 0x109   : > { %v1235_v13 = vadd.f32 %v3130_v14, %v1170_v15  ;;  %v3091_v16 = vpop.f32.mrb[8].mxu0 }
 0x10a   : > { %v3092_v17 = vpop.f32.mrb[9].mxu0 }
 0x10b   : > { %v3131_v18 = vpop.f32.mrb[8].mxu1  ;;  %v3093_v19 = vadd.f32 %v3092_v17, %v3091_v16  ;;  %v3094_v20 = vpop.f32.mrb[10].mxu0 }
 0x10c   : > { %v3132_v21 = vpop.f32.mrb[9].mxu1  ;;  %v3095_v22 = vpop.f32.mrb[11].mxu0 }
 0x10d   : > { %v3133_v23 = vadd.f32 %v3132_v21, %v3131_v18  ;;  %v3134_v24 = vpop.f32.mrb[10].mxu1  ;;  %v1175_v25 = vadd.f32 %v3093_v19, %v2888_v53  ;;  %v3096_v26 = vadd.f32 %v3095_v22, %v3094_v20 }
 0x10e   : > { %v3135_v27 = vpop.f32.mrb[11].mxu1 }
 0x10f   : > { %v3136_v28 = vadd.f32 %v3135_v27, %v3134_v24  ;;  %v1178_v29 = vadd.f32 %v3096_v26, %v2888_v53  ;;  %v1240_v30 = vadd.f32 %v3133_v23, %v1175_v25 }
 0x111   : > { %v1243_v31 = vadd.f32 %v3136_v28, %v1178_v29  ;;  %v3097_v32 = vpop.f32.mrb[12].mxu0 }
 0x112   : > { %v3098_v33 = vpop.f32.mrb[13].mxu0 }
 0x113   : > { %v3099_v34 = vadd.f32 %v3098_v33, %v3097_v32  ;;  %v3100_v35 = vpop.f32.mrb[14].mxu0  ;;  %v3137_v36 = vpop.f32.mrb[12].mxu1 }
 0x114   : > { %v3101_v37 = vpop.f32.mrb[15].mxu0  ;;  %v3138_v40 = vpop.f32.mrb[13].mxu1 }
 0x115   : > { %v1183_v41 = vadd.f32 %v3099_v34, %v2888_v53  ;;  %v3102_v42 = vadd.f32 %v3101_v37, %v3100_v35  ;;  %v3139_v43 = vadd.f32 %v3138_v40, %v3137_v36  ;;  %v3140_v44 = vpop.f32.mrb[14].mxu1 }
 0x116   : > { %v3141_v45 = vpop.f32.mrb[15].mxu1 }
 0x117   : > { %v1186_v46 = vadd.f32 %v3102_v42, %v2888_v53  ;;  %v1248_v47 = vadd.f32 %v3139_v43, %v1183_v41  ;;  %v3142_v48 = vadd.f32 %v3141_v45, %v3140_v44 }
 0x119   : > { %v1251_v52 = vadd.f32 %v3142_v48, %v1186_v46  ;;  %v3159_v54 = vpop.f32.mrb[16].mxu0 }
 0x11a   : > { %v3160_v55 = vpop.f32.mrb[17].mxu0 }
 0x11b   : > { %v3161_v56 = vadd.f32 %v3160_v55, %v3159_v54  ;;  %v3162_v57 = vpop.f32.mrb[18].mxu0  ;;  %v3199_v59 = vpop.f32.mrb[16].mxu1 }
 0x11c   : > { %v3163_v60 = vpop.f32.mrb[19].mxu0  ;;  %v3200_v61 = vpop.f32.mrb[17].mxu1 }
 0x11d   : > { %v1289_v62 = vadd.f32 %v3161_v56, %v1224_v39  ;;  %v3164_v49 = vadd.f32 %v3163_v60, %v3162_v57  ;;  %v3201_v63 = vadd.f32 %v3200_v61, %v3199_v59  ;;  %v3202_v0 = vpop.f32.mrb[18].mxu1 }
 0x11e   : > { %v3203_v1 = vpop.f32.mrb[19].mxu1 }
 0x11f   : > { %v1292_v38 = vadd.f32 %v3164_v49, %v1227_v58  ;;  %v3204_v2 = vadd.f32 %v3203_v1, %v3202_v0  ;;  %v1354_v4 = vadd.f32 %v3201_v63, %v1289_v62  ;;  %v1481_v0 = vld [vmem:[#allocation2 + $0x1] sm:$0xff] }
 0x121   : > { %v3165_v50 = vpop.f32.mrb[20].mxu0  ;;  %v1357_v53 = vadd.f32 %v3204_v2, %v1292_v38 }
 0x122   : > { %v3166_v51 = vpop.f32.mrb[21].mxu0 }
 0x123   : > { %v3167_v5 = vadd.f32 %v3166_v51, %v3165_v50  ;;  %v3168_v6 = vpop.f32.mrb[22].mxu0  ;;  %v3205_v7 = vpop.f32.mrb[20].mxu1 }
 0x124   : > { %v3169_v8 = vpop.f32.mrb[23].mxu0  ;;  %v3206_v9 = vpop.f32.mrb[21].mxu1 }
 0x125   : > { %v1297_v10 = vadd.f32 %v3167_v5, %v1232_v3  ;;  %v3170_v11 = vadd.f32 %v3169_v8, %v3168_v6  ;;  %v3207_v12 = vadd.f32 %v3206_v9, %v3205_v7  ;;  %v3208_v14 = vpop.f32.mrb[22].mxu1 }
 0x126   : > { %v3209_v39 = vpop.f32.mrb[23].mxu1 }
 0x127   : > { %v1300_v15 = vadd.f32 %v3170_v11, %v1235_v13  ;;  %v3210_v16 = vadd.f32 %v3209_v39, %v3208_v14  ;;  %v1362_v17 = vadd.f32 %v3207_v12, %v1297_v10 }
 0x129   : > { %v3171_v18 = vpop.f32.mrb[24].mxu0  ;;  %v1365_v58 = vadd.f32 %v3210_v16, %v1300_v15  ;;  %v3644_v16 = vld [vmem:[%s4504_s3 + $0x100] sm:$0xff]  }
 0x12a   : > { %v3172_v19 = vpop.f32.mrb[25].mxu0 }
 0x12b   : > { %v3173_v20 = vadd.f32 %v3172_v19, %v3171_v18  ;;  %v3174_v21 = vpop.f32.mrb[26].mxu0  ;;  %v3211_v22 = vpop.f32.mrb[24].mxu1  ;;  %v4253_v18 = vld [vmem:[#allocation2] sm:$0xff] }
 0x12c   : > { %v3175_v23 = vpop.f32.mrb[27].mxu0  ;;  %v3212_v24 = vpop.f32.mrb[25].mxu1  ;;  %v1497_v19 = vld [vmem:[#allocation2 + $0x2] sm:$0xff] }
 0x12d   : > { %v1305_v25 = vadd.f32 %v3173_v20, %v1240_v30  ;;  %v3176_v26 = vadd.f32 %v3175_v23, %v3174_v21  ;;  %v3213_v27 = vadd.f32 %v3212_v24, %v3211_v22  ;;  %v3214_v28 = vpop.f32.mrb[26].mxu1  ;;  %v3647_v21 = vld [vmem:[%s4504_s3 + $0x148] sm:$0xff]  }
 0x12e   : > { %v3215_v3 = vpop.f32.mrb[27].mxu1 }
 0x12f   : > { %v1308_v29 = vadd.f32 %v3176_v26, %v1243_v31  ;;  %v3216_v32 = vadd.f32 %v3215_v3, %v3214_v28  ;;  %v1370_v33 = vadd.f32 %v3213_v27, %v1305_v25  ;;  %v3646_v27 = vld [vmem:[%s4504_s3 + $0x180] sm:$0xff]  }
 0x131   : > { %v3177_v34 = vpop.f32.mrb[28].mxu0  ;;  %v1373_v13 = vadd.f32 %v3216_v32, %v1308_v29  ;;  %v3648_v32 = vld [vmem:[%s4504_s3 + $0x108] sm:$0xff]  }
 0x132   : > { %v3178_v35 = vpop.f32.mrb[29].mxu0 }
 0x133   : > { %v3179_v36 = vadd.f32 %v3178_v35, %v3177_v34  ;;  %v3180_v37 = vpop.f32.mrb[30].mxu0  ;;  %v3217_v40 = vpop.f32.mrb[28].mxu1  ;;  %v3651_v35 = vld [vmem:[%s4504_s3 + $0x150] sm:$0xff]  }
 0x134   : > { %v3181_v41 = vpop.f32.mrb[31].mxu0  ;;  %v3218_v42 = vpop.f32.mrb[29].mxu1 }
 0x135   : > { %v1313_v43 = vadd.f32 %v3179_v36, %v1248_v47  ;;  %v3182_v44 = vadd.f32 %v3181_v41, %v3180_v37  ;;  %v3219_v45 = vadd.f32 %v3218_v42, %v3217_v40  ;;  %v3220_v46 = vpop.f32.mrb[30].mxu1  ;;  %v3650_v36 = vld [vmem:[%s4504_s3 + $0x188] sm:$0xff]   ;;  %v3652_v37 = vld [vmem:[%s4504_s3 + $0x110] sm:$0xff]  }
 0x136   : > { %v3221_v30 = vpop.f32.mrb[31].mxu1  ;;  %v3653_v42 = vld [vmem:[%s4504_s3 + $0x1d0] sm:$0xff]  }
 0x137   : > { %v1316_v48 = vadd.f32 %v3182_v44, %v1251_v52  ;;  %v3222_v54 = vadd.f32 %v3221_v30, %v3220_v46  ;;  %v1378_v55 = vadd.f32 %v3219_v45, %v1313_v43  ;;  %v3655_v43 = vld [vmem:[%s4504_s3 + $0x158] sm:$0xff]   ;;  %v3654_v46 = vld [vmem:[%s4504_s3 + $0x190] sm:$0xff]  }
 0x139   : > { %v3447_v56 = vpop.f32.mrb[32].mxu0  ;;  %v1381_v31 = vadd.f32 %v3222_v54, %v1316_v48  ;;  %v3656_v54 = vld [vmem:[%s4504_s3 + $0x118] sm:$0xff]  }
 0x13a   : > { %v1427_v57 = vadd.f32 %v3447_v56, %v1362_v17  ;;  %v1418_v59 = vpop.f32.mrb[33].mxu0 }
 0x13b   : > { %v1419_v60 = vadd.f32 %v1418_v59, %v1354_v4  ;;  %v3448_v61 = vpop.f32.mrb[34].mxu0  ;;  %v3660_v59 = vld [vmem:[%s4504_s3 + $0x120] sm:$0xff]  }
 0x13c   : > { %v4219_v62 = vmax.f32 %v1427_v57, 0.0  ;;  %v1430_v49 = vadd.f32 %v3448_v61, %v1365_v58  ;;  %v1421_v63 = vpop.f32.mrb[35].mxu0  ;;  %v3658_v57 = vld [vmem:[%s4504_s3 + $0x198] sm:$0xff]  }
 0x13d   : > { %v4221_v1 = vmax.f32 %v1419_v60, 0.0  ;;  %v1422_v47 = vadd.f32 %v1421_v63, %v1357_v53  ;;  %v3663_v63 = vld [vmem:[%s4504_s3 + $0x168] sm:$0xff]  }
 0x13e   : > { %1459 = vst [vmem:[#allocation2 + $0x31] sm:$0xff] %v4219_v62  ;;  %v4224_v38 = vmax.f32 %v1430_v49, 0.0  ;;  %v3661_v49 = vld [vmem:[%s4504_s3 + $0x1e0] sm:$0xff]  }
 0x13f   : > { %1457 = vst [vmem:[#allocation2 + $0x11] sm:$0xff] %v4221_v1  ;;  %v4227_v52 = vmax.f32 %v1422_v47, 0.0  ;;  %v1489_v2 = vpack.c.bf16 %v4221_v1, %v1481_v0 }
 0x140   : > { %1460 = vst [vmem:[#allocation2 + $0x41] sm:$0xff] %v4224_v38  ;;  %v1538_v4 = vpack.c.bf16 %v4224_v38, %v4219_v62 }
 0x141   : > { %1458 = vst [vmem:[#allocation2 + $0x21] sm:$0xff] %v4227_v52  ;;  %v3451_v50 = vpop.f32.mrb[36].mxu0  ;;  %2260 = vmatprep.mubr.bf16.mxu1 %v1489_v2  ;;  %v4236_v53 = vpack.c.bf16 %v4219_v62, %v4227_v52  ;;  %v1537_v51 = vpack.c.bf16 %v4227_v52, %v4221_v1  ;;  %v3662_v2 = vld [vmem:[%s4504_s3 + $0x1a0] sm:$0xff]   ;;  %v3680_v1 = vld [vmem:[%s4506_s5 + $0x10] sm:$0xff]   ;;  %v3681_v52 = vld [vmem:[%s4504_s3 + $0x218] sm:$0xff]  }
 0x142   : > { %v1443_v5 = vadd.f32 %v3451_v50, %v1378_v55  ;;  %v1434_v6 = vpop.f32.mrb[37].mxu0  ;;  %v3657_v55 = vld [vmem:[%s4504_s3 + $0x1d8] sm:$0xff]   ;;  %v3684_v62 = vld [vmem:[%s4506_s5 + $0x20] sm:$0xff]  }
 0x143   : > { %v1435_v7 = vadd.f32 %v1434_v6, %v1370_v33  ;;  %v3452_v8 = vpop.f32.mrb[38].mxu0  ;;  %v3649_v33 = vld [vmem:[%s4504_s3 + $0x1c8] sm:$0xff]  }
 0x144   : > { %v4240_v9 = vmax.f32 %v1443_v5, 0.0  ;;  %v1446_v10 = vadd.f32 %v3452_v8, %v1381_v31  ;;  %v1437_v11 = vpop.f32.mrb[39].mxu0  ;;  %v3659_v31 = vld [vmem:[%s4504_s3 + $0x160] sm:$0xff]   ;;  %v3664_v6 = vld [vmem:[%s4504_s3 + $0x128] sm:$0xff]  }
 0x145   : > { %v4242_v12 = vmax.f32 %v1435_v7, 0.0  ;;  %v1438_v14 = vadd.f32 %v1437_v11, %v1373_v13  ;;  %v1515_v29 = vld [vmem:[#allocation2 + $0x30] sm:$0xff]  ;;  %v3665_v7 = vld [vmem:[%s4504_s3 + $0x1e8] sm:$0xff]  }
 0x146   : > { %1463 = vst [vmem:[#allocation2 + $0x71] sm:$0xff] %v4240_v9  ;;  %v4245_v39 = vmax.f32 %v1446_v10, 0.0  ;;  %v1466_v15 = vld [vmem:[#allocation2 + $0x10] sm:$0xff]  ;;  %v3666_v11 = vld [vmem:[%s4504_s3 + $0x1a8] sm:$0xff]  }
 0x147   : > { %1461 = vst [vmem:[#allocation2 + $0x51] sm:$0xff] %v4242_v12  ;;  %v4251_v17 = vmax.f32 %v1438_v14, 0.0  ;;  %v1473_v58 = vpack.c.bf16 %v1466_v15, %v4253_v18  ;;  %v4256_v20 = vld [vmem:[#allocation2 + $0x12] sm:$0xff]  ;;  %v4263_v22 = vpack.c.bf16 %v4242_v12, %v4224_v38  ;;  %v1516_v24 = vld [vmem:[#allocation2 + $0x40] sm:$0xff]  ;;  %v3685_v38 = vld [vmem:[%s4504_s3 + $0x228] sm:$0xff]  }
 0x148   : > { %1464 = vst [vmem:[#allocation2 + $0x81] sm:$0xff] %v4245_v39  ;;  %v1514_v23 = vld [vmem:[#allocation2 + $0x20] sm:$0xff]  ;;  %v1540_v25 = vpack.c.bf16 %v4245_v39, %v4240_v9  ;;  %v1505_v3 = vpack.c.bf16 %v4256_v20, %v1497_v19  ;;  %v1522_v13 = vpack.c.bf16 %v1516_v24, %v1515_v29  ;;  %v4306_v45 = vld [vmem:[#allocation2 + $0x32] sm:$0xff] }
 0x149   : > { %1462 = vst [vmem:[#allocation2 + $0x61] sm:$0xff] %v4251_v17  ;;  %2261 = vmatmul.mubr.bf16.vlgmr.msra.gmra.mrb[32].mxu1 %v1473_v58  ;;  %v1521_v26 = vpack.c.bf16 %v1514_v23, %v1466_v15  ;;  %v4274_v28 = vpack.c.bf16 %v4240_v9, %v4251_v17  ;;  %v1539_v34 = vpack.c.bf16 %v4251_v17, %v4242_v12  ;;  %v4297_v41 = vld [vmem:[#allocation2 + $0x22] sm:$0xff]  ;;  %v3667_v10 = vld [vmem:[%s4504_s3 + $0x170] sm:$0xff]   ;;  %v3671_v19 = vld [vmem:[%s4504_s3 + $0x178] sm:$0xff]  }
 0x14a   : > { %2268 = vmatprep.mubr.bf16.mxu1 %v4236_v53  ;;  %3316 = vmatpush3.bf16.msra.mxu1 %v3644_v16  ;;  %v4295_v40 = vpack.c.bf16 %v1515_v29, %v1514_v23  ;;  %v4314_v30 = vpack.c.bf16 %v4306_v45, %v4297_v41  ;;  %v1501_v47 = vld [vmem:[#allocation2 + $0x42] sm:$0xff]  ;;  %v3668_v14 = vld [vmem:[%s4504_s3 + $0x130] sm:$0xff]   ;;  %v3674_v29 = vld [vmem:[%s4504_s3 + $0x1b8] sm:$0xff]  }
 0x14b   : > { %2325 = vmatprep.mubr.bf16.mxu0 %v1521_v26  ;;  %3317 = vmatprep.subr.bf16.mxu1 %v3647_v21  ;;  %v3669_v58 = vld [vmem:[%s4504_s3 + $0x1f0] sm:$0xff]   ;;  %v1553_v21 = vpack.c.bf16 %v4297_v41, %v4256_v20  ;;  %v3673_v20 = vld [vmem:[%s4504_s3 + $0x1f8] sm:$0xff]   ;;  %v3702_v9 = vld [vmem:[%s3885_s30 + $0x8] sm:$0xff]  }
 0x14c   : > { %2326 = vmatmul.mubr.bf16.vlgmr.msra.gmra.mrb[40].mxu0 %v1505_v3  ;;  %v3675_v3 = vld [vmem:[%s4504_s3 + $0x200] sm:$0xff]   ;;  %v3688_v12 = vld [vmem:[%s4506_s5 + $0x30] sm:$0xff]   ;;  %v3689_v17 = vld [vmem:[%s4504_s3 + $0x238] sm:$0xff]  }
 0x14d   : > { %2333 = vmatprep.mubr.bf16.mxu0 %v1522_v13  ;;  %3356 = vmatpush3.bf16.msra.mxu0 %v3646_v27  ;;  %v1519_v5 = vld [vmem:[#allocation2 + $0x70] sm:$0xff]  ;;  %v3672_v27 = vld [vmem:[%s4504_s3 + $0x138] sm:$0xff]   ;;  %v1554_v13 = vpack.c.bf16 %v1501_v47, %v4306_v45 }
 0x14e   : > { %3318 = vmatpush3.bf16.msra.mxu1 %v3648_v32  ;;  %3357 = vmatprep.subr.bf16.mxu0 %v3649_v33  ;;  %v1517_v48 = vld [vmem:[#allocation2 + $0x50] sm:$0xff]  ;;  %v3676_v32 = vld [vmem:[%s4506_s5] sm:$0xff]   ;;  %v3677_v33 = vld [vmem:[%s4504_s3 + $0x208] sm:$0xff]  }
 0x14f   : > { %3319 = vmatprep.subr.bf16.mxu1 %v3651_v35  ;;  %v4332_v60 = vpack.c.bf16 %v1517_v48, %v1516_v24  ;;  %v4334_v61 = vld [vmem:[#allocation2 + $0x52] sm:$0xff]  ;;  %v4342_v0 = vld [vmem:[#allocation2 + $0x80] sm:$0xff] }
 0x150   : > { %v1518_v44 = vld [vmem:[#allocation2 + $0x60] sm:$0xff]  ;;  %v4350_v50 = vpack.c.bf16 %v4334_v61, %v1501_v47  ;;  %v1524_v8 = vpack.c.bf16 %v4342_v0, %v1519_v5  ;;  %v1504_v23 = vld [vmem:[#allocation2 + $0x72] sm:$0xff] }
 0x151   : > { %3358 = vmatpush3.bf16.msra.mxu0 %v3650_v36  ;;  %2269 = vmatmul.mubr.bf16.gmra.mrb[36].mxu1 %v4295_v40  ;;  %v1523_v56 = vpack.c.bf16 %v1518_v44, %v1517_v48  ;;  %v4369_v15 = vpack.c.bf16 %v1519_v5, %v1518_v44  ;;  %v1503_v16 = vld [vmem:[#allocation2 + $0x62] sm:$0xff]  ;;  %v3670_v24 = vld [vmem:[%s4504_s3 + $0x1b0] sm:$0xff]   ;;  %v3690_v44 = vld [vmem:[%s4506_s5 + $0x38] sm:$0xff]  }
 0x152   : > { %2276 = vmatprep.mubr.bf16.mxu1 %v4263_v22  ;;  %3320 = vmatpush3.bf16.msra.mxu1 %v3652_v37  ;;  %v4383_v26 = vpack.c.bf16 %v1504_v23, %v1503_v16  ;;  %v3679_v35 = vld [vmem:[%s4504_s3 + $0x210] sm:$0xff]   ;;  %v3683_v36 = vld [vmem:[%s4504_s3 + $0x220] sm:$0xff]  }
 0x153   : > { %3359 = vmatprep.subr.bf16.mxu0 %v3653_v42  ;;  %3321 = vmatprep.subr.bf16.mxu1 %v3655_v43  ;;  %v1552_v37 = vld [vmem:[#allocation2 + $0x82] sm:$0xff]  ;;  %v3687_v42 = vld [vmem:[%s4504_s3 + $0x230] sm:$0xff]   ;;  %v1572_v43 = vpack.c.bf16 %v4253_v18, %v4342_v0  ;;  %v2961_v48 = vld [vmem:[%s4505_s4] ss:$0 sm:$0xff] }
 0x154   : > { %2334 = vmatmul.mubr.bf16.gmra.mrb[44].mxu0 %v4314_v30 }
 0x155   : > { %2341 = vmatprep.mubr.bf16.mxu0 %v1523_v56  ;;  %3360 = vmatpush3.bf16.msra.mxu0 %v3654_v46  ;;  %v3704_v46 = vld [vmem:[%s3885_s30 + $0x18] sm:$0xff]  }
 0x156   : > { %3322 = vmatpush3.bf16.msra.mxu1 %v3656_v54  ;;  %3361 = vmatprep.subr.bf16.mxu0 %v3657_v55 }
 0x157   : > { %3323 = vmatprep.subr.bf16.mxu1 %v3659_v31 }
 0x159   : > { %3362 = vmatpush3.bf16.msra.mxu0 %v3658_v57  ;;  %2277 = vmatmul.mubr.bf16.gmra.mrb[40].mxu1 %v4332_v60 }
 0x15a   : > { %2284 = vmatprep.mubr.bf16.mxu1 %v4274_v28  ;;  %3324 = vmatpush3.bf16.msra.mxu1 %v3660_v59 }
 0x15b   : > { %3363 = vmatprep.subr.bf16.mxu0 %v3661_v49  ;;  %3325 = vmatprep.subr.bf16.mxu1 %v3663_v63 }
 0x15c   : > { %2342 = vmatmul.mubr.bf16.gmra.mrb[48].mxu0 %v4350_v50 }
 0x15d   : > { %2349 = vmatprep.mubr.bf16.mxu0 %v1524_v8  ;;  %3364 = vmatpush3.bf16.msra.mxu0 %v3662_v2 }
 0x15e   : > { %3326 = vmatpush3.bf16.msra.mxu1 %v3664_v6  ;;  %3365 = vmatprep.subr.bf16.mxu0 %v3665_v7 }
 0x15f   : > { %3327 = vmatprep.subr.bf16.mxu1 %v3667_v10 }
 0x161   : > { %3366 = vmatpush3.bf16.msra.mxu0 %v3666_v11  ;;  %2285 = vmatmul.mubr.bf16.gmra.mrb[44].mxu1 %v4369_v15 }
 0x162   : > { %3328 = vmatpush3.bf16.msra.mxu1 %v3668_v14  ;;  %2390 = vmatprep.mubr.bf16.mxu1 %v1553_v21 }
 0x163   : > { %3367 = vmatprep.subr.bf16.mxu0 %v3669_v58  ;;  %3329 = vmatprep.subr.bf16.mxu1 %v3671_v19 }
 0x164   : > { %2350 = vmatmul.mubr.bf16.gmra.mrb[52].mxu0 %v4383_v26 }
 0x165   : > { %3368 = vmatpush3.bf16.msra.mxu0 %v3670_v24  ;;  %2455 = vmatprep.mubr.bf16.mxu0 %v4236_v53  ;;  %v3678_v53 = vld [vmem:[%s4506_s5 + $0x8] sm:$0xff]  }
 0x166   : > { %3330 = vmatpush3.bf16.msra.mxu1 %v3672_v27  ;;  %3369 = vmatprep.subr.bf16.mxu0 %v3673_v20 }
 0x167   : > { %3453 = vmatprep.subr.bf16.mxu1 %v3675_v3 }
 0x169   : > { %3370 = vmatpush3.bf16.msra.mxu0 %v3674_v29  ;;  %2391 = vmatmul.mubr.bf16.vlgmr.msra.gmra.mrb[48].mxu1 %v1537_v51  ;;  %v1555_v51 = vpack.c.bf16 %v1503_v16, %v4334_v61 }
 0x16a   : > { %2398 = vmatprep.mubr.bf16.mxu1 %v1554_v13  ;;  %3454 = vmatpush3.bf16.msra.mxu1 %v3675_v3 }
 0x16b   : > { %3477 = vmatprep.subr.bf16.mxu0 %v3676_v32  ;;  %3455 = vmatprep.subr.bf16.mxu1 %v3677_v33 }
 0x16c   : > { %2456 = vmatmul.mubr.bf16.vlgmr.msra.gmra.mrb[56].mxu0 %v4295_v40  ;;  %v1584_v40 = vld [vmem:[#allocation2 + $0x91] sm:$0xff] }
 0x16d   : > { %2463 = vmatprep.mubr.bf16.mxu0 %v4263_v22  ;;  %3478 = vmatpush3.bf16.msra.mxu0 %v3676_v32  ;;  %v3682_v22 = vld [vmem:[%s4506_s5 + $0x18] sm:$0xff]   ;;  %v1588_v41 = vpack.c.bf16 %v1584_v40, %v4245_v39  ;;  %v3703_v39 = vld [vmem:[%s3885_s30 + $0x10] sm:$0xff]  }
 0x16e   : > { %3456 = vmatpush3.bf16.msra.mxu1 %v3677_v33  ;;  %3479 = vmatprep.subr.bf16.mxu0 %v3678_v53 }
 0x16f   : > { %3457 = vmatprep.subr.bf16.mxu1 %v3679_v35 }
 0x171   : > { %3480 = vmatpush3.bf16.msra.mxu0 %v3678_v53  ;;  %2399 = vmatmul.mubr.bf16.gmra.mrb[52].mxu1 %v1538_v4  ;;  %v1556_v4 = vpack.c.bf16 %v1552_v37, %v1504_v23 }
 0x172   : > { %2406 = vmatprep.mubr.bf16.mxu1 %v1555_v51  ;;  %3458 = vmatpush3.bf16.msra.mxu1 %v3679_v35 }
 0x173   : > { %3481 = vmatprep.subr.bf16.mxu0 %v3680_v1  ;;  %3459 = vmatprep.subr.bf16.mxu1 %v3681_v52 }
 0x174   : > { %2464 = vmatmul.mubr.bf16.gmra.mrb[60].mxu0 %v4332_v60 }
 0x175   : > { %2471 = vmatprep.mubr.bf16.mxu0 %v4274_v28  ;;  %3482 = vmatpush3.bf16.msra.mxu0 %v3680_v1  ;;  %v3686_v28 = vld [vmem:[%s4506_s5 + $0x28] sm:$0xff]  }
 0x176   : > { %3460 = vmatpush3.bf16.msra.mxu1 %v3681_v52  ;;  %3483 = vmatprep.subr.bf16.mxu0 %v3682_v22 }
 0x177   : > { %3461 = vmatprep.subr.bf16.mxu1 %v3683_v36 }
 0x179   : > { %3484 = vmatpush3.bf16.msra.mxu0 %v3682_v22  ;;  %2407 = vmatmul.mubr.bf16.gmra.mrb[56].mxu1 %v1539_v34  ;;  %v3701_v34 = vld [vmem:[%s3885_s30] sm:$0xff]  }
 0x17a   : > { %2414 = vmatprep.mubr.bf16.mxu1 %v1556_v4  ;;  %3462 = vmatpush3.bf16.msra.mxu1 %v3683_v36 }
 0x17b   : > { %3485 = vmatprep.subr.bf16.mxu0 %v3684_v62  ;;  %3463 = vmatprep.subr.bf16.mxu1 %v3685_v38 }
 0x17c   : > { %2472 = vmatmul.mubr.bf16.gmra.mrb[64].mxu0 %v4369_v15 }
 0x17d   : > { %2479 = vmatprep.mubr.bf16.mxu0 %v1588_v41  ;;  %3486 = vmatpush3.bf16.msra.mxu0 %v3684_v62 }
 0x17e   : > { %3464 = vmatpush3.bf16.msra.mxu1 %v3685_v38  ;;  %3487 = vmatprep.subr.bf16.mxu0 %v3686_v28 }
 0x17f   : > { %3465 = vmatprep.subr.bf16.mxu1 %v3687_v42 }
 0x181   : > { %3488 = vmatpush3.bf16.msra.mxu0 %v3686_v28  ;;  %2415 = vmatmul.mubr.bf16.gmra.mrb[60].mxu1 %v1540_v25  ;;  %v1600_v25 = vld [vmem:[#allocation2 + $0x92] sm:$0xff] }
 0x182   : > { %3466 = vmatpush3.bf16.msra.mxu1 %v3687_v42  ;;  %3469 = vmatprep.mubr.bf16.mxu1 %v4314_v30  ;;  %v1604_v45 = vpack.c.bf16 %v1600_v25, %v1552_v37 }
 0x183   : > { %3489 = vmatprep.subr.bf16.mxu0 %v3688_v12  ;;  %3467 = vmatprep.subr.bf16.mxu1 %v3689_v17 }
 0x184   : > { %2480 = vmatmul.mubr.bf16.gmra.mrb[68].mxu0 %v1572_v43 }
 0x185   : > { %3490 = vmatpush3.bf16.msra.mxu0 %v3688_v12  ;;  %3493 = vmatprep.mubr.bf16.mxu0 %v3701_v34 }
 0x186   : > { %3468 = vmatpush3.bf16.msra.mxu1 %v3689_v17  ;;  %3491 = vmatprep.subr.bf16.mxu0 %v3690_v44 }
 0x187   : > { %3501 = vmatprep.subr.bf16.mxu1 %v4253_v18 }
 0x189   : > { %3492 = vmatpush3.bf16.msra.mxu0 %v3690_v44  ;;  %3470 = vmatmul.mubr.bf16.vlgmr.msra.gmra.mrb[64].mxu1 %v4350_v50 }
 0x18a   : > { %3473 = vmatprep.mubr.bf16.mxu1 %v4383_v26 }
 0x18c   : > { %3494 = vmatmul.mubr.bf16.vlgmr.msra.gmra.mrb[72].mxu0 %v3702_v9 }
 0x18d   : > { %3497 = vmatprep.mubr.bf16.mxu0 %v3703_v39 }
 0x191   : > { %3474 = vmatmul.mubr.bf16.gmra.mrb[68].mxu1 %v1604_v45 }
 0x192   : > { %3509 = vmatprep.mubr.msk.bf16.mxu1 %vm3714_vm0, %v4253_v18 }
 0x194   : > { %3498 = vmatmul.mubr.bf16.gmra.mrb[76].mxu0 %v3704_v46 }
 0x21c   : > { %v3251_v30 = vpop.f32.mrb[32].mxu1 }
 0x21d   : > { %v3252_v54 = vpop.f32.mrb[33].mxu1 }
 0x21e   : > { %v3253_v55 = vadd.f32 %v3252_v54, %v3251_v30  ;;  %v3254_v56 = vpop.f32.mrb[34].mxu1 }
 0x21f   : > { %v3291_v31 = vpop.f32.mrb[40].mxu0  ;;  %v3255_v57 = vpop.f32.mrb[35].mxu1 }
 0x220   : > { %v2263_v59 = vadd.f32 %v3253_v55, %v2961_v48  ;;  %v3256_v60 = vadd.f32 %v3255_v57, %v3254_v56  ;;  %v3292_v61 = vpop.f32.mrb[41].mxu0 }
 0x221   : > { %v3293_v49 = vadd.f32 %v3292_v61, %v3291_v31  ;;  %v3294_v63 = vpop.f32.mrb[42].mxu0 }
 0x222   : > { %v2266_v0 = vadd.f32 %v3256_v60, %v2961_v48  ;;  %v3295_v47 = vpop.f32.mrb[43].mxu0 }
 0x223   : > { %v2328_v2 = vadd.f32 %v3293_v49, %v2263_v59  ;;  %v3296_v50 = vadd.f32 %v3295_v47, %v3294_v63 }
 0x224   : > { %v3257_v5 = vpop.f32.mrb[36].mxu1 }
 0x225   : > { %v2331_v6 = vadd.f32 %v3296_v50, %v2266_v0  ;;  %v3258_v7 = vpop.f32.mrb[37].mxu1 }
 0x226   : > { %v3259_v8 = vadd.f32 %v3258_v7, %v3257_v5  ;;  %v3260_v10 = vpop.f32.mrb[38].mxu1 }
 0x227   : > { %v3297_v11 = vpop.f32.mrb[44].mxu0  ;;  %v3261_v14 = vpop.f32.mrb[39].mxu1 }
 0x228   : > { %v2271_v15 = vadd.f32 %v3259_v8, %v2961_v48  ;;  %v3262_v16 = vadd.f32 %v3261_v14, %v3260_v10  ;;  %v3298_v58 = vpop.f32.mrb[45].mxu0 }
 0x229   : > { %v3299_v19 = vadd.f32 %v3298_v58, %v3297_v11  ;;  %v3300_v21 = vpop.f32.mrb[46].mxu0 }
 0x22a   : > { %v2274_v23 = vadd.f32 %v3262_v16, %v2961_v48  ;;  %v3301_v24 = vpop.f32.mrb[47].mxu0 }
 0x22b   : > { %v2336_v26 = vadd.f32 %v3299_v19, %v2271_v15  ;;  %v3302_v27 = vadd.f32 %v3301_v24, %v3300_v21 }
 0x22c   : > { %v3263_v20 = vpop.f32.mrb[40].mxu1 }
 0x22d   : > { %v2339_v3 = vadd.f32 %v3302_v27, %v2274_v23  ;;  %v3264_v29 = vpop.f32.mrb[41].mxu1 }
 0x22e   : > { %v3265_v32 = vadd.f32 %v3264_v29, %v3263_v20  ;;  %v3266_v33 = vpop.f32.mrb[42].mxu1 }
 0x22f   : > { %v3303_v13 = vpop.f32.mrb[48].mxu0  ;;  %v3267_v53 = vpop.f32.mrb[43].mxu1 }
 0x230   : > { %v2279_v35 = vadd.f32 %v3265_v32, %v2961_v48  ;;  %v3268_v1 = vadd.f32 %v3267_v53, %v3266_v33  ;;  %v3304_v52 = vpop.f32.mrb[49].mxu0 }
 0x231   : > { %v3305_v51 = vadd.f32 %v3304_v52, %v3303_v13  ;;  %v3306_v22 = vpop.f32.mrb[50].mxu0 }
 0x232   : > { %v2282_v36 = vadd.f32 %v3268_v1, %v2961_v48  ;;  %v3307_v37 = vpop.f32.mrb[51].mxu0 }
 0x233   : > { %v2344_v62 = vadd.f32 %v3305_v51, %v2279_v35  ;;  %v3308_v38 = vadd.f32 %v3307_v37, %v3306_v22 }
 0x234   : > { %v3269_v4 = vpop.f32.mrb[44].mxu1 }
 0x235   : > { %v2347_v40 = vadd.f32 %v3308_v38, %v2282_v36  ;;  %v3270_v28 = vpop.f32.mrb[45].mxu1 }
 0x236   : > { %v3271_v41 = vadd.f32 %v3270_v28, %v3269_v4  ;;  %v3272_v42 = vpop.f32.mrb[46].mxu1 }
 0x237   : > { %v3309_v12 = vpop.f32.mrb[52].mxu0  ;;  %v3273_v17 = vpop.f32.mrb[47].mxu1 }
 0x238   : > { %v2287_v34 = vadd.f32 %v3271_v41, %v2961_v48  ;;  %v3274_v43 = vadd.f32 %v3273_v17, %v3272_v42  ;;  %v3310_v44 = vpop.f32.mrb[53].mxu0 }
 0x239   : > { %v3311_v9 = vadd.f32 %v3310_v44, %v3309_v12  ;;  %v3312_v39 = vpop.f32.mrb[54].mxu0 }
 0x23a   : > { %v2290_v25 = vadd.f32 %v3274_v43, %v2961_v48  ;;  %v3313_v45 = vpop.f32.mrb[55].mxu0 }
 0x23b   : > { %v2352_v46 = vadd.f32 %v3311_v9, %v2287_v34  ;;  %v3314_v30 = vadd.f32 %v3313_v45, %v3312_v39 }
 0x23c   : > { %v3331_v54 = vpop.f32.mrb[48].mxu1 }
 0x23d   : > { %v2355_v55 = vadd.f32 %v3314_v30, %v2290_v25  ;;  %v3332_v56 = vpop.f32.mrb[49].mxu1 }
 0x23e   : > { %v3333_v31 = vadd.f32 %v3332_v56, %v3331_v54  ;;  %v3334_v57 = vpop.f32.mrb[50].mxu1 }
 0x23f   : > { %v3371_v59 = vpop.f32.mrb[56].mxu0  ;;  %v3335_v60 = vpop.f32.mrb[51].mxu1 }
 0x240   : > { %v2393_v61 = vadd.f32 %v3333_v31, %v2328_v2  ;;  %v3336_v49 = vadd.f32 %v3335_v60, %v3334_v57  ;;  %v3372_v63 = vpop.f32.mrb[57].mxu0 }
 0x241   : > { %v3373_v0 = vadd.f32 %v3372_v63, %v3371_v59  ;;  %v3374_v47 = vpop.f32.mrb[58].mxu0 }
 0x242   : > { %v2396_v50 = vadd.f32 %v3336_v49, %v2331_v6  ;;  %v3375_v5 = vpop.f32.mrb[59].mxu0 }
 0x243   : > { %v3376_v7 = vadd.f32 %v3375_v5, %v3374_v47  ;;  %v2458_v8 = vadd.f32 %v3373_v0, %v2393_v61 }
 0x244   : > { %v3337_v48 = vpop.f32.mrb[52].mxu1 }
 0x245   : > { %v3338_v10 = vpop.f32.mrb[53].mxu1  ;;  %v2461_v11 = vadd.f32 %v3376_v7, %v2396_v50 }
 0x246   : > { %v3339_v14 = vadd.f32 %v3338_v10, %v3337_v48  ;;  %v3340_v15 = vpop.f32.mrb[54].mxu1 }
 0x247   : > { %v3377_v16 = vpop.f32.mrb[60].mxu0  ;;  %v3341_v58 = vpop.f32.mrb[55].mxu1 }
 0x248   : > { %v2401_v19 = vadd.f32 %v3339_v14, %v2336_v26  ;;  %v3342_v21 = vadd.f32 %v3341_v58, %v3340_v15  ;;  %v3378_v23 = vpop.f32.mrb[61].mxu0 }
 0x249   : > { %v3379_v24 = vadd.f32 %v3378_v23, %v3377_v16  ;;  %v3380_v2 = vpop.f32.mrb[62].mxu0 }
 0x24a   : > { %v2404_v27 = vadd.f32 %v3342_v21, %v2339_v3  ;;  %v3381_v20 = vpop.f32.mrb[63].mxu0 }
 0x24b   : > { %v3382_v29 = vadd.f32 %v3381_v20, %v3380_v2  ;;  %v2466_v32 = vadd.f32 %v3379_v24, %v2401_v19 }
 0x24c   : > { %v3343_v6 = vpop.f32.mrb[56].mxu1 }
 0x24d   : > { %v3344_v33 = vpop.f32.mrb[57].mxu1  ;;  %v2469_v13 = vadd.f32 %v3382_v29, %v2404_v27 }
 0x24e   : > { %v3345_v53 = vadd.f32 %v3344_v33, %v3343_v6  ;;  %v3346_v35 = vpop.f32.mrb[58].mxu1 }
 0x24f   : > { %v3383_v1 = vpop.f32.mrb[64].mxu0  ;;  %v3347_v52 = vpop.f32.mrb[59].mxu1 }
 0x250   : > { %v2409_v51 = vadd.f32 %v3345_v53, %v2344_v62  ;;  %v3348_v22 = vadd.f32 %v3347_v52, %v3346_v35  ;;  %v3384_v36 = vpop.f32.mrb[65].mxu0 }
 0x251   : > { %v3385_v37 = vadd.f32 %v3384_v36, %v3383_v1  ;;  %v3386_v26 = vpop.f32.mrb[66].mxu0 }
 0x252   : > { %v2412_v38 = vadd.f32 %v3348_v22, %v2347_v40  ;;  %v3387_v4 = vpop.f32.mrb[67].mxu0 }
 0x253   : > { %v3388_v28 = vadd.f32 %v3387_v4, %v3386_v26  ;;  %v2474_v41 = vadd.f32 %v3385_v37, %v2409_v51  ;;  %v3695_v26 = vld [vmem:[%s4508_s7] sm:$0xff]  }
 0x254   : > { %v3349_v3 = vpop.f32.mrb[60].mxu1 }
 0x255   : > { %v3350_v42 = vpop.f32.mrb[61].mxu1  ;;  %v2477_v12 = vadd.f32 %v3388_v28, %v2412_v38 }
 0x256   : > { %v3351_v17 = vadd.f32 %v3350_v42, %v3349_v3  ;;  %v3352_v34 = vpop.f32.mrb[62].mxu1 }
 0x257   : > { %v3389_v43 = vpop.f32.mrb[68].mxu0  ;;  %v3353_v44 = vpop.f32.mrb[63].mxu1 }
 0x258   : > { %v2417_v9 = vadd.f32 %v3351_v17, %v2352_v46  ;;  %v3354_v39 = vadd.f32 %v3353_v44, %v3352_v34  ;;  %v3390_v25 = vpop.f32.mrb[69].mxu0  ;;  %v3034_v46 = vld [vmem:[%s4507_s6] ss:$0 sm:$0xff] }
 0x259   : > { %v3391_v45 = vadd.f32 %v3390_v25, %v3389_v43  ;;  %v3392_v62 = vpop.f32.mrb[70].mxu0 }
 0x25a   : > { %v2420_v30 = vadd.f32 %v3354_v39, %v2355_v55  ;;  %v3393_v54 = vpop.f32.mrb[71].mxu0 }
 0x25b   : > { %v3394_v56 = vadd.f32 %v3393_v54, %v3392_v62  ;;  %v2482_v31 = vadd.f32 %v3391_v45, %v2417_v9 }
 0x25c   : > { %v3471_v40 = vpop.f32.mrb[64].mxu1 }
 0x25d   : > { %v2531_v57 = vadd.f32 %v3471_v40, %v2466_v32  ;;  %v2522_v59 = vpop.f32.mrb[65].mxu1  ;;  %v2485_v60 = vadd.f32 %v3394_v56, %v2420_v30 }
 0x25e   : > { %v2523_v61 = vadd.f32 %v2522_v59, %v2458_v8  ;;  %v3472_v49 = vpop.f32.mrb[66].mxu1 }
 0x25f   : > { %v2534_v63 = vadd.f32 %v3472_v49, %v2469_v13  ;;  %v3495_v0 = vpop.f32.mrb[72].mxu0  ;;  %v2525_v47 = vpop.f32.mrb[67].mxu1 }
 0x260   : > { %v2526_v50 = vadd.f32 %v2525_v47, %v2461_v11  ;;  %v2688_v5 = vpop.f32.mrb[73].mxu0  ;;  %v2697_v48 = vadd.f32 %v3495_v0, %v3034_v46 }
 0x261   : > { %v2556_v7 = vpack.c.bf16 %v2534_v63, %v2531_v57  ;;  %v3496_v55 = vpop.f32.mrb[74].mxu0  ;;  %v2689_v16 = vadd.f32 %v3034_v46, %v2688_v5 }
 0x262   : > { %v2555_v10 = vpack.c.bf16 %v2526_v50, %v2523_v61  ;;  %v2700_v14 = vadd.f32 %v3496_v55, %v3034_v46  ;;  %v2691_v15 = vpop.f32.mrb[75].mxu0 }
 0x263   : > { %v2692_v58 = vadd.f32 %v3034_v46, %v2691_v15 }
 0x264   : > { %v2720_v19 = vpack.c.bf16 %v2700_v14, %v2697_v48  ;;  %v3475_v8 = vpop.f32.mrb[68].mxu1 }
 0x265   : > { %v2719_v21 = vpack.c.bf16 %v2692_v58, %v2689_v16  ;;  %v2547_v23 = vadd.f32 %v3475_v8, %v2482_v31  ;;  %v2538_v24 = vpop.f32.mrb[69].mxu1 }
 0x266   : > { %v2539_v2 = vadd.f32 %v2538_v24, %v2474_v41  ;;  %v3476_v27 = vpop.f32.mrb[70].mxu1 }
 0x267   : > { %v2550_v20 = vadd.f32 %v3476_v27, %v2485_v60  ;;  %v3499_v29 = vpop.f32.mrb[76].mxu0  ;;  %3502 = vmatpush3.bf16.msra.mxu1 %v2719_v21  ;;  %v2541_v11 = vpop.f32.mrb[71].mxu1 }
 0x268   : > { %v2542_v32 = vadd.f32 %v2541_v11, %v2477_v12  ;;  %v2704_v6 = vpop.f32.mrb[77].mxu0  ;;  %3503 = vmatprep.subr.bf16.mxu1 %v4253_v18  ;;  %v2713_v53 = vadd.f32 %v3499_v29, %v3034_v46 }
 0x269   : > { %v2558_v33 = vpack.c.bf16 %v2550_v20, %v2547_v23  ;;  %v3500_v13 = vpop.f32.mrb[78].mxu0  ;;  %v2705_v51 = vadd.f32 %v3034_v46, %v2704_v6 }
 0x26a   : > { %v2557_v35 = vpack.c.bf16 %v2542_v32, %v2539_v2  ;;  %v2716_v1 = vadd.f32 %v3500_v13, %v3034_v46  ;;  %v2707_v52 = vpop.f32.mrb[79].mxu0 }
 0x26b   : > { %v2708_v22 = vadd.f32 %v3034_v46, %v2707_v52  ;;  %3504 = vmatpush3.bf16.msra.mxu1 %v2720_v19 }
 0x26c   : > { %v2722_v36 = vpack.c.bf16 %v2716_v1, %v2713_v53  ;;  %3505 = vmatprep.subr.bf16.mxu1 %v4253_v18 }
 0x26d   : > { %v2721_v37 = vpack.c.bf16 %v2708_v22, %v2705_v51 }
 0x26f   : > { %3506 = vmatpush3.bf16.msra.mxu1 %v2721_v37 }
 0x270   : > { %3507 = vmatprep.subr.bf16.mxu1 %v4253_v18 }
 0x273   : > { %3508 = vmatpush3.bf16.msra.mxu1 %v2722_v36 }
 0x274   : > { %3513 = vmatprep.subr.bf16.mxu1 %v4253_v18 }
 0x276   : > { %3510 = vmatmul.mubr.msk.bf16.vlgmr.msra.gmra.mrb[72].mxu1 %vm2728_vm1, %v3695_v26 }
 0x277   : > { %3514 = vmatpush3.bf16.msra.mxu1 %v2555_v10  ;;  %3521 = vmatprep.mubr.msk.bf16.mxu1 %vm3714_vm0, %v4253_v18 }
 0x278   : > { %3515 = vmatprep.subr.bf16.mxu1 %v4253_v18 }
 0x27b   : > { %3516 = vmatpush3.bf16.msra.mxu1 %v2556_v7 }
 0x27c   : > { %3517 = vmatprep.subr.bf16.mxu1 %v4253_v18 }
 0x27f   : > { %3518 = vmatpush3.bf16.msra.mxu1 %v2557_v35 }
 0x280   : > { %3519 = vmatprep.subr.bf16.mxu1 %v4253_v18 }
 0x283   : > { %3520 = vmatpush3.bf16.msra.mxu1 %v2558_v33 }
 0x286   : > { %3522 = vmatmul.mubr.msk.bf16.vlgmr.msra.gmra.mrb[72].mxu1 %vm2728_vm1, %v3695_v26 }
 0x359   : > { %v2807_v38 = vpop.f32.mrb[72].mxu1 }
 0x35a   : > { %v3523_v4 = vpop.f32.mrb[73].mxu1 }
 0x35b   : > { %v2810_v28 = vpop.f32.mrb[74].mxu1 }
 0x35c   : > { %v3061_v41 = vpack.c.bf16 %v2810_v28, %v2807_v38  ;;  %v3524_v3 = vpop.f32.mrb[75].mxu1 }
 0x35e   : > { %3062 = vst [vmem:[%s305_s18] sm:$0xff] %v3061_v41  }
 0x35f PF: > { %s18_s27 = sadd.s32 1, %s3711_s27  }
 0x360   : > { %p15_p4 = scmp.ge.s32.totalorder %s18_s27, 4  }
 0x362   :  { %17 = sbr.rel (!%p15_p4) target bundleno = 1 (0x1), region = 84 }

// kernel: pallas_forward.7
= control target key start
LH: loop header
LB: loop body
LE: loop exit
PB: predicated region body
PF: predicated region fallthrough
CT: control target
= control target key end

     0   :  { %s2904_s18 = smov 0   ;;  %s3408_s0 = inlined_call_operand.vmem [shape: bf16[2,16,128], index: 0, kind: input, shape index: {}]   ;;  %s3409_s1 = inlined_call_operand.vmem [shape: bf16[1152,128], index: 1, kind: input, shape index: {}]   ;;  %s3410_s2 = inlined_call_operand.vmem [shape: f32[1,128], index: 2, kind: input, shape index: {}]   ;;  %s3411_s3 = inlined_call_operand.vmem [shape: bf16[1152,128], index: 3, kind: input, shape index: {}]   ;;  %s3412_s4 = inlined_call_operand.vmem [shape: f32[1,128], index: 4, kind: input, shape index: {}]   ;;  %s3413_s5 = inlined_call_operand.vmem [shape: bf16[2,16,128], index: 5, kind: output, shape index: {}]  }
   0x1 LB: > { %s2304_s19 = sadd.s32 4294967295, %s2870_s18   ;;  %p2308_p0 = scmp.ge.s32.totalorder %s2870_s18, 1  ;;  %s2870_s18 = sphi %s2904_s18, %s15_s18  }
   0x2   : > { %p187_p1 = scmp.lt.s32.totalorder %s2870_s18, 3 }
   0x4   : > { %p188_p2 = pnand %p2308_p0, %p187_p1 }
   0x5   : > { %v2720_v0 = vld [vmem:[%s3409_s1 + $0x40] sm:$0xff] (!%p188_p2)   ;;  %v2872_v3 = vmov (!%p188_p2), 0.0   ;;  %v2724_v5 = vld [vmem:[%s3409_s1 + $0x48] sm:$0xff] (!%p188_p2)   ;;  %v2728_v9 = vld [vmem:[%s3409_s1 + $0x50] sm:$0xff] (!%p188_p2)   ;;  %p215_p3 = scmp.lt.s32.totalorder (!%p188_p2), %s2304_s19, 1  ;;  %vm2873_vm0 = vmmov (!%p188_p2), 0  }
   0x6   : > { %191 = sbr.rel (%p188_p2) target bundleno = 656 (0x290), region = 40  ;;  %v2721_v1 = vld [vmem:[%s3409_s1] sm:$0xff] (!%p188_p2)   ;;  %2476 = vmatprep.subr.bf16.mxu0 (!%p188_p2), %v2720_v0  ;;  %226 = vst [vmem:[#allocation2] sm:$0x3f] (!%p188_p2), %v2872_v3  ;;  %227 = vst [vmem:[#allocation2 + $0x8] sm:$0x3f] (!%p188_p2), %v2872_v3 }
   0x7   : > { %v2722_v2 = vld [vmem:[%s3409_s1 + $0xc0] sm:$0xff] (!%p188_p2)   ;;  %228 = vst [vmem:[#allocation2 + $0x10] sm:$0x3f] (!%p188_p2), %v2872_v3  ;;  %229 = vst [vmem:[#allocation2 + $0x18] sm:$0x3f] (!%p188_p2), %v2872_v3  ;;  %2477 = vmatpush3.bf16.msra.mxu0 (!%p188_p2), %v2721_v1  ;;  %v2725_v6 = vld [vmem:[%s3409_s1 + $0x8] sm:$0xff] (!%p188_p2)  }
   0x8   : > { %230 = vst [vmem:[#allocation2 + $0x20] sm:$0x3f] (!%p188_p2), %v2872_v3  ;;  %231 = vst [vmem:[#allocation2 + $0x28] sm:$0x3f] (!%p188_p2), %v2872_v3  ;;  %v2723_v4 = vld [vmem:[%s3409_s1 + $0x80] sm:$0xff] (!%p188_p2)   ;;  %2498 = vmatprep.subr.bf16.mxu1 (!%p188_p2), %v2722_v2  ;;  %2478 = vmatprep.subr.bf16.mxu0 (!%p188_p2), %v2724_v5  ;;  %v2726_v7 = vld [vmem:[%s3409_s1 + $0xc8] sm:$0xff] (!%p188_p2)  }
   0x9   : > { %2499 = vmatpush3.bf16.msra.mxu1 (!%p188_p2), %v2723_v4  ;;  %v2727_v8 = vld [vmem:[%s3409_s1 + $0x88] sm:$0xff] (!%p188_p2)   ;;  %v2729_v10 = vld [vmem:[%s3409_s1 + $0x10] sm:$0xff] (!%p188_p2)   ;;  %v2732_v13 = vld [vmem:[%s3409_s1 + $0x58] sm:$0xff] (!%p188_p2)  }
   0xa   : > { %2500 = vmatprep.subr.bf16.mxu1 (!%p188_p2), %v2726_v7  ;;  %v2730_v11 = vld [vmem:[%s3409_s1 + $0xd0] sm:$0xff] (!%p188_p2)   ;;  %v2733_v14 = vld [vmem:[%s3409_s1 + $0x18] sm:$0xff] (!%p188_p2)   ;;  %v2736_v17 = vld [vmem:[%s3409_s1 + $0x60] sm:$0xff] (!%p188_p2)  }
   0xb   : > { %2479 = vmatpush3.bf16.msra.mxu0 (!%p188_p2), %v2725_v6  ;;  %v2731_v12 = vld [vmem:[%s3409_s1 + $0x90] sm:$0xff] (!%p188_p2)   ;;  %v2734_v15 = vld [vmem:[%s3409_s1 + $0xd8] sm:$0xff] (!%p188_p2)   ;;  %v2737_v18 = vld [vmem:[%s3409_s1 + $0x20] sm:$0xff] (!%p188_p2)  }
   0xc   : > { %2480 = vmatprep.subr.bf16.mxu0 (!%p188_p2), %v2728_v9  ;;  %v2735_v16 = vld [vmem:[%s3409_s1 + $0x98] sm:$0xff] (!%p188_p2)   ;;  %v2738_v19 = vld [vmem:[%s3409_s1 + $0xe0] sm:$0xff] (!%p188_p2)   ;;  %v2740_v21 = vld [vmem:[%s3409_s1 + $0x68] sm:$0xff] (!%p188_p2)  }
   0xd   : > { %2501 = vmatpush3.bf16.msra.mxu1 %v2727_v8  ;;  %v2739_v20 = vld [vmem:[%s3409_s1 + $0xa0] sm:$0xff]   ;;  %v2741_v22 = vld [vmem:[%s3409_s1 + $0x28] sm:$0xff]   ;;  %s3415_s19 = smov (!%p215_p3, %s2304_s19), 1  ;;  %v2744_v25 = vld [vmem:[%s3409_s1 + $0x70] sm:$0xff]  }
   0xe   : > { %2502 = vmatprep.subr.bf16.mxu1 %v2730_v11  ;;  %v2742_v23 = vld [vmem:[%s3409_s1 + $0xe8] sm:$0xff]   ;;  %v2745_v26 = vld [vmem:[%s3409_s1 + $0x30] sm:$0xff]   ;;  %s2463_s28 = sshll.u32 %s3415_s19, 3  ;;  %v2748_v29 = vld [vmem:[%s3409_s1 + $0x78] sm:$0xff]  }
   0xf   : > { %2481 = vmatpush3.bf16.msra.mxu0 %v2729_v10  ;;  %v2743_v24 = vld [vmem:[%s3409_s1 + $0xa8] sm:$0xff]   ;;  %v2746_v27 = vld [vmem:[%s3409_s1 + $0xf0] sm:$0xff]   ;;  %v2749_v30 = vld [vmem:[%s3409_s1 + $0x38] sm:$0xff]   ;;  %s219_s12 = scalar_lea.vmem %s3408_s0, %s2463_s28  ;;  %s224_s30 = scalar_lea.vmem %s3413_s5, %s2463_s28 }
  0x10   : > { %2482 = vmatprep.subr.bf16.mxu0 %v2732_v13  ;;  %v2747_v28 = vld [vmem:[%s3409_s1 + $0xb0] sm:$0xff]   ;;  %v2750_v31 = vld [vmem:[%s3409_s1 + $0xf8] sm:$0xff]   ;;  %v3026_v33 = vld [vmem:[%s219_s12] sm:$0xff]  }
  0x11   : > { %2503 = vmatpush3.bf16.msra.mxu1 %v2731_v12  ;;  %v2751_v32 = vld [vmem:[%s3409_s1 + $0xb8] sm:$0xff]   ;;  %v273_v34 = vld [vmem:[#allocation2 + $0x1] sm:$0xf]  ;;  %v2469_v35 = vunpack.c.l.bf16 %v3026_v33  ;;  %v2470_v36 = vunpack.c.h.bf16 %v3026_v33 }
  0x12   : > { %2504 = vmatprep.subr.bf16.mxu1 %v2734_v15  ;;  %v274_v37 = vpack.c.bf16 %v273_v34, %v273_v34  ;;  %v2752_v38 = vld [vmem:[%s3409_s1 + $0x140] sm:$0xff]  }
  0x13   : > { %2483 = vmatpush3.bf16.msra.mxu0 %v2733_v14  ;;  %v252_v39 = vld [vmem:[#allocation2] sm:$0xf]  ;;  %v236_v40 = vmax.f32 %v2469_v35, 0.0  ;;  %v237_v41 = vmax.f32 %v2470_v36, 0.0 }
  0x14   : > { %2484 = vmatprep.subr.bf16.mxu0 %v2736_v17  ;;  %275 = vst [vmem:[#allocation3 + $0x8] sm:$0x3] %v274_v37  ;;  %v253_v42 = vpack.c.bf16 %v252_v39, %v252_v39  ;;  %v2754_v43 = vld [vmem:[%s3409_s1 + $0x1c0] sm:$0xff]  }
  0x15   : > { %2505 = vmatpush3.bf16.msra.mxu1 %v2735_v16  ;;  %v294_v44 = vld [vmem:[#allocation2 + $0x2] sm:$0xf]  ;;  %238 = vst [vmem:[#allocation4] sm:$0xff] %v236_v40  ;;  %239 = vst [vmem:[#allocation4 + $0x8] sm:$0xff] %v237_v41  ;;  %v2758_v40 = vld [vmem:[%s3409_s1 + $0x1c8] sm:$0xff]  }
  0x16   : > { %2506 = vmatprep.subr.bf16.mxu1 %v2738_v19  ;;  %254 = vst [vmem:[#allocation3] sm:$0x3] %v253_v42  ;;  %v295_v45 = vpack.c.bf16 %v294_v44, %v294_v44  ;;  %v1272_v7 = vld [vmem:[#allocation2 + $0x1] sm:$0xf]  ;;  %v2760_v41 = vld [vmem:[%s3409_s1 + $0x150] sm:$0xff]   ;;  %v2759_v44 = vld [vmem:[%s3409_s1 + $0x188] sm:$0xff]  }
  0x17   : > { %2485 = vmatpush3.bf16.msra.mxu0 %v2737_v18  ;;  %v1251_v13 = vld [vmem:[#allocation2] sm:$0xf] }
  0x18   : > { %2486 = vmatprep.subr.bf16.mxu0 %v2740_v21  ;;  %296 = vst [vmem:[#allocation3 + $0x10] sm:$0x3] %v295_v45  ;;  %v2755_v37 = vld [vmem:[%s3409_s1 + $0x180] sm:$0xff]   ;;  %v2761_v45 = vld [vmem:[%s3409_s1 + $0x110] sm:$0xff]  }
  0x19   : > { %2507 = vmatpush3.bf16.msra.mxu1 %v2739_v20 }
  0x1a   : > { %2508 = vmatprep.subr.bf16.mxu1 %v2742_v23 }
  0x1b   : > { %2487 = vmatpush3.bf16.msra.mxu0 %v2741_v22 }
  0x1c   : > { %2488 = vmatprep.subr.bf16.mxu0 %v2744_v25  ;;  %v240_v46 = vld [vmem:[#allocation4] sm:$0xf]  ;;  %v243_v47 = vld [vmem:[#allocation4 + $0x4] sm:$0xf]  ;;  %v246_v48 = vld [vmem:[#allocation4 + $0x8] sm:$0xf] }
  0x1d   : > { %2509 = vmatpush3.bf16.msra.mxu1 %v2743_v24  ;;  %242 = vst [vmem:[#allocation2 + $0x9] sm:$0xf] %v240_v46  ;;  %245 = vst [vmem:[#allocation2 + $0x11] sm:$0xf] %v243_v47  ;;  %v249_v49 = vld [vmem:[#allocation4 + $0xc] sm:$0xf] }
  0x1e   : > { %2510 = vmatprep.subr.bf16.mxu1 %v2746_v27  ;;  %248 = vst [vmem:[#allocation2 + $0x19] sm:$0xf] %v246_v48  ;;  %251 = vst [vmem:[#allocation2 + $0x21] sm:$0xf] %v249_v49  ;;  %v1273_v27 = vpack.c.bf16 %v1272_v7, %v1272_v7  ;;  %v2762_v46 = vld [vmem:[%s3409_s1 + $0x1d0] sm:$0xff]   ;;  %v2764_v47 = vld [vmem:[%s3409_s1 + $0x158] sm:$0xff]  }
  0x1f   : > { %2489 = vmatpush3.bf16.msra.mxu0 %v2745_v26  ;;  %v2763_v48 = vld [vmem:[%s3409_s1 + $0x190] sm:$0xff]   ;;  %v2765_v49 = vld [vmem:[%s3409_s1 + $0x118] sm:$0xff]   ;;  %v2770_v7 = vld [vmem:[%s3409_s1 + $0x1e0] sm:$0xff]  }
  0x20   : > { %2490 = vmatprep.subr.bf16.mxu0 %v2748_v29  ;;  %v2753_v29 = vld [vmem:[%s3409_s1 + $0x100] sm:$0xff]  }
  0x21   : > { %2511 = vmatpush3.bf16.msra.mxu1 %v2747_v28  ;;  %v1252_v28 = vpack.c.bf16 %v1251_v13, %v1251_v13 }
  0x22   : > { %2512 = vmatprep.subr.bf16.mxu1 %v2750_v31 }
  0x23   : > { %2491 = vmatpush3.bf16.msra.mxu0 %v2749_v30  ;;  %v1293_v30 = vld [vmem:[#allocation2 + $0x2] sm:$0xf] }
  0x24   : > { %2520 = vmatprep.subr.bf16.mxu0 %v2752_v38  ;;  %v276_v50 = vld [vmem:[#allocation2 + $0x9] sm:$0xf]  ;;  %v282_v51 = vld [vmem:[#allocation2 + $0x11] sm:$0xf]  ;;  %v1294_v39 = vpack.c.bf16 %v1293_v30, %v1293_v30 }
  0x25   : > { %2513 = vmatpush3.bf16.msra.mxu1 %v2751_v32  ;;  %v288_v52 = vld [vmem:[#allocation2 + $0x19] sm:$0xf]  ;;  %v277_v53 = vpack.c.bf16 %v276_v50, %v276_v50  ;;  %v283_v54 = vpack.c.bf16 %v282_v51, %v282_v51  ;;  %v255_v56 = vld [vmem:[#allocation2 + $0x8] sm:$0xf]  ;;  %v261_v57 = vld [vmem:[#allocation2 + $0x10] sm:$0xf] }
  0x26   : > { %2542 = vmatprep.subr.bf16.mxu1 %v2754_v43  ;;  %v289_v55 = vpack.c.bf16 %v288_v52, %v288_v52  ;;  %v267_v58 = vld [vmem:[#allocation2 + $0x18] sm:$0xf]  ;;  %v256_v59 = vpack.c.bf16 %v255_v56, %v255_v56  ;;  %v262_v60 = vpack.c.bf16 %v261_v57, %v261_v57  ;;  %v315_v62 = vld [vmem:[#allocation2 + $0x8] sm:$0xf]  ;;  %v318_v63 = vld [vmem:[#allocation2 + $0x10] sm:$0xf] }
  0x27   : > { %v268_v61 = vpack.c.bf16 %v267_v58, %v267_v58  ;;  %v324_v0 = vld [vmem:[#allocation2 + $0x18] sm:$0xf]  ;;  %v279_v1 = vrot.slane %v277_v53, 6  ;;  %v285_v2 = vrot.slane %v283_v54, 4  ;;  %v316_v5 = vpack.c.bf16 %v315_v62, %v315_v62  ;;  %v330_v6 = vld [vmem:[#allocation2 + $0x20] sm:$0xf] }
  0x28   : > { %v291_v4 = vrot.slane %v289_v55, 2  ;;  %v258_v8 = vrot.slane %v256_v59, 6  ;;  %v264_v9 = vrot.slane %v262_v60, 4  ;;  %v319_v11 = vpack.c.bf16 %v318_v63, %v318_v63  ;;  %v297_v12 = vld [vmem:[#allocation2 + $0xa] sm:$0xf]  ;;  %v2766_v51 = vld [vmem:[%s3409_s1 + $0x1d8] sm:$0xff]  }
  0x29   : > { %v270_v10 = vrot.slane %v268_v61, 2  ;;  %281 = vst [vmem:[#allocation3 + $0x8] sm:$0xc] %v279_v1  ;;  %287 = vst [vmem:[#allocation3 + $0x8] sm:$0x30] %v285_v2  ;;  %v325_v14 = vpack.c.bf16 %v324_v0, %v324_v0  ;;  %v331_v15 = vpack.c.bf16 %v330_v6, %v330_v6  ;;  %v298_v16 = vpack.c.bf16 %v297_v12, %v297_v12  ;;  %v2756_v32 = vld [vmem:[%s3409_s1 + $0x148] sm:$0xff]  }
  0x2a   : > { %293 = vst [vmem:[#allocation3 + $0x8] sm:$0xc0] %v291_v4  ;;  %317 = vst [vmem:[#allocation3 + $0x18] sm:$0x3] %v316_v5  ;;  %v303_v17 = vld [vmem:[#allocation2 + $0x12] sm:$0xf] }
  0x2b   : > { %v309_v18 = vld [vmem:[#allocation2 + $0x1a] sm:$0xf]  ;;  %260 = vst [vmem:[#allocation3] sm:$0xc] %v258_v8  ;;  %266 = vst [vmem:[#allocation3] sm:$0x30] %v264_v9  ;;  %v304_v20 = vpack.c.bf16 %v303_v17, %v303_v17 }
  0x2c   : > { %272 = vst [vmem:[#allocation3] sm:$0xc0] %v270_v10  ;;  %v321_v19 = vrot.slane %v319_v11, 6  ;;  %v310_v21 = vpack.c.bf16 %v309_v18, %v309_v18  ;;  %v327_v22 = vrot.slane %v325_v14, 4  ;;  %v333_v23 = vrot.slane %v331_v15, 2  ;;  %v2757_v38 = vld [vmem:[%s3409_s1 + $0x108] sm:$0xff]  }
  0x2d   : > { %v300_v24 = vrot.slane %v298_v16, 6  ;;  %v306_v25 = vrot.slane %v304_v20, 4  ;;  %v357_v50 = vld [vmem:[#allocation2 + $0xa] sm:$0xf]  ;;  %v360_v53 = vld [vmem:[#allocation2 + $0x12] sm:$0xf] }
  0x2e   : > { %323 = vst [vmem:[#allocation3 + $0x18] sm:$0xc] %v321_v19  ;;  %v312_v26 = vrot.slane %v310_v21, 2  ;;  %329 = vst [vmem:[#allocation3 + $0x18] sm:$0x30] %v327_v22  ;;  %v358_v52 = vpack.c.bf16 %v357_v50, %v357_v50  ;;  %v2768_v56 = vld [vmem:[%s3409_s1 + $0x160] sm:$0xff]   ;;  %v361_v57 = vpack.c.bf16 %v360_v53, %v360_v53 }
  0x2f   : > { %335 = vst [vmem:[#allocation3 + $0x18] sm:$0xc0] %v333_v23  ;;  %302 = vst [vmem:[#allocation3 + $0x10] sm:$0xc] %v300_v24  ;;  %v366_v54 = vld [vmem:[#allocation2 + $0x1a] sm:$0xf] }
  0x30   : > { %308 = vst [vmem:[#allocation3 + $0x10] sm:$0x30] %v306_v25  ;;  %314 = vst [vmem:[#allocation3 + $0x10] sm:$0xc0] %v312_v26  ;;  %v372_v55 = vld [vmem:[#allocation2 + $0x22] sm:$0xf]  ;;  %v367_v58 = vpack.c.bf16 %v366_v54, %v366_v54 }
  0x31   : > { %v443_v31 = vld [vmem:[#allocation3 + $0x8] sm:$0xff]  ;;  %v373_v59 = vpack.c.bf16 %v372_v55, %v372_v55  ;;  %359 = vst [vmem:[#allocation3 + $0x28] sm:$0x3] %v358_v52  ;;  %v336_v60 = vld [vmem:[#allocation2 + $0x9] sm:$0xf]  ;;  %v2769_v0 = vld [vmem:[%s3409_s1 + $0x120] sm:$0xff]  }
  0x32   : > { %1066 = vmatprep.mubr.bf16.mxu0 %v443_v31  ;;  %1274 = vst [vmem:[#allocation3 + $0x8] sm:$0x3] %v1273_v27  ;;  %v339_v61 = vld [vmem:[#allocation2 + $0x11] sm:$0xf]  ;;  %v345_v62 = vld [vmem:[#allocation2 + $0x19] sm:$0xf]  ;;  %v337_v5 = vpack.c.bf16 %v336_v60, %v336_v60 }
  0x33   : > { %v442_v34 = vld [vmem:[#allocation3] sm:$0xff]  ;;  %v2767_v63 = vld [vmem:[%s3409_s1 + $0x198] sm:$0xff]   ;;  %v363_v1 = vrot.slane %v361_v57, 6  ;;  %v369_v2 = vrot.slane %v367_v58, 4  ;;  %v375_v4 = vrot.slane %v373_v59, 2  ;;  %v340_v8 = vpack.c.bf16 %v339_v61, %v339_v61  ;;  %v2772_v19 = vld [vmem:[%s3409_s1 + $0x168] sm:$0xff]  }
  0x34   : > { %1067 = vmatmul.mubr.bf16.vlgmr.msra.gmra.mrb[0].mxu0 %v442_v34  ;;  %1253 = vst [vmem:[#allocation3] sm:$0x3] %v1252_v28  ;;  %v351_v6 = vld [vmem:[#allocation2 + $0x21] sm:$0xf]  ;;  %v346_v9 = vpack.c.bf16 %v345_v62, %v345_v62  ;;  %v400_v11 = vld [vmem:[#allocation2 + $0x11] sm:$0xf] }
  0x35   : > { %2521 = vmatpush3.bf16.msra.mxu0 %v2753_v29  ;;  %v352_v10 = vpack.c.bf16 %v351_v6, %v351_v6  ;;  %v403_v12 = vld [vmem:[#allocation2 + $0x19] sm:$0xf]  ;;  %v409_v13 = vld [vmem:[#allocation2 + $0x21] sm:$0xf]  ;;  %365 = vst [vmem:[#allocation3 + $0x28] sm:$0xc] %v363_v1  ;;  %v401_v14 = vpack.c.bf16 %v400_v11, %v400_v11 }
  0x36   : > { %v445_v42 = vld [vmem:[#allocation3 + $0x18] sm:$0xff]  ;;  %2522 = vmatprep.subr.bf16.mxu0 %v2756_v32  ;;  %371 = vst [vmem:[#allocation3 + $0x28] sm:$0x30] %v369_v2  ;;  %377 = vst [vmem:[#allocation3 + $0x28] sm:$0xc0] %v375_v4  ;;  %v404_v15 = vpack.c.bf16 %v403_v12, %v403_v12  ;;  %v410_v16 = vpack.c.bf16 %v409_v13, %v409_v13  ;;  %v342_v20 = vrot.slane %v340_v8, 6 }
  0x37   : > { %1107 = vmatprep.mubr.bf16.mxu1 %v445_v42  ;;  %v444_v43 = vld [vmem:[#allocation3 + $0x10] sm:$0xff]  ;;  %338 = vst [vmem:[#allocation3 + $0x20] sm:$0x3] %v337_v5  ;;  %v415_v17 = vld [vmem:[#allocation2 + $0x29] sm:$0xf]  ;;  %v348_v21 = vrot.slane %v346_v9, 4 }
  0x38   : > { %1108 = vmatmul.mubr.bf16.vlgmr.msra.gmra.mrb[0].mxu1 %v444_v43  ;;  %1295 = vst [vmem:[#allocation3 + $0x10] sm:$0x3] %v1294_v39  ;;  %v1413_v18 = vld [vmem:[#allocation2 + $0x29] sm:$0xf]  ;;  %v354_v22 = vrot.slane %v352_v10, 2  ;;  %v416_v23 = vpack.c.bf16 %v415_v17, %v415_v17  ;;  %v2771_v24 = vld [vmem:[%s3409_s1 + $0x1a0] sm:$0xff]  }
  0x39   : > { %2543 = vmatpush3.bf16.msra.mxu1 %v2755_v37  ;;  %2523 = vmatpush3.bf16.msra.mxu0 %v2757_v38  ;;  %402 = vst [vmem:[#allocation3 + $0x38] sm:$0x3] %v401_v14  ;;  %v406_v25 = vrot.slane %v404_v15, 6  ;;  %v412_v26 = vrot.slane %v410_v16, 4  ;;  %v378_v27 = vld [vmem:[#allocation2 + $0x10] sm:$0xf]  ;;  %v1414_v43 = vpack.c.bf16 %v1413_v18, %v1413_v18 }
  0x3a   : > { %2544 = vmatprep.subr.bf16.mxu1 %v2758_v40  ;;  %2524 = vmatprep.subr.bf16.mxu0 %v2760_v41  ;;  %v381_v28 = vld [vmem:[#allocation2 + $0x18] sm:$0xf]  ;;  %v2773_v29 = vld [vmem:[%s3409_s1 + $0x128] sm:$0xff]   ;;  %344 = vst [vmem:[#allocation3 + $0x20] sm:$0xc] %v342_v20  ;;  %v418_v30 = vrot.slane %v416_v23, 2  ;;  %v379_v31 = vpack.c.bf16 %v378_v27, %v378_v27 }
  0x3b   : > { %350 = vst [vmem:[#allocation3 + $0x20] sm:$0x30] %v348_v21  ;;  %356 = vst [vmem:[#allocation3 + $0x20] sm:$0xc0] %v354_v22  ;;  %v382_v32 = vpack.c.bf16 %v381_v28, %v381_v28  ;;  %v387_v34 = vld [vmem:[#allocation2 + $0x20] sm:$0xf] }
  0x3c   : > { %v394_v37 = vld [vmem:[#allocation2 + $0x28] sm:$0xf]  ;;  %408 = vst [vmem:[#allocation3 + $0x38] sm:$0xc] %v406_v25  ;;  %414 = vst [vmem:[#allocation3 + $0x38] sm:$0x30] %v412_v26  ;;  %v388_v39 = vpack.c.bf16 %v387_v34, %v387_v34 }
  0x3d   : > { %2545 = vmatpush3.bf16.msra.mxu1 %v2759_v44  ;;  %2525 = vmatpush3.bf16.msra.mxu0 %v2761_v45  ;;  %v2774_v38 = vld [vmem:[%s3409_s1 + $0x1e8] sm:$0xff]   ;;  %v395_v40 = vpack.c.bf16 %v394_v37, %v394_v37  ;;  %v2776_v42 = vld [vmem:[%s3409_s1 + $0x170] sm:$0xff]   ;;  %420 = vst [vmem:[#allocation3 + $0x38] sm:$0xc0] %v418_v30  ;;  %380 = vst [vmem:[#allocation3 + $0x30] sm:$0x3] %v379_v31 }
  0x3e   : > { %2546 = vmatprep.subr.bf16.mxu1 %v2762_v46  ;;  %2526 = vmatprep.subr.bf16.mxu0 %v2764_v47  ;;  %v1392_v41 = vld [vmem:[#allocation2 + $0x28] sm:$0xf]  ;;  %v384_v44 = vrot.slane %v382_v32, 6  ;;  %v2777_v46 = vld [vmem:[%s3409_s1 + $0x130] sm:$0xff]   ;;  %v390_v47 = vrot.slane %v388_v39, 4  ;;  %v447_v50 = vld [vmem:[#allocation3 + $0x28] sm:$0xff] }
  0x3f   : > { %v2775_v45 = vld [vmem:[%s3409_s1 + $0x1a8] sm:$0xff]   ;;  %v2780_v52 = vld [vmem:[%s3409_s1 + $0x178] sm:$0xff]   ;;  %v1416_v53 = vrot.slane %v1414_v43, 2  ;;  %v2779_v54 = vld [vmem:[%s3409_s1 + $0x1b0] sm:$0xff]   ;;  %1148 = vmatprep.mubr.bf16.mxu0 %v447_v50 }
  0x40   : > { %386 = vst [vmem:[#allocation3 + $0x30] sm:$0xc] %v384_v44  ;;  %392 = vst [vmem:[#allocation3 + $0x30] sm:$0x30] %v390_v47  ;;  %v2781_v55 = vld [vmem:[%s3409_s1 + $0x138] sm:$0xff]   ;;  %v2784_v5 = vld [vmem:[%s3409_s1 + $0x200] sm:$0xff]  }
  0x41   : > { %2547 = vmatpush3.bf16.msra.mxu1 %v2763_v48  ;;  %2527 = vmatpush3.bf16.msra.mxu0 %v2765_v49  ;;  %v397_v48 = vrot.slane %v395_v40, 2  ;;  %v2778_v49 = vld [vmem:[%s3409_s1 + $0x1f0] sm:$0xff]   ;;  %v424_v61 = vld [vmem:[#allocation2 + $0x1a] sm:$0xf]  ;;  %v430_v62 = vld [vmem:[#allocation2 + $0x22] sm:$0xf] }
  0x42   : > { %2548 = vmatprep.subr.bf16.mxu1 %v2766_v51  ;;  %2528 = vmatprep.subr.bf16.mxu0 %v2768_v56  ;;  %v1393_v51 = vpack.c.bf16 %v1392_v41, %v1392_v41  ;;  %v2782_v56 = vld [vmem:[%s3409_s1 + $0x1f8] sm:$0xff]   ;;  %v421_v57 = vld [vmem:[#allocation2 + $0x12] sm:$0xf]  ;;  %v436_v1 = vld [vmem:[#allocation2 + $0x2a] sm:$0xf] }
  0x43   : > { %399 = vst [vmem:[#allocation3 + $0x30] sm:$0xc0] %v397_v48  ;;  %v422_v60 = vpack.c.bf16 %v421_v57, %v421_v57  ;;  %v1434_v2 = vld [vmem:[#allocation2 + $0x2a] sm:$0xf]  ;;  %v2783_v4 = vld [vmem:[%s3409_s1 + $0x1b8] sm:$0xff]   ;;  %v437_v6 = vpack.c.bf16 %v436_v1, %v436_v1  ;;  %v446_v8 = vld [vmem:[#allocation3 + $0x20] sm:$0xff] }
  0x44   : > { %v449_v58 = vld [vmem:[#allocation3 + $0x38] sm:$0xff]  ;;  %v1395_v59 = vrot.slane %v1393_v51, 2  ;;  %v2786_v15 = vld [vmem:[%s3409_s1 + $0x210] sm:$0xff]   ;;  %v2787_v17 = vld [vmem:[%s3409_s1 + $0x218] sm:$0xff]  }
  0x45   : > { %2549 = vmatpush3.bf16.msra.mxu1 %v2767_v63  ;;  %2529 = vmatpush3.bf16.msra.mxu0 %v2769_v0  ;;  %1418 = vst [vmem:[#allocation3 + $0x38] sm:$0xc0] %v1416_v53  ;;  %v425_v63 = vpack.c.bf16 %v424_v61, %v424_v61  ;;  %v431_v0 = vpack.c.bf16 %v430_v62, %v430_v62  ;;  %423 = vst [vmem:[#allocation3 + $0x40] sm:$0x3] %v422_v60  ;;  %v439_v12 = vrot.slane %v437_v6, 2  ;;  %v2785_v14 = vld [vmem:[%s3409_s1 + $0x208] sm:$0xff]  }
  0x46   : > { %2550 = vmatprep.subr.bf16.mxu1 %v2770_v7  ;;  %2530 = vmatprep.subr.bf16.mxu0 %v2772_v19  ;;  %v1435_v7 = vpack.c.bf16 %v1434_v2, %v1434_v2  ;;  %v2788_v18 = vld [vmem:[%s3409_s1 + $0x220] sm:$0xff]   ;;  %v2789_v19 = vld [vmem:[%s3409_s1 + $0x228] sm:$0xff]   ;;  %v2790_v20 = vld [vmem:[%s3409_s1 + $0x230] sm:$0xff]  }
  0x47   : > { %1189 = vmatprep.mubr.bf16.mxu1 %v449_v58  ;;  %v427_v10 = vrot.slane %v425_v63, 6  ;;  %v433_v11 = vrot.slane %v431_v0, 4  ;;  %441 = vst [vmem:[#allocation3 + $0x40] sm:$0xc0] %v439_v12  ;;  %v2791_v21 = vld [vmem:[%s3409_s1 + $0x238] sm:$0xff]   ;;  %v2792_v22 = vld [vmem:[%s3411_s3 + $0x40] sm:$0xff]  }
  0x48   : > { %v1437_v13 = vrot.slane %v1435_v7, 2  ;;  %v2793_v23 = vld [vmem:[%s3411_s3 + $0xc0] sm:$0xff]   ;;  %v2796_v26 = vld [vmem:[%s3411_s3 + $0x48] sm:$0xff]   ;;  %v2800_v30 = vld [vmem:[%s3411_s3 + $0x50] sm:$0xff]  }
  0x49   : > { %2551 = vmatpush3.bf16.msra.mxu1 %v2771_v24  ;;  %2531 = vmatpush3.bf16.msra.mxu0 %v2773_v29  ;;  %429 = vst [vmem:[#allocation3 + $0x40] sm:$0xc] %v427_v10  ;;  %435 = vst [vmem:[#allocation3 + $0x40] sm:$0x30] %v433_v11  ;;  %v2794_v24 = vld [vmem:[%s3411_s3] sm:$0xff]   ;;  %v2797_v27 = vld [vmem:[%s3411_s3 + $0xc8] sm:$0xff]  }
  0x4a   : > { %2552 = vmatprep.subr.bf16.mxu1 %v2774_v38  ;;  %2532 = vmatprep.subr.bf16.mxu0 %v2776_v42  ;;  %v448_v9 = vld [vmem:[#allocation3 + $0x30] sm:$0xff]  ;;  %v2798_v28 = vld [vmem:[%s3411_s3 + $0x8] sm:$0xff]   ;;  %v2801_v31 = vld [vmem:[%s3411_s3 + $0xd0] sm:$0xff]  }
  0x4b   : > { %1397 = vst [vmem:[#allocation3 + $0x30] sm:$0xc0] %v1395_v59  ;;  %v2795_v25 = vld [vmem:[%s3411_s3 + $0x80] sm:$0xff]   ;;  %v2799_v29 = vld [vmem:[%s3411_s3 + $0x88] sm:$0xff]   ;;  %v2802_v32 = vld [vmem:[%s3411_s3 + $0x10] sm:$0xff]  }
  0x4c   : > { %v2803_v34 = vld [vmem:[%s3411_s3 + $0x90] sm:$0xff]   ;;  %v2804_v37 = vld [vmem:[%s3411_s3 + $0x58] sm:$0xff]   ;;  %v2808_v41 = vld [vmem:[%s3411_s3 + $0x60] sm:$0xff]  }
  0x4d   : > { %2553 = vmatpush3.bf16.msra.mxu1 %v2775_v45  ;;  %2533 = vmatpush3.bf16.msra.mxu0 %v2777_v46  ;;  %v2805_v38 = vld [vmem:[%s3411_s3 + $0xd8] sm:$0xff]   ;;  %v2809_v42 = vld [vmem:[%s3411_s3 + $0xe0] sm:$0xff]   ;;  %v2812_v45 = vld [vmem:[%s3411_s3 + $0x68] sm:$0xff]  }
  0x4e   : > { %2554 = vmatprep.subr.bf16.mxu1 %v2778_v49  ;;  %2534 = vmatprep.subr.bf16.mxu0 %v2780_v52  ;;  %v2806_v39 = vld [vmem:[%s3411_s3 + $0x18] sm:$0xff]   ;;  %v2810_v43 = vld [vmem:[%s3411_s3 + $0x20] sm:$0xff]   ;;  %v2813_v46 = vld [vmem:[%s3411_s3 + $0xe8] sm:$0xff]  }
  0x4f   : > { %v2807_v40 = vld [vmem:[%s3411_s3 + $0x98] sm:$0xff]   ;;  %v2811_v44 = vld [vmem:[%s3411_s3 + $0xa0] sm:$0xff]   ;;  %v2814_v47 = vld [vmem:[%s3411_s3 + $0x28] sm:$0xff]  }
  0x50   : > { %v450_v16 = vld [vmem:[#allocation3 + $0x40] sm:$0xff]  ;;  %v2815_v48 = vld [vmem:[%s3411_s3 + $0xa8] sm:$0xff]   ;;  %v2820_v53 = vld [vmem:[%s3411_s3 + $0x78] sm:$0xff]  }
  0x51   : > { %2555 = vmatpush3.bf16.msra.mxu1 %v2779_v54  ;;  %2535 = vmatpush3.bf16.msra.mxu0 %v2781_v55  ;;  %1439 = vst [vmem:[#allocation3 + $0x40] sm:$0xc0] %v1437_v13  ;;  %v2816_v49 = vld [vmem:[%s3411_s3 + $0x70] sm:$0xff]   ;;  %v2821_v54 = vld [vmem:[%s3411_s3 + $0xf8] sm:$0xff]   ;;  %v2824_v57 = vld [vmem:[%s3411_s3 + $0x140] sm:$0xff]  }
  0x52   : > { %2556 = vmatprep.subr.bf16.mxu1 %v2782_v56  ;;  %2670 = vmatprep.subr.bf16.mxu0 %v2872_v3  ;;  %v2817_v50 = vld [vmem:[%s3411_s3 + $0xf0] sm:$0xff]   ;;  %v2822_v55 = vld [vmem:[%s3411_s3 + $0x38] sm:$0xff]   ;;  %v2825_v58 = vld [vmem:[%s3411_s3 + $0x1c0] sm:$0xff]  }
  0x53   : > { %v2818_v51 = vld [vmem:[%s3411_s3 + $0x30] sm:$0xff]   ;;  %v2823_v56 = vld [vmem:[%s3411_s3 + $0xb8] sm:$0xff]   ;;  %v2313_v60 = vld [vmem:[%s3410_s2] ss:$0 sm:$0xff] }
  0x54   : > { %1149 = vmatmul.mubr.bf16.vlgmr.msra.gmra.mrb[4].mxu0 %v446_v8  ;;  %v2819_v52 = vld [vmem:[%s3411_s3 + $0xb0] sm:$0xff]  }
  0x55   : > { %2557 = vmatpush3.bf16.msra.mxu1 %v2783_v4  ;;  %2671 = vmatpush3.bf16.msra.mxu0 %v2784_v5 }
  0x56   : > { %2672 = vmatprep.subr.bf16.mxu0 %v2872_v3  ;;  %2686 = vmatprep.mubr.msk.bf16.mxu0 %vm2873_vm0, %v2872_v3 }
  0x57   : > { %2573 = vmatprep.subr.bf16.mxu1 %v2792_v22 }
  0x58   : > { %1190 = vmatmul.mubr.bf16.vlgmr.msra.gmra.mrb[4].mxu1 %v448_v9 }
  0x59   : > { %2673 = vmatpush3.bf16.msra.mxu0 %v2785_v14  ;;  %2574 = vmatpush3.bf16.msra.mxu1 %v2794_v24 }
  0x5a   : > { %2674 = vmatprep.subr.bf16.mxu0 %v2872_v3  ;;  %2575 = vmatprep.subr.bf16.mxu1 %v2796_v26 }
  0x5d   : > { %2675 = vmatpush3.bf16.msra.mxu0 %v2786_v15  ;;  %2576 = vmatpush3.bf16.msra.mxu1 %v2798_v28 }
  0x5e   : > { %2676 = vmatprep.subr.bf16.mxu0 %v2872_v3  ;;  %2577 = vmatprep.subr.bf16.mxu1 %v2800_v30 }
  0x61   : > { %2677 = vmatpush3.bf16.msra.mxu0 %v2787_v17  ;;  %2578 = vmatpush3.bf16.msra.mxu1 %v2802_v32 }
  0x62   : > { %2678 = vmatprep.subr.bf16.mxu0 %v2872_v3  ;;  %2579 = vmatprep.subr.bf16.mxu1 %v2804_v37 }
  0x65   : > { %2679 = vmatpush3.bf16.msra.mxu0 %v2788_v18  ;;  %2580 = vmatpush3.bf16.msra.mxu1 %v2806_v39 }
  0x66   : > { %2680 = vmatprep.subr.bf16.mxu0 %v2872_v3  ;;  %2581 = vmatprep.subr.bf16.mxu1 %v2808_v41 }
  0x69   : > { %2681 = vmatpush3.bf16.msra.mxu0 %v2789_v19  ;;  %2582 = vmatpush3.bf16.msra.mxu1 %v2810_v43 }
  0x6a   : > { %2682 = vmatprep.subr.bf16.mxu0 %v2872_v3  ;;  %2583 = vmatprep.subr.bf16.mxu1 %v2812_v45 }
  0x6d   : > { %2683 = vmatpush3.bf16.msra.mxu0 %v2790_v20  ;;  %2584 = vmatpush3.bf16.msra.mxu1 %v2814_v47 }
  0x6e   : > { %2684 = vmatprep.subr.bf16.mxu0 %v2872_v3  ;;  %2585 = vmatprep.subr.bf16.mxu1 %v2816_v49 }
  0x71   : > { %2685 = vmatpush3.bf16.msra.mxu0 %v2791_v21  ;;  %2586 = vmatpush3.bf16.msra.mxu1 %v2818_v51 }
  0x72   : > { %2595 = vmatprep.subr.bf16.mxu0 %v2793_v23  ;;  %2587 = vmatprep.subr.bf16.mxu1 %v2820_v53 }
  0x74   : > { %2687 = vmatmul.mubr.bf16.vlgmr.msra.gmra.mrb[8].mxu0 %v450_v16 }
  0x75   : > { %2596 = vmatpush3.bf16.msra.mxu0 %v2795_v25  ;;  %2588 = vmatpush3.bf16.msra.mxu1 %v2822_v55 }
  0x76   : > { %2597 = vmatprep.subr.bf16.mxu0 %v2797_v27  ;;  %2617 = vmatprep.subr.bf16.mxu1 %v2824_v57 }
  0x79   : > { %2598 = vmatpush3.bf16.msra.mxu0 %v2799_v29 }
  0x7a   : > { %2599 = vmatprep.subr.bf16.mxu0 %v2801_v31 }
  0x7d   : > { %2600 = vmatpush3.bf16.msra.mxu0 %v2803_v34 }
  0x7e   : > { %2601 = vmatprep.subr.bf16.mxu0 %v2805_v38 }
  0x81   : > { %2602 = vmatpush3.bf16.msra.mxu0 %v2807_v40 }
  0x82   : > { %2603 = vmatprep.subr.bf16.mxu0 %v2809_v42 }
  0x85   : > { %2604 = vmatpush3.bf16.msra.mxu0 %v2811_v44 }
  0x86   : > { %2605 = vmatprep.subr.bf16.mxu0 %v2813_v46 }
  0x89   : > { %2606 = vmatpush3.bf16.msra.mxu0 %v2815_v48 }
  0x8a   : > { %2607 = vmatprep.subr.bf16.mxu0 %v2817_v50 }
  0x8d   : > { %2608 = vmatpush3.bf16.msra.mxu0 %v2819_v52 }
  0x8e   : > { %2609 = vmatprep.subr.bf16.mxu0 %v2821_v54 }
  0x91   : > { %2610 = vmatpush3.bf16.msra.mxu0 %v2823_v56 }
  0x92   : > { %2639 = vmatprep.subr.bf16.mxu0 %v2825_v58 }
 0x107   : > { %v2492_v59 = vpop.f32.mrb[0].mxu0 }
 0x108   : > { %v2493_v61 = vpop.f32.mrb[1].mxu0 }
 0x109   : > { %v2494_v62 = vadd.f32 %v2493_v61, %v2492_v59  ;;  %v2495_v63 = vpop.f32.mrb[2].mxu0 }
 0x10a   : > { %v2496_v0 = vpop.f32.mrb[3].mxu0 }
 0x10b   : > { %v1069_v1 = vadd.f32 %v2494_v62, %v2313_v60  ;;  %v2514_v2 = vpop.f32.mrb[0].mxu1  ;;  %v2497_v4 = vadd.f32 %v2496_v0, %v2495_v63 }
 0x10c   : > { %v2515_v5 = vpop.f32.mrb[1].mxu1 }
 0x10d   : > { %v1072_v6 = vadd.f32 %v2497_v4, %v2313_v60  ;;  %v2516_v7 = vadd.f32 %v2515_v5, %v2514_v2  ;;  %v2517_v8 = vpop.f32.mrb[2].mxu1 }
 0x10e   : > { %v2518_v9 = vpop.f32.mrb[3].mxu1 }
 0x10f   : > { %v1110_v10 = vadd.f32 %v2516_v7, %v1069_v1  ;;  %v2519_v11 = vadd.f32 %v2518_v9, %v2517_v8 }
 0x111   : > { %v1113_v12 = vadd.f32 %v2519_v11, %v1072_v6 }
 0x127   : > { %v2536_v13 = vpop.f32.mrb[4].mxu0 }
 0x128   : > { %v2537_v14 = vpop.f32.mrb[5].mxu0 }
 0x129   : > { %v2538_v15 = vadd.f32 %v2537_v14, %v2536_v13  ;;  %v2539_v16 = vpop.f32.mrb[6].mxu0 }
 0x12a   : > { %v2540_v17 = vpop.f32.mrb[7].mxu0 }
 0x12b   : > { %v1151_v18 = vadd.f32 %v2538_v15, %v1110_v10  ;;  %v2558_v19 = vpop.f32.mrb[4].mxu1  ;;  %v2541_v20 = vadd.f32 %v2540_v17, %v2539_v16 }
 0x12c   : > { %v2559_v21 = vpop.f32.mrb[5].mxu1 }
 0x12d   : > { %v1154_v22 = vadd.f32 %v2541_v20, %v1113_v12  ;;  %v2560_v23 = vadd.f32 %v2559_v21, %v2558_v19  ;;  %v2561_v24 = vpop.f32.mrb[6].mxu1 }
 0x12e   : > { %v2562_v25 = vpop.f32.mrb[7].mxu1 }
 0x12f   : > { %v2563_v26 = vadd.f32 %v2562_v25, %v2561_v24  ;;  %v1192_v27 = vadd.f32 %v2560_v23, %v1151_v18 }
 0x131   : > { %v1195_v28 = vadd.f32 %v2563_v26, %v1154_v22 }
 0x147   : > { %v1232_v29 = vpop.f32.mrb[8].mxu0 }
 0x148   : > { %v1233_v30 = vadd.f32 %v1232_v29, %v1192_v27  ;;  %v2688_v31 = vpop.f32.mrb[9].mxu0 }
 0x149   : > { %v1235_v32 = vpop.f32.mrb[10].mxu0 }
 0x14a   : > { %v1239_v34 = vmax.f32 %v1233_v30, 0.0  ;;  %v1236_v37 = vadd.f32 %v1235_v32, %v1195_v28  ;;  %v2689_v38 = vpop.f32.mrb[11].mxu0 }
 0x14c   : > { %1241 = vst [vmem:[#allocation4] sm:$0xff] %v1239_v34  ;;  %v1240_v39 = vmax.f32 %v1236_v37, 0.0 }
 0x14e   : > { %1242 = vst [vmem:[#allocation4 + $0x8] sm:$0xff] %v1240_v39 }
 0x153   : > { %v1243_v40 = vld [vmem:[#allocation4] sm:$0xf]  ;;  %v1245_v41 = vld [vmem:[#allocation4 + $0x4] sm:$0xf] }
 0x154   : > { %1244 = vst [vmem:[#allocation2 + $0x9] sm:$0xf] %v1243_v40  ;;  %1246 = vst [vmem:[#allocation2 + $0x11] sm:$0xf] %v1245_v41 }
 0x155   : > { %v1247_v42 = vld [vmem:[#allocation4 + $0x8] sm:$0xf]  ;;  %v1249_v43 = vld [vmem:[#allocation4 + $0xc] sm:$0xf] }
 0x156   : > { %1250 = vst [vmem:[#allocation2 + $0x21] sm:$0xf] %v1249_v43  ;;  %1248 = vst [vmem:[#allocation2 + $0x19] sm:$0xf] %v1247_v42 }
 0x15b   : > { %v1275_v44 = vld [vmem:[#allocation2 + $0x9] sm:$0xf]  ;;  %v1281_v45 = vld [vmem:[#allocation2 + $0x11] sm:$0xf] }
 0x15c   : > { %v1314_v46 = vld [vmem:[#allocation2 + $0x8] sm:$0xf]  ;;  %v1276_v47 = vpack.c.bf16 %v1275_v44, %v1275_v44  ;;  %v1282_v48 = vpack.c.bf16 %v1281_v45, %v1281_v45  ;;  %v1317_v50 = vld [vmem:[#allocation2 + $0x10] sm:$0xf] }
 0x15d   : > { %v1315_v49 = vpack.c.bf16 %v1314_v46, %v1314_v46  ;;  %v1254_v51 = vld [vmem:[#allocation2 + $0x8] sm:$0xf]  ;;  %v1260_v52 = vld [vmem:[#allocation2 + $0x10] sm:$0xf]  ;;  %v1287_v53 = vld [vmem:[#allocation2 + $0x19] sm:$0xf]  ;;  %v1318_v54 = vpack.c.bf16 %v1317_v50, %v1317_v50 }
 0x15e   : > { %v1323_v55 = vld [vmem:[#allocation2 + $0x18] sm:$0xf]  ;;  %v1329_v56 = vld [vmem:[#allocation2 + $0x20] sm:$0xf]  ;;  %v1255_v57 = vpack.c.bf16 %v1254_v51, %v1254_v51  ;;  %v1261_v58 = vpack.c.bf16 %v1260_v52, %v1260_v52  ;;  %v1278_v59 = vrot.slane %v1276_v47, 6  ;;  %v1284_v60 = vrot.slane %v1282_v48, 4 }
 0x15f   : > { %v1288_v61 = vpack.c.bf16 %v1287_v53, %v1287_v53  ;;  %1316 = vst [vmem:[#allocation3 + $0x18] sm:$0x3] %v1315_v49  ;;  %v1324_v62 = vpack.c.bf16 %v1323_v55, %v1323_v55  ;;  %v1266_v63 = vld [vmem:[#allocation2 + $0x18] sm:$0xf]  ;;  %v1296_v0 = vld [vmem:[#allocation2 + $0xa] sm:$0xf]  ;;  %v1330_v2 = vpack.c.bf16 %v1329_v56, %v1329_v56 }
 0x160   : > { %v1320_v1 = vrot.slane %v1318_v54, 6  ;;  %v1257_v4 = vrot.slane %v1255_v57, 6  ;;  %v1263_v5 = vrot.slane %v1261_v58, 4  ;;  %v1302_v6 = vld [vmem:[#allocation2 + $0x12] sm:$0xf]  ;;  %v1267_v9 = vpack.c.bf16 %v1266_v63, %v1266_v63  ;;  %v2826_v63 = vld [vmem:[%s3411_s3 + $0x100] sm:$0xff]  }
 0x161   : > { %1280 = vst [vmem:[#allocation3 + $0x8] sm:$0xc] %v1278_v59  ;;  %1286 = vst [vmem:[#allocation3 + $0x8] sm:$0x30] %v1284_v60  ;;  %v1290_v7 = vrot.slane %v1288_v61, 2  ;;  %v1326_v8 = vrot.slane %v1324_v62, 4  ;;  %v1297_v10 = vpack.c.bf16 %v1296_v0, %v1296_v0  ;;  %v1303_v14 = vpack.c.bf16 %v1302_v6, %v1302_v6 }
 0x162   : > { %v1308_v11 = vld [vmem:[#allocation2 + $0x1a] sm:$0xf]  ;;  %v1356_v12 = vld [vmem:[#allocation2 + $0xa] sm:$0xf]  ;;  %1322 = vst [vmem:[#allocation3 + $0x18] sm:$0xc] %v1320_v1 }
 0x163   : > { %v1332_v13 = vrot.slane %v1330_v2, 2  ;;  %1259 = vst [vmem:[#allocation3] sm:$0xc] %v1257_v4  ;;  %1265 = vst [vmem:[#allocation3] sm:$0x30] %v1263_v5  ;;  %v1309_v15 = vpack.c.bf16 %v1308_v11, %v1308_v11  ;;  %v1357_v16 = vpack.c.bf16 %v1356_v12, %v1356_v12  ;;  %v1269_v19 = vrot.slane %v1267_v9, 2 }
 0x164   : > { %v1359_v17 = vld [vmem:[#allocation2 + $0x12] sm:$0xf]  ;;  %v1365_v18 = vld [vmem:[#allocation2 + $0x1a] sm:$0xf]  ;;  %1292 = vst [vmem:[#allocation3 + $0x8] sm:$0xc0] %v1290_v7 }
 0x165   : > { %1328 = vst [vmem:[#allocation3 + $0x18] sm:$0x30] %v1326_v8  ;;  %v1299_v20 = vrot.slane %v1297_v10, 6  ;;  %v1360_v21 = vpack.c.bf16 %v1359_v17, %v1359_v17  ;;  %v1366_v22 = vpack.c.bf16 %v1365_v18, %v1365_v18  ;;  %v1371_v23 = vld [vmem:[#allocation2 + $0x22] sm:$0xf]  ;;  %v1305_v25 = vrot.slane %v1303_v14, 4 }
 0x166   : > { %v1398_v24 = vld [vmem:[#allocation2 + $0x11] sm:$0xf]  ;;  %1334 = vst [vmem:[#allocation3 + $0x18] sm:$0xc0] %v1332_v13  ;;  %v1311_v26 = vrot.slane %v1309_v15, 2  ;;  %v1372_v27 = vpack.c.bf16 %v1371_v23, %v1371_v23  ;;  %v2827_v5 = vld [vmem:[%s3411_s3 + $0x180] sm:$0xff]  }
 0x167   : > { %1358 = vst [vmem:[#allocation3 + $0x28] sm:$0x3] %v1357_v16  ;;  %v1399_v28 = vpack.c.bf16 %v1398_v24, %v1398_v24  ;;  %v1401_v29 = vld [vmem:[#allocation2 + $0x19] sm:$0xf]  ;;  %v1407_v30 = vld [vmem:[#allocation2 + $0x21] sm:$0xf] }
 0x168   : > { %1271 = vst [vmem:[#allocation3] sm:$0xc0] %v1269_v19  ;;  %1301 = vst [vmem:[#allocation3 + $0x10] sm:$0xc] %v1299_v20  ;;  %v1362_v31 = vrot.slane %v1360_v21, 6  ;;  %v1368_v32 = vrot.slane %v1366_v22, 4  ;;  %v1402_v34 = vpack.c.bf16 %v1401_v29, %v1401_v29  ;;  %v1408_v37 = vpack.c.bf16 %v1407_v30, %v1407_v30 }
 0x169   : > { %v1335_v38 = vld [vmem:[#allocation2 + $0x9] sm:$0xf]  ;;  %v1338_v39 = vld [vmem:[#allocation2 + $0x11] sm:$0xf]  ;;  %1307 = vst [vmem:[#allocation3 + $0x10] sm:$0x30] %v1305_v25 }
 0x16a   : > { %1313 = vst [vmem:[#allocation3 + $0x10] sm:$0xc0] %v1311_v26  ;;  %v1374_v40 = vrot.slane %v1372_v27, 2  ;;  %1400 = vst [vmem:[#allocation3 + $0x38] sm:$0x3] %v1399_v28  ;;  %v1336_v41 = vpack.c.bf16 %v1335_v38, %v1335_v38  ;;  %v1339_v42 = vpack.c.bf16 %v1338_v39, %v1338_v39  ;;  %v1404_v45 = vrot.slane %v1402_v34, 6 }
 0x16b   : > { %v1344_v43 = vld [vmem:[#allocation2 + $0x19] sm:$0xf]  ;;  %v1350_v44 = vld [vmem:[#allocation2 + $0x21] sm:$0xf]  ;;  %1364 = vst [vmem:[#allocation3 + $0x28] sm:$0xc] %v1362_v31 }
 0x16c   : > { %1370 = vst [vmem:[#allocation3 + $0x28] sm:$0x30] %v1368_v32  ;;  %v1410_v46 = vrot.slane %v1408_v37, 4  ;;  %v1345_v47 = vpack.c.bf16 %v1344_v43, %v1344_v43  ;;  %v1351_v48 = vpack.c.bf16 %v1350_v44, %v1350_v44  ;;  %v1377_v49 = vld [vmem:[#allocation2 + $0x10] sm:$0xf]  ;;  %v1341_v51 = vrot.slane %v1339_v42, 6 }
 0x16d   : > { %v1380_v50 = vld [vmem:[#allocation2 + $0x18] sm:$0xf]  ;;  %1376 = vst [vmem:[#allocation3 + $0x28] sm:$0xc0] %v1374_v40  ;;  %1337 = vst [vmem:[#allocation3 + $0x20] sm:$0x3] %v1336_v41  ;;  %v1378_v52 = vpack.c.bf16 %v1377_v49, %v1377_v49 }
 0x16e   : > { %v1381_v53 = vpack.c.bf16 %v1380_v50, %v1380_v50  ;;  %v1386_v54 = vld [vmem:[#allocation2 + $0x20] sm:$0xf]  ;;  %v1419_v55 = vld [vmem:[#allocation2 + $0x12] sm:$0xf]  ;;  %1406 = vst [vmem:[#allocation3 + $0x38] sm:$0xc] %v1404_v45 }
 0x16f   : > { %1412 = vst [vmem:[#allocation3 + $0x38] sm:$0x30] %v1410_v46  ;;  %v1347_v56 = vrot.slane %v1345_v47, 4  ;;  %v1353_v57 = vrot.slane %v1351_v48, 2  ;;  %v1387_v58 = vpack.c.bf16 %v1386_v54, %v1386_v54  ;;  %v1420_v59 = vpack.c.bf16 %v1419_v55, %v1419_v55  ;;  %v1422_v60 = vld [vmem:[#allocation2 + $0x1a] sm:$0xf] }
 0x170   : > { %v1428_v61 = vld [vmem:[#allocation2 + $0x22] sm:$0xf]  ;;  %v1441_v62 = vld [vmem:[#allocation3 + $0x8] sm:$0xff]  ;;  %1343 = vst [vmem:[#allocation3 + $0x20] sm:$0xc] %v1341_v51  ;;  %v1383_v0 = vrot.slane %v1381_v53, 6  ;;  %v1423_v1 = vpack.c.bf16 %v1422_v60, %v1422_v60 }
 0x171   : > { %1379 = vst [vmem:[#allocation3 + $0x30] sm:$0x3] %v1378_v52  ;;  %v1429_v2 = vpack.c.bf16 %v1428_v61, %v1428_v61  ;;  %2064 = vmatprep.mubr.bf16.mxu1 %v1441_v62  ;;  %v1443_v4 = vld [vmem:[#allocation3 + $0x18] sm:$0xff]  ;;  %1349 = vst [vmem:[#allocation3 + $0x20] sm:$0x30] %v1347_v56  ;;  %v1389_v7 = vrot.slane %v1387_v58, 4 }
 0x172   : > { %v2828_v6 = vld [vmem:[%s3411_s3 + $0x148] sm:$0xff]   ;;  %1355 = vst [vmem:[#allocation3 + $0x20] sm:$0xc0] %v1353_v57  ;;  %1421 = vst [vmem:[#allocation3 + $0x40] sm:$0x3] %v1420_v59  ;;  %2105 = vmatprep.mubr.bf16.mxu0 %v1443_v4  ;;  %v1440_v8 = vld [vmem:[#allocation3] sm:$0xff] }
 0x173   : > { %v2829_v9 = vld [vmem:[%s3411_s3 + $0x1c8] sm:$0xff]   ;;  %1385 = vst [vmem:[#allocation3 + $0x30] sm:$0xc] %v1383_v0  ;;  %v1425_v10 = vrot.slane %v1423_v1, 6  ;;  %v1431_v11 = vrot.slane %v1429_v2, 4  ;;  %2065 = vmatmul.mubr.bf16.vlgmr.msra.gmra.mrb[8].mxu1 %v1440_v8  ;;  %v1442_v12 = vld [vmem:[#allocation3 + $0x10] sm:$0xff] }
 0x174   : > { %1391 = vst [vmem:[#allocation3 + $0x30] sm:$0x30] %v1389_v7  ;;  %2106 = vmatmul.mubr.bf16.vlgmr.msra.gmra.mrb[12].mxu0 %v1442_v12  ;;  %2618 = vmatpush3.bf16.msra.mxu1 %v2826_v63  ;;  %v2830_v13 = vld [vmem:[%s3411_s3 + $0x108] sm:$0xff]   ;;  %v1445_v14 = vld [vmem:[#allocation3 + $0x28] sm:$0xff]  ;;  %v2832_v16 = vld [vmem:[%s3411_s3 + $0x150] sm:$0xff]  }
 0x175   : > { %1427 = vst [vmem:[#allocation3 + $0x40] sm:$0xc] %v1425_v10  ;;  %1433 = vst [vmem:[#allocation3 + $0x40] sm:$0x30] %v1431_v11  ;;  %2640 = vmatpush3.bf16.msra.mxu0 %v2827_v5  ;;  %2619 = vmatprep.subr.bf16.mxu1 %v2828_v6  ;;  %v2831_v15 = vld [vmem:[%s3411_s3 + $0x188] sm:$0xff]   ;;  %v2833_v18 = vld [vmem:[%s3411_s3 + $0x1d0] sm:$0xff]  }
 0x176   : > { %2146 = vmatprep.mubr.bf16.mxu1 %v1445_v14  ;;  %v1447_v17 = vld [vmem:[#allocation3 + $0x38] sm:$0xff]  ;;  %2641 = vmatprep.subr.bf16.mxu0 %v2829_v9  ;;  %v2834_v19 = vld [vmem:[%s3411_s3 + $0x110] sm:$0xff]   ;;  %v2836_v21 = vld [vmem:[%s3411_s3 + $0x158] sm:$0xff]  }
 0x177   : > { %2187 = vmatprep.mubr.bf16.mxu0 %v1447_v17  ;;  %v2835_v20 = vld [vmem:[%s3411_s3 + $0x190] sm:$0xff]   ;;  %v2837_v22 = vld [vmem:[%s3411_s3 + $0x1d8] sm:$0xff]   ;;  %v2840_v25 = vld [vmem:[%s3411_s3 + $0x160] sm:$0xff]  }
 0x178   : > { %2620 = vmatpush3.bf16.msra.mxu1 %v2830_v13  ;;  %v2838_v23 = vld [vmem:[%s3411_s3 + $0x118] sm:$0xff]   ;;  %v2841_v26 = vld [vmem:[%s3411_s3 + $0x1e0] sm:$0xff]   ;;  %v2844_v29 = vld [vmem:[%s3411_s3 + $0x168] sm:$0xff]  }
 0x179   : > { %2642 = vmatpush3.bf16.msra.mxu0 %v2831_v15  ;;  %2621 = vmatprep.subr.bf16.mxu1 %v2832_v16  ;;  %v2839_v24 = vld [vmem:[%s3411_s3 + $0x198] sm:$0xff]   ;;  %v2842_v27 = vld [vmem:[%s3411_s3 + $0x120] sm:$0xff]   ;;  %v2845_v30 = vld [vmem:[%s3411_s3 + $0x1e8] sm:$0xff]  }
 0x17a   : > { %2643 = vmatprep.subr.bf16.mxu0 %v2833_v18  ;;  %v2843_v28 = vld [vmem:[%s3411_s3 + $0x1a0] sm:$0xff]   ;;  %v2846_v31 = vld [vmem:[%s3411_s3 + $0x128] sm:$0xff]   ;;  %v2848_v34 = vld [vmem:[%s3411_s3 + $0x170] sm:$0xff]  }
 0x17b   : > { %v2847_v32 = vld [vmem:[%s3411_s3 + $0x1a8] sm:$0xff]   ;;  %v2849_v37 = vld [vmem:[%s3411_s3 + $0x1f0] sm:$0xff]   ;;  %v2852_v40 = vld [vmem:[%s3411_s3 + $0x178] sm:$0xff]  }
 0x17c   : > { %2622 = vmatpush3.bf16.msra.mxu1 %v2834_v19  ;;  %v2850_v38 = vld [vmem:[%s3411_s3 + $0x130] sm:$0xff]   ;;  %v2853_v41 = vld [vmem:[%s3411_s3 + $0x1f8] sm:$0xff]   ;;  %v2856_v44 = vld [vmem:[%s3411_s3 + $0x200] sm:$0xff]  }
 0x17d   : > { %2644 = vmatpush3.bf16.msra.mxu0 %v2835_v20  ;;  %2623 = vmatprep.subr.bf16.mxu1 %v2836_v21  ;;  %v2851_v39 = vld [vmem:[%s3411_s3 + $0x1b0] sm:$0xff]   ;;  %v2854_v42 = vld [vmem:[%s3411_s3 + $0x138] sm:$0xff]   ;;  %v1446_v46 = vld [vmem:[#allocation3 + $0x30] sm:$0xff] }
 0x17e   : > { %2645 = vmatprep.subr.bf16.mxu0 %v2837_v22  ;;  %v2855_v43 = vld [vmem:[%s3411_s3 + $0x1b8] sm:$0xff]   ;;  %v1444_v45 = vld [vmem:[#allocation3 + $0x20] sm:$0xff]  ;;  %v2857_v47 = vld [vmem:[%s3411_s3 + $0x208] sm:$0xff]  }
 0x17f   : > { %v2858_v48 = vld [vmem:[%s3411_s3 + $0x210] sm:$0xff]   ;;  %v2859_v49 = vld [vmem:[%s3411_s3 + $0x218] sm:$0xff]   ;;  %v2860_v50 = vld [vmem:[%s3411_s3 + $0x220] sm:$0xff]  }
 0x180   : > { %2624 = vmatpush3.bf16.msra.mxu1 %v2838_v23  ;;  %v2861_v51 = vld [vmem:[%s3411_s3 + $0x228] sm:$0xff]   ;;  %v2862_v52 = vld [vmem:[%s3411_s3 + $0x230] sm:$0xff]   ;;  %v2863_v53 = vld [vmem:[%s3411_s3 + $0x238] sm:$0xff]  }
 0x181   : > { %2646 = vmatpush3.bf16.msra.mxu0 %v2839_v24  ;;  %2625 = vmatprep.subr.bf16.mxu1 %v2840_v25  ;;  %v1448_v54 = vld [vmem:[#allocation3 + $0x40] sm:$0xff]  ;;  %v2386_v57 = vld [vmem:[%s3412_s4] ss:$0 sm:$0xff] }
 0x182   : > { %2647 = vmatprep.subr.bf16.mxu0 %v2841_v26 }
 0x184   : > { %2626 = vmatpush3.bf16.msra.mxu1 %v2842_v27 }
 0x185   : > { %2648 = vmatpush3.bf16.msra.mxu0 %v2843_v28  ;;  %2627 = vmatprep.subr.bf16.mxu1 %v2844_v29 }
 0x186   : > { %2649 = vmatprep.subr.bf16.mxu0 %v2845_v30 }
 0x188   : > { %2628 = vmatpush3.bf16.msra.mxu1 %v2846_v31 }
 0x189   : > { %2650 = vmatpush3.bf16.msra.mxu0 %v2847_v32  ;;  %2629 = vmatprep.subr.bf16.mxu1 %v2848_v34 }
 0x18a   : > { %2651 = vmatprep.subr.bf16.mxu0 %v2849_v37 }
 0x18c   : > { %2630 = vmatpush3.bf16.msra.mxu1 %v2850_v38 }
 0x18d   : > { %2652 = vmatpush3.bf16.msra.mxu0 %v2851_v39  ;;  %2631 = vmatprep.subr.bf16.mxu1 %v2852_v40 }
 0x18e   : > { %2653 = vmatprep.subr.bf16.mxu0 %v2853_v41 }
 0x190   : > { %2632 = vmatpush3.bf16.msra.mxu1 %v2854_v42 }
 0x191   : > { %2654 = vmatpush3.bf16.msra.mxu0 %v2855_v43  ;;  %2690 = vmatprep.subr.bf16.mxu1 %v2872_v3 }
 0x193   : > { %2147 = vmatmul.mubr.bf16.vlgmr.msra.gmra.mrb[12].mxu1 %v1444_v45 }
 0x194   : > { %2188 = vmatmul.mubr.bf16.vlgmr.msra.gmra.mrb[16].mxu0 %v1446_v46  ;;  %2691 = vmatpush3.bf16.msra.mxu1 %v2856_v44 }
 0x195   : > { %2692 = vmatprep.subr.bf16.mxu1 %v2872_v3  ;;  %2706 = vmatprep.mubr.msk.bf16.mxu1 %vm2873_vm0, %v2872_v3 }
 0x198   : > { %2693 = vmatpush3.bf16.msra.mxu1 %v2857_v47 }
 0x199   : > { %2694 = vmatprep.subr.bf16.mxu1 %v2872_v3 }
 0x19c   : > { %2695 = vmatpush3.bf16.msra.mxu1 %v2858_v48 }
 0x19d   : > { %2696 = vmatprep.subr.bf16.mxu1 %v2872_v3 }
 0x1a0   : > { %2697 = vmatpush3.bf16.msra.mxu1 %v2859_v49 }
 0x1a1   : > { %2698 = vmatprep.subr.bf16.mxu1 %v2872_v3 }
 0x1a4   : > { %2699 = vmatpush3.bf16.msra.mxu1 %v2860_v50 }
 0x1a5   : > { %2700 = vmatprep.subr.bf16.mxu1 %v2872_v3 }
 0x1a8   : > { %2701 = vmatpush3.bf16.msra.mxu1 %v2861_v51 }
 0x1a9   : > { %2702 = vmatprep.subr.bf16.mxu1 %v2872_v3 }
 0x1ac   : > { %2703 = vmatpush3.bf16.msra.mxu1 %v2862_v52 }
 0x1ad   : > { %2704 = vmatprep.subr.bf16.mxu1 %v2872_v3 }
 0x1b0   : > { %2705 = vmatpush3.bf16.msra.mxu1 %v2863_v53 }
 0x1b3   : > { %2707 = vmatmul.mubr.bf16.vlgmr.msra.gmra.mrb[16].mxu1 %v1448_v54 }
 0x246   : > { %v2589_v55 = vpop.f32.mrb[8].mxu1 }
 0x247   : > { %v2611_v56 = vpop.f32.mrb[12].mxu0  ;;  %v2590_v58 = vpop.f32.mrb[9].mxu1 }
 0x248   : > { %v2591_v59 = vadd.f32 %v2590_v58, %v2589_v55  ;;  %v2612_v60 = vpop.f32.mrb[13].mxu0  ;;  %v2592_v61 = vpop.f32.mrb[10].mxu1 }
 0x249   : > { %v2613_v62 = vadd.f32 %v2612_v60, %v2611_v56  ;;  %v2614_v63 = vpop.f32.mrb[14].mxu0  ;;  %v2593_v0 = vpop.f32.mrb[11].mxu1 }
 0x24a   : > { %v2067_v1 = vadd.f32 %v2591_v59, %v2386_v57  ;;  %v2594_v2 = vadd.f32 %v2593_v0, %v2592_v61  ;;  %v2615_v4 = vpop.f32.mrb[15].mxu0 }
 0x24b   : > { %v2616_v3 = vadd.f32 %v2615_v4, %v2614_v63 }
 0x24c   : > { %v2108_v5 = vadd.f32 %v2613_v62, %v2067_v1  ;;  %v2070_v6 = vadd.f32 %v2594_v2, %v2386_v57 }
 0x24e   : > { %v2111_v7 = vadd.f32 %v2616_v3, %v2070_v6 }
 0x266   : > { %v2633_v8 = vpop.f32.mrb[12].mxu1 }
 0x267   : > { %v2655_v9 = vpop.f32.mrb[16].mxu0  ;;  %v2634_v10 = vpop.f32.mrb[13].mxu1 }
 0x268   : > { %v2635_v11 = vadd.f32 %v2634_v10, %v2633_v8  ;;  %v2656_v12 = vpop.f32.mrb[17].mxu0  ;;  %v2636_v13 = vpop.f32.mrb[14].mxu1 }
 0x269   : > { %v2657_v14 = vadd.f32 %v2656_v12, %v2655_v9  ;;  %v2658_v15 = vpop.f32.mrb[18].mxu0  ;;  %v2637_v16 = vpop.f32.mrb[15].mxu1 }
 0x26a   : > { %v2149_v17 = vadd.f32 %v2635_v11, %v2108_v5  ;;  %v2638_v18 = vadd.f32 %v2637_v16, %v2636_v13  ;;  %v2659_v19 = vpop.f32.mrb[19].mxu0 }
 0x26b   : > { %v2660_v20 = vadd.f32 %v2659_v19, %v2658_v15 }
 0x26c   : > { %v2152_v21 = vadd.f32 %v2638_v18, %v2111_v7  ;;  %v2190_v22 = vadd.f32 %v2657_v14, %v2149_v17 }
 0x26e   : > { %v2193_v23 = vadd.f32 %v2660_v20, %v2152_v21 }
 0x286   : > { %v2230_v24 = vpop.f32.mrb[16].mxu1 }
 0x287   : > { %v2231_v25 = vadd.f32 %v2230_v24, %v2190_v22  ;;  %v2708_v26 = vpop.f32.mrb[17].mxu1 }
 0x288   : > { %v2233_v27 = vpop.f32.mrb[18].mxu1 }
 0x289   : > { %v2234_v28 = vadd.f32 %v2233_v27, %v2193_v23  ;;  %v2709_v29 = vpop.f32.mrb[19].mxu1  ;;  %v2237_v30 = vadd.f32 %v2469_v35, %v2231_v25 }
 0x28b   : > { %v2238_v31 = vadd.f32 %v2470_v36, %v2234_v28 }
 0x28d   : > { %v2474_v32 = vpack.c.bf16 %v2238_v31, %v2237_v30 }
 0x28f   : > { %2475 = vst [vmem:[%s224_s30] sm:$0xff] %v2474_v32  }
 0x290 PF: > { %s15_s18 = sadd.s32 1, %s2870_s18  }
 0x291   : > { %p12_p4 = scmp.ge.s32.totalorder %s15_s18, 4  }
 0x293   :  { %14 = sbr.rel (!%p12_p4) target bundleno = 1 (0x1), region = 75 }

// kernel: pallas_forward.5
= control target key start
LH: loop header
LB: loop body
LE: loop exit
PB: predicated region body
PF: predicated region fallthrough
CT: control target
= control target key end

     0   :  { %s4293_s30 = smov 0   ;;  %s5141_s0 = inlined_call_operand.vmem [shape: bf16[2,256,27], index: 0, kind: input, shape index: {}]   ;;  %s5142_s1 = inlined_call_operand.vmem [shape: bf16[2,64,3], index: 1, kind: input, shape index: {}]   ;;  %s5143_s2 = inlined_call_operand.vmem [shape: bf16[27,128], index: 2, kind: input, shape index: {}]   ;;  %s5144_s3 = inlined_call_operand.vmem [shape: f32[1,128], index: 3, kind: input, shape index: {}]   ;;  %s5145_s4 = inlined_call_operand.vmem [shape: bf16[1152,128], index: 4, kind: input, shape index: {}]   ;;  %s5146_s5 = inlined_call_operand.vmem [shape: f32[1,128], index: 5, kind: input, shape index: {}]   ;;  %s5147_s6 = inlined_call_operand.vmem [shape: bf16[3,128], index: 6, kind: input, shape index: {}]   ;;  %s5148_s7 = inlined_call_operand.vmem [shape: f32[1,128], index: 7, kind: input, shape index: {}]   ;;  %s5149_s8 = inlined_call_operand.vmem [shape: bf16[64,256], index: 8, kind: input, shape index: {}]   ;;  %s5150_s9 = inlined_call_operand.vmem [shape: bf16[2,64,128], index: 9, kind: output, shape index: {}]  }
   0x1 LB: > { %s3290_s10 = sadd.s32 4294967295, %s4238_s30   ;;  %p3294_p0 = scmp.ge.s32.totalorder %s4238_s30, 1  ;;  %s4238_s30 = sphi %s4293_s30, %s19_s30  }
   0x2   : > { %p297_p1 = scmp.lt.s32.totalorder %s4238_s30, 3 }
   0x4   : > { %p298_p2 = pnand %p3294_p0, %p297_p1 }
   0x5   : > { %v4125_v0 = vld [vmem:[%s5143_s2] sm:$0xff] (!%p298_p2)   ;;  %vm591_vm0 = vcmask (!%p298_p2), 1044480   ;;  %v4126_v1 = vld [vmem:[%s5143_s2 + $0x8] sm:$0x3f] (!%p298_p2)   ;;  %vm592_vm1 = vcmask (!%p298_p2), 1045504   ;;  %p338_p3 = scmp.lt.s32.totalorder (!%p298_p2), %s3290_s10, 1 }
   0x6   : > { %301 = sbr.rel (%p298_p2) target bundleno = 1008 (0x3f0), region = 56  ;;  %4005 = vmatprep.subr.bf16.mxu0 (!%p298_p2), %v4125_v0  ;;  %vm542_vm2 = vcmask (!%p298_p2), 220160   ;;  %v4240_v2 = vmov (!%p298_p2), 65535   ;;  %v4143_v4 = vld [vmem:[%s5145_s4 + $0x40] sm:$0xff] (!%p298_p2)   ;;  %v4145_v7 = vld [vmem:[%s5145_s4 + $0x48] sm:$0xff] (!%p298_p2)   ;;  %v4241_v12 = vmov (!%p298_p2), 0.0  }
   0x7   : > { %4006 = vmatpush3.bf16.msra.mxu0 (!%p298_p2), %v4125_v0  ;;  %v593_v3 = vsel (!%p298_p2), %vm591_vm0, 4294967295, %v4240_v2  ;;  %v4144_v6 = vld [vmem:[%s5145_s4] sm:$0xff] (!%p298_p2)   ;;  %3488 = vmatprep.subr.bf16.mxu1 (!%p298_p2), %v4143_v4  ;;  %v4147_v10 = vld [vmem:[%s5145_s4 + $0x8] sm:$0xff] (!%p298_p2)   ;;  %360 = vst [vmem:[#allocation2 + $0x30] sm:$0xff] (!%p298_p2), %v4241_v12  ;;  %361 = vst [vmem:[#allocation2 + $0x38] sm:$0xff] (!%p298_p2), %v4241_v12  ;;  %v4242_v54 = vmov (!%p298_p2), 0.0|0.0  }
   0x8   : > { %v594_v5 = vsel (!%p298_p2), %vm592_vm1, %v593_v3, 0  ;;  %3489 = vmatpush3.bf16.msra.mxu1 (!%p298_p2), %v4144_v6  ;;  %v4146_v9 = vld [vmem:[%s5145_s4 + $0xc0] sm:$0xff] (!%p298_p2)   ;;  %354 = vst [vmem:[#allocation2] sm:$0xff] (!%p298_p2), %v4241_v12  ;;  %355 = vst [vmem:[#allocation2 + $0x8] sm:$0xff] (!%p298_p2), %v4241_v12  ;;  %v4149_v20 = vld [vmem:[%s5145_s4 + $0x50] sm:$0xff] (!%p298_p2)   ;;  %vm3006_vm3 = vcmask (!%p298_p2), 1040384  }
   0x9   : > { %v596_v8 = vand.u32 (!%p298_p2), %v4126_v1, %v594_v5  ;;  %3490 = vmatprep.subr.bf16.mxu1 (!%p298_p2), %v4145_v7  ;;  %356 = vst [vmem:[#allocation2 + $0x10] sm:$0x3] (!%p298_p2), %v4241_v12  ;;  %357 = vst [vmem:[#allocation2 + $0x18] sm:$0xff] (!%p298_p2), %v4241_v12  ;;  %v4148_v19 = vld [vmem:[%s5145_s4 + $0x80] sm:$0xff] (!%p298_p2)   ;;  %v4150_v21 = vld [vmem:[%s5145_s4 + $0x10] sm:$0xff] (!%p298_p2)   ;;  %vm3007_vm4 = vcmask (!%p298_p2), 1041408  }
   0xa   : > { %358 = vst [vmem:[#allocation2 + $0x20] sm:$0xff] (!%p298_p2), %v4241_v12  ;;  %359 = vst [vmem:[#allocation2 + $0x28] sm:$0x3] (!%p298_p2), %v4241_v12  ;;  %v4151_v22 = vld [vmem:[%s5145_s4 + $0x58] sm:$0xff] (!%p298_p2)   ;;  %v4152_v23 = vld [vmem:[%s5145_s4 + $0xc8] sm:$0xff] (!%p298_p2)   ;;  %vm2993_vm5 = vcmask (!%p298_p2), 23552  }
   0xb   : > { %4007 = vmatprep.subr.bf16.mxu0 (!%p298_p2), %v596_v8  ;;  %362 = vst [vmem:[#allocation2 + $0x40] sm:$0x3] (!%p298_p2), %v4241_v12  ;;  %363 = vst [vmem:[#allocation2 + $0x48] sm:$0xff] (!%p298_p2), %v4241_v12  ;;  %v4153_v25 = vld [vmem:[%s5145_s4 + $0x18] sm:$0xff] (!%p298_p2)   ;;  %v4154_v27 = vld [vmem:[%s5145_s4 + $0x88] sm:$0xff] (!%p298_p2)  }
   0xc   : > { %4008 = vmatpush3.bf16.msra.mxu0 (!%p298_p2), %v596_v8  ;;  %364 = vst [vmem:[#allocation2 + $0x50] sm:$0xff] (!%p298_p2), %v4241_v12  ;;  %365 = vst [vmem:[#allocation2 + $0x58] sm:$0x3] (!%p298_p2), %v4241_v12  ;;  %3491 = vmatpush3.bf16.msra.mxu1 (!%p298_p2), %v4147_v10  ;;  %v4155_v28 = vld [vmem:[%s5145_s4 + $0x60] sm:$0xff] (!%p298_p2)   ;;  %v4157_v30 = vld [vmem:[%s5145_s4 + $0xd0] sm:$0xff] (!%p298_p2)  }
   0xd   : > { %s5152_s10 = smov (!%p338_p3, %s3290_s10), 1  ;;  %366 = vst [vmem:[#allocation2 + $0x60] sm:$0xff] %v4241_v12  ;;  %367 = vst [vmem:[#allocation2 + $0x68] sm:$0xff] %v4241_v12  ;;  %3600 = vmatprep.subr.bf16.mxu0 %v4146_v9  ;;  %3492 = vmatprep.subr.bf16.mxu1 %v4149_v20  ;;  %v4156_v29 = vld [vmem:[%s5145_s4 + $0x20] sm:$0xff]   ;;  %v4158_v31 = vld [vmem:[%s5145_s4 + $0x68] sm:$0xff]  }
   0xe   : > { %s3436_s21 = sshll.u32 %s5152_s10, 7  ;;  %368 = vst [vmem:[#allocation2 + $0x70] sm:$0x3] %v4241_v12  ;;  %369 = vst [vmem:[#allocation2 + $0x78] sm:$0xff] %v4241_v12  ;;  %v4159_v32 = vld [vmem:[%s5145_s4 + $0x90] sm:$0xff]   ;;  %v4160_v33 = vld [vmem:[%s5145_s4 + $0x28] sm:$0xff]  }
   0xf   : > { %s4326_s26 = scalar_lea.vmem %s5141_s0, %s3436_s21  ;;  %370 = vst [vmem:[#allocation2 + $0x80] sm:$0xff] %v4241_v12  ;;  %371 = vst [vmem:[#allocation2 + $0x88] sm:$0x3] %v4241_v12  ;;  %v4161_v35 = vld [vmem:[%s5145_s4 + $0xd8] sm:$0xff]   ;;  %v4162_v42 = vld [vmem:[%s5145_s4 + $0x70] sm:$0xff]   ;;  %s3437_s18 = sshll.u32 %s5152_s10, 5 }
  0x10   : > { %v4127_v11 = vld [vmem:[%s4326_s26] sm:$0xff]   ;;  %372 = vst [vmem:[#allocation2 + $0x90] sm:$0xff] %v4241_v12  ;;  %373 = vst [vmem:[#allocation2 + $0x98] sm:$0xff] %v4241_v12  ;;  %v4128_v13 = vld [vmem:[%s4326_s26 + $0x8] sm:$0xff]   ;;  %3493 = vmatpush3.bf16.msra.mxu1 %v4150_v21  ;;  %s347_s23 = scalar_lea.vmem %s5142_s1, %s3437_s18  ;;  %s5132_s24 = scalar_lea.vmem %s5150_s9, %s3437_s18 }
  0x11   : > { %374 = vst [vmem:[#allocation2 + $0xa0] sm:$0x3] %v4241_v12  ;;  %375 = vst [vmem:[#allocation2 + $0xa8] sm:$0xff] %v4241_v12  ;;  %4009 = vmatprep.mubr.msk.bf16.mxu0 %vm542_vm2, %v4127_v11  ;;  %v4129_v14 = vld [vmem:[%s4326_s26 + $0x10] sm:$0xff]   ;;  %v4130_v15 = vld [vmem:[%s4326_s26 + $0x18] sm:$0xff]   ;;  %3494 = vmatprep.subr.bf16.mxu1 %v4151_v22 }
  0x12   : > { %376 = vst [vmem:[#allocation2 + $0xb0] sm:$0xff] %v4241_v12  ;;  %377 = vst [vmem:[#allocation2 + $0xb8] sm:$0x3] %v4241_v12  ;;  %4010 = vmatmul.mubr.msk.bf16.vlgmr.msra.gmra.mrb[0].mxu0 %vm542_vm2, %v4128_v13  ;;  %v4131_v16 = vld [vmem:[%s4326_s26 + $0x20] sm:$0xff]   ;;  %v4132_v17 = vld [vmem:[%s4326_s26 + $0x28] sm:$0xff]  }
  0x13   : > { %378 = vst [vmem:[#allocation2 + $0xc0] sm:$0xff] %v4241_v12  ;;  %379 = vst [vmem:[#allocation2 + $0xc8] sm:$0xff] %v4241_v12  ;;  %4013 = vmatprep.mubr.msk.bf16.mxu0 %vm542_vm2, %v4129_v14  ;;  %v4133_v18 = vld [vmem:[%s4326_s26 + $0x30] sm:$0xff]   ;;  %3601 = vmatpush3.bf16.msra.mxu0 %v4148_v19  ;;  %v4134_v24 = vld [vmem:[%s4326_s26 + $0x38] sm:$0xff]  }
  0x14   : > { %380 = vst [vmem:[#allocation2 + $0xd0] sm:$0x3] %v4241_v12  ;;  %381 = vst [vmem:[#allocation2 + $0xd8] sm:$0xff] %v4241_v12  ;;  %v4135_v26 = vld [vmem:[%s4326_s26 + $0x40] sm:$0xff]   ;;  %3602 = vmatprep.subr.bf16.mxu0 %v4152_v23  ;;  %3495 = vmatpush3.bf16.msra.mxu1 %v4153_v25  ;;  %v4136_v34 = vld [vmem:[%s4326_s26 + $0x48] sm:$0xff]  }
  0x15   : > { %382 = vst [vmem:[#allocation2 + $0xe0] sm:$0xff] %v4241_v12  ;;  %383 = vst [vmem:[#allocation2 + $0xe8] sm:$0x3] %v4241_v12  ;;  %3496 = vmatprep.subr.bf16.mxu1 %v4155_v28  ;;  %v4137_v36 = vld [vmem:[%s4326_s26 + $0x50] sm:$0xff]   ;;  %v4138_v37 = vld [vmem:[%s4326_s26 + $0x58] sm:$0xff]  }
  0x16   : > { %384 = vst [vmem:[#allocation2 + $0xf0] sm:$0xff] %v4241_v12  ;;  %385 = vst [vmem:[#allocation2 + $0xf8] sm:$0xff] %v4241_v12  ;;  %v4139_v38 = vld [vmem:[%s4326_s26 + $0x60] sm:$0xff]   ;;  %v4140_v39 = vld [vmem:[%s4326_s26 + $0x68] sm:$0xff]  }
  0x17   : > { %386 = vst [vmem:[#allocation2 + $0x100] sm:$0x3] %v4241_v12  ;;  %387 = vst [vmem:[#allocation2 + $0x108] sm:$0xff] %v4241_v12  ;;  %3603 = vmatpush3.bf16.msra.mxu0 %v4154_v27  ;;  %v4141_v40 = vld [vmem:[%s4326_s26 + $0x70] sm:$0xff]   ;;  %v4142_v41 = vld [vmem:[%s4326_s26 + $0x78] sm:$0xff]  }
  0x18   : > { %388 = vst [vmem:[#allocation2 + $0x110] sm:$0xff] %v4241_v12  ;;  %389 = vst [vmem:[#allocation2 + $0x118] sm:$0x3] %v4241_v12  ;;  %3604 = vmatprep.subr.bf16.mxu0 %v4157_v30  ;;  %3497 = vmatpush3.bf16.msra.mxu1 %v4156_v29  ;;  %v4163_v43 = vld [vmem:[%s5145_s4 + $0x98] sm:$0xff]   ;;  %v4164_v44 = vld [vmem:[%s5145_s4 + $0x30] sm:$0xff]  }
  0x19   : > { %390 = vst [vmem:[#allocation2 + $0x120] sm:$0xff] %v4241_v12  ;;  %391 = vst [vmem:[#allocation2 + $0x128] sm:$0xff] %v4241_v12  ;;  %3498 = vmatprep.subr.bf16.mxu1 %v4158_v31  ;;  %v4165_v45 = vld [vmem:[%s5145_s4 + $0xe0] sm:$0xff]   ;;  %v4166_v46 = vld [vmem:[%s5145_s4 + $0x78] sm:$0xff]  }
  0x1a   : > { %392 = vst [vmem:[#allocation2 + $0x130] sm:$0x3] %v4241_v12  ;;  %393 = vst [vmem:[#allocation2 + $0x138] sm:$0xff] %v4241_v12  ;;  %4014 = vmatmul.mubr.msk.bf16.gmra.mrb[4].mxu0 %vm542_vm2, %v4130_v15  ;;  %v4167_v47 = vld [vmem:[%s5145_s4 + $0xa0] sm:$0xff]   ;;  %v4168_v48 = vld [vmem:[%s5145_s4 + $0x38] sm:$0xff]  }
  0x1b   : > { %394 = vst [vmem:[#allocation2 + $0x140] sm:$0xff] %v4241_v12  ;;  %395 = vst [vmem:[#allocation2 + $0x148] sm:$0x3] %v4241_v12  ;;  %4017 = vmatprep.mubr.msk.bf16.mxu0 %vm542_vm2, %v4131_v16  ;;  %3605 = vmatpush3.bf16.msra.mxu0 %v4159_v32  ;;  %v888_v49 = vld [vmem:[#allocation2 + $0x1] sm:$0xff]  ;;  %v889_v50 = vld [vmem:[#allocation2 + $0x9] sm:$0xff] }
  0x1c   : > { %396 = vst [vmem:[#allocation2 + $0x150] sm:$0xff] %v4241_v12  ;;  %397 = vst [vmem:[#allocation2 + $0x158] sm:$0xff] %v4241_v12  ;;  %3606 = vmatprep.subr.bf16.mxu0 %v4161_v35  ;;  %3499 = vmatpush3.bf16.msra.mxu1 %v4160_v33  ;;  %v920_v51 = vpack.c.bf16 %v889_v50, %v888_v49  ;;  %v4169_v52 = vld [vmem:[%s5145_s4 + $0xe8] sm:$0xff]   ;;  %v4171_v55 = vld [vmem:[%s5145_s4 + $0xf0] sm:$0xff]  }
  0x1d   : > { %398 = vst [vmem:[#allocation2 + $0x160] sm:$0x3] %v4241_v12  ;;  %399 = vst [vmem:[#allocation2 + $0x168] sm:$0xff] %v4241_v12  ;;  %3500 = vmatprep.subr.bf16.mxu1 %v4162_v42  ;;  %v4170_v53 = vld [vmem:[%s5145_s4 + $0xa8] sm:$0xff]   ;;  %v4172_v56 = vld [vmem:[%s5145_s4 + $0xb0] sm:$0xff]  }
  0x1e   : > { %400 = vst [vmem:[#allocation2 + $0x170] sm:$0xff] %v4241_v12  ;;  %401 = vst [vmem:[#allocation2 + $0x178] sm:$0x3] %v4241_v12  ;;  %2160 = vmatprep.mubr.bf16.mxu1 %v920_v51  ;;  %v4173_v57 = vld [vmem:[%s5145_s4 + $0xf8] sm:$0xff]   ;;  %v4175_v59 = vld [vmem:[%s5145_s4 + $0x140] sm:$0xff]  }
  0x1f   : > { %402 = vst [vmem:[#allocation2 + $0x180] sm:$0xff] %v4241_v12  ;;  %403 = vst [vmem:[#allocation2 + $0x188] sm:$0xff] %v4241_v12  ;;  %3607 = vmatpush3.bf16.msra.mxu0 %v4163_v43  ;;  %v4174_v58 = vld [vmem:[%s5145_s4 + $0xb8] sm:$0xff]   ;;  %v4176_v60 = vld [vmem:[%s5145_s4 + $0x100] sm:$0xff]  }
  0x20   : > { %404 = vst [vmem:[#allocation2 + $0x190] sm:$0x3] %v4241_v12  ;;  %405 = vst [vmem:[#allocation2 + $0x198] sm:$0xff] %v4241_v12  ;;  %3501 = vmatpush3.bf16.msra.mxu1 %v4164_v44  ;;  %3608 = vmatprep.subr.bf16.mxu0 %v4165_v45  ;;  %v4177_v61 = vld [vmem:[%s5145_s4 + $0x148] sm:$0xff]   ;;  %v4179_v63 = vld [vmem:[%s5145_s4 + $0x1c0] sm:$0xff]  }
  0x21   : > { %406 = vst [vmem:[#allocation2 + $0x1a0] sm:$0xff] %v4241_v12  ;;  %407 = vst [vmem:[#allocation2 + $0x1a8] sm:$0x3] %v4241_v12  ;;  %3502 = vmatprep.subr.bf16.mxu1 %v4166_v46  ;;  %v4178_v62 = vld [vmem:[%s5145_s4 + $0x108] sm:$0xff]   ;;  %v4181_v0 = vld [vmem:[%s5145_s4 + $0x150] sm:$0xff]  }
  0x22   : > { %4018 = vmatmul.mubr.msk.bf16.gmra.mrb[8].mxu0 %vm542_vm2, %v4132_v17  ;;  %v4182_v1 = vld [vmem:[%s5145_s4 + $0x110] sm:$0xff]   ;;  %v4185_v3 = vld [vmem:[%s5145_s4 + $0x158] sm:$0xff]   ;;  %v4189_v5 = vld [vmem:[%s5145_s4 + $0x160] sm:$0xff]  }
  0x23   : > { %4021 = vmatprep.mubr.msk.bf16.mxu0 %vm542_vm2, %v4133_v18  ;;  %3609 = vmatpush3.bf16.msra.mxu0 %v4167_v47  ;;  %v4186_v4 = vld [vmem:[%s5145_s4 + $0x118] sm:$0xff]   ;;  %v4190_v6 = vld [vmem:[%s5145_s4 + $0x120] sm:$0xff]   ;;  %v4193_v7 = vld [vmem:[%s5145_s4 + $0x168] sm:$0xff]  }
  0x24   : > { %3503 = vmatpush3.bf16.msra.mxu1 %v4168_v48  ;;  %3610 = vmatprep.subr.bf16.mxu0 %v4169_v52  ;;  %v4194_v8 = vld [vmem:[%s5145_s4 + $0x128] sm:$0xff]   ;;  %v4197_v9 = vld [vmem:[%s5145_s4 + $0x170] sm:$0xff]   ;;  %v4492_v11 = vld [vmem:[%s5144_s3] ss:$0 sm:$0xff] }
  0x25   : > { %3712 = vmatprep.subr.bf16.mxu1 %v4175_v59  ;;  %v4198_v10 = vld [vmem:[%s5145_s4 + $0x130] sm:$0xff]   ;;  %v4201_v22 = vld [vmem:[%s5145_s4 + $0x178] sm:$0xff]   ;;  %v4180_v50 = vld [vmem:[%s5145_s4 + $0x180] sm:$0xff]  }
  0x26   : > { %v4202_v23 = vld [vmem:[%s5145_s4 + $0x138] sm:$0xff]  }
  0x27   : > { %2161 = vmatmul.mubr.bf16.vlgmr.msra.gmra.mrb[0].mxu1 %v4242_v54  ;;  %3611 = vmatpush3.bf16.msra.mxu0 %v4170_v53  ;;  %v4183_v54 = vld [vmem:[%s5145_s4 + $0x1c8] sm:$0xff]  }
  0x28   : > { %3612 = vmatprep.subr.bf16.mxu0 %v4171_v55  ;;  %3713 = vmatpush3.bf16.msra.mxu1 %v4176_v60 }
  0x29   : > { %3714 = vmatprep.subr.bf16.mxu1 %v4177_v61 }
  0x2a   : > { %4022 = vmatmul.mubr.msk.bf16.gmra.mrb[12].mxu0 %vm542_vm2, %v4134_v24 }
  0x2b   : > { %4025 = vmatprep.mubr.msk.bf16.mxu0 %vm542_vm2, %v4135_v26  ;;  %3613 = vmatpush3.bf16.msra.mxu0 %v4172_v56 }
  0x2c   : > { %3614 = vmatprep.subr.bf16.mxu0 %v4173_v57  ;;  %3715 = vmatpush3.bf16.msra.mxu1 %v4178_v62 }
  0x2d   : > { %3716 = vmatprep.subr.bf16.mxu1 %v4181_v0 }
  0x2f   : > { %3615 = vmatpush3.bf16.msra.mxu0 %v4174_v58 }
  0x30   : > { %3824 = vmatprep.subr.bf16.mxu0 %v4179_v63  ;;  %3717 = vmatpush3.bf16.msra.mxu1 %v4182_v1  ;;  %v4184_v63 = vld [vmem:[%s5145_s4 + $0x188] sm:$0xff]  }
  0x31   : > { %3718 = vmatprep.subr.bf16.mxu1 %v4185_v3  ;;  %v4187_v3 = vld [vmem:[%s5145_s4 + $0x1d0] sm:$0xff]  }
  0x32   : > { %4026 = vmatmul.mubr.msk.bf16.gmra.mrb[16].mxu0 %vm542_vm2, %v4136_v34 }
  0x33   : > { %4029 = vmatprep.mubr.msk.bf16.mxu0 %vm542_vm2, %v4137_v36 }
  0x34   : > { %3719 = vmatpush3.bf16.msra.mxu1 %v4186_v4 }
  0x35   : > { %3720 = vmatprep.subr.bf16.mxu1 %v4189_v5 }
  0x38   : > { %3721 = vmatpush3.bf16.msra.mxu1 %v4190_v6 }
  0x39   : > { %3722 = vmatprep.subr.bf16.mxu1 %v4193_v7 }
  0x3a   : > { %4030 = vmatmul.mubr.msk.bf16.gmra.mrb[20].mxu0 %vm542_vm2, %v4138_v37 }
  0x3b   : > { %4033 = vmatprep.mubr.msk.bf16.mxu0 %vm542_vm2, %v4139_v38  ;;  %v952_v38 = vld [vmem:[#allocation2 + $0x2] sm:$0xff] }
  0x3c   : > { %3723 = vmatpush3.bf16.msra.mxu1 %v4194_v8 }
  0x3d   : > { %3724 = vmatprep.subr.bf16.mxu1 %v4197_v9 }
  0x40   : > { %3725 = vmatpush3.bf16.msra.mxu1 %v4198_v10 }
  0x41   : > { %3726 = vmatprep.subr.bf16.mxu1 %v4201_v22 }
  0x42   : > { %4034 = vmatmul.mubr.msk.bf16.gmra.mrb[24].mxu0 %vm542_vm2, %v4140_v39  ;;  %v953_v39 = vld [vmem:[#allocation2 + $0xa] sm:$0xff] }
  0x43   : > { %4037 = vmatprep.mubr.msk.bf16.mxu0 %vm542_vm2, %v4141_v40  ;;  %v984_v44 = vpack.c.bf16 %v953_v39, %v952_v38 }
  0x44   : > { %3727 = vmatpush3.bf16.msra.mxu1 %v4202_v23  ;;  %v4559_v23 = vld [vmem:[%s5145_s4 + $0x200] sm:$0xff]  }
  0x45   : > { %4099 = vmatprep.subr.bf16.mxu1 %v4559_v23 }
  0x4a   : > { %4038 = vmatmul.mubr.msk.bf16.gmra.mrb[28].mxu0 %vm542_vm2, %v4142_v41 }
  0xe5   : > { %v4011_v12 = vpop.f32.mrb[0].mxu0 }
  0xe6   : > { %v641_v13 = vadd.f32 %v4011_v12, %v4492_v11  ;;  %v632_v14 = vpop.f32.mrb[1].mxu0 }
  0xe7   : > { %v633_v15 = vadd.f32 %v4492_v11, %v632_v14  ;;  %v4012_v16 = vpop.f32.mrb[2].mxu0 }
  0xe8   : > { %v761_v17 = vmax.f32 %v641_v13, 0.0  ;;  %v644_v18 = vadd.f32 %v4012_v16, %v4492_v11  ;;  %v635_v19 = vpop.f32.mrb[3].mxu0  ;;  %v4188_v13 = vld [vmem:[%s5145_s4 + $0x190] sm:$0xff]  }
  0xe9   : > { %v759_v20 = vmax.f32 %v633_v15, 0.0  ;;  %v636_v21 = vadd.f32 %v4492_v11, %v635_v19 }
  0xea   : > { %794 = vst [vmem:[#allocation2 + $0x31] sm:$0xff] %v761_v17  ;;  %v762_v24 = vmax.f32 %v644_v18, 0.0 }
  0xeb   : > { %792 = vst [vmem:[#allocation2 + $0x19] sm:$0xff] %v759_v20  ;;  %v760_v25 = vmax.f32 %v636_v21, 0.0 }
  0xec   : > { %795 = vst [vmem:[#allocation2 + $0x39] sm:$0xff] %v762_v24  ;;  %v922_v26 = vpack.c.bf16 %v762_v24, %v761_v17  ;;  %v4191_v17 = vld [vmem:[%s5145_s4 + $0x1d8] sm:$0xff]  }
  0xed   : > { %793 = vst [vmem:[#allocation2 + $0x21] sm:$0xff] %v760_v25  ;;  %v4015_v27 = vpop.f32.mrb[4].mxu0  ;;  %v921_v28 = vpack.c.bf16 %v760_v25, %v759_v20 }
  0xee   : > { %v657_v29 = vadd.f32 %v4015_v27, %v4492_v11  ;;  %v648_v30 = vpop.f32.mrb[5].mxu0 }
  0xef   : > { %v649_v31 = vadd.f32 %v4492_v11, %v648_v30  ;;  %v4016_v32 = vpop.f32.mrb[6].mxu0  ;;  %2168 = vmatprep.mubr.bf16.mxu1 %v921_v28  ;;  %v4195_v28 = vld [vmem:[%s5145_s4 + $0x1e0] sm:$0xff]  }
  0xf0   : > { %v765_v33 = vmax.f32 %v657_v29, 0.0  ;;  %v660_v34 = vadd.f32 %v4016_v32, %v4492_v11  ;;  %v651_v35 = vpop.f32.mrb[7].mxu0 }
  0xf1   : > { %v763_v36 = vmax.f32 %v649_v31, 0.0  ;;  %v652_v37 = vadd.f32 %v4492_v11, %v651_v35  ;;  %v1018_v51 = vld [vmem:[#allocation2 + $0x30] sm:$0xff] }
  0xf2   : > { %798 = vst [vmem:[#allocation2 + $0x61] sm:$0xff] %v765_v33  ;;  %v766_v40 = vmax.f32 %v660_v34, 0.0  ;;  %v1016_v42 = vld [vmem:[#allocation2 + $0x18] sm:$0xff] }
  0xf3   : > { %796 = vst [vmem:[#allocation2 + $0x49] sm:$0xff] %v763_v36  ;;  %v4508_v41 = vmax.f32 %v652_v37, 0.0  ;;  %v1019_v45 = vld [vmem:[#allocation2 + $0x38] sm:$0xff]  ;;  %v4196_v37 = vld [vmem:[%s5145_s4 + $0x1a0] sm:$0xff]  }
  0xf4   : > { %799 = vst [vmem:[#allocation2 + $0x69] sm:$0xff] %v766_v40  ;;  %v1017_v43 = vld [vmem:[#allocation2 + $0x20] sm:$0xff]  ;;  %v4510_v46 = vpack.c.bf16 %v766_v40, %v765_v33  ;;  %v4521_v55 = vpack.c.bf16 %v1019_v45, %v1018_v51  ;;  %v956_v29 = vld [vmem:[#allocation2 + $0x32] sm:$0xff] }
  0xf5   : > { %797 = vst [vmem:[#allocation2 + $0x51] sm:$0xff] %v4508_v41  ;;  %v1048_v47 = vpack.c.bf16 %v1017_v43, %v1016_v42  ;;  %v4019_v48 = vpop.f32.mrb[8].mxu0  ;;  %v923_v49 = vpack.c.bf16 %v4508_v41, %v763_v36  ;;  %v954_v4 = vld [vmem:[#allocation2 + $0x1a] sm:$0xff]  ;;  %v955_v5 = vld [vmem:[#allocation2 + $0x22] sm:$0xff] }
  0xf6   : > { %v673_v52 = vadd.f32 %v4019_v48, %v4492_v11  ;;  %v664_v53 = vpop.f32.mrb[9].mxu0  ;;  %v4546_v14 = vpack.c.bf16 %v955_v5, %v954_v4  ;;  %v957_v30 = vld [vmem:[#allocation2 + $0x3a] sm:$0xff]  ;;  %v4199_v42 = vld [vmem:[%s5145_s4 + $0x1e8] sm:$0xff]  }
  0xf7   : > { %2321 = vmatprep.mubr.bf16.mxu0 %v1048_v47  ;;  %2169 = vmatmul.mubr.bf16.gmra.mrb[4].mxu1 %v1048_v47  ;;  %v665_v56 = vadd.f32 %v4492_v11, %v664_v53  ;;  %v4020_v57 = vpop.f32.mrb[10].mxu0  ;;  %v4577_v38 = vpack.c.bf16 %v957_v30, %v956_v29 }
  0xf8   : > { %2322 = vmatmul.mubr.bf16.vlgmr.msra.gmra.mrb[32].mxu0 %v984_v44  ;;  %2176 = vmatprep.mubr.bf16.mxu1 %v922_v26  ;;  %v769_v58 = vmax.f32 %v673_v52, 0.0  ;;  %v676_v59 = vadd.f32 %v4020_v57, %v4492_v11  ;;  %v667_v60 = vpop.f32.mrb[11].mxu0  ;;  %v4192_v26 = vld [vmem:[%s5145_s4 + $0x198] sm:$0xff]   ;;  %v4200_v52 = vld [vmem:[%s5145_s4 + $0x1a8] sm:$0xff]  }
  0xf9   : > { %2329 = vmatprep.mubr.bf16.mxu0 %v4521_v55  ;;  %v767_v61 = vmax.f32 %v665_v56, 0.0  ;;  %v668_v62 = vadd.f32 %v4492_v11, %v667_v60  ;;  %3825 = vmatpush3.bf16.msra.mxu0 %v4180_v50  ;;  %v1022_v32 = vld [vmem:[#allocation2 + $0x60] sm:$0xff] }
  0xfa   : > { %802 = vst [vmem:[#allocation2 + $0x91] sm:$0xff] %v769_v58  ;;  %v4530_v0 = vmax.f32 %v676_v59, 0.0  ;;  %v1020_v1 = vld [vmem:[#allocation2 + $0x48] sm:$0xff]  ;;  %3826 = vmatprep.subr.bf16.mxu0 %v4183_v54 }
  0xfb   : > { %800 = vst [vmem:[#allocation2 + $0x79] sm:$0xff] %v767_v61  ;;  %v768_v6 = vmax.f32 %v668_v62, 0.0  ;;  %v1023_v33 = vld [vmem:[#allocation2 + $0x68] sm:$0xff] }
  0xfc   : > { %803 = vst [vmem:[#allocation2 + $0x99] sm:$0xff] %v4530_v0  ;;  %v1021_v7 = vld [vmem:[#allocation2 + $0x50] sm:$0xff]  ;;  %v4537_v8 = vpack.c.bf16 %v4530_v0, %v769_v58  ;;  %v4584_v43 = vpack.c.bf16 %v1023_v33, %v1022_v32 }
  0xfd   : > { %v4539_v9 = vpack.c.bf16 %v1021_v7, %v1020_v1  ;;  %801 = vst [vmem:[#allocation2 + $0x81] sm:$0xff] %v768_v6  ;;  %v4023_v10 = vpop.f32.mrb[12].mxu0  ;;  %v4541_v12 = vpack.c.bf16 %v768_v6, %v767_v61  ;;  %3827 = vmatpush3.bf16.msra.mxu0 %v4184_v63  ;;  %v958_v57 = vld [vmem:[#allocation2 + $0x4a] sm:$0xff]  ;;  %v959_v58 = vld [vmem:[#allocation2 + $0x52] sm:$0xff] }
  0xfe   : > { %v689_v15 = vadd.f32 %v4023_v10, %v4492_v11  ;;  %v680_v16 = vpop.f32.mrb[13].mxu0  ;;  %3828 = vmatprep.subr.bf16.mxu0 %v4187_v3  ;;  %v4204_v1 = vld [vmem:[%s5145_s4 + $0x1b0] sm:$0xff]   ;;  %v4607_v3 = vpack.c.bf16 %v959_v58, %v958_v57  ;;  %v4205_v6 = vld [vmem:[%s5145_s4 + $0x1f8] sm:$0xff]  }
  0xff   : > { %2177 = vmatmul.mubr.bf16.gmra.mrb[8].mxu1 %v4521_v55  ;;  %v681_v18 = vadd.f32 %v4492_v11, %v680_v16  ;;  %v4024_v19 = vpop.f32.mrb[14].mxu0 }
 0x100   : > { %2330 = vmatmul.mubr.bf16.gmra.mrb[36].mxu0 %v4546_v14  ;;  %2184 = vmatprep.mubr.bf16.mxu1 %v923_v49  ;;  %v773_v20 = vmax.f32 %v689_v15, 0.0  ;;  %v692_v21 = vadd.f32 %v4024_v19, %v4492_v11  ;;  %v683_v22 = vpop.f32.mrb[15].mxu0  ;;  %v4206_v19 = vld [vmem:[%s5145_s4 + $0x1b8] sm:$0xff]  }
 0x101   : > { %2337 = vmatprep.mubr.bf16.mxu0 %v4539_v9  ;;  %v771_v24 = vmax.f32 %v681_v18, 0.0  ;;  %v684_v25 = vadd.f32 %v4492_v11, %v683_v22  ;;  %3829 = vmatpush3.bf16.msra.mxu0 %v4188_v13  ;;  %v961_v22 = vld [vmem:[#allocation2 + $0x6a] sm:$0xff] }
 0x102   : > { %806 = vst [vmem:[#allocation2 + $0xc1] sm:$0xff] %v773_v20  ;;  %v774_v27 = vmax.f32 %v692_v21, 0.0  ;;  %3830 = vmatprep.subr.bf16.mxu0 %v4191_v17  ;;  %v1024_v53 = vld [vmem:[#allocation2 + $0x78] sm:$0xff]  ;;  %v960_v21 = vld [vmem:[#allocation2 + $0x62] sm:$0xff] }
 0x103   : > { %804 = vst [vmem:[#allocation2 + $0xa9] sm:$0xff] %v771_v24  ;;  %v772_v31 = vmax.f32 %v684_v25, 0.0  ;;  %v1026_v25 = vld [vmem:[#allocation2 + $0x90] sm:$0xff]  ;;  %v4627_v30 = vpack.c.bf16 %v961_v22, %v960_v21 }
 0x104   : > { %807 = vst [vmem:[#allocation2 + $0xc9] sm:$0xff] %v774_v27  ;;  %v4570_v34 = vpack.c.bf16 %v774_v27, %v773_v20  ;;  %v1025_v54 = vld [vmem:[#allocation2 + $0x80] sm:$0xff] }
 0x105   : > { %805 = vst [vmem:[#allocation2 + $0xb1] sm:$0xff] %v772_v31  ;;  %v4027_v35 = vpop.f32.mrb[16].mxu0  ;;  %v4572_v36 = vpack.c.bf16 %v772_v31, %v771_v24  ;;  %3831 = vmatpush3.bf16.msra.mxu0 %v4192_v26  ;;  %v4600_v61 = vpack.c.bf16 %v1025_v54, %v1024_v53  ;;  %v1027_v26 = vld [vmem:[#allocation2 + $0x98] sm:$0xff] }
 0x106   : > { %v705_v39 = vadd.f32 %v4027_v35, %v4492_v11  ;;  %v696_v40 = vpop.f32.mrb[17].mxu0  ;;  %3832 = vmatprep.subr.bf16.mxu0 %v4195_v28  ;;  %v4632_v33 = vpack.c.bf16 %v1027_v26, %v1026_v25 }
 0x107   : > { %2185 = vmatmul.mubr.bf16.gmra.mrb[12].mxu1 %v4539_v9  ;;  %v697_v44 = vadd.f32 %v4492_v11, %v696_v40  ;;  %v4028_v45 = vpop.f32.mrb[18].mxu0 }
 0x108   : > { %2338 = vmatmul.mubr.bf16.gmra.mrb[40].mxu0 %v4577_v38  ;;  %2192 = vmatprep.mubr.bf16.mxu1 %v4510_v46  ;;  %v777_v47 = vmax.f32 %v705_v39, 0.0  ;;  %v708_v48 = vadd.f32 %v4028_v45, %v4492_v11  ;;  %v699_v49 = vpop.f32.mrb[19].mxu0  ;;  %v4203_v46 = vld [vmem:[%s5145_s4 + $0x1f0] sm:$0xff]  }
 0x109   : > { %2345 = vmatprep.mubr.bf16.mxu0 %v4584_v43  ;;  %v775_v50 = vmax.f32 %v697_v44, 0.0  ;;  %v700_v51 = vadd.f32 %v4492_v11, %v699_v49  ;;  %3833 = vmatpush3.bf16.msra.mxu0 %v4196_v37 }
 0x10a   : > { %810 = vst [vmem:[#allocation2 + $0xf1] sm:$0xff] %v777_v47  ;;  %v778_v56 = vmax.f32 %v708_v48, 0.0  ;;  %3834 = vmatprep.subr.bf16.mxu0 %v4199_v42 }
 0x10b   : > { %808 = vst [vmem:[#allocation2 + $0xd9] sm:$0xff] %v775_v50  ;;  %v776_v59 = vmax.f32 %v700_v51, 0.0  ;;  %v963_v51 = vld [vmem:[#allocation2 + $0x82] sm:$0xff] }
 0x10c   : > { %811 = vst [vmem:[#allocation2 + $0xf9] sm:$0xff] %v778_v56  ;;  %v4598_v60 = vpack.c.bf16 %v778_v56, %v777_v47  ;;  %v1028_v47 = vld [vmem:[#allocation2 + $0xa8] sm:$0xff]  ;;  %v1029_v48 = vld [vmem:[#allocation2 + $0xb0] sm:$0xff] }
 0x10d   : > { %809 = vst [vmem:[#allocation2 + $0xe1] sm:$0xff] %v776_v59  ;;  %v4031_v62 = vpop.f32.mrb[20].mxu0  ;;  %v4602_v63 = vpack.c.bf16 %v776_v59, %v775_v50  ;;  %3835 = vmatpush3.bf16.msra.mxu0 %v4200_v52  ;;  %v962_v50 = vld [vmem:[#allocation2 + $0x7a] sm:$0xff]  ;;  %v966_v25 = vld [vmem:[#allocation2 + $0xaa] sm:$0xff]  ;;  %v967_v26 = vld [vmem:[#allocation2 + $0xb2] sm:$0xff] }
 0x10e   : > { %v721_v4 = vadd.f32 %v4031_v62, %v4492_v11  ;;  %v712_v5 = vpop.f32.mrb[21].mxu0  ;;  %3836 = vmatprep.subr.bf16.mxu0 %v4203_v46  ;;  %v4646_v46 = vpack.c.bf16 %v963_v51, %v962_v50  ;;  %v3504_v51 = vpop.f32.mrb[0].mxu1 }
 0x10f   : > { %2193 = vmatmul.mubr.bf16.gmra.mrb[16].mxu1 %v4584_v43  ;;  %v713_v7 = vadd.f32 %v4492_v11, %v712_v5  ;;  %v4032_v10 = vpop.f32.mrb[22].mxu0 }
 0x110   : > { %2346 = vmatmul.mubr.bf16.gmra.mrb[44].mxu0 %v4607_v3  ;;  %2200 = vmatprep.mubr.bf16.mxu1 %v4541_v12  ;;  %v781_v13 = vmax.f32 %v721_v4, 0.0  ;;  %v724_v15 = vadd.f32 %v4032_v10, %v4492_v11  ;;  %v715_v16 = vpop.f32.mrb[23].mxu0 }
 0x111   : > { %2353 = vmatprep.mubr.bf16.mxu0 %v4600_v61  ;;  %v779_v17 = vmax.f32 %v713_v7, 0.0  ;;  %v716_v18 = vadd.f32 %v4492_v11, %v715_v16  ;;  %3837 = vmatpush3.bf16.msra.mxu0 %v4204_v1 }
 0x112   : > { %814 = vst [vmem:[#allocation2 + $0x121] sm:$0xff] %v781_v13  ;;  %v782_v20 = vmax.f32 %v724_v15, 0.0  ;;  %3838 = vmatprep.subr.bf16.mxu0 %v4205_v6  ;;  %v965_v15 = vld [vmem:[#allocation2 + $0x9a] sm:$0xff] }
 0x113   : > { %812 = vst [vmem:[#allocation2 + $0x109] sm:$0xff] %v779_v17  ;;  %v780_v24 = vmax.f32 %v716_v18, 0.0  ;;  %v1031_v18 = vld [vmem:[#allocation2 + $0xc8] sm:$0xff] }
 0x114   : > { %815 = vst [vmem:[#allocation2 + $0x129] sm:$0xff] %v782_v20  ;;  %v4623_v27 = vpack.c.bf16 %v782_v20, %v781_v13  ;;  %v964_v13 = vld [vmem:[#allocation2 + $0x92] sm:$0xff] }
 0x115   : > { %813 = vst [vmem:[#allocation2 + $0x111] sm:$0xff] %v780_v24  ;;  %v4035_v28 = vpop.f32.mrb[24].mxu0  ;;  %v4625_v29 = vpack.c.bf16 %v780_v24, %v779_v17  ;;  %3839 = vmatpush3.bf16.msra.mxu0 %v4206_v19  ;;  %v1030_v17 = vld [vmem:[#allocation2 + $0xc0] sm:$0xff]  ;;  %v4660_v21 = vpack.c.bf16 %v965_v15, %v964_v13 }
 0x116   : > { %v737_v31 = vadd.f32 %v4035_v28, %v4492_v11  ;;  %v728_v32 = vpop.f32.mrb[25].mxu0  ;;  %4041 = vmatprep.subr.bf16.mxu0 %v4559_v23  ;;  %v4663_v22 = vpack.c.bf16 %v1031_v18, %v1030_v17  ;;  %v1033_v24 = vld [vmem:[#allocation2 + $0xe0] sm:$0xff] }
 0x117   : > { %2201 = vmatmul.mubr.bf16.gmra.mrb[20].mxu1 %v4600_v61  ;;  %v729_v35 = vadd.f32 %v4492_v11, %v728_v32  ;;  %v4036_v37 = vpop.f32.mrb[26].mxu0  ;;  %v968_v32 = vld [vmem:[#allocation2 + $0xc2] sm:$0xff] }
 0x118   : > { %2354 = vmatmul.mubr.bf16.gmra.mrb[48].mxu0 %v4627_v30  ;;  %2208 = vmatprep.mubr.bf16.mxu1 %v4537_v8  ;;  %v785_v39 = vmax.f32 %v737_v31, 0.0  ;;  %v740_v40 = vadd.f32 %v4036_v37, %v4492_v11  ;;  %v731_v42 = vpop.f32.mrb[27].mxu0  ;;  %v4642_v8 = vpack.c.bf16 %v1029_v48, %v1028_v47  ;;  %v4670_v31 = vpack.c.bf16 %v967_v26, %v966_v25  ;;  %v1034_v37 = vld [vmem:[#allocation2 + $0xf0] sm:$0xff]  ;;  %v970_v47 = vld [vmem:[#allocation2 + $0xda] sm:$0xff]  ;;  %v971_v48 = vld [vmem:[#allocation2 + $0xe2] sm:$0xff] }
 0x119   : > { %2361 = vmatprep.mubr.bf16.mxu0 %v4632_v33  ;;  %v783_v44 = vmax.f32 %v729_v35, 0.0  ;;  %v732_v45 = vadd.f32 %v4492_v11, %v731_v42  ;;  %v969_v35 = vld [vmem:[#allocation2 + $0xca] sm:$0xff]  ;;  %v4686_v50 = vpack.c.bf16 %v971_v48, %v970_v47 }
 0x11a   : > { %818 = vst [vmem:[#allocation2 + $0x151] sm:$0xff] %v785_v39  ;;  %v786_v49 = vmax.f32 %v740_v40, 0.0  ;;  %v4676_v40 = vpack.c.bf16 %v969_v35, %v968_v32 }
 0x11b   : > { %816 = vst [vmem:[#allocation2 + $0x139] sm:$0xff] %v783_v44  ;;  %v784_v52 = vmax.f32 %v732_v45, 0.0 }
 0x11c   : > { %819 = vst [vmem:[#allocation2 + $0x159] sm:$0xff] %v786_v49  ;;  %v4640_v53 = vpack.c.bf16 %v786_v49, %v785_v39  ;;  %v1035_v39 = vld [vmem:[#allocation2 + $0xf8] sm:$0xff]  ;;  %v1037_v45 = vld [vmem:[#allocation2 + $0x110] sm:$0xff] }
 0x11d   : > { %817 = vst [vmem:[#allocation2 + $0x141] sm:$0xff] %v784_v52  ;;  %v4039_v54 = vpop.f32.mrb[28].mxu0  ;;  %v4644_v56 = vpack.c.bf16 %v784_v52, %v783_v44  ;;  %v4679_v42 = vpack.c.bf16 %v1035_v39, %v1034_v37  ;;  %v1036_v44 = vld [vmem:[#allocation2 + $0x108] sm:$0xff]  ;;  %v3505_v52 = vpop.f32.mrb[1].mxu1 }
 0x11e   : > { %v753_v57 = vadd.f32 %v4039_v54, %v4492_v11  ;;  %v744_v58 = vpop.f32.mrb[29].mxu0  ;;  %v4684_v49 = vpack.c.bf16 %v1037_v45, %v1036_v44  ;;  %v4692_v54 = vadd.f32 %v3505_v52, %v3504_v51  ;;  %v974_v15 = vld [vmem:[#allocation2 + $0x10a] sm:$0xff] }
 0x11f   : > { %2209 = vmatmul.mubr.bf16.gmra.mrb[24].mxu1 %v4632_v33  ;;  %v745_v59 = vadd.f32 %v4492_v11, %v744_v58  ;;  %v4040_v62 = vpop.f32.mrb[30].mxu0 }
 0x120   : > { %2362 = vmatmul.mubr.bf16.gmra.mrb[52].mxu0 %v4646_v46  ;;  %2216 = vmatprep.mubr.bf16.mxu1 %v4572_v36  ;;  %v789_v1 = vmax.f32 %v753_v57, 0.0  ;;  %v756_v4 = vadd.f32 %v4040_v62, %v4492_v11  ;;  %v747_v5 = vpop.f32.mrb[31].mxu0  ;;  %v3507_v57 = vpop.f32.mrb[2].mxu1  ;;  %v973_v62 = vld [vmem:[#allocation2 + $0xfa] sm:$0xff] }
 0x121   : > { %2369 = vmatprep.mubr.bf16.mxu0 %v4642_v8  ;;  %v787_v6 = vmax.f32 %v745_v59, 0.0  ;;  %v748_v7 = vadd.f32 %v4492_v11, %v747_v5  ;;  %v1032_v11 = vld [vmem:[#allocation2 + $0xd8] sm:$0xff]  ;;  %v3508_v58 = vpop.f32.mrb[3].mxu1  ;;  %v1039_v5 = vld [vmem:[#allocation2 + $0x128] sm:$0xff]  ;;  %v1042_v25 = vld [vmem:[#allocation2 + $0x150] sm:$0xff] }
 0x122   : > { %822 = vst [vmem:[#allocation2 + $0x181] sm:$0xff] %v789_v1  ;;  %v790_v10 = vmax.f32 %v756_v4, 0.0  ;;  %v4668_v28 = vpack.c.bf16 %v1033_v24, %v1032_v11  ;;  %v972_v59 = vld [vmem:[#allocation2 + $0xf2] sm:$0xff]  ;;  %v1038_v4 = vld [vmem:[#allocation2 + $0x120] sm:$0xff]  ;;  %v977_v24 = vld [vmem:[#allocation2 + $0x12a] sm:$0xff] }
 0x123   : > { %820 = vst [vmem:[#allocation2 + $0x169] sm:$0xff] %v787_v6  ;;  %v788_v16 = vmax.f32 %v748_v7, 0.0  ;;  %v4699_v7 = vpack.c.bf16 %v1039_v5, %v1038_v4  ;;  %v976_v11 = vld [vmem:[#allocation2 + $0x122] sm:$0xff]  ;;  %v1043_v26 = vld [vmem:[#allocation2 + $0x158] sm:$0xff] }
 0x124   : > { %823 = vst [vmem:[#allocation2 + $0x189] sm:$0xff] %v790_v10  ;;  %v4656_v19 = vpack.c.bf16 %v790_v10, %v789_v1  ;;  %v4694_v1 = vadd.f32 %v3508_v58, %v3507_v57  ;;  %v1040_v10 = vld [vmem:[#allocation2 + $0x138] sm:$0xff]  ;;  %v1041_v13 = vld [vmem:[#allocation2 + $0x140] sm:$0xff]  ;;  %v4712_v32 = vpack.c.bf16 %v977_v24, %v976_v11  ;;  %v4715_v35 = vpack.c.bf16 %v1043_v26, %v1042_v25  ;;  %v4208_v25 = vld [vmem:[%s5145_s4 + $0x208] sm:$0xff]  }
 0x125   : > { %821 = vst [vmem:[#allocation2 + $0x171] sm:$0xff] %v788_v16  ;;  %v4658_v20 = vpack.c.bf16 %v788_v16, %v787_v6  ;;  %v4696_v6 = vpack.c.bf16 %v973_v62, %v972_v59  ;;  %v975_v16 = vld [vmem:[#allocation2 + $0x112] sm:$0xff]  ;;  %v4704_v17 = vpack.c.bf16 %v1041_v13, %v1040_v10  ;;  %v978_v44 = vld [vmem:[#allocation2 + $0x13a] sm:$0xff]  ;;  %v979_v45 = vld [vmem:[#allocation2 + $0x142] sm:$0xff] }
 0x126   : > { %v4706_v18 = vpack.c.bf16 %v975_v16, %v974_v15  ;;  %v4722_v48 = vpack.c.bf16 %v979_v45, %v978_v44  ;;  %v980_v51 = vld [vmem:[#allocation2 + $0x152] sm:$0xff]  ;;  %v981_v52 = vld [vmem:[#allocation2 + $0x15a] sm:$0xff] }
 0x127   : > { %2217 = vmatmul.mubr.bf16.gmra.mrb[28].mxu1 %v4642_v8  ;;  %v4728_v59 = vpack.c.bf16 %v981_v52, %v980_v51  ;;  %v1081_v4 = vld [vmem:[#allocation2 + $0x21] sm:$0xff]  ;;  %v1080_v13 = vld [vmem:[#allocation2 + $0x19] sm:$0xff]  ;;  %v1273_v24 = vld [vmem:[#allocation2 + $0x31] sm:$0xff] }
 0x128   : > { %2370 = vmatmul.mubr.bf16.gmra.mrb[56].mxu0 %v4660_v21  ;;  %2224 = vmatprep.mubr.bf16.mxu1 %v4570_v34  ;;  %v1274_v15 = vld [vmem:[#allocation2 + $0x39] sm:$0xff]  ;;  %v1112_v16 = vpack.c.bf16 %v1081_v4, %v1080_v13  ;;  %v1277_v45 = vld [vmem:[#allocation2 + $0x61] sm:$0xff] }
 0x129   : > { %2377 = vmatprep.mubr.bf16.mxu0 %v4663_v22  ;;  %v1046_v57 = vld [vmem:[#allocation2 + $0x180] sm:$0xff]  ;;  %v1305_v26 = vpack.c.bf16 %v1274_v15, %v1273_v24  ;;  %v4210_v44 = vld [vmem:[%s5145_s4 + $0x218] sm:$0xff]  }
 0x12a   : > { %v1044_v37 = vld [vmem:[#allocation2 + $0x168] sm:$0xff] }
 0x12b   : > { %v1047_v58 = vld [vmem:[#allocation2 + $0x188] sm:$0xff] }
 0x12c   : > { %v1045_v39 = vld [vmem:[#allocation2 + $0x170] sm:$0xff]  ;;  %v4731_v62 = vpack.c.bf16 %v1047_v58, %v1046_v57  ;;  %v1174_v15 = vld [vmem:[#allocation2 + $0x182] sm:$0xff] }
 0x12d   : > { %v4720_v47 = vpack.c.bf16 %v1045_v39, %v1044_v37  ;;  %v982_v5 = vld [vmem:[#allocation2 + $0x16a] sm:$0xff]  ;;  %v983_v10 = vld [vmem:[#allocation2 + $0x172] sm:$0xff] }
 0x12e   : > { %v4736_v11 = vpack.c.bf16 %v983_v10, %v982_v5  ;;  %v1275_v37 = vld [vmem:[#allocation2 + $0x49] sm:$0xff] }
 0x12f   : > { %2225 = vmatmul.mubr.bf16.gmra.mrb[32].mxu1 %v4663_v22  ;;  %v1306_v39 = vpack.c.bf16 %v4508_v41, %v1275_v37  ;;  %v1278_v41 = vld [vmem:[#allocation2 + $0x69] sm:$0xff] }
 0x130   : > { %2378 = vmatmul.mubr.bf16.gmra.mrb[60].mxu0 %v4670_v31  ;;  %2232 = vmatprep.mubr.bf16.mxu1 %v4602_v63  ;;  %v1307_v51 = vpack.c.bf16 %v1278_v41, %v1277_v45 }
 0x131   : > { %2385 = vmatprep.mubr.bf16.mxu0 %v4668_v28 }
 0x137   : > { %2233 = vmatmul.mubr.bf16.gmra.mrb[36].mxu1 %v4668_v28 }
 0x138   : > { %2386 = vmatmul.mubr.bf16.gmra.mrb[64].mxu0 %v4676_v40  ;;  %2240 = vmatprep.mubr.bf16.mxu1 %v4598_v60 }
 0x139   : > { %2393 = vmatprep.mubr.bf16.mxu0 %v4679_v42 }
 0x13f   : > { %2241 = vmatmul.mubr.bf16.gmra.mrb[40].mxu1 %v4679_v42 }
 0x140   : > { %2394 = vmatmul.mubr.bf16.gmra.mrb[68].mxu0 %v4686_v50  ;;  %2248 = vmatprep.mubr.bf16.mxu1 %v4625_v29 }
 0x141   : > { %2401 = vmatprep.mubr.bf16.mxu0 %v4684_v49 }
 0x147   : > { %2249 = vmatmul.mubr.bf16.gmra.mrb[44].mxu1 %v4684_v49 }
 0x148   : > { %2402 = vmatmul.mubr.bf16.gmra.mrb[72].mxu0 %v4696_v6  ;;  %2256 = vmatprep.mubr.bf16.mxu1 %v4623_v27 }
 0x149   : > { %2409 = vmatprep.mubr.bf16.mxu0 %v4699_v7 }
 0x14f   : > { %2257 = vmatmul.mubr.bf16.gmra.mrb[48].mxu1 %v4699_v7 }
 0x150   : > { %2410 = vmatmul.mubr.bf16.gmra.mrb[76].mxu0 %v4706_v18  ;;  %2264 = vmatprep.mubr.bf16.mxu1 %v4644_v56 }
 0x151   : > { %2417 = vmatprep.mubr.bf16.mxu0 %v4704_v17 }
 0x157   : > { %2265 = vmatmul.mubr.bf16.gmra.mrb[52].mxu1 %v4704_v17 }
 0x158   : > { %2418 = vmatmul.mubr.bf16.gmra.mrb[80].mxu0 %v4712_v32  ;;  %2272 = vmatprep.mubr.bf16.mxu1 %v4640_v53 }
 0x159   : > { %2425 = vmatprep.mubr.bf16.mxu0 %v4715_v35 }
 0x15f   : > { %2273 = vmatmul.mubr.bf16.gmra.mrb[56].mxu1 %v4715_v35 }
 0x160   : > { %2426 = vmatmul.mubr.bf16.gmra.mrb[84].mxu0 %v4722_v48  ;;  %2280 = vmatprep.mubr.bf16.mxu1 %v4658_v20 }
 0x161   : > { %2433 = vmatprep.mubr.bf16.mxu0 %v4720_v47 }
 0x167   : > { %2281 = vmatmul.mubr.bf16.gmra.mrb[60].mxu1 %v4720_v47 }
 0x168   : > { %2434 = vmatmul.mubr.bf16.gmra.mrb[88].mxu0 %v4728_v59  ;;  %2482 = vmatprep.mubr.bf16.mxu1 %v4546_v14  ;;  %v4209_v14 = vld [vmem:[%s5145_s4 + $0x210] sm:$0xff]  }
 0x169   : > { %2441 = vmatprep.mubr.bf16.mxu0 %v4731_v62 }
 0x16f   : > { %2483 = vmatmul.mubr.bf16.vlgmr.msra.gmra.mrb[64].mxu1 %v1112_v16  ;;  %v1175_v16 = vld [vmem:[#allocation2 + $0x18a] sm:$0xff] }
 0x170   : > { %2442 = vmatmul.mubr.bf16.gmra.mrb[92].mxu0 %v4736_v11  ;;  %2490 = vmatprep.mubr.bf16.mxu1 %v4577_v38  ;;  %v4211_v38 = vld [vmem:[%s5145_s4 + $0x220] sm:$0xff]  }
 0x171   : > { %2643 = vmatprep.mubr.bf16.mxu0 %v1305_v26  ;;  %4107 = vmatpush3.bf16.msra.mxu1 %v4559_v23 }
 0x172   : > { %4100 = vmatprep.subr.bf16.mxu1 %v4208_v25 }
 0x175   : > { %4108 = vmatpush3.bf16.msra.mxu1 %v4208_v25 }
 0x176   : > { %4101 = vmatprep.subr.bf16.mxu1 %v4209_v14 }
 0x177   : > { %2491 = vmatmul.mubr.bf16.gmra.mrb[68].mxu1 %v1305_v26 }
 0x178   : > { %2644 = vmatmul.mubr.bf16.vlgmr.msra.gmra.mrb[96].mxu0 %v4521_v55  ;;  %2498 = vmatprep.mubr.bf16.mxu1 %v4607_v3  ;;  %v4212_v55 = vld [vmem:[%s5145_s4 + $0x228] sm:$0xff]   ;;  %v1281_v3 = vld [vmem:[#allocation2 + $0x91] sm:$0xff] }
 0x179   : > { %2651 = vmatprep.mubr.bf16.mxu0 %v1306_v39  ;;  %4042 = vmatpush3.bf16.msra.mxu0 %v4559_v23  ;;  %v4213_v23 = vld [vmem:[%s5145_s4 + $0x230] sm:$0xff]  }
 0x17a   : > { %4043 = vmatprep.subr.bf16.mxu0 %v4208_v25  ;;  %4109 = vmatpush3.bf16.msra.mxu1 %v4209_v14 }
 0x17b   : > { %4102 = vmatprep.subr.bf16.mxu1 %v4210_v44 }
 0x17d   : > { %4044 = vmatpush3.bf16.msra.mxu0 %v4208_v25 }
 0x17e   : > { %4045 = vmatprep.subr.bf16.mxu0 %v4209_v14  ;;  %4110 = vmatpush3.bf16.msra.mxu1 %v4210_v44 }
 0x17f   : > { %2499 = vmatmul.mubr.bf16.gmra.mrb[72].mxu1 %v1306_v39  ;;  %4103 = vmatprep.subr.bf16.mxu1 %v4211_v38 }
 0x180   : > { %2652 = vmatmul.mubr.bf16.gmra.mrb[100].mxu0 %v4539_v9  ;;  %2506 = vmatprep.mubr.bf16.mxu1 %v4627_v30  ;;  %v4214_v9 = vld [vmem:[%s5145_s4 + $0x238] sm:$0xff]   ;;  %v1309_v30 = vpack.c.bf16 %v4530_v0, %v1281_v3  ;;  %v4805_v0 = vld [vmem:[%s5146_s5] ss:$0 sm:$0xff] }
 0x181   : > { %2659 = vmatprep.mubr.bf16.mxu0 %v1307_v51  ;;  %4046 = vmatpush3.bf16.msra.mxu0 %v4209_v14 }
 0x182   : > { %4047 = vmatprep.subr.bf16.mxu0 %v4210_v44  ;;  %4111 = vmatpush3.bf16.msra.mxu1 %v4211_v38 }
 0x183   : > { %4104 = vmatprep.subr.bf16.mxu1 %v4212_v55 }
 0x185   : > { %4048 = vmatpush3.bf16.msra.mxu0 %v4210_v44 }
 0x186   : > { %4049 = vmatprep.subr.bf16.mxu0 %v4211_v38  ;;  %4112 = vmatpush3.bf16.msra.mxu1 %v4212_v55 }
 0x187   : > { %2507 = vmatmul.mubr.bf16.gmra.mrb[76].mxu1 %v1307_v51  ;;  %4105 = vmatprep.subr.bf16.mxu1 %v4213_v23 }
 0x188   : > { %2660 = vmatmul.mubr.bf16.gmra.mrb[104].mxu0 %v4584_v43  ;;  %2514 = vmatprep.mubr.bf16.mxu1 %v4646_v46  ;;  %v1091_v43 = vld [vmem:[#allocation2 + $0x99] sm:$0xff] }
 0x189   : > { %2667 = vmatprep.mubr.bf16.mxu0 %v4541_v12  ;;  %4050 = vmatpush3.bf16.msra.mxu0 %v4211_v38  ;;  %v1117_v46 = vpack.c.bf16 %v1091_v43, %v1281_v3  ;;  %v1345_v43 = vld [vmem:[#allocation2 + $0x92] sm:$0xff] }
 0x18a   : > { %4051 = vmatprep.subr.bf16.mxu0 %v4212_v55  ;;  %4113 = vmatpush3.bf16.msra.mxu1 %v4213_v23 }
 0x18b   : > { %4106 = vmatprep.subr.bf16.mxu1 %v4214_v9 }
 0x18d   : > { %4052 = vmatpush3.bf16.msra.mxu0 %v4212_v55 }
 0x18e   : > { %4114 = vmatpush3.bf16.msra.mxu1 %v4214_v9  ;;  %4053 = vmatprep.subr.bf16.mxu0 %v4213_v23 }
 0x18f   : > { %2515 = vmatmul.mubr.bf16.gmra.mrb[80].mxu1 %v4541_v12 }
 0x190   : > { %2668 = vmatmul.mubr.bf16.gmra.mrb[108].mxu0 %v4600_v61  ;;  %2522 = vmatprep.mubr.bf16.mxu1 %v4660_v21 }
 0x191   : > { %2675 = vmatprep.mubr.bf16.mxu0 %v1309_v30  ;;  %4054 = vmatpush3.bf16.msra.mxu0 %v4213_v23  ;;  %v1303_v23 = vld [vmem:[#allocation2 + $0x199] sm:$0xff] }
 0x192   : > { %4055 = vmatprep.subr.bf16.mxu0 %v4214_v9 }
 0x195   : > { %4056 = vmatpush3.bf16.msra.mxu0 %v4214_v9  ;;  %v1304_v9 = vld [vmem:[#allocation2 + $0x1a1] sm:$0xff] }
 0x197   : > { %2523 = vmatmul.mubr.bf16.gmra.mrb[84].mxu1 %v1117_v46  ;;  %v1346_v46 = vld [vmem:[#allocation2 + $0x9a] sm:$0xff] }
 0x198   : > { %2676 = vmatmul.mubr.bf16.gmra.mrb[112].mxu0 %v4632_v33  ;;  %2530 = vmatprep.mubr.bf16.mxu1 %v4670_v31 }
 0x199   : > { %2683 = vmatprep.mubr.bf16.mxu0 %v4572_v36 }
 0x19f   : > { %2531 = vmatmul.mubr.bf16.gmra.mrb[88].mxu1 %v4572_v36 }
 0x1a0   : > { %2684 = vmatmul.mubr.bf16.gmra.mrb[116].mxu0 %v4642_v8  ;;  %2538 = vmatprep.mubr.bf16.mxu1 %v4676_v40 }
 0x1a1   : > { %2691 = vmatprep.mubr.bf16.mxu0 %v4570_v34 }
 0x1a7   : > { %2539 = vmatmul.mubr.bf16.gmra.mrb[92].mxu1 %v4570_v34 }
 0x1a8   : > { %2692 = vmatmul.mubr.bf16.gmra.mrb[120].mxu0 %v4663_v22  ;;  %2546 = vmatprep.mubr.bf16.mxu1 %v4686_v50 }
 0x1a9   : > { %2699 = vmatprep.mubr.bf16.mxu0 %v4602_v63 }
 0x1af   : > { %2547 = vmatmul.mubr.bf16.gmra.mrb[96].mxu1 %v4602_v63 }
 0x1b0   : > { %2700 = vmatmul.mubr.bf16.gmra.mrb[124].mxu0 %v4668_v28  ;;  %2554 = vmatprep.mubr.bf16.mxu1 %v4696_v6  ;;  %v2166_v28 = vadd.f32 %v4694_v1, %v4805_v0 }
 0x1b1   : > { %2707 = vmatprep.mubr.bf16.mxu0 %v4598_v60 }
 0x1b7   : > { %2555 = vmatmul.mubr.bf16.gmra.mrb[100].mxu1 %v4598_v60 }
 0x1b8   : > { %2708 = vmatmul.mubr.bf16.gmra.mrb[128].mxu0 %v4679_v42  ;;  %2562 = vmatprep.mubr.bf16.mxu1 %v4706_v18 }
 0x1b9   : > { %2715 = vmatprep.mubr.bf16.mxu0 %v4625_v29 }
 0x1bf   : > { %2563 = vmatmul.mubr.bf16.gmra.mrb[104].mxu1 %v4625_v29 }
 0x1c0   : > { %2716 = vmatmul.mubr.bf16.gmra.mrb[132].mxu0 %v4684_v49  ;;  %2570 = vmatprep.mubr.bf16.mxu1 %v4712_v32 }
 0x1c1   : > { %2723 = vmatprep.mubr.bf16.mxu0 %v4623_v27 }
 0x1c7   : > { %2571 = vmatmul.mubr.bf16.gmra.mrb[108].mxu1 %v4623_v27  ;;  %v2163_v27 = vadd.f32 %v4692_v54, %v4805_v0 }
 0x1c8   : > { %2724 = vmatmul.mubr.bf16.gmra.mrb[136].mxu0 %v4699_v7  ;;  %2578 = vmatprep.mubr.bf16.mxu1 %v4722_v48 }
 0x1c9   : > { %2731 = vmatprep.mubr.bf16.mxu0 %v4644_v56 }
 0x1ca   : > { %v3510_v12 = vpop.f32.mrb[4].mxu1 }
 0x1cb   : > { %v3616_v34 = vpop.f32.mrb[32].mxu0  ;;  %v3511_v36 = vpop.f32.mrb[5].mxu1 }
 0x1cc   : > { %v3512_v60 = vadd.f32 %v3511_v36, %v3510_v12  ;;  %v3617_v61 = vpop.f32.mrb[33].mxu0  ;;  %v3513_v63 = vpop.f32.mrb[6].mxu1 }
 0x1cd   : > { %v3618_v29 = vadd.f32 %v3617_v61, %v3616_v34  ;;  %v3619_v33 = vpop.f32.mrb[34].mxu0  ;;  %v3514_v8 = vpop.f32.mrb[7].mxu1 }
 0x1ce   : > { %v3515_v21 = vadd.f32 %v3514_v8, %v3513_v63  ;;  %v3620_v22 = vpop.f32.mrb[35].mxu0  ;;  %v2171_v1 = vadd.f32 %v3512_v60, %v4805_v0  ;;  %v1320_v63 = vpack.c.bf16 %v1304_v9, %v1303_v23  ;;  %v1353_v23 = vld [vmem:[#allocation2 + $0xf2] sm:$0xff]  ;;  %v1354_v9 = vld [vmem:[#allocation2 + $0xfa] sm:$0xff] }
 0x1cf   : > { %v4811_v31 = vadd.f32 %v3618_v29, %v2163_v27  ;;  %v3621_v40 = vadd.f32 %v3620_v22, %v3619_v33  ;;  %2579 = vmatmul.mubr.bf16.gmra.mrb[112].mxu1 %v4644_v56  ;;  %v1373_v33 = vpack.c.bf16 %v1346_v46, %v1345_v43  ;;  %v1341_v46 = vld [vmem:[#allocation2 + $0x62] sm:$0xff] }
 0x1d0   : > { %2732 = vmatmul.mubr.bf16.gmra.mrb[140].mxu0 %v4704_v17  ;;  %2586 = vmatprep.mubr.bf16.mxu1 %v4728_v59  ;;  %v2174_v17 = vadd.f32 %v3515_v21, %v4805_v0 }
 0x1d1   : > { %v4816_v42 = vadd.f32 %v3621_v40, %v2166_v28  ;;  %2739 = vmatprep.mubr.bf16.mxu0 %v4640_v53 }
 0x1d2   : > { %v3516_v49 = vpop.f32.mrb[8].mxu1 }
 0x1d3   : > { %v3622_v50 = vpop.f32.mrb[36].mxu0  ;;  %v3517_v54 = vpop.f32.mrb[9].mxu1 }
 0x1d4   : > { %v3518_v6 = vadd.f32 %v3517_v54, %v3516_v49  ;;  %v3623_v7 = vpop.f32.mrb[37].mxu0  ;;  %v3519_v18 = vpop.f32.mrb[10].mxu1  ;;  %v1347_v49 = vld [vmem:[#allocation2 + $0xaa] sm:$0xff] }
 0x1d5   : > { %v3624_v32 = vadd.f32 %v3623_v7, %v3622_v50  ;;  %v3625_v48 = vpop.f32.mrb[38].mxu0  ;;  %v3520_v52 = vpop.f32.mrb[11].mxu1  ;;  %v1348_v50 = vld [vmem:[#allocation2 + $0xb2] sm:$0xff]  ;;  %v1349_v7 = vld [vmem:[#allocation2 + $0xc2] sm:$0xff] }
 0x1d6   : > { %v3521_v56 = vadd.f32 %v3520_v52, %v3519_v18  ;;  %v3626_v57 = vpop.f32.mrb[39].mxu0  ;;  %v2179_v14 = vadd.f32 %v3518_v6, %v4805_v0  ;;  %v1350_v18 = vld [vmem:[#allocation2 + $0xca] sm:$0xff]  ;;  %v4231_v52 = vld [vmem:[#allocation2] sm:$0xff] }
 0x1d7   : > { %v4821_v58 = vadd.f32 %v3624_v32, %v2171_v1  ;;  %v3627_v59 = vadd.f32 %v3626_v57, %v3625_v48  ;;  %2587 = vmatmul.mubr.bf16.gmra.mrb[116].mxu1 %v4640_v53  ;;  %v1337_v57 = vld [vmem:[#allocation2 + $0x32] sm:$0xff] }
 0x1d8   : > { %2740 = vmatmul.mubr.bf16.gmra.mrb[144].mxu0 %v4715_v35  ;;  %2594 = vmatprep.mubr.bf16.mxu1 %v4736_v11  ;;  %v4830_v11 = vpack.c.bf16 %v1175_v16, %v1174_v15  ;;  %v2182_v38 = vadd.f32 %v3521_v56, %v4805_v0  ;;  %v1256_v56 = vpack.c.bf16 %v4231_v52, %v4231_v52  ;;  %v1358_v52 = vld [vmem:[#allocation2 + $0x12a] sm:$0xff] }
 0x1d9   : > { %v4826_v4 = vadd.f32 %v3627_v59, %v2174_v17  ;;  %2747 = vmatprep.mubr.bf16.mxu0 %v4658_v20  ;;  %v1375_v16 = vpack.c.bf16 %v1350_v18, %v1349_v7  ;;  %v1356_v7 = vld [vmem:[#allocation2 + $0x112] sm:$0xff] }
 0x1da   : > { %v3522_v5 = vpop.f32.mrb[12].mxu1 }
 0x1db   : > { %v3628_v10 = vpop.f32.mrb[40].mxu0  ;;  %v3523_v13 = vpop.f32.mrb[13].mxu1 }
 0x1dc   : > { %v3524_v24 = vadd.f32 %v3523_v13, %v3522_v5  ;;  %v3629_v25 = vpop.f32.mrb[41].mxu0  ;;  %v3525_v26 = vpop.f32.mrb[14].mxu1 }
 0x1dd   : > { %v3630_v37 = vadd.f32 %v3629_v25, %v3628_v10  ;;  %v3631_v53 = vpop.f32.mrb[42].mxu0  ;;  %v3526_v39 = vpop.f32.mrb[15].mxu1  ;;  %v1374_v10 = vpack.c.bf16 %v1348_v50, %v1347_v49 }
 0x1de   : > { %v3527_v35 = vadd.f32 %v3526_v39, %v3525_v26  ;;  %v3632_v44 = vpop.f32.mrb[43].mxu0  ;;  %v1339_v39 = vld [vmem:[#allocation2 + $0x4a] sm:$0xff] }
 0x1df   : > { %v4833_v45 = vadd.f32 %v3630_v37, %v2179_v14  ;;  %v3633_v41 = vadd.f32 %v3632_v44, %v3631_v53  ;;  %2595 = vmatmul.mubr.bf16.gmra.mrb[120].mxu1 %v4658_v20  ;;  %v2187_v20 = vadd.f32 %v3524_v24, %v4805_v0  ;;  %v1352_v44 = vld [vmem:[#allocation2 + $0xe2] sm:$0xff] }
 0x1e0   : > { %2748 = vmatmul.mubr.bf16.gmra.mrb[148].mxu0 %v4720_v47  ;;  %2602 = vmatprep.mubr.bf16.mxu1 %v4830_v11  ;;  %v2190_v8 = vadd.f32 %v3527_v35, %v4805_v0  ;;  %v1351_v35 = vld [vmem:[#allocation2 + $0xda] sm:$0xff] }
 0x1e1   : > { %v4838_v51 = vadd.f32 %v3633_v41, %v2182_v38  ;;  %2755 = vmatprep.mubr.bf16.mxu0 %v4656_v19 }
 0x1e2   : > { %v3528_v55 = vpop.f32.mrb[16].mxu1 }
 0x1e3   : > { %v3634_v3 = vpop.f32.mrb[44].mxu0  ;;  %v3529_v30 = vpop.f32.mrb[17].mxu1 }
 0x1e4   : > { %v3530_v12 = vadd.f32 %v3529_v30, %v3528_v55  ;;  %v3635_v34 = vpop.f32.mrb[45].mxu0  ;;  %v3531_v36 = vpop.f32.mrb[18].mxu1  ;;  %v1340_v55 = vld [vmem:[#allocation2 + $0x52] sm:$0xff] }
 0x1e5   : > { %v3636_v60 = vadd.f32 %v3635_v34, %v3634_v3  ;;  %v3637_v47 = vpop.f32.mrb[46].mxu0  ;;  %v3532_v61 = vpop.f32.mrb[19].mxu1 }
 0x1e6   : > { %v3533_v27 = vadd.f32 %v3532_v61, %v3531_v36  ;;  %v3638_v29 = vpop.f32.mrb[47].mxu0 }
 0x1e7   : > { %v4843_v21 = vadd.f32 %v3636_v60, %v2187_v20  ;;  %v3639_v22 = vadd.f32 %v3638_v29, %v3637_v47  ;;  %2603 = vmatmul.mubr.bf16.gmra.mrb[124].mxu1 %v4656_v19  ;;  %v1338_v19 = vld [vmem:[#allocation2 + $0x3a] sm:$0xff]  ;;  %v1376_v47 = vpack.c.bf16 %v1352_v44, %v1351_v35  ;;  %v1377_v29 = vpack.c.bf16 %v1354_v9, %v1353_v23  ;;  %v1361_v23 = vld [vmem:[#allocation2 + $0x152] sm:$0xff] }
 0x1e8   : > { %2756 = vmatmul.mubr.bf16.gmra.mrb[152].mxu0 %v4731_v62  ;;  %4065 = vmatprep.mubr.bf16.mxu1 %v1373_v33  ;;  %v2195_v62 = vadd.f32 %v3530_v12, %v4805_v0  ;;  %v2198_v24 = vadd.f32 %v3533_v27, %v4805_v0  ;;  %v1369_v14 = vpack.c.bf16 %v1338_v19, %v1337_v57  ;;  %v1342_v12 = vld [vmem:[#allocation2 + $0x6a] sm:$0xff]  ;;  %v1359_v44 = vld [vmem:[#allocation2 + $0x13a] sm:$0xff] }
 0x1e9   : > { %v4847_v28 = vadd.f32 %v3639_v22, %v2190_v8  ;;  %2763 = vmatprep.mubr.bf16.mxu0 %v1320_v63  ;;  %v1370_v27 = vpack.c.bf16 %v1340_v55, %v1339_v39  ;;  %v1362_v9 = vld [vmem:[#allocation2 + $0x15a] sm:$0xff] }
 0x1ea   : > { %v3534_v40 = vpop.f32.mrb[20].mxu1 }
 0x1eb   : > { %v3640_v54 = vpop.f32.mrb[48].mxu0  ;;  %v3535_v6 = vpop.f32.mrb[21].mxu1 }
 0x1ec   : > { %v3536_v1 = vadd.f32 %v3535_v6, %v3534_v40  ;;  %v3641_v32 = vpop.f32.mrb[49].mxu0  ;;  %v3537_v48 = vpop.f32.mrb[22].mxu1  ;;  %v1371_v40 = vpack.c.bf16 %v1342_v12, %v1341_v46  ;;  %v1355_v6 = vld [vmem:[#allocation2 + $0x10a] sm:$0xff] }
 0x1ed   : > { %v3642_v17 = vadd.f32 %v3641_v32, %v3640_v54  ;;  %v3643_v59 = vpop.f32.mrb[50].mxu0  ;;  %v3538_v5 = vpop.f32.mrb[23].mxu1  ;;  %v1343_v54 = vld [vmem:[#allocation2 + $0x7a] sm:$0xff]  ;;  %v1344_v32 = vld [vmem:[#allocation2 + $0x82] sm:$0xff] }
 0x1ee   : > { %v3539_v13 = vadd.f32 %v3538_v5, %v3537_v48  ;;  %v3644_v15 = vpop.f32.mrb[51].mxu0  ;;  %v2203_v34 = vadd.f32 %v3536_v1, %v4805_v0  ;;  %v1357_v48 = vld [vmem:[#allocation2 + $0x122] sm:$0xff] }
 0x1ef   : > { %v4851_v25 = vadd.f32 %v3642_v17, %v2195_v62  ;;  %v3645_v26 = vadd.f32 %v3644_v15, %v3643_v59  ;;  %4066 = vmatmul.mubr.bf16.vlgmr.msra.gmra.mrb[128].mxu1 %v1374_v10  ;;  %v1378_v10 = vpack.c.bf16 %v1356_v7, %v1355_v6 }
 0x1f0   : > { %2764 = vmatmul.mubr.bf16.gmra.mrb[156].mxu0 %v1256_v56  ;;  %4069 = vmatprep.mubr.bf16.mxu1 %v1375_v16  ;;  %v2206_v33 = vadd.f32 %v3539_v13, %v4805_v0  ;;  %v1372_v16 = vpack.c.bf16 %v1344_v32, %v1343_v54 }
 0x1f1   : > { %v4853_v37 = vadd.f32 %v3645_v26, %v2198_v24  ;;  %4057 = vmatprep.mubr.bf16.mxu0 %v1369_v14  ;;  %v1379_v24 = vpack.c.bf16 %v1358_v52, %v1357_v48 }
 0x1f2   : > { %v3540_v53 = vpop.f32.mrb[24].mxu1 }
 0x1f3   : > { %v3646_v38 = vpop.f32.mrb[52].mxu0  ;;  %v3541_v41 = vpop.f32.mrb[25].mxu1 }
 0x1f4   : > { %v3542_v3 = vadd.f32 %v3541_v41, %v3540_v53  ;;  %v3647_v30 = vpop.f32.mrb[53].mxu0  ;;  %v3543_v43 = vpop.f32.mrb[26].mxu1 }
 0x1f5   : > { %v3648_v36 = vadd.f32 %v3647_v30, %v3646_v38  ;;  %v3649_v20 = vpop.f32.mrb[54].mxu0  ;;  %v3544_v60 = vpop.f32.mrb[27].mxu1  ;;  %v1360_v38 = vld [vmem:[#allocation2 + $0x142] sm:$0xff] }
 0x1f6   : > { %v3545_v61 = vadd.f32 %v3544_v60, %v3543_v43  ;;  %v3650_v63 = vpop.f32.mrb[55].mxu0  ;;  %v2211_v62 = vadd.f32 %v3542_v3, %v4805_v0 }
 0x1f7   : > { %v4857_v8 = vadd.f32 %v3648_v36, %v2203_v34  ;;  %v3651_v22 = vadd.f32 %v3650_v63, %v3649_v20  ;;  %4070 = vmatmul.mubr.bf16.gmra.mrb[132].mxu1 %v1376_v47  ;;  %v1380_v20 = vpack.c.bf16 %v1360_v38, %v1359_v44 }
 0x1f8   : > { %4058 = vmatmul.mubr.bf16.vlgmr.msra.gmra.mrb[160].mxu0 %v1370_v27  ;;  %4073 = vmatprep.mubr.bf16.mxu1 %v1377_v29  ;;  %v2214_v26 = vadd.f32 %v3545_v61, %v4805_v0  ;;  %v1381_v61 = vpack.c.bf16 %v1362_v9, %v1361_v23 }
 0x1f9   : > { %v4859_v49 = vadd.f32 %v3651_v22, %v2206_v33  ;;  %4061 = vmatprep.mubr.bf16.mxu0 %v1371_v40  ;;  %v1363_v40 = vld [vmem:[#allocation2 + $0x16a] sm:$0xff] }
 0x1fa   : > { %v3546_v50 = vpop.f32.mrb[28].mxu1 }
 0x1fb   : > { %v3652_v18 = vpop.f32.mrb[56].mxu0  ;;  %v3547_v1 = vpop.f32.mrb[29].mxu1 }
 0x1fc   : > { %v3548_v56 = vadd.f32 %v3547_v1, %v3546_v50  ;;  %v3653_v57 = vpop.f32.mrb[57].mxu0  ;;  %v3549_v19 = vpop.f32.mrb[30].mxu1  ;;  %v1364_v50 = vld [vmem:[#allocation2 + $0x172] sm:$0xff] }
 0x1fd   : > { %v3654_v17 = vadd.f32 %v3653_v57, %v3652_v18  ;;  %v3655_v59 = vpop.f32.mrb[58].mxu0  ;;  %v3550_v5 = vpop.f32.mrb[31].mxu1  ;;  %v1382_v57 = vpack.c.bf16 %v1364_v50, %v1363_v40 }
 0x1fe   : > { %v3551_v13 = vadd.f32 %v3550_v5, %v3549_v19  ;;  %v3656_v15 = vpop.f32.mrb[59].mxu0  ;;  %v2219_v46 = vadd.f32 %v3548_v56, %v4805_v0 }
 0x1ff   : > { %v4863_v14 = vadd.f32 %v3654_v17, %v2211_v62  ;;  %v3657_v53 = vadd.f32 %v3656_v15, %v3655_v59  ;;  %4074 = vmatmul.mubr.bf16.gmra.mrb[136].mxu1 %v1378_v10  ;;  %v1367_v10 = vld [vmem:[#allocation2 + $0x19a] sm:$0xff] }
 0x200   : > { %4062 = vmatmul.mubr.bf16.gmra.mrb[164].mxu0 %v1372_v16  ;;  %4077 = vmatprep.mubr.bf16.mxu1 %v1379_v24  ;;  %v2222_v63 = vadd.f32 %v3551_v13, %v4805_v0  ;;  %v1368_v13 = vld [vmem:[#allocation2 + $0x1a2] sm:$0xff] }
 0x201   : > { %v4865_v39 = vadd.f32 %v3657_v53, %v2214_v26  ;;  %v1384_v53 = vpack.c.bf16 %v1368_v13, %v1367_v10 }
 0x202   : > { %v3552_v35 = vpop.f32.mrb[32].mxu1 }
 0x203   : > { %v3658_v41 = vpop.f32.mrb[60].mxu0  ;;  %v3553_v55 = vpop.f32.mrb[33].mxu1 }
 0x204   : > { %v3554_v3 = vadd.f32 %v3553_v55, %v3552_v35  ;;  %v3659_v30 = vpop.f32.mrb[61].mxu0  ;;  %v3555_v43 = vpop.f32.mrb[34].mxu1 }
 0x205   : > { %v3660_v12 = vadd.f32 %v3659_v30, %v3658_v41  ;;  %v3661_v34 = vpop.f32.mrb[62].mxu0  ;;  %v3556_v36 = vpop.f32.mrb[35].mxu1 }
 0x206   : > { %v3557_v60 = vadd.f32 %v3556_v36, %v3555_v43  ;;  %v3662_v47 = vpop.f32.mrb[63].mxu0  ;;  %v2227_v32 = vadd.f32 %v3554_v3, %v4805_v0 }
 0x207   : > { %v4869_v27 = vadd.f32 %v3660_v12, %v2219_v46  ;;  %v3663_v29 = vadd.f32 %v3662_v47, %v3661_v34  ;;  %4078 = vmatmul.mubr.bf16.gmra.mrb[140].mxu1 %v1380_v20 }
 0x208   : > { %4081 = vmatprep.mubr.bf16.mxu1 %v1381_v61  ;;  %v2230_v17 = vadd.f32 %v3557_v60, %v4805_v0 }
 0x209   : > { %v4871_v33 = vadd.f32 %v3663_v29, %v2222_v63 }
 0x20a   : > { %v3558_v22 = vpop.f32.mrb[36].mxu1 }
 0x20b   : > { %v3664_v54 = vpop.f32.mrb[64].mxu0  ;;  %v3559_v6 = vpop.f32.mrb[37].mxu1 }
 0x20c   : > { %v3560_v7 = vadd.f32 %v3559_v6, %v3558_v22  ;;  %v3665_v18 = vpop.f32.mrb[65].mxu0  ;;  %v3561_v1 = vpop.f32.mrb[38].mxu1 }
 0x20d   : > { %v3666_v48 = vadd.f32 %v3665_v18, %v3664_v54  ;;  %v3667_v52 = vpop.f32.mrb[66].mxu0  ;;  %v3562_v56 = vpop.f32.mrb[39].mxu1 }
 0x20e   : > { %v3563_v19 = vadd.f32 %v3562_v56, %v3561_v1  ;;  %v3668_v62 = vpop.f32.mrb[67].mxu0  ;;  %v2235_v41 = vadd.f32 %v3560_v7, %v4805_v0 }
 0x20f   : > { %v4875_v59 = vadd.f32 %v3666_v48, %v2227_v32  ;;  %v3669_v5 = vadd.f32 %v3668_v62, %v3667_v52  ;;  %4082 = vmatmul.mubr.bf16.gmra.mrb[144].mxu1 %v1382_v57 }
 0x210   : > { %4085 = vmatprep.mubr.bf16.mxu1 %v4830_v11  ;;  %v2238_v11 = vadd.f32 %v3563_v19, %v4805_v0 }
 0x211   : > { %v4878_v15 = vadd.f32 %v3669_v5, %v2230_v17 }
 0x212   : > { %v3564_v16 = vpop.f32.mrb[40].mxu1 }
 0x213   : > { %v3670_v24 = vpop.f32.mrb[68].mxu0  ;;  %v3565_v26 = vpop.f32.mrb[41].mxu1 }
 0x214   : > { %v3566_v35 = vadd.f32 %v3565_v26, %v3564_v16  ;;  %v3671_v44 = vpop.f32.mrb[69].mxu0  ;;  %v3567_v38 = vpop.f32.mrb[42].mxu1 }
 0x215   : > { %v3672_v55 = vadd.f32 %v3671_v44, %v3670_v24  ;;  %v3673_v23 = vpop.f32.mrb[70].mxu0  ;;  %v3568_v9 = vpop.f32.mrb[43].mxu1 }
 0x216   : > { %v3569_v3 = vadd.f32 %v3568_v9, %v3567_v38  ;;  %v3674_v30 = vpop.f32.mrb[71].mxu0  ;;  %v2243_v63 = vadd.f32 %v3566_v35, %v4805_v0 }
 0x217   : > { %v4882_v43 = vadd.f32 %v3672_v55, %v2235_v41  ;;  %v3675_v46 = vadd.f32 %v3674_v30, %v3673_v23  ;;  %4086 = vmatmul.mubr.bf16.gmra.mrb[148].mxu1 %v1384_v53 }
 0x218   : > { %v2246_v6 = vadd.f32 %v3569_v3, %v4805_v0 }
 0x219   : > { %v4884_v12 = vadd.f32 %v3675_v46, %v2238_v11 }
 0x21a   : > { %v3570_v34 = vpop.f32.mrb[44].mxu1 }
 0x21b   : > { %v3676_v36 = vpop.f32.mrb[72].mxu0  ;;  %v3571_v20 = vpop.f32.mrb[45].mxu1 }
 0x21c   : > { %v3572_v60 = vadd.f32 %v3571_v20, %v3570_v34  ;;  %v3677_v47 = vpop.f32.mrb[73].mxu0  ;;  %v3573_v61 = vpop.f32.mrb[46].mxu1 }
 0x21d   : > { %v3678_v29 = vadd.f32 %v3677_v47, %v3676_v36  ;;  %v3679_v22 = vpop.f32.mrb[74].mxu0  ;;  %v3574_v40 = vpop.f32.mrb[47].mxu1 }
 0x21e   : > { %v3575_v50 = vadd.f32 %v3574_v40, %v3573_v61  ;;  %v3680_v54 = vpop.f32.mrb[75].mxu0  ;;  %v2251_v62 = vadd.f32 %v3572_v60, %v4805_v0 }
 0x21f   : > { %v4888_v7 = vadd.f32 %v3678_v29, %v2243_v63  ;;  %v3681_v18 = vadd.f32 %v3680_v54, %v3679_v22 }
 0x220   : > { %v2254_v24 = vadd.f32 %v3575_v50, %v4805_v0 }
 0x221   : > { %v4890_v1 = vadd.f32 %v3681_v18, %v2246_v6 }
 0x222   : > { %v3576_v32 = vpop.f32.mrb[48].mxu1 }
 0x223   : > { %v3682_v48 = vpop.f32.mrb[76].mxu0  ;;  %v3577_v52 = vpop.f32.mrb[49].mxu1 }
 0x224   : > { %v3578_v56 = vadd.f32 %v3577_v52, %v3576_v32  ;;  %v3683_v57 = vpop.f32.mrb[77].mxu0  ;;  %v3579_v19 = vpop.f32.mrb[50].mxu1 }
 0x225   : > { %v3684_v17 = vadd.f32 %v3683_v57, %v3682_v48  ;;  %v3685_v5 = vpop.f32.mrb[78].mxu0  ;;  %v3580_v10 = vpop.f32.mrb[51].mxu1 }
 0x226   : > { %v3581_v13 = vadd.f32 %v3580_v10, %v3579_v19  ;;  %v3686_v16 = vpop.f32.mrb[79].mxu0  ;;  %v2259_v3 = vadd.f32 %v3578_v56, %v4805_v0 }
 0x227   : > { %v4894_v26 = vadd.f32 %v3684_v17, %v2251_v62  ;;  %v3687_v53 = vadd.f32 %v3686_v16, %v3685_v5 }
 0x228   : > { %v2262_v20 = vadd.f32 %v3581_v13, %v4805_v0 }
 0x229   : > { %v4896_v35 = vadd.f32 %v3687_v53, %v2254_v24 }
 0x22a   : > { %v3582_v44 = vpop.f32.mrb[52].mxu1 }
 0x22b   : > { %v3688_v38 = vpop.f32.mrb[80].mxu0  ;;  %v3583_v41 = vpop.f32.mrb[53].mxu1 }
 0x22c   : > { %v3584_v55 = vadd.f32 %v3583_v41, %v3582_v44  ;;  %v3689_v23 = vpop.f32.mrb[81].mxu0  ;;  %v3585_v9 = vpop.f32.mrb[54].mxu1 }
 0x22d   : > { %v3690_v30 = vadd.f32 %v3689_v23, %v3688_v38  ;;  %v3691_v11 = vpop.f32.mrb[82].mxu0  ;;  %v3586_v46 = vpop.f32.mrb[55].mxu1 }
 0x22e   : > { %v3587_v34 = vadd.f32 %v3586_v46, %v3585_v9  ;;  %v3692_v36 = vpop.f32.mrb[83].mxu0  ;;  %v2267_v6 = vadd.f32 %v3584_v55, %v4805_v0 }
 0x22f   : > { %v4900_v60 = vadd.f32 %v3690_v30, %v2259_v3  ;;  %v3693_v47 = vadd.f32 %v3692_v36, %v3691_v11 }
 0x230   : > { %v2270_v57 = vadd.f32 %v3587_v34, %v4805_v0 }
 0x231   : > { %v4902_v61 = vadd.f32 %v3693_v47, %v2262_v20 }
 0x232   : > { %v3588_v63 = vpop.f32.mrb[56].mxu1 }
 0x233   : > { %v3694_v29 = vpop.f32.mrb[84].mxu0  ;;  %v3589_v22 = vpop.f32.mrb[57].mxu1 }
 0x234   : > { %v3590_v40 = vadd.f32 %v3589_v22, %v3588_v63  ;;  %v3695_v50 = vpop.f32.mrb[85].mxu0  ;;  %v3591_v54 = vpop.f32.mrb[58].mxu1 }
 0x235   : > { %v3696_v18 = vadd.f32 %v3695_v50, %v3694_v29  ;;  %v3697_v32 = vpop.f32.mrb[86].mxu0  ;;  %v3592_v48 = vpop.f32.mrb[59].mxu1 }
 0x236   : > { %v3593_v52 = vadd.f32 %v3592_v48, %v3591_v54  ;;  %v3698_v56 = vpop.f32.mrb[87].mxu0  ;;  %v2275_v44 = vadd.f32 %v3590_v40, %v4805_v0 }
 0x237   : > { %v4906_v19 = vadd.f32 %v3696_v18, %v2267_v6  ;;  %v3699_v62 = vadd.f32 %v3698_v56, %v3697_v32 }
 0x238   : > { %v2278_v3 = vadd.f32 %v3593_v52, %v4805_v0 }
 0x239   : > { %v4908_v17 = vadd.f32 %v3699_v62, %v2270_v57 }
 0x23a   : > { %v3594_v5 = vpop.f32.mrb[60].mxu1 }
 0x23b   : > { %v3700_v10 = vpop.f32.mrb[88].mxu0  ;;  %v3595_v13 = vpop.f32.mrb[61].mxu1 }
 0x23c   : > { %v3596_v16 = vadd.f32 %v3595_v13, %v3594_v5  ;;  %v3701_v24 = vpop.f32.mrb[89].mxu0  ;;  %v3597_v53 = vpop.f32.mrb[62].mxu1 }
 0x23d   : > { %v3702_v38 = vadd.f32 %v3701_v24, %v3700_v10  ;;  %v3703_v41 = vpop.f32.mrb[90].mxu0  ;;  %v3598_v55 = vpop.f32.mrb[63].mxu1 }
 0x23e   : > { %v3599_v23 = vadd.f32 %v3598_v55, %v3597_v53  ;;  %v3704_v9 = vpop.f32.mrb[91].mxu0  ;;  %v2283_v22 = vadd.f32 %v3596_v16, %v4805_v0 }
 0x23f   : > { %v4912_v30 = vadd.f32 %v3702_v38, %v2275_v44  ;;  %v3705_v11 = vadd.f32 %v3704_v9, %v3703_v41 }
 0x240   : > { %v2286_v48 = vadd.f32 %v3599_v23, %v4805_v0 }
 0x241   : > { %v4914_v46 = vadd.f32 %v3705_v11, %v2278_v3 }
 0x242   : > { %v3728_v34 = vpop.f32.mrb[64].mxu1 }
 0x243   : > { %v3706_v36 = vpop.f32.mrb[92].mxu0  ;;  %v3729_v20 = vpop.f32.mrb[65].mxu1 }
 0x244   : > { %v3707_v47 = vpop.f32.mrb[93].mxu0  ;;  %v3730_v63 = vadd.f32 %v3729_v20, %v3728_v34  ;;  %v3731_v29 = vpop.f32.mrb[66].mxu1 }
 0x245   : > { %v3708_v40 = vadd.f32 %v3707_v47, %v3706_v36  ;;  %v3709_v50 = vpop.f32.mrb[94].mxu0  ;;  %v3732_v54 = vpop.f32.mrb[67].mxu1 }
 0x246   : > { %v2485_v6 = vadd.f32 %v3730_v63, %v4811_v31  ;;  %v3710_v18 = vpop.f32.mrb[95].mxu0  ;;  %v3733_v32 = vadd.f32 %v3732_v54, %v3731_v29 }
 0x247   : > { %v4919_v52 = vadd.f32 %v3708_v40, %v2283_v22  ;;  %v3711_v56 = vadd.f32 %v3710_v18, %v3709_v50 }
 0x248   : > { %v2488_v57 = vadd.f32 %v3733_v32, %v4816_v42 }
 0x249   : > { %v4922_v62 = vadd.f32 %v3711_v56, %v2286_v48 }
 0x24a   : > { %v3734_v5 = vpop.f32.mrb[68].mxu1 }
 0x24b   : > { %v3840_v10 = vpop.f32.mrb[96].mxu0  ;;  %v3735_v13 = vpop.f32.mrb[69].mxu1 }
 0x24c   : > { %v3736_v16 = vadd.f32 %v3735_v13, %v3734_v5  ;;  %v3841_v24 = vpop.f32.mrb[97].mxu0  ;;  %v3737_v53 = vpop.f32.mrb[70].mxu1 }
 0x24d   : > { %v3842_v44 = vadd.f32 %v3841_v24, %v3840_v10  ;;  %v3843_v38 = vpop.f32.mrb[98].mxu0  ;;  %v3738_v31 = vpop.f32.mrb[71].mxu1 }
 0x24e   : > { %v2493_v41 = vadd.f32 %v3736_v16, %v4821_v58  ;;  %v3739_v55 = vadd.f32 %v3738_v31, %v3737_v53  ;;  %v3844_v0 = vpop.f32.mrb[99].mxu0 }
 0x24f   : > { %v3845_v23 = vadd.f32 %v3844_v0, %v3843_v38  ;;  %v4925_v9 = vadd.f32 %v3842_v44, %v2485_v6 }
 0x250   : > { %v2496_v42 = vadd.f32 %v3739_v55, %v4826_v4 }
 0x251   : > { %v4928_v3 = vadd.f32 %v3845_v23, %v2488_v57 }
 0x252   : > { %v3740_v11 = vpop.f32.mrb[72].mxu1 }
 0x253   : > { %v3846_v34 = vpop.f32.mrb[100].mxu0  ;;  %v3741_v36 = vpop.f32.mrb[73].mxu1 }
 0x254   : > { %v3742_v20 = vadd.f32 %v3741_v36, %v3740_v11  ;;  %v3847_v47 = vpop.f32.mrb[101].mxu0  ;;  %v3743_v63 = vpop.f32.mrb[74].mxu1 }
 0x255   : > { %v3848_v29 = vadd.f32 %v3847_v47, %v3846_v34  ;;  %v3849_v22 = vpop.f32.mrb[102].mxu0  ;;  %v3744_v40 = vpop.f32.mrb[75].mxu1 }
 0x256   : > { %v2501_v58 = vadd.f32 %v3742_v20, %v4833_v45  ;;  %v3745_v50 = vadd.f32 %v3744_v40, %v3743_v63  ;;  %v3850_v54 = vpop.f32.mrb[103].mxu0 }
 0x257   : > { %v3851_v18 = vadd.f32 %v3850_v54, %v3849_v22  ;;  %v4931_v6 = vadd.f32 %v3848_v29, %v2493_v41 }
 0x258   : > { %v2504_v4 = vadd.f32 %v3745_v50, %v4838_v51 }
 0x259   : > { %v4934_v32 = vadd.f32 %v3851_v18, %v2496_v42 }
 0x25a   : > { %v3746_v48 = vpop.f32.mrb[76].mxu1 }
 0x25b   : > { %v3852_v56 = vpop.f32.mrb[104].mxu0  ;;  %v3747_v57 = vpop.f32.mrb[77].mxu1 }
 0x25c   : > { %v3748_v5 = vadd.f32 %v3747_v57, %v3746_v48  ;;  %v3853_v10 = vpop.f32.mrb[105].mxu0  ;;  %v3749_v13 = vpop.f32.mrb[78].mxu1 }
 0x25d   : > { %v3854_v16 = vadd.f32 %v3853_v10, %v3852_v56  ;;  %v3855_v24 = vpop.f32.mrb[106].mxu0  ;;  %v3750_v53 = vpop.f32.mrb[79].mxu1 }
 0x25e   : > { %v2509_v45 = vadd.f32 %v3748_v5, %v4843_v21  ;;  %v3751_v44 = vadd.f32 %v3750_v53, %v3749_v13  ;;  %v3856_v38 = vpop.f32.mrb[107].mxu0 }
 0x25f   : > { %v3857_v31 = vadd.f32 %v3856_v38, %v3855_v24  ;;  %v4937_v41 = vadd.f32 %v3854_v16, %v2501_v58 }
 0x260   : > { %v2512_v51 = vadd.f32 %v3751_v44, %v4847_v28 }
 0x261   : > { %v4940_v55 = vadd.f32 %v3857_v31, %v2504_v4 }
 0x262   : > { %v3752_v0 = vpop.f32.mrb[80].mxu1 }
 0x263   : > { %v3858_v23 = vpop.f32.mrb[108].mxu0  ;;  %v3753_v42 = vpop.f32.mrb[81].mxu1 }
 0x264   : > { %v3754_v11 = vadd.f32 %v3753_v42, %v3752_v0  ;;  %v3859_v34 = vpop.f32.mrb[109].mxu0  ;;  %v3755_v36 = vpop.f32.mrb[82].mxu1 }
 0x265   : > { %v3860_v20 = vadd.f32 %v3859_v34, %v3858_v23  ;;  %v3861_v47 = vpop.f32.mrb[110].mxu0  ;;  %v3756_v63 = vpop.f32.mrb[83].mxu1 }
 0x266   : > { %v2517_v21 = vadd.f32 %v3754_v11, %v4851_v25  ;;  %v3757_v29 = vadd.f32 %v3756_v63, %v3755_v36  ;;  %v3862_v22 = vpop.f32.mrb[111].mxu0  ;;  %v3008_v36 = vsel %vm3006_vm3, 4294967295, %v4240_v2  ;;  %v2965_v63 = vld [vmem:[%s5147_s6] sm:$0x3] }
 0x267   : > { %v3863_v40 = vadd.f32 %v3862_v22, %v3861_v47  ;;  %v4943_v58 = vadd.f32 %v3860_v20, %v2509_v45 }
 0x268   : > { %v2520_v28 = vadd.f32 %v3757_v29, %v4853_v37 }
 0x269   : > { %v4946_v50 = vadd.f32 %v3863_v40, %v2512_v51 }
 0x26a   : > { %v3758_v54 = vpop.f32.mrb[84].mxu1 }
 0x26b   : > { %v3864_v18 = vpop.f32.mrb[112].mxu0  ;;  %v3759_v4 = vpop.f32.mrb[85].mxu1 }
 0x26c   : > { %v3760_v48 = vadd.f32 %v3759_v4, %v3758_v54  ;;  %v3865_v56 = vpop.f32.mrb[113].mxu0  ;;  %v3761_v57 = vpop.f32.mrb[86].mxu1  ;;  %v4215_v54 = vld [vmem:[%s347_s23] sm:$0xff]   ;;  %v4219_v4 = vld [vmem:[%s347_s23 + $0x8] sm:$0xff]  }
 0x26d   : > { %v3866_v5 = vadd.f32 %v3865_v56, %v3864_v18  ;;  %v3867_v10 = vpop.f32.mrb[114].mxu0  ;;  %v3762_v13 = vpop.f32.mrb[87].mxu1  ;;  %4091 = vmatprep.mubr.msk.bf16.mxu0 %vm2993_vm5, %v4215_v54 }
 0x26e   : > { %v2525_v25 = vadd.f32 %v3760_v48, %v4857_v8  ;;  %v3763_v16 = vadd.f32 %v3762_v13, %v3761_v57  ;;  %v3868_v24 = vpop.f32.mrb[115].mxu0 }
 0x26f   : > { %v3869_v53 = vadd.f32 %v3868_v24, %v3867_v10  ;;  %v4949_v45 = vadd.f32 %v3866_v5, %v2517_v21  ;;  %v3009_v21 = vsel %vm3007_vm4, %v3008_v36, 0 }
 0x270   : > { %v2528_v37 = vadd.f32 %v3763_v16, %v4859_v49  ;;  %v3011_v40 = vand.u32 %v3009_v21, %v2965_v63 }
 0x271   : > { %v4952_v44 = vadd.f32 %v3869_v53, %v2520_v28  ;;  %v4218_v28 = vld [vmem:[%s5149_s8 + $0x4] ss:$8 sps:$4 sm:$0xff]  }
 0x272   : > { %v3764_v38 = vpop.f32.mrb[88].mxu1  ;;  %4089 = vmatprep.subr.bf16.mxu0 %v3011_v40  ;;  %3150 = vmatprep.mubr.bf16.mxu1 %v4218_v28 }
 0x273   : > { %v3870_v31 = vpop.f32.mrb[116].mxu0  ;;  %v3765_v51 = vpop.f32.mrb[89].mxu1  ;;  %4090 = vmatpush3.bf16.msra.mxu0 %v3011_v40 }
 0x274   : > { %v3766_v0 = vadd.f32 %v3765_v51, %v3764_v38  ;;  %v3871_v23 = vpop.f32.mrb[117].mxu0  ;;  %v3767_v42 = vpop.f32.mrb[90].mxu1 }
 0x275   : > { %v3872_v11 = vadd.f32 %v3871_v23, %v3870_v31  ;;  %v3873_v8 = vpop.f32.mrb[118].mxu0  ;;  %v3768_v34 = vpop.f32.mrb[91].mxu1  ;;  %v4223_v23 = vld [vmem:[%s347_s23 + $0x10] sm:$0xff]  }
 0x276   : > { %v2533_v20 = vadd.f32 %v3766_v0, %v4863_v14  ;;  %v3769_v49 = vadd.f32 %v3768_v34, %v3767_v42  ;;  %v3874_v47 = vpop.f32.mrb[119].mxu0  ;;  %4092 = vmatmul.mubr.msk.bf16.vlgmr.msra.gmra.mrb[168].mxu0 %vm2993_vm5, %v4219_v4 }
 0x277   : > { %v3875_v29 = vadd.f32 %v3874_v47, %v3873_v8  ;;  %v4959_v22 = vadd.f32 %v3872_v11, %v2525_v25  ;;  %v4226_v8 = vld [vmem:[%s347_s23 + $0x18] sm:$0xff]   ;;  %4095 = vmatprep.mubr.msk.bf16.mxu0 %vm2993_vm5, %v4223_v23 }
 0x278   : > { %v2536_v2 = vadd.f32 %v3769_v49, %v4865_v39 }
 0x279   : > { %v4971_v14 = vadd.f32 %v3875_v29, %v2528_v37 }
 0x27a   : > { %v3770_v18 = vpop.f32.mrb[92].mxu1 }
 0x27b   : > { %v3876_v48 = vpop.f32.mrb[120].mxu0  ;;  %v3771_v56 = vpop.f32.mrb[93].mxu1 }
 0x27c   : > { %v3772_v57 = vadd.f32 %v3771_v56, %v3770_v18  ;;  %v3877_v39 = vpop.f32.mrb[121].mxu0  ;;  %v3773_v5 = vpop.f32.mrb[94].mxu1 }
 0x27d   : > { %v3878_v10 = vadd.f32 %v3877_v39, %v3876_v48  ;;  %v3879_v13 = vpop.f32.mrb[122].mxu0  ;;  %v3774_v25 = vpop.f32.mrb[95].mxu1 }
 0x27e   : > { %v2541_v16 = vadd.f32 %v3772_v57, %v4869_v27  ;;  %v3775_v24 = vadd.f32 %v3774_v25, %v3773_v5  ;;  %v3880_v53 = vpop.f32.mrb[123].mxu0  ;;  %4096 = vmatmul.mubr.msk.bf16.gmra.mrb[172].mxu0 %vm2993_vm5, %v4226_v8 }
 0x27f   : > { %v3881_v37 = vadd.f32 %v3880_v53, %v3879_v13  ;;  %v4976_v38 = vadd.f32 %v3878_v10, %v2533_v20 }
 0x280   : > { %v2544_v31 = vadd.f32 %v3775_v24, %v4871_v33 }
 0x281   : > { %v4979_v51 = vadd.f32 %v3881_v37, %v2536_v2 }
 0x282   : > { %v3776_v0 = vpop.f32.mrb[96].mxu1 }
 0x283   : > { %v3882_v42 = vpop.f32.mrb[124].mxu0  ;;  %v3777_v11 = vpop.f32.mrb[97].mxu1 }
 0x284   : > { %v3778_v34 = vadd.f32 %v3777_v11, %v3776_v0  ;;  %v3883_v36 = vpop.f32.mrb[125].mxu0  ;;  %v3779_v49 = vpop.f32.mrb[98].mxu1 }
 0x285   : > { %v3884_v27 = vadd.f32 %v3883_v36, %v3882_v42  ;;  %v3885_v47 = vpop.f32.mrb[126].mxu0  ;;  %v3780_v63 = vpop.f32.mrb[99].mxu1 }
 0x286   : > { %v2549_v20 = vadd.f32 %v3778_v34, %v4875_v59  ;;  %v3781_v33 = vadd.f32 %v3780_v63, %v3779_v49  ;;  %v3886_v21 = vpop.f32.mrb[127].mxu0 }
 0x287   : > { %v3887_v29 = vadd.f32 %v3886_v21, %v3885_v47  ;;  %v4984_v40 = vadd.f32 %v3884_v27, %v2541_v16 }
 0x288   : > { %v2552_v28 = vadd.f32 %v3781_v33, %v4878_v15 }
 0x289   : > { %v4987_v2 = vadd.f32 %v3887_v29, %v2544_v31 }
 0x28a   : > { %v3782_v54 = vpop.f32.mrb[100].mxu1 }
 0x28b   : > { %v3888_v18 = vpop.f32.mrb[128].mxu0  ;;  %v3783_v4 = vpop.f32.mrb[101].mxu1 }
 0x28c   : > { %v3784_v48 = vadd.f32 %v3783_v4, %v3782_v54  ;;  %v3889_v56 = vpop.f32.mrb[129].mxu0  ;;  %v3785_v57 = vpop.f32.mrb[102].mxu1 }
 0x28d   : > { %v3890_v39 = vadd.f32 %v3889_v56, %v3888_v18  ;;  %v3891_v5 = vpop.f32.mrb[130].mxu0  ;;  %v3786_v10 = vpop.f32.mrb[103].mxu1 }
 0x28e   : > { %v2557_v59 = vadd.f32 %v3784_v48, %v4882_v43  ;;  %v3787_v13 = vadd.f32 %v3786_v10, %v3785_v57  ;;  %v3892_v25 = vpop.f32.mrb[131].mxu0 }
 0x28f   : > { %v3893_v24 = vadd.f32 %v3892_v25, %v3891_v5  ;;  %v4990_v16 = vadd.f32 %v3890_v39, %v2549_v20 }
 0x290   : > { %v2560_v15 = vadd.f32 %v3787_v13, %v4884_v12 }
 0x291   : > { %v4993_v53 = vadd.f32 %v3893_v24, %v2552_v28 }
 0x292   : > { %v3788_v37 = vpop.f32.mrb[104].mxu1 }
 0x293   : > { %v3894_v31 = vpop.f32.mrb[132].mxu0  ;;  %v3789_v0 = vpop.f32.mrb[105].mxu1 }
 0x294   : > { %v3790_v23 = vadd.f32 %v3789_v0, %v3788_v37  ;;  %v3895_v42 = vpop.f32.mrb[133].mxu0  ;;  %v3791_v11 = vpop.f32.mrb[106].mxu1 }
 0x295   : > { %v3896_v8 = vadd.f32 %v3895_v42, %v3894_v31  ;;  %v3897_v34 = vpop.f32.mrb[134].mxu0  ;;  %v3792_v36 = vpop.f32.mrb[107].mxu1 }
 0x296   : > { %v2565_v43 = vadd.f32 %v3790_v23, %v4888_v7  ;;  %v3793_v49 = vadd.f32 %v3792_v36, %v3791_v11  ;;  %v3898_v27 = vpop.f32.mrb[135].mxu0 }
 0x297   : > { %v3899_v47 = vadd.f32 %v3898_v27, %v3897_v34  ;;  %v4996_v63 = vadd.f32 %v3896_v8, %v2557_v59 }
 0x298   : > { %v2568_v12 = vadd.f32 %v3793_v49, %v4890_v1 }
 0x299   : > { %v4999_v20 = vadd.f32 %v3899_v47, %v2560_v15 }
 0x29a   : > { %v3794_v33 = vpop.f32.mrb[108].mxu1 }
 0x29b   : > { %v3900_v21 = vpop.f32.mrb[136].mxu0  ;;  %v3795_v29 = vpop.f32.mrb[109].mxu1 }
 0x29c   : > { %v3796_v28 = vadd.f32 %v3795_v29, %v3794_v33  ;;  %v3901_v54 = vpop.f32.mrb[137].mxu0  ;;  %v3797_v18 = vpop.f32.mrb[110].mxu1 }
 0x29d   : > { %v3902_v4 = vadd.f32 %v3901_v54, %v3900_v21  ;;  %v3903_v48 = vpop.f32.mrb[138].mxu0  ;;  %v3798_v56 = vpop.f32.mrb[111].mxu1 }
 0x29e   : > { %v2573_v7 = vadd.f32 %v3796_v28, %v4894_v26  ;;  %v3799_v57 = vadd.f32 %v3798_v56, %v3797_v18  ;;  %v3904_v39 = vpop.f32.mrb[139].mxu0 }
 0x29f   : > { %v3905_v5 = vadd.f32 %v3904_v39, %v3903_v48  ;;  %v5002_v10 = vadd.f32 %v3902_v4, %v2565_v43 }
 0x2a0   : > { %v2576_v1 = vadd.f32 %v3799_v57, %v4896_v35 }
 0x2a1   : > { %v5005_v59 = vadd.f32 %v3905_v5, %v2568_v12 }
 0x2a2   : > { %v3800_v13 = vpop.f32.mrb[112].mxu1 }
 0x2a3   : > { %v3906_v25 = vpop.f32.mrb[140].mxu0  ;;  %v3801_v24 = vpop.f32.mrb[113].mxu1 }
 0x2a4   : > { %v3802_v15 = vadd.f32 %v3801_v24, %v3800_v13  ;;  %v3907_v37 = vpop.f32.mrb[141].mxu0  ;;  %v3803_v31 = vpop.f32.mrb[114].mxu1 }
 0x2a5   : > { %v3908_v0 = vadd.f32 %v3907_v37, %v3906_v25  ;;  %v3909_v23 = vpop.f32.mrb[142].mxu0  ;;  %v3804_v42 = vpop.f32.mrb[115].mxu1 }
 0x2a6   : > { %v2581_v26 = vadd.f32 %v3802_v15, %v4900_v60  ;;  %v3805_v11 = vadd.f32 %v3804_v42, %v3803_v31  ;;  %v3910_v8 = vpop.f32.mrb[143].mxu0 }
 0x2a7   : > { %v3911_v34 = vadd.f32 %v3910_v8, %v3909_v23  ;;  %v5008_v36 = vadd.f32 %v3908_v0, %v2573_v7 }
 0x2a8   : > { %v2584_v35 = vadd.f32 %v3805_v11, %v4902_v61 }
 0x2a9   : > { %v5011_v43 = vadd.f32 %v3911_v34, %v2576_v1 }
 0x2aa   : > { %v3806_v49 = vpop.f32.mrb[116].mxu1 }
 0x2ab   : > { %v3912_v27 = vpop.f32.mrb[144].mxu0  ;;  %v3807_v47 = vpop.f32.mrb[117].mxu1 }
 0x2ac   : > { %v3808_v12 = vadd.f32 %v3807_v47, %v3806_v49  ;;  %v3913_v33 = vpop.f32.mrb[145].mxu0  ;;  %v3809_v21 = vpop.f32.mrb[118].mxu1 }
 0x2ad   : > { %v3914_v29 = vadd.f32 %v3913_v33, %v3912_v27  ;;  %v3915_v28 = vpop.f32.mrb[146].mxu0  ;;  %v3810_v54 = vpop.f32.mrb[119].mxu1 }
 0x2ae   : > { %v2589_v60 = vadd.f32 %v3808_v12, %v4906_v19  ;;  %v3811_v18 = vadd.f32 %v3810_v54, %v3809_v21  ;;  %v3916_v4 = vpop.f32.mrb[147].mxu0 }
 0x2af   : > { %v3917_v48 = vadd.f32 %v3916_v4, %v3915_v28  ;;  %v5014_v56 = vadd.f32 %v3914_v29, %v2581_v26 }
 0x2b0   : > { %v2592_v61 = vadd.f32 %v3811_v18, %v4908_v17 }
 0x2b1   : > { %v5017_v7 = vadd.f32 %v3917_v48, %v2584_v35 }
 0x2b2   : > { %v3812_v57 = vpop.f32.mrb[120].mxu1 }
 0x2b3   : > { %v3918_v39 = vpop.f32.mrb[148].mxu0  ;;  %v3813_v5 = vpop.f32.mrb[121].mxu1 }
 0x2b4   : > { %v3814_v1 = vadd.f32 %v3813_v5, %v3812_v57  ;;  %v3919_v13 = vpop.f32.mrb[149].mxu0  ;;  %v3815_v25 = vpop.f32.mrb[122].mxu1 }
 0x2b5   : > { %v3920_v24 = vadd.f32 %v3919_v13, %v3918_v39  ;;  %v3921_v15 = vpop.f32.mrb[150].mxu0  ;;  %v3816_v37 = vpop.f32.mrb[123].mxu1 }
 0x2b6   : > { %v2597_v19 = vadd.f32 %v3814_v1, %v4912_v30  ;;  %v3817_v31 = vadd.f32 %v3816_v37, %v3815_v25  ;;  %v3922_v0 = vpop.f32.mrb[151].mxu0 }
 0x2b7   : > { %v3923_v23 = vadd.f32 %v3922_v0, %v3921_v15  ;;  %v5020_v42 = vadd.f32 %v3920_v24, %v2589_v60 }
 0x2b8   : > { %v2600_v17 = vadd.f32 %v3817_v31, %v4914_v46 }
 0x2b9   : > { %v5023_v26 = vadd.f32 %v3923_v23, %v2592_v61 }
 0x2ba   : > { %v3818_v11 = vpop.f32.mrb[124].mxu1 }
 0x2bb   : > { %v3924_v8 = vpop.f32.mrb[152].mxu0  ;;  %v3819_v34 = vpop.f32.mrb[125].mxu1 }
 0x2bc   : > { %v3820_v35 = vadd.f32 %v3819_v34, %v3818_v11  ;;  %v3925_v49 = vpop.f32.mrb[153].mxu0  ;;  %v3821_v27 = vpop.f32.mrb[126].mxu1 }
 0x2bd   : > { %v3926_v47 = vadd.f32 %v3925_v49, %v3924_v8  ;;  %v3927_v12 = vpop.f32.mrb[154].mxu0  ;;  %v3822_v33 = vpop.f32.mrb[127].mxu1 }
 0x2be   : > { %v2605_v30 = vadd.f32 %v3820_v35, %v4919_v52  ;;  %v3823_v21 = vadd.f32 %v3822_v33, %v3821_v27  ;;  %v3928_v29 = vpop.f32.mrb[155].mxu0 }
 0x2bf   : > { %v3929_v28 = vadd.f32 %v3928_v29, %v3927_v12  ;;  %v5026_v54 = vadd.f32 %v3926_v47, %v2597_v19 }
 0x2c0   : > { %v2608_v46 = vadd.f32 %v3823_v21, %v4922_v62 }
 0x2c1   : > { %v5029_v60 = vadd.f32 %v3929_v28, %v2600_v17 }
 0x2c2   : > { %v4067_v18 = vpop.f32.mrb[128].mxu1 }
 0x2c3   : > { %v3930_v4 = vpop.f32.mrb[156].mxu0  ;;  %v5032_v48 = vadd.f32 %v4067_v18, %v4959_v22  ;;  %v2838_v61 = vpop.f32.mrb[129].mxu1 }
 0x2c4   : > { %v3931_v57 = vpop.f32.mrb[157].mxu0  ;;  %v5035_v39 = vadd.f32 %v2838_v61, %v4949_v45  ;;  %v4068_v52 = vpop.f32.mrb[130].mxu1 }
 0x2c5   : > { %v3932_v5 = vadd.f32 %v3931_v57, %v3930_v4  ;;  %v3933_v1 = vpop.f32.mrb[158].mxu0  ;;  %v5038_v13 = vadd.f32 %v4068_v52, %v4971_v14  ;;  %v2841_v25 = vpop.f32.mrb[131].mxu1 }
 0x2c6   : > { %v3934_v62 = vpop.f32.mrb[159].mxu0  ;;  %v5041_v24 = vadd.f32 %v2841_v25, %v4952_v44 }
 0x2c7   : > { %v2946_v22 = vpack.c.bf16 %v5038_v13, %v5032_v48  ;;  %v3935_v15 = vadd.f32 %v3934_v62, %v3933_v1  ;;  %v5045_v37 = vadd.f32 %v3932_v5, %v2605_v30  ;;  %v4222_v48 = vld [vmem:[%s5149_s8 + $0x10] ss:$8 sps:$4 sm:$0xff]   ;;  %v4227_v13 = vld [vmem:[%s5149_s8 + $0x20] ss:$8 sps:$4 sm:$0xff]  }
 0x2c8   : > { %v2945_v45 = vpack.c.bf16 %v5041_v24, %v5035_v39  ;;  %v4224_v39 = vld [vmem:[%s5149_s8 + $0x24] ss:$8 sps:$4 sm:$0xff]   ;;  %v4228_v24 = vld [vmem:[%s5149_s8 + $0x34] ss:$8 sps:$4 sm:$0xff]  }
 0x2c9   : > { %v5049_v19 = vadd.f32 %v3935_v15, %v2608_v46 }
 0x2ca   : > { %v4071_v31 = vpop.f32.mrb[132].mxu1 }
 0x2cb   : > { %v4059_v0 = vpop.f32.mrb[160].mxu0  ;;  %v5052_v14 = vadd.f32 %v4071_v31, %v4984_v40  ;;  %v2854_v23 = vpop.f32.mrb[133].mxu1 }
 0x2cc   : > { %v2815_v44 = vadd.f32 %v4059_v0, %v4931_v6  ;;  %v2806_v17 = vpop.f32.mrb[161].mxu0  ;;  %v5056_v11 = vadd.f32 %v2854_v23, %v4976_v38  ;;  %v4072_v8 = vpop.f32.mrb[134].mxu1 }
 0x2cd   : > { %v2807_v34 = vadd.f32 %v2806_v17, %v4925_v9  ;;  %v4060_v35 = vpop.f32.mrb[162].mxu0  ;;  %v5060_v49 = vadd.f32 %v4072_v8, %v4987_v2  ;;  %v2857_v27 = vpop.f32.mrb[135].mxu1 }
 0x2ce   : > { %v2818_v47 = vadd.f32 %v4060_v35, %v4934_v32  ;;  %v2809_v12 = vpop.f32.mrb[163].mxu0  ;;  %v5064_v40 = vadd.f32 %v2857_v27, %v4979_v51 }
 0x2cf   : > { %v2948_v6 = vpack.c.bf16 %v5060_v49, %v5052_v14  ;;  %v2810_v38 = vadd.f32 %v2809_v12, %v4928_v3 }
 0x2d0   : > { %v2942_v33 = vpack.c.bf16 %v2818_v47, %v2815_v44  ;;  %v2947_v9 = vpack.c.bf16 %v5064_v40, %v5056_v11 }
 0x2d1   : > { %v2941_v30 = vpack.c.bf16 %v2810_v38, %v2807_v34 }
 0x2d2   : > { %v4075_v21 = vpop.f32.mrb[136].mxu1 }
 0x2d3   : > { %v4063_v2 = vpop.f32.mrb[164].mxu0  ;;  %v2879_v29 = vadd.f32 %v4075_v21, %v4996_v63  ;;  %v2870_v28 = vpop.f32.mrb[137].mxu1 }
 0x2d4   : > { %v2831_v32 = vadd.f32 %v4063_v2, %v4943_v58  ;;  %v2822_v46 = vpop.f32.mrb[165].mxu0  ;;  %v2871_v51 = vadd.f32 %v2870_v28, %v4990_v16  ;;  %v4076_v18 = vpop.f32.mrb[138].mxu1  ;;  %v3409_v2 = vld [vmem:[%s5148_s7] ss:$0 sm:$0xff] }
 0x2d5   : > { %v2823_v4 = vadd.f32 %v2822_v46, %v4937_v41  ;;  %v4064_v61 = vpop.f32.mrb[166].mxu0  ;;  %v2882_v3 = vadd.f32 %v4076_v18, %v4999_v20  ;;  %v2873_v57 = vpop.f32.mrb[139].mxu1 }
 0x2d6   : > { %v2834_v52 = vadd.f32 %v4064_v61, %v4946_v50  ;;  %v2825_v5 = vpop.f32.mrb[167].mxu0  ;;  %v2874_v1 = vadd.f32 %v2873_v57, %v4993_v53 }
 0x2d7   : > { %v2950_v25 = vpack.c.bf16 %v2882_v3, %v2879_v29  ;;  %v2826_v63 = vadd.f32 %v2825_v5, %v4940_v55 }
 0x2d8   : > { %v2944_v62 = vpack.c.bf16 %v2834_v52, %v2831_v32  ;;  %v2949_v58 = vpack.c.bf16 %v2874_v1, %v2871_v51 }
 0x2d9   : > { %v2943_v15 = vpack.c.bf16 %v2826_v63, %v2823_v4 }
 0x2da   : > { %v4079_v31 = vpop.f32.mrb[140].mxu1  ;;  %3965 = vmatprep.subr.bf16.mxu1 %v2949_v58 }
 0x2db   : > { %v2895_v16 = vadd.f32 %v4079_v31, %v5008_v36  ;;  %v2886_v41 = vpop.f32.mrb[141].mxu1  ;;  %3966 = vmatpush3.bf16.msra.mxu1 %v2941_v30 }
 0x2dc   : > { %v2887_v20 = vadd.f32 %v2886_v41, %v5002_v10  ;;  %v4080_v0 = vpop.f32.mrb[142].mxu1  ;;  %3967 = vmatprep.subr.bf16.mxu1 %v2950_v25 }
 0x2dd   : > { %v2898_v50 = vadd.f32 %v4080_v0, %v5011_v43  ;;  %v2889_v23 = vpop.f32.mrb[143].mxu1 }
 0x2de   : > { %v2890_v53 = vadd.f32 %v2889_v23, %v5005_v59 }
 0x2df   : > { %v2952_v44 = vpack.c.bf16 %v2898_v50, %v2895_v16  ;;  %3968 = vmatpush3.bf16.msra.mxu1 %v2942_v33 }
 0x2e0   : > { %v2951_v55 = vpack.c.bf16 %v2890_v53, %v2887_v20 }
 0x2e2   : > { %v4083_v17 = vpop.f32.mrb[144].mxu1  ;;  %3969 = vmatprep.subr.bf16.mxu1 %v2951_v55 }
 0x2e3   : > { %v2911_v8 = vadd.f32 %v4083_v17, %v5020_v42  ;;  %v2902_v34 = vpop.f32.mrb[145].mxu1  ;;  %3970 = vmatpush3.bf16.msra.mxu1 %v2943_v15 }
 0x2e4   : > { %v2903_v36 = vadd.f32 %v2902_v34, %v5014_v56  ;;  %v4084_v35 = vpop.f32.mrb[146].mxu1  ;;  %3971 = vmatprep.subr.bf16.mxu1 %v2952_v44 }
 0x2e5   : > { %v2914_v10 = vadd.f32 %v4084_v35, %v5023_v26  ;;  %v2905_v27 = vpop.f32.mrb[147].mxu1 }
 0x2e6   : > { %v2906_v43 = vadd.f32 %v2905_v27, %v5017_v7 }
 0x2e7   : > { %v2954_v47 = vpack.c.bf16 %v2914_v10, %v2911_v8  ;;  %3972 = vmatpush3.bf16.msra.mxu1 %v2944_v62 }
 0x2e8   : > { %v2953_v59 = vpack.c.bf16 %v2906_v43, %v2903_v36 }
 0x2ea   : > { %v4087_v12 = vpop.f32.mrb[148].mxu1  ;;  %3973 = vmatprep.subr.bf16.mxu1 %v2953_v59 }
 0x2eb   : > { %v2927_v38 = vadd.f32 %v4087_v12, %v5045_v37  ;;  %v2918_v33 = vpop.f32.mrb[149].mxu1  ;;  %3974 = vmatpush3.bf16.msra.mxu1 %v2945_v45 }
 0x2ec   : > { %v2919_v56 = vadd.f32 %v2918_v33, %v5026_v54  ;;  %v4088_v42 = vpop.f32.mrb[150].mxu1  ;;  %3975 = vmatprep.subr.bf16.mxu1 %v2954_v47  ;;  %v4216_v54 = vld [vmem:[%s5149_s8] ss:$8 sps:$4 sm:$0xff]  }
 0x2ed   : > { %v2930_v26 = vadd.f32 %v4088_v42, %v5049_v19  ;;  %v2921_v30 = vpop.f32.mrb[151].mxu1 }
 0x2ee   : > { %v2922_v7 = vadd.f32 %v2921_v30, %v5029_v60  ;;  %v4220_v60 = vld [vmem:[%s5149_s8 + $0x14] ss:$8 sps:$4 sm:$0xff]  }
 0x2ef   : > { %v2956_v21 = vpack.c.bf16 %v2930_v26, %v2927_v38  ;;  %3976 = vmatpush3.bf16.msra.mxu1 %v2946_v22  ;;  %v4230_v22 = vld [vmem:[%s5149_s8 + $0x30] ss:$8 sps:$4 sm:$0xff]  }
 0x2f0   : > { %v2955_v37 = vpack.c.bf16 %v2922_v7, %v2919_v56 }
 0x2f2   : > { %3977 = vmatprep.subr.bf16.mxu1 %v2955_v37 }
 0x2f3   : > { %3978 = vmatpush3.bf16.msra.mxu1 %v2947_v9 }
 0x2f4   : > { %3979 = vmatprep.subr.bf16.mxu1 %v2956_v21 }
 0x2f7   : > { %3980 = vmatpush3.bf16.msra.mxu1 %v2948_v6 }
 0x2fa   : > { %3151 = vmatmul.mubr.bf16.vlgmr.msra.gmra.mrb[152].mxu1 %v4216_v54 }
 0x2fb   : > { %3158 = vmatprep.mubr.bf16.mxu1 %v4220_v60 }
 0x302   : > { %3159 = vmatmul.mubr.bf16.gmra.mrb[156].mxu1 %v4222_v48 }
 0x303   : > { %3166 = vmatprep.mubr.bf16.mxu1 %v4224_v39 }
 0x30a   : > { %3167 = vmatmul.mubr.bf16.gmra.mrb[160].mxu1 %v4227_v13 }
 0x30b   : > { %3174 = vmatprep.mubr.bf16.mxu1 %v4228_v24 }
 0x312   : > { %3175 = vmatmul.mubr.bf16.gmra.mrb[164].mxu1 %v4230_v22 }
 0x349   : > { %v4093_v45 = vpop.f32.mrb[168].mxu0 }
 0x34a   : > { %v3047_v19 = vpop.f32.mrb[169].mxu0  ;;  %v3056_v52 = vadd.f32 %v4093_v45, %v3409_v2 }
 0x34b   : > { %v4094_v14 = vpop.f32.mrb[170].mxu0  ;;  %v3048_v28 = vadd.f32 %v3409_v2, %v3047_v19 }
 0x34c   : > { %v3050_v11 = vpop.f32.mrb[171].mxu0  ;;  %v3059_v63 = vadd.f32 %v4094_v14, %v3409_v2 }
 0x34d   : > { %v3051_v18 = vadd.f32 %v3409_v2, %v3050_v11 }
 0x351   : > { %v4097_v49 = vpop.f32.mrb[172].mxu0 }
 0x352   : > { %v3063_v40 = vpop.f32.mrb[173].mxu0  ;;  %v3072_v35 = vadd.f32 %v4097_v49, %v3409_v2 }
 0x353   : > { %v4098_v6 = vpop.f32.mrb[174].mxu0  ;;  %v3064_v50 = vadd.f32 %v3409_v2, %v3063_v40 }
 0x354   : > { %v3066_v9 = vpop.f32.mrb[175].mxu0  ;;  %v3075_v38 = vadd.f32 %v4098_v6, %v3409_v2 }
 0x355   : > { %v3067_v55 = vadd.f32 %v3409_v2, %v3066_v9 }
 0x3cd   : > { %v3981_v29 = vpop.f32.mrb[152].mxu1 }
 0x3ce   : > { %v3982_v32 = vpop.f32.mrb[153].mxu1 }
 0x3cf   : > { %v3983_v46 = vadd.f32 %v3982_v32, %v3981_v29  ;;  %v3984_v51 = vpop.f32.mrb[154].mxu1 }
 0x3d0   : > { %v3985_v4 = vpop.f32.mrb[155].mxu1 }
 0x3d1   : > { %v3153_v61 = vadd.f32 %v3983_v46, %v3048_v28  ;;  %v3986_v3 = vadd.f32 %v3985_v4, %v3984_v51 }
 0x3d3   : > { %v3156_v57 = vadd.f32 %v3986_v3, %v3051_v18 }
 0x3d5   : > { %v3450_v5 = vpack.c.bf16 %v3156_v57, %v3153_v61  ;;  %v3987_v1 = vpop.f32.mrb[156].mxu1 }
 0x3d6   : > { %v3988_v25 = vpop.f32.mrb[157].mxu1 }
 0x3d7   : > { %3451 = vst [vmem:[%s5132_s24] sm:$0xff] %v3450_v5   ;;  %v3989_v62 = vadd.f32 %v3988_v25, %v3987_v1  ;;  %v3990_v58 = vpop.f32.mrb[158].mxu1 }
 0x3d8   : > { %v3991_v15 = vpop.f32.mrb[159].mxu1 }
 0x3d9   : > { %v3161_v31 = vadd.f32 %v3989_v62, %v3056_v52  ;;  %v3992_v16 = vadd.f32 %v3991_v15, %v3990_v58 }
 0x3db   : > { %v3164_v41 = vadd.f32 %v3992_v16, %v3059_v63 }
 0x3dd   : > { %v3455_v20 = vpack.c.bf16 %v3164_v41, %v3161_v31  ;;  %v3993_v0 = vpop.f32.mrb[160].mxu1 }
 0x3de   : > { %v3994_v23 = vpop.f32.mrb[161].mxu1 }
 0x3df   : > { %3467 = vst [vmem:[%s5132_s24 + $0x8] sm:$0xff] %v3455_v20   ;;  %v3995_v53 = vadd.f32 %v3994_v23, %v3993_v0  ;;  %v3996_v44 = vpop.f32.mrb[162].mxu1 }
 0x3e0   : > { %v3997_v17 = vpop.f32.mrb[163].mxu1 }
 0x3e1   : > { %v3169_v8 = vadd.f32 %v3995_v53, %v3064_v50  ;;  %v3998_v34 = vadd.f32 %v3997_v17, %v3996_v44 }
 0x3e3   : > { %v3172_v36 = vadd.f32 %v3998_v34, %v3067_v55 }
 0x3e5   : > { %v3460_v10 = vpack.c.bf16 %v3172_v36, %v3169_v8  ;;  %v3999_v27 = vpop.f32.mrb[164].mxu1 }
 0x3e6   : > { %v4000_v43 = vpop.f32.mrb[165].mxu1 }
 0x3e7   : > { %3468 = vst [vmem:[%s5132_s24 + $0x10] sm:$0xff] %v3460_v10   ;;  %v4001_v47 = vadd.f32 %v4000_v43, %v3999_v27  ;;  %v4002_v59 = vpop.f32.mrb[166].mxu1 }
 0x3e8   : > { %v4003_v12 = vpop.f32.mrb[167].mxu1 }
 0x3e9   : > { %v3177_v33 = vadd.f32 %v4001_v47, %v3072_v35  ;;  %v4004_v56 = vadd.f32 %v4003_v12, %v4002_v59 }
 0x3eb   : > { %v3180_v42 = vadd.f32 %v4004_v56, %v3075_v38 }
 0x3ed   : > { %v3465_v26 = vpack.c.bf16 %v3180_v42, %v3177_v33 }
 0x3ef   : > { %3469 = vst [vmem:[%s5132_s24 + $0x18] sm:$0xff] %v3465_v26  }
 0x3f0 PF: > { %s19_s30 = sadd.s32 1, %s4238_s30  }
 0x3f1   : > { %p16_p4 = scmp.ge.s32.totalorder %s19_s30, 4  }
 0x3f3   :  { %18 = sbr.rel (!%p16_p4) target bundleno = 1 (0x1), region = 91 }

// kernel: pallas_forward.9
= control target key start
LH: loop header
LB: loop body
LE: loop exit
PB: predicated region body
PF: predicated region fallthrough
CT: control target
= control target key end

     0   :  { %v208_v0 = vmov 0.0|0.0   ;;  %vm209_vm0 = vmmov 0   ;;  %v210_v4 = vmov 0.0   ;;  %vm17_vm1 = vcmask 1043456   ;;  %s291_s1 = inlined_call_operand.vmem [shape: f32[128,1], index: 1, kind: input, shape index: {}]   ;;  %s292_s0 = inlined_call_operand.vmem [shape: bf16[2,4,128], index: 0, kind: input, shape index: {}]   ;;  %s293_s2 = inlined_call_operand.vmem [shape: f32[2,1], index: 2, kind: output, shape index: {}]  }
   0x1   :  { %181 = vmatprep.subr.bf16.mxu0 %v208_v0  ;;  %v32_v1 = vld [vmem:[%s291_s1] sm:$0xff]  ;;  %v33_v2 = vld [vmem:[%s291_s1 + $0x8] sm:$0xff]  ;;  %v34_v3 = vld [vmem:[%s291_s1 + $0x10] sm:$0xff]  ;;  %178 = vmatprep.mubr.msk.f32.mxu0 %vm209_vm0, %v210_v4  ;;  %vm50_vm2 = vcmask 1041409   ;;  %vm123_vm3 = vcmask 1024  }
   0x2   :  { %v182_v5 = vpack.c.bf16 %v33_v2, %v32_v1  ;;  %v35_v6 = vld [vmem:[%s291_s1 + $0x18] sm:$0xff]  ;;  %v36_v8 = vld [vmem:[%s291_s1 + $0x20] sm:$0xff]  ;;  %v37_v9 = vld [vmem:[%s291_s1 + $0x28] sm:$0xff] }
   0x3   :  { %v185_v7 = vpack.c.bf16 %v35_v6, %v34_v3  ;;  %v11_v10 = vld [vmem:[%s292_s0] sm:$0x3]  ;;  %v12_v11 = vld [vmem:[%s292_s0 + $0x2] sm:$0x3]  ;;  %v188_v14 = vpack.c.bf16 %v37_v9, %v36_v8  ;;  %v38_v15 = vld [vmem:[%s291_s1 + $0x30] sm:$0xff] }
   0x4   :  { %183 = vmatpush3.bf16.msra.mxu0 %v182_v5  ;;  %v13_v12 = vunpack.c.l.bf16 %v11_v10  ;;  %v14_v13 = vunpack.c.l.bf16 %v12_v11  ;;  %v39_v16 = vld [vmem:[%s291_s1 + $0x38] sm:$0xff]  ;;  %v40_v24 = vld [vmem:[%s291_s1 + $0x40] sm:$0xff]  ;;  %v41_v25 = vld [vmem:[%s291_s1 + $0x48] sm:$0xff] }
   0x5   :  { %184 = vmatprep.subr.bf16.mxu0 %v208_v0  ;;  %v191_v21 = vpack.c.bf16 %v39_v16, %v38_v15  ;;  %v194_v28 = vpack.c.bf16 %v41_v25, %v40_v24  ;;  %v42_v31 = vld [vmem:[%s291_s1 + $0x50] sm:$0xff]  ;;  %v43_v32 = vld [vmem:[%s291_s1 + $0x58] sm:$0xff]  ;;  %v44_v36 = vld [vmem:[%s291_s1 + $0x60] sm:$0xff] }
   0x6   :  { %v15_v17 = vmax.f32 %v13_v12, 0.0  ;;  %v16_v18 = vmax.f32 %v14_v13, 0.0  ;;  %v197_v33 = vpack.c.bf16 %v43_v32, %v42_v31  ;;  %v45_v37 = vld [vmem:[%s291_s1 + $0x68] sm:$0xff]  ;;  %v46_v41 = vld [vmem:[%s291_s1 + $0x70] sm:$0xff]  ;;  %v47_v42 = vld [vmem:[%s291_s1 + $0x78] sm:$0xff] }
   0x7   :  { %v200_v38 = vpack.c.bf16 %v45_v37, %v44_v36  ;;  %v203_v43 = vpack.c.bf16 %v47_v42, %v46_v41 }
   0x8   :  { %186 = vmatpush3.bf16.msra.mxu0 %v185_v7  ;;  %v18_v19 = vsel %vm17_vm1, %v15_v17, 0.0  ;;  %v25_v20 = vsel %vm17_vm1, %v16_v18, 0.0 }
   0x9   :  { %187 = vmatprep.subr.bf16.mxu0 %v208_v0  ;;  %v19_v22 = vrot.slane %v18_v19, 4  ;;  %v26_v23 = vrot.slane %v25_v20, 4 }
   0xb   :  { %v20_v26 = vadd.f32 %v19_v22, %v18_v19  ;;  %v27_v27 = vadd.f32 %v26_v23, %v25_v20 }
   0xc   :  { %189 = vmatpush3.bf16.msra.mxu0 %v188_v14 }
   0xd   :  { %190 = vmatprep.subr.bf16.mxu0 %v208_v0  ;;  %v21_v29 = vrot.slane %v20_v26, 2  ;;  %v28_v30 = vrot.slane %v27_v27, 2 }
   0xf   :  { %v22_v34 = vadd.f32 %v21_v29, %v20_v26  ;;  %v29_v35 = vadd.f32 %v28_v30, %v27_v27 }
  0x10   :  { %192 = vmatpush3.bf16.msra.mxu0 %v191_v21 }
  0x11   :  { %193 = vmatprep.subr.bf16.mxu0 %v208_v0  ;;  %v23_v39 = vrot.slane %v22_v34, 1  ;;  %v30_v40 = vrot.slane %v29_v35, 1 }
  0x13   :  { %v24_v44 = vadd.f32 %v23_v39, %v22_v34  ;;  %v31_v45 = vadd.f32 %v30_v40, %v29_v35 }
  0x14   :  { %195 = vmatpush3.bf16.msra.mxu0 %v194_v28 }
  0x15   :  { %196 = vmatprep.subr.bf16.mxu0 %v208_v0  ;;  %v51_v46 = vsel %vm50_vm2, %v31_v45, %v24_v44 }
  0x18   :  { %198 = vmatpush3.bf16.msra.mxu0 %v197_v33 }
  0x19   :  { %199 = vmatprep.subr.bf16.mxu0 %v208_v0 }
  0x1c   :  { %201 = vmatpush3.bf16.msra.mxu0 %v200_v38 }
  0x1d   :  { %202 = vmatprep.subr.bf16.mxu0 %v208_v0 }
  0x20   :  { %204 = vmatpush3.bf16.msra.mxu0 %v203_v43 }
  0x23   :  { %179 = vmatmul.mubr.f32.vlgmr.msra.gmra.mrb[0].mxu0 %v51_v46 }
  0xf6   :  { %v119_v47 = vpop.f32.mrb[0].mxu0 }
  0xf7   :  { %124 = vst.msk [vmem:[%s293_s2] sm:$0x3] %vm123_vm3, %v119_v47  ;;  %v180_v48 = vpop.f32.mrb[1].mxu0 }

// kernel: pallas_forward.8
= control target key start
LH: loop header
LB: loop body
LE: loop exit
PB: predicated region body
PF: predicated region fallthrough
CT: control target
= control target key end

     0   :  { %s3248_s27 = smov 0   ;;  %s3787_s0 = inlined_call_operand.vmem [shape: bf16[2,16,128], index: 0, kind: input, shape index: {}]   ;;  %s3788_s1 = inlined_call_operand.vmem [shape: bf16[1152,128], index: 1, kind: input, shape index: {}]   ;;  %s3789_s2 = inlined_call_operand.vmem [shape: f32[1,128], index: 2, kind: input, shape index: {}]   ;;  %s3790_s3 = inlined_call_operand.vmem [shape: bf16[1152,128], index: 3, kind: input, shape index: {}]   ;;  %s3791_s4 = inlined_call_operand.vmem [shape: f32[1,128], index: 4, kind: input, shape index: {}]   ;;  %s3792_s5 = inlined_call_operand.vmem [shape: bf16[128,128], index: 5, kind: input, shape index: {}]   ;;  %s3793_s6 = inlined_call_operand.vmem [shape: f32[1,128], index: 6, kind: input, shape index: {}]   ;;  %s3794_s7 = inlined_call_operand.vmem [shape: bf16[4,16], index: 7, kind: input, shape index: {}]   ;;  %s3795_s8 = inlined_call_operand.vmem [shape: bf16[2,4,128], index: 8, kind: output, shape index: {}]  }
   0x1 LB: > { %s2576_s28 = sadd.s32 4294967295, %s3199_s27   ;;  %p2580_p0 = scmp.ge.s32.totalorder %s3199_s27, 1  ;;  %s3199_s27 = sphi %s3248_s27, %s18_s27  }
   0x2   : > { %p262_p1 = scmp.lt.s32.totalorder %s3199_s27, 3 }
   0x4   : > { %p263_p2 = pnand %p2580_p0, %p262_p1 }
   0x5   : > { %v3038_v0 = vld [vmem:[%s3788_s1 + $0x40] sm:$0xff] (!%p263_p2)   ;;  %v3201_v3 = vmov (!%p263_p2), 0.0   ;;  %v3042_v5 = vld [vmem:[%s3788_s1 + $0x48] sm:$0xff] (!%p263_p2)   ;;  %v3046_v9 = vld [vmem:[%s3788_s1 + $0x50] sm:$0xff] (!%p263_p2)   ;;  %p295_p3 = scmp.lt.s32.totalorder (!%p263_p2), %s2576_s28, 1  ;;  %vm3202_vm0 = vmmov (!%p263_p2), 0  }
   0x6   : > { %266 = sbr.rel (%p263_p2) target bundleno = 885 (0x375), region = 52  ;;  %v3039_v1 = vld [vmem:[%s3788_s1] sm:$0xff] (!%p263_p2)   ;;  %2745 = vmatprep.subr.bf16.mxu0 (!%p263_p2), %v3038_v0  ;;  %305 = vst [vmem:[#allocation2] sm:$0x3f] (!%p263_p2), %v3201_v3  ;;  %306 = vst [vmem:[#allocation2 + $0x8] sm:$0x3f] (!%p263_p2), %v3201_v3 }
   0x7   : > { %v3040_v2 = vld [vmem:[%s3788_s1 + $0xc0] sm:$0xff] (!%p263_p2)   ;;  %307 = vst [vmem:[#allocation2 + $0x10] sm:$0x3f] (!%p263_p2), %v3201_v3  ;;  %308 = vst [vmem:[#allocation2 + $0x18] sm:$0x3f] (!%p263_p2), %v3201_v3  ;;  %2746 = vmatpush3.bf16.msra.mxu0 (!%p263_p2), %v3039_v1  ;;  %v3043_v6 = vld [vmem:[%s3788_s1 + $0x8] sm:$0xff] (!%p263_p2)  }
   0x8   : > { %309 = vst [vmem:[#allocation2 + $0x20] sm:$0x3f] (!%p263_p2), %v3201_v3  ;;  %310 = vst [vmem:[#allocation2 + $0x28] sm:$0x3f] (!%p263_p2), %v3201_v3  ;;  %v3041_v4 = vld [vmem:[%s3788_s1 + $0x80] sm:$0xff] (!%p263_p2)   ;;  %2767 = vmatprep.subr.bf16.mxu1 (!%p263_p2), %v3040_v2  ;;  %2747 = vmatprep.subr.bf16.mxu0 (!%p263_p2), %v3042_v5  ;;  %v3044_v7 = vld [vmem:[%s3788_s1 + $0xc8] sm:$0xff] (!%p263_p2)  }
   0x9   : > { %2768 = vmatpush3.bf16.msra.mxu1 (!%p263_p2), %v3041_v4  ;;  %v3045_v8 = vld [vmem:[%s3788_s1 + $0x88] sm:$0xff] (!%p263_p2)   ;;  %v3047_v10 = vld [vmem:[%s3788_s1 + $0x10] sm:$0xff] (!%p263_p2)   ;;  %v3050_v13 = vld [vmem:[%s3788_s1 + $0x58] sm:$0xff] (!%p263_p2)   ;;  %vm2437_vm1 = vcmask (!%p263_p2), 130048  }
   0xa   : > { %2769 = vmatprep.subr.bf16.mxu1 (!%p263_p2), %v3044_v7  ;;  %v3048_v11 = vld [vmem:[%s3788_s1 + $0xd0] sm:$0xff] (!%p263_p2)   ;;  %v3051_v14 = vld [vmem:[%s3788_s1 + $0x18] sm:$0xff] (!%p263_p2)   ;;  %v3054_v17 = vld [vmem:[%s3788_s1 + $0x60] sm:$0xff] (!%p263_p2)  }
   0xb   : > { %2748 = vmatpush3.bf16.msra.mxu0 (!%p263_p2), %v3043_v6  ;;  %v3049_v12 = vld [vmem:[%s3788_s1 + $0x90] sm:$0xff] (!%p263_p2)   ;;  %v3052_v15 = vld [vmem:[%s3788_s1 + $0xd8] sm:$0xff] (!%p263_p2)   ;;  %v3055_v18 = vld [vmem:[%s3788_s1 + $0x20] sm:$0xff] (!%p263_p2)  }
   0xc   : > { %2749 = vmatprep.subr.bf16.mxu0 (!%p263_p2), %v3046_v9  ;;  %v3053_v16 = vld [vmem:[%s3788_s1 + $0x98] sm:$0xff] (!%p263_p2)   ;;  %v3056_v19 = vld [vmem:[%s3788_s1 + $0xe0] sm:$0xff] (!%p263_p2)   ;;  %v3058_v21 = vld [vmem:[%s3788_s1 + $0x68] sm:$0xff] (!%p263_p2)  }
   0xd   : > { %2770 = vmatpush3.bf16.msra.mxu1 %v3045_v8  ;;  %v3057_v20 = vld [vmem:[%s3788_s1 + $0xa0] sm:$0xff]   ;;  %v3059_v22 = vld [vmem:[%s3788_s1 + $0x28] sm:$0xff]   ;;  %s3797_s28 = smov (!%p295_p3, %s2576_s28), 1  ;;  %v3062_v25 = vld [vmem:[%s3788_s1 + $0x70] sm:$0xff]  }
   0xe   : > { %2771 = vmatprep.subr.bf16.mxu1 %v3048_v11  ;;  %v3060_v23 = vld [vmem:[%s3788_s1 + $0xe8] sm:$0xff]   ;;  %v3063_v26 = vld [vmem:[%s3788_s1 + $0x30] sm:$0xff]   ;;  %s2744_s21 = sshll.u32 %s3797_s28, 3  ;;  %v3066_v29 = vld [vmem:[%s3788_s1 + $0x78] sm:$0xff]   ;;  %s2583_s15 = sshll.u32 %s3797_s28, 1 }
   0xf   : > { %2750 = vmatpush3.bf16.msra.mxu0 %v3047_v10  ;;  %v3061_v24 = vld [vmem:[%s3788_s1 + $0xa8] sm:$0xff]   ;;  %v3064_v27 = vld [vmem:[%s3788_s1 + $0xf0] sm:$0xff]   ;;  %v3067_v30 = vld [vmem:[%s3788_s1 + $0x38] sm:$0xff]   ;;  %s3362_s10 = scalar_lea.vmem %s3787_s0, %s2744_s21  ;;  %s303_s18 = scalar_lea.vmem %s3795_s8, %s2583_s15 }
  0x10   : > { %2751 = vmatprep.subr.bf16.mxu0 %v3050_v13  ;;  %v3065_v28 = vld [vmem:[%s3788_s1 + $0xb0] sm:$0xff]   ;;  %v3068_v31 = vld [vmem:[%s3788_s1 + $0xf8] sm:$0xff]   ;;  %v311_v33 = vld [vmem:[%s3362_s10] sm:$0xff]  }
  0x11   : > { %2772 = vmatpush3.bf16.msra.mxu1 %v3049_v12  ;;  %v3069_v32 = vld [vmem:[%s3788_s1 + $0xb8] sm:$0xff]   ;;  %v352_v34 = vld [vmem:[#allocation2 + $0x1] sm:$0xf]  ;;  %v313_v35 = vunpack.c.l.bf16 %v311_v33  ;;  %v314_v36 = vunpack.c.h.bf16 %v311_v33 }
  0x12   : > { %2773 = vmatprep.subr.bf16.mxu1 %v3052_v15  ;;  %v353_v37 = vpack.c.bf16 %v352_v34, %v352_v34  ;;  %v3070_v38 = vld [vmem:[%s3788_s1 + $0x140] sm:$0xff]  }
  0x13   : > { %2752 = vmatpush3.bf16.msra.mxu0 %v3051_v14  ;;  %v331_v39 = vld [vmem:[#allocation2] sm:$0xf]  ;;  %v315_v40 = vmax.f32 %v313_v35, 0.0  ;;  %v316_v41 = vmax.f32 %v314_v36, 0.0  ;;  %v3075_v35 = vld [vmem:[%s3788_s1 + $0x108] sm:$0xff]  }
  0x14   : > { %2753 = vmatprep.subr.bf16.mxu0 %v3054_v17  ;;  %354 = vst [vmem:[#allocation3 + $0x8] sm:$0x3] %v353_v37  ;;  %v332_v42 = vpack.c.bf16 %v331_v39, %v331_v39  ;;  %v3072_v43 = vld [vmem:[%s3788_s1 + $0x1c0] sm:$0xff]   ;;  %v3076_v37 = vld [vmem:[%s3788_s1 + $0x1c8] sm:$0xff]  }
  0x15   : > { %2774 = vmatpush3.bf16.msra.mxu1 %v3053_v16  ;;  %v373_v44 = vld [vmem:[#allocation2 + $0x2] sm:$0xf]  ;;  %317 = vst [vmem:[#allocation4] sm:$0xff] %v315_v40  ;;  %318 = vst [vmem:[#allocation4 + $0x8] sm:$0xff] %v316_v41  ;;  %v3077_v41 = vld [vmem:[%s3788_s1 + $0x188] sm:$0xff]  }
  0x16   : > { %2775 = vmatprep.subr.bf16.mxu1 %v3056_v19  ;;  %333 = vst [vmem:[#allocation3] sm:$0x3] %v332_v42  ;;  %v374_v45 = vpack.c.bf16 %v373_v44, %v373_v44  ;;  %v1351_v7 = vld [vmem:[#allocation2 + $0x1] sm:$0xf]  ;;  %v3079_v42 = vld [vmem:[%s3788_s1 + $0x110] sm:$0xff]   ;;  %v3082_v44 = vld [vmem:[%s3788_s1 + $0x158] sm:$0xff]  }
  0x17   : > { %2754 = vmatpush3.bf16.msra.mxu0 %v3055_v18  ;;  %v1330_v13 = vld [vmem:[#allocation2] sm:$0xf] }
  0x18   : > { %2755 = vmatprep.subr.bf16.mxu0 %v3058_v21  ;;  %375 = vst [vmem:[#allocation3 + $0x10] sm:$0x3] %v374_v45  ;;  %v3073_v34 = vld [vmem:[%s3788_s1 + $0x180] sm:$0xff]   ;;  %v3081_v45 = vld [vmem:[%s3788_s1 + $0x190] sm:$0xff]  }
  0x19   : > { %2776 = vmatpush3.bf16.msra.mxu1 %v3057_v20 }
  0x1a   : > { %2777 = vmatprep.subr.bf16.mxu1 %v3060_v23 }
  0x1b   : > { %2756 = vmatpush3.bf16.msra.mxu0 %v3059_v22 }
  0x1c   : > { %2757 = vmatprep.subr.bf16.mxu0 %v3062_v25  ;;  %v319_v46 = vld [vmem:[#allocation4] sm:$0xf]  ;;  %v322_v47 = vld [vmem:[#allocation4 + $0x4] sm:$0xf]  ;;  %v325_v48 = vld [vmem:[#allocation4 + $0x8] sm:$0xf] }
  0x1d   : > { %2778 = vmatpush3.bf16.msra.mxu1 %v3061_v24  ;;  %321 = vst [vmem:[#allocation2 + $0x9] sm:$0xf] %v319_v46  ;;  %324 = vst [vmem:[#allocation2 + $0x11] sm:$0xf] %v322_v47  ;;  %v328_v49 = vld [vmem:[#allocation4 + $0xc] sm:$0xf] }
  0x1e   : > { %2779 = vmatprep.subr.bf16.mxu1 %v3064_v27  ;;  %327 = vst [vmem:[#allocation2 + $0x19] sm:$0xf] %v325_v48  ;;  %330 = vst [vmem:[#allocation2 + $0x21] sm:$0xf] %v328_v49  ;;  %v1352_v27 = vpack.c.bf16 %v1351_v7, %v1351_v7  ;;  %v3083_v46 = vld [vmem:[%s3788_s1 + $0x118] sm:$0xff]  }
  0x1f   : > { %2758 = vmatpush3.bf16.msra.mxu0 %v3063_v26  ;;  %v3084_v48 = vld [vmem:[%s3788_s1 + $0x1d8] sm:$0xff]  }
  0x20   : > { %2759 = vmatprep.subr.bf16.mxu0 %v3066_v29  ;;  %v3071_v29 = vld [vmem:[%s3788_s1 + $0x100] sm:$0xff]  }
  0x21   : > { %2780 = vmatpush3.bf16.msra.mxu1 %v3065_v28  ;;  %v1331_v28 = vpack.c.bf16 %v1330_v13, %v1330_v13 }
  0x22   : > { %2781 = vmatprep.subr.bf16.mxu1 %v3068_v31 }
  0x23   : > { %2760 = vmatpush3.bf16.msra.mxu0 %v3067_v30  ;;  %v1372_v30 = vld [vmem:[#allocation2 + $0x2] sm:$0xf] }
  0x24   : > { %2789 = vmatprep.subr.bf16.mxu0 %v3070_v38  ;;  %v355_v50 = vld [vmem:[#allocation2 + $0x9] sm:$0xf]  ;;  %v361_v51 = vld [vmem:[#allocation2 + $0x11] sm:$0xf]  ;;  %v1373_v36 = vpack.c.bf16 %v1372_v30, %v1372_v30 }
  0x25   : > { %2782 = vmatpush3.bf16.msra.mxu1 %v3069_v32  ;;  %v367_v52 = vld [vmem:[#allocation2 + $0x19] sm:$0xf]  ;;  %v356_v53 = vpack.c.bf16 %v355_v50, %v355_v50  ;;  %v362_v54 = vpack.c.bf16 %v361_v51, %v361_v51  ;;  %v334_v56 = vld [vmem:[#allocation2 + $0x8] sm:$0xf]  ;;  %v340_v57 = vld [vmem:[#allocation2 + $0x10] sm:$0xf] }
  0x26   : > { %2811 = vmatprep.subr.bf16.mxu1 %v3072_v43  ;;  %v368_v55 = vpack.c.bf16 %v367_v52, %v367_v52  ;;  %v346_v58 = vld [vmem:[#allocation2 + $0x18] sm:$0xf]  ;;  %v335_v59 = vpack.c.bf16 %v334_v56, %v334_v56  ;;  %v341_v60 = vpack.c.bf16 %v340_v57, %v340_v57  ;;  %v394_v62 = vld [vmem:[#allocation2 + $0x8] sm:$0xf]  ;;  %v397_v63 = vld [vmem:[#allocation2 + $0x10] sm:$0xf] }
  0x27   : > { %v347_v61 = vpack.c.bf16 %v346_v58, %v346_v58  ;;  %v403_v0 = vld [vmem:[#allocation2 + $0x18] sm:$0xf]  ;;  %v358_v1 = vrot.slane %v356_v53, 6  ;;  %v364_v2 = vrot.slane %v362_v54, 4  ;;  %v395_v5 = vpack.c.bf16 %v394_v62, %v394_v62  ;;  %v409_v6 = vld [vmem:[#allocation2 + $0x20] sm:$0xf] }
  0x28   : > { %v370_v4 = vrot.slane %v368_v55, 2  ;;  %v337_v8 = vrot.slane %v335_v59, 6  ;;  %v343_v9 = vrot.slane %v341_v60, 4  ;;  %v398_v11 = vpack.c.bf16 %v397_v63, %v397_v63  ;;  %v376_v12 = vld [vmem:[#allocation2 + $0xa] sm:$0xf]  ;;  %v3078_v38 = vld [vmem:[%s3788_s1 + $0x150] sm:$0xff]  }
  0x29   : > { %v349_v10 = vrot.slane %v347_v61, 2  ;;  %360 = vst [vmem:[#allocation3 + $0x8] sm:$0xc] %v358_v1  ;;  %366 = vst [vmem:[#allocation3 + $0x8] sm:$0x30] %v364_v2  ;;  %v404_v14 = vpack.c.bf16 %v403_v0, %v403_v0  ;;  %v410_v15 = vpack.c.bf16 %v409_v6, %v409_v6  ;;  %v377_v16 = vpack.c.bf16 %v376_v12, %v376_v12  ;;  %v3074_v32 = vld [vmem:[%s3788_s1 + $0x148] sm:$0xff]  }
  0x2a   : > { %372 = vst [vmem:[#allocation3 + $0x8] sm:$0xc0] %v370_v4  ;;  %396 = vst [vmem:[#allocation3 + $0x18] sm:$0x3] %v395_v5  ;;  %v382_v17 = vld [vmem:[#allocation2 + $0x12] sm:$0xf] }
  0x2b   : > { %v388_v18 = vld [vmem:[#allocation2 + $0x1a] sm:$0xf]  ;;  %339 = vst [vmem:[#allocation3] sm:$0xc] %v337_v8  ;;  %345 = vst [vmem:[#allocation3] sm:$0x30] %v343_v9  ;;  %v383_v20 = vpack.c.bf16 %v382_v17, %v382_v17 }
  0x2c   : > { %351 = vst [vmem:[#allocation3] sm:$0xc0] %v349_v10  ;;  %v400_v19 = vrot.slane %v398_v11, 6  ;;  %v389_v21 = vpack.c.bf16 %v388_v18, %v388_v18  ;;  %v406_v22 = vrot.slane %v404_v14, 4  ;;  %v412_v23 = vrot.slane %v410_v15, 2  ;;  %v3080_v43 = vld [vmem:[%s3788_s1 + $0x1d0] sm:$0xff]  }
  0x2d   : > { %v379_v24 = vrot.slane %v377_v16, 6  ;;  %v385_v25 = vrot.slane %v383_v20, 4  ;;  %v436_v47 = vld [vmem:[#allocation2 + $0xa] sm:$0xf]  ;;  %v439_v50 = vld [vmem:[#allocation2 + $0x12] sm:$0xf] }
  0x2e   : > { %402 = vst [vmem:[#allocation3 + $0x18] sm:$0xc] %v400_v19  ;;  %v391_v26 = vrot.slane %v389_v21, 2  ;;  %408 = vst [vmem:[#allocation3 + $0x18] sm:$0x30] %v406_v22  ;;  %v437_v49 = vpack.c.bf16 %v436_v47, %v436_v47  ;;  %v3086_v53 = vld [vmem:[%s3788_s1 + $0x160] sm:$0xff]   ;;  %v440_v54 = vpack.c.bf16 %v439_v50, %v439_v50 }
  0x2f   : > { %414 = vst [vmem:[#allocation3 + $0x18] sm:$0xc0] %v412_v23  ;;  %381 = vst [vmem:[#allocation3 + $0x10] sm:$0xc] %v379_v24  ;;  %v445_v51 = vld [vmem:[#allocation2 + $0x1a] sm:$0xf] }
  0x30   : > { %387 = vst [vmem:[#allocation3 + $0x10] sm:$0x30] %v385_v25  ;;  %393 = vst [vmem:[#allocation3 + $0x10] sm:$0xc0] %v391_v26  ;;  %v451_v52 = vld [vmem:[#allocation2 + $0x22] sm:$0xf]  ;;  %v446_v55 = vpack.c.bf16 %v445_v51, %v445_v51 }
  0x31   : > { %v522_v31 = vld [vmem:[#allocation3 + $0x8] sm:$0xff]  ;;  %v452_v56 = vpack.c.bf16 %v451_v52, %v451_v52  ;;  %438 = vst [vmem:[#allocation3 + $0x28] sm:$0x3] %v437_v49  ;;  %v415_v57 = vld [vmem:[#allocation2 + $0x9] sm:$0xf]  ;;  %v3087_v61 = vld [vmem:[%s3788_s1 + $0x120] sm:$0xff]  }
  0x32   : > { %1145 = vmatprep.mubr.bf16.mxu0 %v522_v31  ;;  %1353 = vst [vmem:[#allocation3 + $0x8] sm:$0x3] %v1352_v27  ;;  %v418_v58 = vld [vmem:[#allocation2 + $0x11] sm:$0xf]  ;;  %v424_v59 = vld [vmem:[#allocation2 + $0x19] sm:$0xf]  ;;  %v416_v1 = vpack.c.bf16 %v415_v57, %v415_v57 }
  0x33   : > { %v521_v33 = vld [vmem:[#allocation3] sm:$0xff]  ;;  %v3085_v60 = vld [vmem:[%s3788_s1 + $0x198] sm:$0xff]   ;;  %v442_v62 = vrot.slane %v440_v54, 6  ;;  %v448_v63 = vrot.slane %v446_v55, 4  ;;  %v454_v0 = vrot.slane %v452_v56, 2  ;;  %v3088_v4 = vld [vmem:[%s3788_s1 + $0x1e0] sm:$0xff]   ;;  %v419_v5 = vpack.c.bf16 %v418_v58, %v418_v58 }
  0x34   : > { %1146 = vmatmul.mubr.bf16.vlgmr.msra.gmra.mrb[0].mxu0 %v521_v33  ;;  %1332 = vst [vmem:[#allocation3] sm:$0x3] %v1331_v28  ;;  %v430_v2 = vld [vmem:[#allocation2 + $0x21] sm:$0xf]  ;;  %v425_v6 = vpack.c.bf16 %v424_v59, %v424_v59  ;;  %v479_v8 = vld [vmem:[#allocation2 + $0x11] sm:$0xf] }
  0x35   : > { %2790 = vmatpush3.bf16.msra.mxu0 %v3071_v29  ;;  %v431_v7 = vpack.c.bf16 %v430_v2, %v430_v2  ;;  %v482_v9 = vld [vmem:[#allocation2 + $0x19] sm:$0xf]  ;;  %v488_v10 = vld [vmem:[#allocation2 + $0x21] sm:$0xf]  ;;  %444 = vst [vmem:[#allocation3 + $0x28] sm:$0xc] %v442_v62  ;;  %v480_v11 = vpack.c.bf16 %v479_v8, %v479_v8 }
  0x36   : > { %v524_v39 = vld [vmem:[#allocation3 + $0x18] sm:$0xff]  ;;  %2791 = vmatprep.subr.bf16.mxu0 %v3074_v32  ;;  %450 = vst [vmem:[#allocation3 + $0x28] sm:$0x30] %v448_v63  ;;  %456 = vst [vmem:[#allocation3 + $0x28] sm:$0xc0] %v454_v0  ;;  %v483_v12 = vpack.c.bf16 %v482_v9, %v482_v9  ;;  %v489_v13 = vpack.c.bf16 %v488_v10, %v488_v10  ;;  %v421_v17 = vrot.slane %v419_v5, 6 }
  0x37   : > { %1186 = vmatprep.mubr.bf16.mxu1 %v524_v39  ;;  %v523_v40 = vld [vmem:[#allocation3 + $0x10] sm:$0xff]  ;;  %417 = vst [vmem:[#allocation3 + $0x20] sm:$0x3] %v416_v1  ;;  %v494_v14 = vld [vmem:[#allocation2 + $0x29] sm:$0xf]  ;;  %v427_v18 = vrot.slane %v425_v6, 4 }
  0x38   : > { %1187 = vmatmul.mubr.bf16.vlgmr.msra.gmra.mrb[0].mxu1 %v523_v40  ;;  %1374 = vst [vmem:[#allocation3 + $0x10] sm:$0x3] %v1373_v36  ;;  %v1492_v15 = vld [vmem:[#allocation2 + $0x29] sm:$0xf]  ;;  %v433_v19 = vrot.slane %v431_v7, 2  ;;  %v495_v20 = vpack.c.bf16 %v494_v14, %v494_v14  ;;  %v3089_v21 = vld [vmem:[%s3788_s1 + $0x1a0] sm:$0xff]  }
  0x39   : > { %2812 = vmatpush3.bf16.msra.mxu1 %v3073_v34  ;;  %2792 = vmatpush3.bf16.msra.mxu0 %v3075_v35  ;;  %v3090_v16 = vld [vmem:[%s3788_s1 + $0x168] sm:$0xff]   ;;  %481 = vst [vmem:[#allocation3 + $0x38] sm:$0x3] %v480_v11  ;;  %v485_v22 = vrot.slane %v483_v12, 6  ;;  %v491_v23 = vrot.slane %v489_v13, 4  ;;  %v3094_v36 = vld [vmem:[%s3788_s1 + $0x170] sm:$0xff]  }
  0x3a   : > { %2813 = vmatprep.subr.bf16.mxu1 %v3076_v37  ;;  %2793 = vmatprep.subr.bf16.mxu0 %v3078_v38  ;;  %v457_v24 = vld [vmem:[#allocation2 + $0x10] sm:$0xf]  ;;  %v460_v25 = vld [vmem:[#allocation2 + $0x18] sm:$0xf]  ;;  %v3091_v26 = vld [vmem:[%s3788_s1 + $0x128] sm:$0xff]   ;;  %v497_v27 = vrot.slane %v495_v20, 2  ;;  %v1493_v37 = vpack.c.bf16 %v1492_v15, %v1492_v15 }
  0x3b   : > { %423 = vst [vmem:[#allocation3 + $0x20] sm:$0xc] %v421_v17  ;;  %429 = vst [vmem:[#allocation3 + $0x20] sm:$0x30] %v427_v18  ;;  %v458_v28 = vpack.c.bf16 %v457_v24, %v457_v24  ;;  %v461_v29 = vpack.c.bf16 %v460_v25, %v460_v25  ;;  %v466_v30 = vld [vmem:[#allocation2 + $0x20] sm:$0xf] }
  0x3c   : > { %435 = vst [vmem:[#allocation3 + $0x20] sm:$0xc0] %v433_v19  ;;  %v473_v31 = vld [vmem:[#allocation2 + $0x28] sm:$0xf]  ;;  %487 = vst [vmem:[#allocation3 + $0x38] sm:$0xc] %v485_v22  ;;  %v467_v33 = vpack.c.bf16 %v466_v30, %v466_v30 }
  0x3d   : > { %2814 = vmatpush3.bf16.msra.mxu1 %v3077_v41  ;;  %2794 = vmatpush3.bf16.msra.mxu0 %v3079_v42  ;;  %v3092_v32 = vld [vmem:[%s3788_s1 + $0x1e8] sm:$0xff]   ;;  %493 = vst [vmem:[#allocation3 + $0x38] sm:$0x30] %v491_v23  ;;  %v474_v34 = vpack.c.bf16 %v473_v31, %v473_v31  ;;  %499 = vst [vmem:[#allocation3 + $0x38] sm:$0xc0] %v497_v27  ;;  %v463_v38 = vrot.slane %v461_v29, 6 }
  0x3e   : > { %2815 = vmatprep.subr.bf16.mxu1 %v3080_v43  ;;  %2795 = vmatprep.subr.bf16.mxu0 %v3082_v44  ;;  %v1471_v35 = vld [vmem:[#allocation2 + $0x28] sm:$0xf]  ;;  %459 = vst [vmem:[#allocation3 + $0x30] sm:$0x3] %v458_v28  ;;  %v3095_v40 = vld [vmem:[%s3788_s1 + $0x130] sm:$0xff]   ;;  %v469_v41 = vrot.slane %v467_v33, 4 }
  0x3f   : > { %v3093_v39 = vld [vmem:[%s3788_s1 + $0x1a8] sm:$0xff]   ;;  %v476_v42 = vrot.slane %v474_v34, 2  ;;  %v3096_v43 = vld [vmem:[%s3788_s1 + $0x1f0] sm:$0xff]   ;;  %v526_v44 = vld [vmem:[#allocation3 + $0x28] sm:$0xff]  ;;  %465 = vst [vmem:[#allocation3 + $0x30] sm:$0xc] %v463_v38 }
  0x40   : > { %471 = vst [vmem:[#allocation3 + $0x30] sm:$0x30] %v469_v41  ;;  %v1495_v47 = vrot.slane %v1493_v37, 2  ;;  %v3099_v49 = vld [vmem:[%s3788_s1 + $0x138] sm:$0xff]   ;;  %1227 = vmatprep.mubr.bf16.mxu0 %v526_v44  ;;  %v500_v51 = vld [vmem:[#allocation2 + $0x12] sm:$0xf] }
  0x41   : > { %2816 = vmatpush3.bf16.msra.mxu1 %v3081_v45  ;;  %2796 = vmatpush3.bf16.msra.mxu0 %v3083_v46  ;;  %478 = vst [vmem:[#allocation3 + $0x30] sm:$0xc0] %v476_v42  ;;  %v1472_v45 = vpack.c.bf16 %v1471_v35, %v1471_v35  ;;  %v3098_v46 = vld [vmem:[%s3788_s1 + $0x178] sm:$0xff]   ;;  %v501_v54 = vpack.c.bf16 %v500_v51, %v500_v51  ;;  %v509_v56 = vld [vmem:[#allocation2 + $0x22] sm:$0xf]  ;;  %v3103_v8 = vld [vmem:[%s3788_s1 + $0x208] sm:$0xff]  }
  0x42   : > { %2817 = vmatprep.subr.bf16.mxu1 %v3084_v48  ;;  %2797 = vmatprep.subr.bf16.mxu0 %v3086_v53  ;;  %v3097_v48 = vld [vmem:[%s3788_s1 + $0x1b0] sm:$0xff]   ;;  %v3100_v50 = vld [vmem:[%s3788_s1 + $0x1f8] sm:$0xff]   ;;  %v510_v58 = vpack.c.bf16 %v509_v56, %v509_v56  ;;  %v515_v59 = vld [vmem:[#allocation2 + $0x2a] sm:$0xf] }
  0x43   : > { %v1474_v53 = vrot.slane %v1472_v45, 2  ;;  %v503_v55 = vld [vmem:[#allocation2 + $0x1a] sm:$0xf]  ;;  %v3102_v62 = vld [vmem:[%s3788_s1 + $0x200] sm:$0xff]   ;;  %502 = vst [vmem:[#allocation3 + $0x40] sm:$0x3] %v501_v54  ;;  %v516_v63 = vpack.c.bf16 %v515_v59, %v515_v59 }
  0x44   : > { %v528_v52 = vld [vmem:[#allocation3 + $0x38] sm:$0xff]  ;;  %v504_v57 = vpack.c.bf16 %v503_v55, %v503_v55  ;;  %v525_v1 = vld [vmem:[#allocation3 + $0x20] sm:$0xff]  ;;  %v512_v5 = vrot.slane %v510_v58, 4  ;;  %v3105_v11 = vld [vmem:[%s3788_s1 + $0x218] sm:$0xff]  }
  0x45   : > { %2818 = vmatpush3.bf16.msra.mxu1 %v3085_v60  ;;  %2798 = vmatpush3.bf16.msra.mxu0 %v3087_v61  ;;  %1497 = vst [vmem:[#allocation3 + $0x38] sm:$0xc0] %v1495_v47  ;;  %v1513_v60 = vld [vmem:[#allocation2 + $0x2a] sm:$0xf]  ;;  %v3101_v61 = vld [vmem:[%s3788_s1 + $0x1b8] sm:$0xff]   ;;  %v518_v6 = vrot.slane %v516_v63, 2 }
  0x46   : > { %2819 = vmatprep.subr.bf16.mxu1 %v3088_v4  ;;  %2799 = vmatprep.subr.bf16.mxu0 %v3090_v16  ;;  %v1514_v0 = vpack.c.bf16 %v1513_v60, %v1513_v60  ;;  %v506_v4 = vrot.slane %v504_v57, 6  ;;  %514 = vst [vmem:[#allocation3 + $0x40] sm:$0x30] %v512_v5  ;;  %v3104_v9 = vld [vmem:[%s3788_s1 + $0x210] sm:$0xff]   ;;  %v3106_v12 = vld [vmem:[%s3788_s1 + $0x220] sm:$0xff]   ;;  %v3107_v13 = vld [vmem:[%s3788_s1 + $0x228] sm:$0xff]  }
  0x47   : > { %1268 = vmatprep.mubr.bf16.mxu1 %v528_v52  ;;  %520 = vst [vmem:[#allocation3 + $0x40] sm:$0xc0] %v518_v6  ;;  %v3108_v14 = vld [vmem:[%s3788_s1 + $0x230] sm:$0xff]   ;;  %v3109_v15 = vld [vmem:[%s3788_s1 + $0x238] sm:$0xff]   ;;  %v3110_v16 = vld [vmem:[%s3790_s3 + $0x40] sm:$0xff]  }
  0x48   : > { %v527_v2 = vld [vmem:[#allocation3 + $0x30] sm:$0xff]  ;;  %v1516_v7 = vrot.slane %v1514_v0, 2  ;;  %508 = vst [vmem:[#allocation3 + $0x40] sm:$0xc] %v506_v4  ;;  %v3114_v20 = vld [vmem:[%s3790_s3 + $0x48] sm:$0xff]   ;;  %v3118_v24 = vld [vmem:[%s3790_s3 + $0x50] sm:$0xff]  }
  0x49   : > { %2820 = vmatpush3.bf16.msra.mxu1 %v3089_v21  ;;  %2800 = vmatpush3.bf16.msra.mxu0 %v3091_v26  ;;  %1476 = vst [vmem:[#allocation3 + $0x30] sm:$0xc0] %v1474_v53  ;;  %v3111_v17 = vld [vmem:[%s3790_s3 + $0xc0] sm:$0xff]   ;;  %v3115_v21 = vld [vmem:[%s3790_s3 + $0xc8] sm:$0xff]   ;;  %v3119_v25 = vld [vmem:[%s3790_s3 + $0xd0] sm:$0xff]  }
  0x4a   : > { %2821 = vmatprep.subr.bf16.mxu1 %v3092_v32  ;;  %2801 = vmatprep.subr.bf16.mxu0 %v3094_v36  ;;  %v3112_v18 = vld [vmem:[%s3790_s3] sm:$0xff]   ;;  %v3116_v22 = vld [vmem:[%s3790_s3 + $0x8] sm:$0xff]   ;;  %v3120_v26 = vld [vmem:[%s3790_s3 + $0x10] sm:$0xff]  }
  0x4b   : > { %v3113_v19 = vld [vmem:[%s3790_s3 + $0x80] sm:$0xff]   ;;  %v3117_v23 = vld [vmem:[%s3790_s3 + $0x88] sm:$0xff]   ;;  %v3121_v27 = vld [vmem:[%s3790_s3 + $0x90] sm:$0xff]  }
  0x4c   : > { %v3122_v28 = vld [vmem:[%s3790_s3 + $0x58] sm:$0xff]   ;;  %v3126_v32 = vld [vmem:[%s3790_s3 + $0x60] sm:$0xff]   ;;  %v3130_v36 = vld [vmem:[%s3790_s3 + $0x68] sm:$0xff]  }
  0x4d   : > { %2822 = vmatpush3.bf16.msra.mxu1 %v3093_v39  ;;  %2802 = vmatpush3.bf16.msra.mxu0 %v3095_v40  ;;  %v3123_v29 = vld [vmem:[%s3790_s3 + $0xd8] sm:$0xff]   ;;  %v3127_v33 = vld [vmem:[%s3790_s3 + $0xe0] sm:$0xff]   ;;  %v3131_v37 = vld [vmem:[%s3790_s3 + $0xe8] sm:$0xff]  }
  0x4e   : > { %2823 = vmatprep.subr.bf16.mxu1 %v3096_v43  ;;  %2803 = vmatprep.subr.bf16.mxu0 %v3098_v46  ;;  %v3124_v30 = vld [vmem:[%s3790_s3 + $0x18] sm:$0xff]   ;;  %v3128_v34 = vld [vmem:[%s3790_s3 + $0x20] sm:$0xff]   ;;  %v3132_v38 = vld [vmem:[%s3790_s3 + $0x28] sm:$0xff]  }
  0x4f   : > { %v529_v10 = vld [vmem:[#allocation3 + $0x40] sm:$0xff]  ;;  %v3125_v31 = vld [vmem:[%s3790_s3 + $0x98] sm:$0xff]   ;;  %v3129_v35 = vld [vmem:[%s3790_s3 + $0xa0] sm:$0xff]  }
  0x50   : > { %1518 = vst [vmem:[#allocation3 + $0x40] sm:$0xc0] %v1516_v7  ;;  %v3133_v39 = vld [vmem:[%s3790_s3 + $0xa8] sm:$0xff]   ;;  %v3134_v40 = vld [vmem:[%s3790_s3 + $0x70] sm:$0xff]   ;;  %v3138_v44 = vld [vmem:[%s3790_s3 + $0x78] sm:$0xff]  }
  0x51   : > { %2824 = vmatpush3.bf16.msra.mxu1 %v3097_v48  ;;  %2804 = vmatpush3.bf16.msra.mxu0 %v3099_v49  ;;  %v3135_v41 = vld [vmem:[%s3790_s3 + $0xf0] sm:$0xff]   ;;  %v3139_v45 = vld [vmem:[%s3790_s3 + $0xf8] sm:$0xff]   ;;  %v3142_v48 = vld [vmem:[%s3790_s3 + $0x140] sm:$0xff]  }
  0x52   : > { %2825 = vmatprep.subr.bf16.mxu1 %v3100_v50  ;;  %2952 = vmatprep.subr.bf16.mxu0 %v3201_v3  ;;  %v3136_v42 = vld [vmem:[%s3790_s3 + $0x30] sm:$0xff]   ;;  %v3140_v46 = vld [vmem:[%s3790_s3 + $0x38] sm:$0xff]   ;;  %v3143_v49 = vld [vmem:[%s3790_s3 + $0x1c0] sm:$0xff]  }
  0x53   : > { %v3137_v43 = vld [vmem:[%s3790_s3 + $0xb0] sm:$0xff]   ;;  %v3141_v47 = vld [vmem:[%s3790_s3 + $0xb8] sm:$0xff]   ;;  %v2584_v51 = vld [vmem:[%s3789_s2] ss:$0 sm:$0xff] }
  0x54   : > { %1228 = vmatmul.mubr.bf16.vlgmr.msra.gmra.mrb[4].mxu0 %v525_v1 }
  0x55   : > { %2826 = vmatpush3.bf16.msra.mxu1 %v3101_v61  ;;  %2953 = vmatpush3.bf16.msra.mxu0 %v3102_v62 }
  0x56   : > { %2954 = vmatprep.subr.bf16.mxu0 %v3201_v3  ;;  %2968 = vmatprep.mubr.msk.bf16.mxu0 %vm3202_vm0, %v3201_v3 }
  0x57   : > { %2842 = vmatprep.subr.bf16.mxu1 %v3110_v16 }
  0x58   : > { %1269 = vmatmul.mubr.bf16.vlgmr.msra.gmra.mrb[4].mxu1 %v527_v2 }
  0x59   : > { %2955 = vmatpush3.bf16.msra.mxu0 %v3103_v8  ;;  %2843 = vmatpush3.bf16.msra.mxu1 %v3112_v18 }
  0x5a   : > { %2956 = vmatprep.subr.bf16.mxu0 %v3201_v3  ;;  %2844 = vmatprep.subr.bf16.mxu1 %v3114_v20 }
  0x5d   : > { %2957 = vmatpush3.bf16.msra.mxu0 %v3104_v9  ;;  %2845 = vmatpush3.bf16.msra.mxu1 %v3116_v22 }
  0x5e   : > { %2958 = vmatprep.subr.bf16.mxu0 %v3201_v3  ;;  %2846 = vmatprep.subr.bf16.mxu1 %v3118_v24 }
  0x61   : > { %2959 = vmatpush3.bf16.msra.mxu0 %v3105_v11  ;;  %2847 = vmatpush3.bf16.msra.mxu1 %v3120_v26 }
  0x62   : > { %2960 = vmatprep.subr.bf16.mxu0 %v3201_v3  ;;  %2848 = vmatprep.subr.bf16.mxu1 %v3122_v28 }
  0x65   : > { %2961 = vmatpush3.bf16.msra.mxu0 %v3106_v12  ;;  %2849 = vmatpush3.bf16.msra.mxu1 %v3124_v30 }
  0x66   : > { %2962 = vmatprep.subr.bf16.mxu0 %v3201_v3  ;;  %2850 = vmatprep.subr.bf16.mxu1 %v3126_v32 }
  0x69   : > { %2963 = vmatpush3.bf16.msra.mxu0 %v3107_v13  ;;  %2851 = vmatpush3.bf16.msra.mxu1 %v3128_v34 }
  0x6a   : > { %2964 = vmatprep.subr.bf16.mxu0 %v3201_v3  ;;  %2852 = vmatprep.subr.bf16.mxu1 %v3130_v36 }
  0x6d   : > { %2965 = vmatpush3.bf16.msra.mxu0 %v3108_v14  ;;  %2853 = vmatpush3.bf16.msra.mxu1 %v3132_v38 }
  0x6e   : > { %2966 = vmatprep.subr.bf16.mxu0 %v3201_v3  ;;  %2854 = vmatprep.subr.bf16.mxu1 %v3134_v40 }
  0x71   : > { %2967 = vmatpush3.bf16.msra.mxu0 %v3109_v15  ;;  %2855 = vmatpush3.bf16.msra.mxu1 %v3136_v42 }
  0x72   : > { %2864 = vmatprep.subr.bf16.mxu0 %v3111_v17  ;;  %2856 = vmatprep.subr.bf16.mxu1 %v3138_v44 }
  0x74   : > { %2969 = vmatmul.mubr.bf16.vlgmr.msra.gmra.mrb[8].mxu0 %v529_v10 }
  0x75   : > { %2865 = vmatpush3.bf16.msra.mxu0 %v3113_v19  ;;  %2857 = vmatpush3.bf16.msra.mxu1 %v3140_v46 }
  0x76   : > { %2866 = vmatprep.subr.bf16.mxu0 %v3115_v21  ;;  %2886 = vmatprep.subr.bf16.mxu1 %v3142_v48 }
  0x79   : > { %2867 = vmatpush3.bf16.msra.mxu0 %v3117_v23 }
  0x7a   : > { %2868 = vmatprep.subr.bf16.mxu0 %v3119_v25 }
  0x7d   : > { %2869 = vmatpush3.bf16.msra.mxu0 %v3121_v27 }
  0x7e   : > { %2870 = vmatprep.subr.bf16.mxu0 %v3123_v29 }
  0x81   : > { %2871 = vmatpush3.bf16.msra.mxu0 %v3125_v31 }
  0x82   : > { %2872 = vmatprep.subr.bf16.mxu0 %v3127_v33 }
  0x85   : > { %2873 = vmatpush3.bf16.msra.mxu0 %v3129_v35 }
  0x86   : > { %2874 = vmatprep.subr.bf16.mxu0 %v3131_v37 }
  0x89   : > { %2875 = vmatpush3.bf16.msra.mxu0 %v3133_v39 }
  0x8a   : > { %2876 = vmatprep.subr.bf16.mxu0 %v3135_v41 }
  0x8d   : > { %2877 = vmatpush3.bf16.msra.mxu0 %v3137_v43 }
  0x8e   : > { %2878 = vmatprep.subr.bf16.mxu0 %v3139_v45 }
  0x91   : > { %2879 = vmatpush3.bf16.msra.mxu0 %v3141_v47 }
  0x92   : > { %2908 = vmatprep.subr.bf16.mxu0 %v3143_v49 }
 0x107   : > { %v2761_v50 = vpop.f32.mrb[0].mxu0 }
 0x108   : > { %v2762_v52 = vpop.f32.mrb[1].mxu0 }
 0x109   : > { %v2763_v53 = vadd.f32 %v2762_v52, %v2761_v50  ;;  %v2764_v54 = vpop.f32.mrb[2].mxu0 }
 0x10a   : > { %v2765_v55 = vpop.f32.mrb[3].mxu0 }
 0x10b   : > { %v1148_v56 = vadd.f32 %v2763_v53, %v2584_v51  ;;  %v2783_v57 = vpop.f32.mrb[0].mxu1  ;;  %v2766_v58 = vadd.f32 %v2765_v55, %v2764_v54 }
 0x10c   : > { %v2784_v59 = vpop.f32.mrb[1].mxu1 }
 0x10d   : > { %v1151_v60 = vadd.f32 %v2766_v58, %v2584_v51  ;;  %v2785_v61 = vadd.f32 %v2784_v59, %v2783_v57  ;;  %v2786_v62 = vpop.f32.mrb[2].mxu1 }
 0x10e   : > { %v2787_v63 = vpop.f32.mrb[3].mxu1 }
 0x10f   : > { %v1189_v0 = vadd.f32 %v2785_v61, %v1148_v56  ;;  %v2788_v1 = vadd.f32 %v2787_v63, %v2786_v62 }
 0x111   : > { %v1192_v2 = vadd.f32 %v2788_v1, %v1151_v60 }
 0x127   : > { %v2805_v4 = vpop.f32.mrb[4].mxu0 }
 0x128   : > { %v2806_v5 = vpop.f32.mrb[5].mxu0 }
 0x129   : > { %v2807_v6 = vadd.f32 %v2806_v5, %v2805_v4  ;;  %v2808_v7 = vpop.f32.mrb[6].mxu0 }
 0x12a   : > { %v2809_v8 = vpop.f32.mrb[7].mxu0 }
 0x12b   : > { %v1230_v9 = vadd.f32 %v2807_v6, %v1189_v0  ;;  %v2827_v10 = vpop.f32.mrb[4].mxu1  ;;  %v2810_v11 = vadd.f32 %v2809_v8, %v2808_v7 }
 0x12c   : > { %v2828_v12 = vpop.f32.mrb[5].mxu1 }
 0x12d   : > { %v1233_v13 = vadd.f32 %v2810_v11, %v1192_v2  ;;  %v2829_v14 = vadd.f32 %v2828_v12, %v2827_v10  ;;  %v2830_v15 = vpop.f32.mrb[6].mxu1 }
 0x12e   : > { %v2831_v16 = vpop.f32.mrb[7].mxu1 }
 0x12f   : > { %v2832_v17 = vadd.f32 %v2831_v16, %v2830_v15  ;;  %v1271_v18 = vadd.f32 %v2829_v14, %v1230_v9 }
 0x131   : > { %v1274_v19 = vadd.f32 %v2832_v17, %v1233_v13 }
 0x147   : > { %v1311_v20 = vpop.f32.mrb[8].mxu0 }
 0x148   : > { %v1312_v21 = vadd.f32 %v1311_v20, %v1271_v18  ;;  %v2970_v22 = vpop.f32.mrb[9].mxu0 }
 0x149   : > { %v1314_v23 = vpop.f32.mrb[10].mxu0 }
 0x14a   : > { %v1318_v24 = vmax.f32 %v1312_v21, 0.0  ;;  %v1315_v25 = vadd.f32 %v1314_v23, %v1274_v19  ;;  %v2971_v26 = vpop.f32.mrb[11].mxu0 }
 0x14c   : > { %1320 = vst [vmem:[#allocation4] sm:$0xff] %v1318_v24  ;;  %v1319_v27 = vmax.f32 %v1315_v25, 0.0 }
 0x14e   : > { %1321 = vst [vmem:[#allocation4 + $0x8] sm:$0xff] %v1319_v27 }
 0x153   : > { %v1322_v28 = vld [vmem:[#allocation4] sm:$0xf]  ;;  %v1324_v29 = vld [vmem:[#allocation4 + $0x4] sm:$0xf] }
 0x154   : > { %1323 = vst [vmem:[#allocation2 + $0x9] sm:$0xf] %v1322_v28  ;;  %1325 = vst [vmem:[#allocation2 + $0x11] sm:$0xf] %v1324_v29 }
 0x155   : > { %v1326_v30 = vld [vmem:[#allocation4 + $0x8] sm:$0xf]  ;;  %v1328_v31 = vld [vmem:[#allocation4 + $0xc] sm:$0xf] }
 0x156   : > { %1329 = vst [vmem:[#allocation2 + $0x21] sm:$0xf] %v1328_v31  ;;  %1327 = vst [vmem:[#allocation2 + $0x19] sm:$0xf] %v1326_v30 }
 0x15b   : > { %v1354_v32 = vld [vmem:[#allocation2 + $0x9] sm:$0xf]  ;;  %v1360_v33 = vld [vmem:[#allocation2 + $0x11] sm:$0xf] }
 0x15c   : > { %v1393_v34 = vld [vmem:[#allocation2 + $0x8] sm:$0xf]  ;;  %v1355_v35 = vpack.c.bf16 %v1354_v32, %v1354_v32  ;;  %v1361_v36 = vpack.c.bf16 %v1360_v33, %v1360_v33  ;;  %v1396_v38 = vld [vmem:[#allocation2 + $0x10] sm:$0xf] }
 0x15d   : > { %v1394_v37 = vpack.c.bf16 %v1393_v34, %v1393_v34  ;;  %v1333_v39 = vld [vmem:[#allocation2 + $0x8] sm:$0xf]  ;;  %v1339_v40 = vld [vmem:[#allocation2 + $0x10] sm:$0xf]  ;;  %v1366_v41 = vld [vmem:[#allocation2 + $0x19] sm:$0xf]  ;;  %v1397_v42 = vpack.c.bf16 %v1396_v38, %v1396_v38 }
 0x15e   : > { %v1402_v43 = vld [vmem:[#allocation2 + $0x18] sm:$0xf]  ;;  %v1408_v44 = vld [vmem:[#allocation2 + $0x20] sm:$0xf]  ;;  %v1334_v45 = vpack.c.bf16 %v1333_v39, %v1333_v39  ;;  %v1340_v46 = vpack.c.bf16 %v1339_v40, %v1339_v40  ;;  %v1357_v47 = vrot.slane %v1355_v35, 6  ;;  %v1363_v48 = vrot.slane %v1361_v36, 4 }
 0x15f   : > { %v1367_v49 = vpack.c.bf16 %v1366_v41, %v1366_v41  ;;  %1395 = vst [vmem:[#allocation3 + $0x18] sm:$0x3] %v1394_v37  ;;  %v1403_v50 = vpack.c.bf16 %v1402_v43, %v1402_v43  ;;  %v1345_v51 = vld [vmem:[#allocation2 + $0x18] sm:$0xf]  ;;  %v1375_v52 = vld [vmem:[#allocation2 + $0xa] sm:$0xf]  ;;  %v1409_v54 = vpack.c.bf16 %v1408_v44, %v1408_v44 }
 0x160   : > { %v1399_v53 = vrot.slane %v1397_v42, 6  ;;  %v1336_v55 = vrot.slane %v1334_v45, 6  ;;  %v1342_v56 = vrot.slane %v1340_v46, 4  ;;  %v1381_v57 = vld [vmem:[#allocation2 + $0x12] sm:$0xf]  ;;  %v1346_v60 = vpack.c.bf16 %v1345_v51, %v1345_v51 }
 0x161   : > { %1359 = vst [vmem:[#allocation3 + $0x8] sm:$0xc] %v1357_v47  ;;  %1365 = vst [vmem:[#allocation3 + $0x8] sm:$0x30] %v1363_v48  ;;  %v1369_v58 = vrot.slane %v1367_v49, 2  ;;  %v1405_v59 = vrot.slane %v1403_v50, 4  ;;  %v1376_v61 = vpack.c.bf16 %v1375_v52, %v1375_v52  ;;  %v1382_v1 = vpack.c.bf16 %v1381_v57, %v1381_v57 }
 0x162   : > { %v1387_v62 = vld [vmem:[#allocation2 + $0x1a] sm:$0xf]  ;;  %v1435_v63 = vld [vmem:[#allocation2 + $0xa] sm:$0xf]  ;;  %1401 = vst [vmem:[#allocation3 + $0x18] sm:$0xc] %v1399_v53 }
 0x163   : > { %v1411_v0 = vrot.slane %v1409_v54, 2  ;;  %1338 = vst [vmem:[#allocation3] sm:$0xc] %v1336_v55  ;;  %1344 = vst [vmem:[#allocation3] sm:$0x30] %v1342_v56  ;;  %v1388_v2 = vpack.c.bf16 %v1387_v62, %v1387_v62  ;;  %v1436_v4 = vpack.c.bf16 %v1435_v63, %v1435_v63  ;;  %v1348_v7 = vrot.slane %v1346_v60, 2 }
 0x164   : > { %v1438_v5 = vld [vmem:[#allocation2 + $0x12] sm:$0xf]  ;;  %v1444_v6 = vld [vmem:[#allocation2 + $0x1a] sm:$0xf]  ;;  %1371 = vst [vmem:[#allocation3 + $0x8] sm:$0xc0] %v1369_v58 }
 0x165   : > { %1407 = vst [vmem:[#allocation3 + $0x18] sm:$0x30] %v1405_v59  ;;  %v1378_v8 = vrot.slane %v1376_v61, 6  ;;  %v1439_v9 = vpack.c.bf16 %v1438_v5, %v1438_v5  ;;  %v1445_v10 = vpack.c.bf16 %v1444_v6, %v1444_v6  ;;  %v1450_v11 = vld [vmem:[#allocation2 + $0x22] sm:$0xf]  ;;  %v1384_v13 = vrot.slane %v1382_v1, 4 }
 0x166   : > { %v1477_v12 = vld [vmem:[#allocation2 + $0x11] sm:$0xf]  ;;  %1413 = vst [vmem:[#allocation3 + $0x18] sm:$0xc0] %v1411_v0  ;;  %v1390_v14 = vrot.slane %v1388_v2, 2  ;;  %v1451_v15 = vpack.c.bf16 %v1450_v11, %v1450_v11  ;;  %v3144_v48 = vld [vmem:[%s3790_s3 + $0x100] sm:$0xff]  }
 0x167   : > { %1437 = vst [vmem:[#allocation3 + $0x28] sm:$0x3] %v1436_v4  ;;  %v1478_v16 = vpack.c.bf16 %v1477_v12, %v1477_v12  ;;  %v1480_v17 = vld [vmem:[#allocation2 + $0x19] sm:$0xf]  ;;  %v1486_v18 = vld [vmem:[#allocation2 + $0x21] sm:$0xf] }
 0x168   : > { %1350 = vst [vmem:[#allocation3] sm:$0xc0] %v1348_v7  ;;  %1380 = vst [vmem:[#allocation3 + $0x10] sm:$0xc] %v1378_v8  ;;  %v1441_v19 = vrot.slane %v1439_v9, 6  ;;  %v1447_v20 = vrot.slane %v1445_v10, 4  ;;  %v1481_v21 = vpack.c.bf16 %v1480_v17, %v1480_v17  ;;  %v1487_v22 = vpack.c.bf16 %v1486_v18, %v1486_v18 }
 0x169   : > { %v1414_v23 = vld [vmem:[#allocation2 + $0x9] sm:$0xf]  ;;  %v1417_v24 = vld [vmem:[#allocation2 + $0x11] sm:$0xf]  ;;  %1386 = vst [vmem:[#allocation3 + $0x10] sm:$0x30] %v1384_v13 }
 0x16a   : > { %1392 = vst [vmem:[#allocation3 + $0x10] sm:$0xc0] %v1390_v14  ;;  %v1453_v25 = vrot.slane %v1451_v15, 2  ;;  %1479 = vst [vmem:[#allocation3 + $0x38] sm:$0x3] %v1478_v16  ;;  %v1415_v26 = vpack.c.bf16 %v1414_v23, %v1414_v23  ;;  %v1418_v27 = vpack.c.bf16 %v1417_v24, %v1417_v24  ;;  %v1483_v30 = vrot.slane %v1481_v21, 6 }
 0x16b   : > { %v1423_v28 = vld [vmem:[#allocation2 + $0x19] sm:$0xf]  ;;  %v1429_v29 = vld [vmem:[#allocation2 + $0x21] sm:$0xf]  ;;  %1443 = vst [vmem:[#allocation3 + $0x28] sm:$0xc] %v1441_v19 }
 0x16c   : > { %1449 = vst [vmem:[#allocation3 + $0x28] sm:$0x30] %v1447_v20  ;;  %v1489_v31 = vrot.slane %v1487_v22, 4  ;;  %v1424_v32 = vpack.c.bf16 %v1423_v28, %v1423_v28  ;;  %v1430_v33 = vpack.c.bf16 %v1429_v29, %v1429_v29  ;;  %v1456_v34 = vld [vmem:[#allocation2 + $0x10] sm:$0xf]  ;;  %v1420_v36 = vrot.slane %v1418_v27, 6 }
 0x16d   : > { %v1459_v35 = vld [vmem:[#allocation2 + $0x18] sm:$0xf]  ;;  %1455 = vst [vmem:[#allocation3 + $0x28] sm:$0xc0] %v1453_v25  ;;  %1416 = vst [vmem:[#allocation3 + $0x20] sm:$0x3] %v1415_v26  ;;  %v1457_v37 = vpack.c.bf16 %v1456_v34, %v1456_v34 }
 0x16e   : > { %v1460_v38 = vpack.c.bf16 %v1459_v35, %v1459_v35  ;;  %v1465_v39 = vld [vmem:[#allocation2 + $0x20] sm:$0xf]  ;;  %v1498_v40 = vld [vmem:[#allocation2 + $0x12] sm:$0xf]  ;;  %1485 = vst [vmem:[#allocation3 + $0x38] sm:$0xc] %v1483_v30 }
 0x16f   : > { %1491 = vst [vmem:[#allocation3 + $0x38] sm:$0x30] %v1489_v31  ;;  %v1426_v41 = vrot.slane %v1424_v32, 4  ;;  %v1432_v42 = vrot.slane %v1430_v33, 2  ;;  %v1466_v43 = vpack.c.bf16 %v1465_v39, %v1465_v39  ;;  %v1499_v44 = vpack.c.bf16 %v1498_v40, %v1498_v40  ;;  %v1501_v45 = vld [vmem:[#allocation2 + $0x1a] sm:$0xf] }
 0x170   : > { %v1507_v46 = vld [vmem:[#allocation2 + $0x22] sm:$0xf]  ;;  %v1520_v47 = vld [vmem:[#allocation3 + $0x8] sm:$0xff]  ;;  %1422 = vst [vmem:[#allocation3 + $0x20] sm:$0xc] %v1420_v36  ;;  %v1462_v49 = vrot.slane %v1460_v38, 6  ;;  %v1502_v50 = vpack.c.bf16 %v1501_v45, %v1501_v45 }
 0x171   : > { %1458 = vst [vmem:[#allocation3 + $0x30] sm:$0x3] %v1457_v37  ;;  %v1508_v51 = vpack.c.bf16 %v1507_v46, %v1507_v46  ;;  %2143 = vmatprep.mubr.bf16.mxu1 %v1520_v47  ;;  %v1522_v52 = vld [vmem:[#allocation3 + $0x18] sm:$0xff]  ;;  %v3145_v53 = vld [vmem:[%s3790_s3 + $0x180] sm:$0xff]   ;;  %1428 = vst [vmem:[#allocation3 + $0x20] sm:$0x30] %v1426_v41 }
 0x172   : > { %v3146_v54 = vld [vmem:[%s3790_s3 + $0x148] sm:$0xff]   ;;  %1434 = vst [vmem:[#allocation3 + $0x20] sm:$0xc0] %v1432_v42  ;;  %v1468_v55 = vrot.slane %v1466_v43, 4  ;;  %1500 = vst [vmem:[#allocation3 + $0x40] sm:$0x3] %v1499_v44  ;;  %2184 = vmatprep.mubr.bf16.mxu0 %v1522_v52 }
 0x173   : > { %v1519_v56 = vld [vmem:[#allocation3] sm:$0xff]  ;;  %v3147_v57 = vld [vmem:[%s3790_s3 + $0x1c8] sm:$0xff]   ;;  %1464 = vst [vmem:[#allocation3 + $0x30] sm:$0xc] %v1462_v49  ;;  %v1504_v58 = vrot.slane %v1502_v50, 6  ;;  %v1510_v59 = vrot.slane %v1508_v51, 4 }
 0x174   : > { %2144 = vmatmul.mubr.bf16.vlgmr.msra.gmra.mrb[8].mxu1 %v1519_v56  ;;  %v1521_v60 = vld [vmem:[#allocation3 + $0x10] sm:$0xff]  ;;  %1470 = vst [vmem:[#allocation3 + $0x30] sm:$0x30] %v1468_v55  ;;  %v3148_v61 = vld [vmem:[%s3790_s3 + $0x108] sm:$0xff]   ;;  %v1524_v62 = vld [vmem:[#allocation3 + $0x28] sm:$0xff] }
 0x175   : > { %2185 = vmatmul.mubr.bf16.vlgmr.msra.gmra.mrb[12].mxu0 %v1521_v60  ;;  %2887 = vmatpush3.bf16.msra.mxu1 %v3144_v48  ;;  %1506 = vst [vmem:[#allocation3 + $0x40] sm:$0xc] %v1504_v58  ;;  %1512 = vst [vmem:[#allocation3 + $0x40] sm:$0x30] %v1510_v59  ;;  %v3149_v63 = vld [vmem:[%s3790_s3 + $0x188] sm:$0xff]   ;;  %v3150_v0 = vld [vmem:[%s3790_s3 + $0x150] sm:$0xff]  }
 0x176   : > { %2909 = vmatpush3.bf16.msra.mxu0 %v3145_v53  ;;  %2888 = vmatprep.subr.bf16.mxu1 %v3146_v54  ;;  %v1526_v1 = vld [vmem:[#allocation3 + $0x38] sm:$0xff]  ;;  %v3151_v2 = vld [vmem:[%s3790_s3 + $0x1d0] sm:$0xff]   ;;  %v3154_v6 = vld [vmem:[%s3790_s3 + $0x158] sm:$0xff]  }
 0x177   : > { %2225 = vmatprep.mubr.bf16.mxu1 %v1524_v62  ;;  %2910 = vmatprep.subr.bf16.mxu0 %v3147_v57  ;;  %v3152_v4 = vld [vmem:[%s3790_s3 + $0x110] sm:$0xff]   ;;  %v3155_v7 = vld [vmem:[%s3790_s3 + $0x1d8] sm:$0xff]   ;;  %v3158_v10 = vld [vmem:[%s3790_s3 + $0x160] sm:$0xff]  }
 0x178   : > { %2266 = vmatprep.mubr.bf16.mxu0 %v1526_v1  ;;  %v3153_v5 = vld [vmem:[%s3790_s3 + $0x190] sm:$0xff]   ;;  %v3156_v8 = vld [vmem:[%s3790_s3 + $0x118] sm:$0xff]   ;;  %v3159_v11 = vld [vmem:[%s3790_s3 + $0x1e0] sm:$0xff]  }
 0x179   : > { %2889 = vmatpush3.bf16.msra.mxu1 %v3148_v61  ;;  %v3157_v9 = vld [vmem:[%s3790_s3 + $0x198] sm:$0xff]   ;;  %v3160_v12 = vld [vmem:[%s3790_s3 + $0x120] sm:$0xff]   ;;  %v3162_v14 = vld [vmem:[%s3790_s3 + $0x168] sm:$0xff]  }
 0x17a   : > { %2911 = vmatpush3.bf16.msra.mxu0 %v3149_v63  ;;  %2890 = vmatprep.subr.bf16.mxu1 %v3150_v0  ;;  %v3161_v13 = vld [vmem:[%s3790_s3 + $0x1a0] sm:$0xff]   ;;  %v3163_v15 = vld [vmem:[%s3790_s3 + $0x1e8] sm:$0xff]   ;;  %v3166_v18 = vld [vmem:[%s3790_s3 + $0x170] sm:$0xff]  }
 0x17b   : > { %2912 = vmatprep.subr.bf16.mxu0 %v3151_v2  ;;  %v3164_v16 = vld [vmem:[%s3790_s3 + $0x128] sm:$0xff]   ;;  %v3167_v19 = vld [vmem:[%s3790_s3 + $0x1f0] sm:$0xff]   ;;  %v3170_v22 = vld [vmem:[%s3790_s3 + $0x178] sm:$0xff]  }
 0x17c   : > { %v3165_v17 = vld [vmem:[%s3790_s3 + $0x1a8] sm:$0xff]   ;;  %v3168_v20 = vld [vmem:[%s3790_s3 + $0x130] sm:$0xff]   ;;  %v3171_v23 = vld [vmem:[%s3790_s3 + $0x1f8] sm:$0xff]  }
 0x17d   : > { %2891 = vmatpush3.bf16.msra.mxu1 %v3152_v4  ;;  %v3169_v21 = vld [vmem:[%s3790_s3 + $0x1b0] sm:$0xff]   ;;  %v3172_v24 = vld [vmem:[%s3790_s3 + $0x138] sm:$0xff]   ;;  %v3174_v26 = vld [vmem:[%s3790_s3 + $0x200] sm:$0xff]  }
 0x17e   : > { %2913 = vmatpush3.bf16.msra.mxu0 %v3153_v5  ;;  %2892 = vmatprep.subr.bf16.mxu1 %v3154_v6  ;;  %v3173_v25 = vld [vmem:[%s3790_s3 + $0x1b8] sm:$0xff]   ;;  %v3175_v27 = vld [vmem:[%s3792_s5] sm:$0xff]   ;;  %v1523_v28 = vld [vmem:[#allocation3 + $0x20] sm:$0xff] }
 0x17f   : > { %2914 = vmatprep.subr.bf16.mxu0 %v3155_v7  ;;  %v1525_v29 = vld [vmem:[#allocation3 + $0x30] sm:$0xff]  ;;  %v3176_v30 = vld [vmem:[%s3790_s3 + $0x208] sm:$0xff]   ;;  %v3178_v32 = vld [vmem:[%s3790_s3 + $0x210] sm:$0xff]  }
 0x180   : > { %v3177_v31 = vld [vmem:[%s3792_s5 + $0x8] sm:$0xff]   ;;  %v3179_v33 = vld [vmem:[%s3792_s5 + $0x10] sm:$0xff]   ;;  %v3180_v34 = vld [vmem:[%s3790_s3 + $0x218] sm:$0xff]  }
 0x181   : > { %2893 = vmatpush3.bf16.msra.mxu1 %v3156_v8  ;;  %v3181_v35 = vld [vmem:[%s3792_s5 + $0x18] sm:$0xff]   ;;  %v3182_v36 = vld [vmem:[%s3790_s3 + $0x220] sm:$0xff]   ;;  %v3184_v38 = vld [vmem:[%s3790_s3 + $0x228] sm:$0xff]  }
 0x182   : > { %2915 = vmatpush3.bf16.msra.mxu0 %v3157_v9  ;;  %2894 = vmatprep.subr.bf16.mxu1 %v3158_v10  ;;  %v3183_v37 = vld [vmem:[%s3792_s5 + $0x20] sm:$0xff]   ;;  %v3185_v39 = vld [vmem:[%s3792_s5 + $0x28] sm:$0xff]   ;;  %v3186_v40 = vld [vmem:[%s3790_s3 + $0x230] sm:$0xff]  }
 0x183   : > { %2916 = vmatprep.subr.bf16.mxu0 %v3159_v11  ;;  %v3187_v41 = vld [vmem:[%s3792_s5 + $0x30] sm:$0xff]   ;;  %v3188_v42 = vld [vmem:[%s3790_s3 + $0x238] sm:$0xff]   ;;  %v3192_v44 = vld [vmem:[%s3362_s10] sm:$0xff]  }
 0x184   : > { %v3189_v43 = vld [vmem:[%s3792_s5 + $0x38] sm:$0xff]   ;;  %v1527_v45 = vld [vmem:[#allocation3 + $0x40] sm:$0xff]  ;;  %v2657_v48 = vld [vmem:[%s3791_s4] ss:$0 sm:$0xff] }
 0x185   : > { %2895 = vmatpush3.bf16.msra.mxu1 %v3160_v12 }
 0x186   : > { %2917 = vmatpush3.bf16.msra.mxu0 %v3161_v13  ;;  %2896 = vmatprep.subr.bf16.mxu1 %v3162_v14 }
 0x187   : > { %2918 = vmatprep.subr.bf16.mxu0 %v3163_v15 }
 0x189   : > { %2897 = vmatpush3.bf16.msra.mxu1 %v3164_v16 }
 0x18a   : > { %2919 = vmatpush3.bf16.msra.mxu0 %v3165_v17  ;;  %2898 = vmatprep.subr.bf16.mxu1 %v3166_v18  ;;  %v2730_v18 = vld [vmem:[%s3793_s6] ss:$0 sm:$0xff] }
 0x18b   : > { %2920 = vmatprep.subr.bf16.mxu0 %v3167_v19 }
 0x18d   : > { %2899 = vmatpush3.bf16.msra.mxu1 %v3168_v20 }
 0x18e   : > { %2921 = vmatpush3.bf16.msra.mxu0 %v3169_v21  ;;  %2900 = vmatprep.subr.bf16.mxu1 %v3170_v22 }
 0x18f   : > { %2922 = vmatprep.subr.bf16.mxu0 %v3171_v23 }
 0x191   : > { %2901 = vmatpush3.bf16.msra.mxu1 %v3172_v24 }
 0x192   : > { %2923 = vmatpush3.bf16.msra.mxu0 %v3173_v25  ;;  %2972 = vmatprep.subr.bf16.mxu1 %v3201_v3 }
 0x193   : > { %2992 = vmatprep.subr.bf16.mxu0 %v3201_v3 }
 0x194   : > { %2226 = vmatmul.mubr.bf16.vlgmr.msra.gmra.mrb[12].mxu1 %v1523_v28 }
 0x195   : > { %2267 = vmatmul.mubr.bf16.vlgmr.msra.gmra.mrb[16].mxu0 %v1525_v29  ;;  %2973 = vmatpush3.bf16.msra.mxu1 %v3174_v26 }
 0x196   : > { %2993 = vmatpush3.bf16.msra.mxu0 %v3175_v27  ;;  %2974 = vmatprep.subr.bf16.mxu1 %v3201_v3 }
 0x197   : > { %2994 = vmatprep.subr.bf16.mxu0 %v3201_v3  ;;  %2988 = vmatprep.mubr.msk.bf16.mxu1 %vm3202_vm0, %v3201_v3 }
 0x198   : > { %3008 = vmatprep.mubr.msk.bf16.mxu0 %vm3202_vm0, %v3201_v3 }
 0x199   : > { %2975 = vmatpush3.bf16.msra.mxu1 %v3176_v30 }
 0x19a   : > { %2995 = vmatpush3.bf16.msra.mxu0 %v3177_v31  ;;  %2976 = vmatprep.subr.bf16.mxu1 %v3201_v3  ;;  %v2316_v31 = vld [vmem:[%s3794_s7] sm:$0x3] }
 0x19b   : > { %2996 = vmatprep.subr.bf16.mxu0 %v3201_v3 }
 0x19d   : > { %2977 = vmatpush3.bf16.msra.mxu1 %v3178_v32 }
 0x19e   : > { %2997 = vmatpush3.bf16.msra.mxu0 %v3179_v33  ;;  %2978 = vmatprep.subr.bf16.mxu1 %v3201_v3 }
 0x19f   : > { %2998 = vmatprep.subr.bf16.mxu0 %v3201_v3 }
 0x1a1   : > { %2979 = vmatpush3.bf16.msra.mxu1 %v3180_v34 }
 0x1a2   : > { %2999 = vmatpush3.bf16.msra.mxu0 %v3181_v35  ;;  %2980 = vmatprep.subr.bf16.mxu1 %v3201_v3 }
 0x1a3   : > { %3000 = vmatprep.subr.bf16.mxu0 %v3201_v3 }
 0x1a5   : > { %2981 = vmatpush3.bf16.msra.mxu1 %v3182_v36 }
 0x1a6   : > { %3001 = vmatpush3.bf16.msra.mxu0 %v3183_v37  ;;  %2982 = vmatprep.subr.bf16.mxu1 %v3201_v3 }
 0x1a7   : > { %3002 = vmatprep.subr.bf16.mxu0 %v3201_v3 }
 0x1a9   : > { %2983 = vmatpush3.bf16.msra.mxu1 %v3184_v38 }
 0x1aa   : > { %3003 = vmatpush3.bf16.msra.mxu0 %v3185_v39  ;;  %2984 = vmatprep.subr.bf16.mxu1 %v3201_v3 }
 0x1ab   : > { %3004 = vmatprep.subr.bf16.mxu0 %v3201_v3 }
 0x1ad   : > { %2985 = vmatpush3.bf16.msra.mxu1 %v3186_v40 }
 0x1ae   : > { %3005 = vmatpush3.bf16.msra.mxu0 %v3187_v41  ;;  %2986 = vmatprep.subr.bf16.mxu1 %v3201_v3 }
 0x1af   : > { %3006 = vmatprep.subr.bf16.mxu0 %v3201_v3 }
 0x1b1   : > { %2987 = vmatpush3.bf16.msra.mxu1 %v3188_v42 }
 0x1b2   : > { %3007 = vmatpush3.bf16.msra.mxu0 %v3189_v43  ;;  %3012 = vmatprep.subr.bf16.mxu1 %v3201_v3 }
 0x1b4   : > { %2989 = vmatmul.mubr.bf16.vlgmr.msra.gmra.mrb[16].mxu1 %v1527_v45 }
 0x1b5   : > { %3009 = vmatmul.mubr.bf16.vlgmr.msra.gmra.mrb[20].mxu0 %v3192_v44  ;;  %3014 = vmatprep.mubr.msk.bf16.mxu1 %vm3202_vm0, %v3201_v3 }
 0x247   : > { %v2858_v46 = vpop.f32.mrb[8].mxu1 }
 0x248   : > { %v2880_v47 = vpop.f32.mrb[12].mxu0  ;;  %v2859_v49 = vpop.f32.mrb[9].mxu1 }
 0x249   : > { %v2860_v50 = vadd.f32 %v2859_v49, %v2858_v46  ;;  %v2881_v51 = vpop.f32.mrb[13].mxu0  ;;  %v2861_v52 = vpop.f32.mrb[10].mxu1 }
 0x24a   : > { %v2882_v53 = vadd.f32 %v2881_v51, %v2880_v47  ;;  %v2883_v54 = vpop.f32.mrb[14].mxu0  ;;  %v2862_v55 = vpop.f32.mrb[11].mxu1 }
 0x24b   : > { %v2146_v56 = vadd.f32 %v2860_v50, %v2657_v48  ;;  %v2863_v57 = vadd.f32 %v2862_v55, %v2861_v52  ;;  %v2884_v58 = vpop.f32.mrb[15].mxu0 }
 0x24c   : > { %v2885_v59 = vadd.f32 %v2884_v58, %v2883_v54 }
 0x24d   : > { %v2187_v60 = vadd.f32 %v2882_v53, %v2146_v56  ;;  %v2149_v61 = vadd.f32 %v2863_v57, %v2657_v48 }
 0x24f   : > { %v2190_v62 = vadd.f32 %v2885_v59, %v2149_v61 }
 0x267   : > { %v2902_v63 = vpop.f32.mrb[12].mxu1 }
 0x268   : > { %v2924_v0 = vpop.f32.mrb[16].mxu0  ;;  %v2903_v1 = vpop.f32.mrb[13].mxu1 }
 0x269   : > { %v2904_v2 = vadd.f32 %v2903_v1, %v2902_v63  ;;  %v2925_v4 = vpop.f32.mrb[17].mxu0  ;;  %v2905_v5 = vpop.f32.mrb[14].mxu1 }
 0x26a   : > { %v2926_v6 = vadd.f32 %v2925_v4, %v2924_v0  ;;  %v2927_v7 = vpop.f32.mrb[18].mxu0  ;;  %v2906_v8 = vpop.f32.mrb[15].mxu1 }
 0x26b   : > { %v2228_v9 = vadd.f32 %v2904_v2, %v2187_v60  ;;  %v2907_v10 = vadd.f32 %v2906_v8, %v2905_v5  ;;  %v2928_v11 = vpop.f32.mrb[19].mxu0 }
 0x26c   : > { %v2929_v12 = vadd.f32 %v2928_v11, %v2927_v7 }
 0x26d   : > { %v2231_v13 = vadd.f32 %v2907_v10, %v2190_v62  ;;  %v2269_v14 = vadd.f32 %v2926_v6, %v2228_v9 }
 0x26f   : > { %v2272_v15 = vadd.f32 %v2929_v12, %v2231_v13 }
 0x287   : > { %v2309_v16 = vpop.f32.mrb[16].mxu1 }
 0x288   : > { %v2310_v17 = vadd.f32 %v2309_v16, %v2269_v14  ;;  %v2429_v19 = vpop.f32.mrb[20].mxu0  ;;  %v2990_v20 = vpop.f32.mrb[17].mxu1 }
 0x289   : > { %v3010_v21 = vpop.f32.mrb[21].mxu0  ;;  %v2312_v22 = vpop.f32.mrb[18].mxu1  ;;  %v2430_v26 = vadd.f32 %v2730_v18, %v2429_v19 }
 0x28a   : > { %v2313_v23 = vadd.f32 %v2312_v22, %v2272_v15  ;;  %v2432_v24 = vpop.f32.mrb[22].mxu0  ;;  %v2991_v25 = vpop.f32.mrb[19].mxu1 }
 0x28b   : > { %v2433_v27 = vadd.f32 %v2730_v18, %v2432_v24  ;;  %v3011_v28 = vpop.f32.mrb[23].mxu0 }
 0x28c   : > { %v2317_v29 = vpack.c.bf16 %v2313_v23, %v2310_v17 }
 0x28d   : > { %v2436_v30 = vpack.c.bf16 %v2433_v27, %v2430_v26 }
 0x28f   : > { %3013 = vmatpush3.bf16.msra.mxu1 %v2436_v30 }
 0x290   : > { %3018 = vmatprep.subr.bf16.mxu1 %v3201_v3 }
 0x292   : > { %3015 = vmatmul.mubr.msk.bf16.vlgmr.msra.gmra.mrb[20].mxu1 %vm2437_vm1, %v2316_v31 }
 0x293   : > { %3019 = vmatpush3.bf16.msra.mxu1 %v2317_v29  ;;  %3020 = vmatprep.mubr.msk.bf16.mxu1 %vm3202_vm0, %v3201_v3 }
 0x29e   : > { %3021 = vmatmul.mubr.msk.bf16.vlgmr.msra.gmra.mrb[20].mxu1 %vm2437_vm1, %v2316_v31 }
 0x371   : > { %v2515_v32 = vpop.f32.mrb[20].mxu1 }
 0x372   : > { %v2521_v33 = vpack.c.bf16 %v2515_v32, %v2515_v32  ;;  %v3022_v34 = vpop.f32.mrb[21].mxu1 }
 0x373   : > { %v2518_v35 = vpop.f32.mrb[22].mxu1 }
 0x374   : > { %2522 = vst [vmem:[%s303_s18] sm:$0x3] %v2521_v33  ;;  %v3023_v36 = vpop.f32.mrb[23].mxu1 }
 0x375 PF: > { %s18_s27 = sadd.s32 1, %s3199_s27  }
 0x376   : > { %p15_p4 = scmp.ge.s32.totalorder %s18_s27, 4  }
 0x378   :  { %17 = sbr.rel (!%p15_p4) target bundleno = 1 (0x1), region = 87 }

</bundles_post_ra>
